<compile_context>
chip_gen: v6e
topology: v6e:2x2x1
jax: 0.10.0
libtpu: 0.0.40
codegen_flags: <defaults>
</compile_context>

<pallas_src>
import functools

import jax
import jax.numpy as jnp
from jax.experimental import pallas as pl
from jax.experimental.pallas import tpu as pltpu


# --------------------------------------------------------------------------- #
# Kernel
# --------------------------------------------------------------------------- #
def _lstm_fc_kernel(x_ref, wih_ref, whh_ref, b_ref, wfc_ref, bfc_ref,
                    out_ref, xp_ref):
    """One grid step: full T-step LSTM + final FC on a tile of sequences.

    Layouts (lane axis last, tile_m on lanes, gate rows pre-permuted [i,f,o,g]):
      x_ref   : (D, T*tile_m)   columns grouped by timestep t
      wih_ref : (4H, D)      whh_ref : (4H, H)     b_ref  : (4H, 1)
      wfc_ref : (D_out, H)   bfc_ref : (D_out, 1)
      out_ref : (D_out, tile_m)
      xp_ref  : VMEM scratch (4H, T*tile_m) -- precomputed input projections
    """
    H = whh_ref.shape[1]
    tile_m = out_ref.shape[-1]
    T = x_ref.shape[-1] // tile_m

    whh = whh_ref[...]                                      # (4H, H)

    # One wide input-projection matmul for all T steps + a single bias add
    # (replaces 12 K=8 matmuls and 12 bias adds on the recurrence chain).
    xp_ref[...] = (
        jnp.dot(wih_ref[...], x_ref[...], preferred_element_type=jnp.float32)
        + b_ref[...]
    )

    h = jnp.zeros((H, tile_m), jnp.float32)
    c = jnp.zeros((H, tile_m), jnp.float32)

    # T=12 is small & static: unrolled loop with static 128-aligned lane slices
    # keeps the LLO scheduler fully informed (no dynamic lane offsets needed).
    for t in range(T):
        gates = (
            xp_ref[:, t * tile_m:(t + 1) * tile_m]
            + jnp.dot(whh, h, preferred_element_type=jnp.float32)
        )                                                    # (4H, tile_m)
        # Rows are [i, f, o, g]: one sigmoid over (3H, tile_m), one tanh over
        # (H, tile_m).  sigmoid(x) = 0.5*(1 + tanh(x/2)) -- exact identity,
        # lowers to a single EUP op per vreg.
        sig = 0.5 * (jnp.tanh(0.5 * gates[:3 * H]) + 1.0)
        i_g = sig[0 * H:1 * H]
        f_g = sig[1 * H:2 * H]
        o_g = sig[2 * H:3 * H]
        g_g = jnp.tanh(gates[3 * H:4 * H])
        c = f_g * c + i_g * g_g
        h = o_g * jnp.tanh(c)

    # Final FC on the last hidden state: (D_out, H) @ (H, tile_m).
    out_ref[...] = (
        jnp.dot(wfc_ref[...], h, preferred_element_type=jnp.float32)
        + bfc_ref[...]
    )


# --------------------------------------------------------------------------- #
# pallas_call wrapper
# --------------------------------------------------------------------------- #
@functools.partial(jax.jit, static_argnames=("tile_m", "num_tiles"))
def _forward_impl(x, w_ih, w_hh, b_all, w_fc, b_fc, *, tile_m, num_tiles):
    B, C, T, N = x.shape
    D = w_ih.shape[1]
    H4, H = w_hh.shape
    D_out = w_fc.shape[0]
    M = B * N
    m_pad = tile_m * num_tiles

    # Exact PyTorch plumbing: x[:, :D] -> permute(0,2,3,1) -> .view(B*N, T, D)
    # (row-major reshape matches .contiguous().view, including B/T/N mixing).
    seq = jnp.transpose(x[:, :D], (0, 2, 3, 1)).reshape(M, T, D)
    if m_pad != M:
        seq = jnp.pad(seq, ((0, m_pad - M), (0, 0), (0, 0)))

    # Kernel layout: (num_tiles, D, T*tile_m), columns grouped by timestep, so
    # the kernel can do one (4H,D)@(D,T*tile_m) dot per tile.
    # TODO(synk): at production M this transpose is a standalone HBM pass; emit
    # this layout from the upstream producer (or allow_input_fusion) instead.
    seq_k = jnp.transpose(seq.reshape(num_tiles, tile_m, T, D), (0, 3, 2, 1))
    seq_k = seq_k.reshape(num_tiles, D, T * tile_m)

    out_t = pl.pallas_call(
        _lstm_fc_kernel,
        out_shape=jax.ShapeDtypeStruct((D_out, m_pad), jnp.float32),
        grid_spec=pltpu.PrefetchScalarGridSpec(
            num_scalar_prefetch=0,
            grid=(num_tiles,),
            in_specs=[
                # per-tile sequence slab (leading grid dim squeezed away)
                pl.BlockSpec((pl.Squeezed(), D, T * tile_m),
                             lambda i: (i, 0, 0)),
                pl.BlockSpec((H4, D), lambda i: (0, 0)),      # W_ih (full)
                pl.BlockSpec((H4, H), lambda i: (0, 0)),      # W_hh (full)
                pl.BlockSpec((H4, 1), lambda i: (0, 0)),      # b_ih + b_hh
                pl.BlockSpec((D_out, H), lambda i: (0, 0)),   # W_fc (full)
                pl.BlockSpec((D_out, 1), lambda i: (0, 0)),   # b_fc
            ],
            out_specs=pl.BlockSpec((D_out, tile_m), lambda i: (0, i)),
            scratch_shapes=[pltpu.VMEM((H4, T * tile_m), jnp.float32)],
        ),
        compiler_params=pltpu.CompilerParams(
            dimension_semantics=("parallel",),
        ),
    )(seq_k, w_ih, w_hh, b_all, w_fc, b_fc)                  # (D_out, m_pad)

    flat = jnp.transpose(out_t)[:M]                          # (B*N, D_out)
    y = jnp.transpose(flat.reshape(B, N, D_out), (0, 2, 1))  # (B, D_out, N)
    return y


# --------------------------------------------------------------------------- #
# Generation-aware tiling
# --------------------------------------------------------------------------- #
def _round_up(x, m):
    return ((x + m - 1) // m) * m


def _is_dual_tensorcore():
    """True on chips with 2 TensorCores per chip (v7x)."""
    try:
        kind = jax.devices()[0].device_kind.lower()
    except Exception:
        return False
    return ("v7" in kind) or ("tpu7" in kind) or ("7x" in kind)


def _choose_tiling(M, *, cap=512):
    """Pick (tile_m, num_tiles).

    Single-TC chips (v5e/v6e): smallest grid possible (grid=1 at small M) so
    the serial 12-step recurrence is run as few times as possible.
    Dual-TC v7x: grid kept an even multiple of 2 so both cores get tiles.
    tile_m is a multiple of 128 (lane axis) and capped to bound live ranges
    and VMEM (xp scratch = 6 KiB * tile_m per tile).
    """
    group = 2 if _is_dual_tensorcore() else 1
    tiles = group
    while _round_up(pl.cdiv(M, tiles), 128) > cap:
        tiles += group
    tile_m = _round_up(pl.cdiv(M, tiles), 128)
    return tile_m, tiles


# --------------------------------------------------------------------------- #
# Parameters (PyTorch order) + kernel-ready prep
# --------------------------------------------------------------------------- #
def init_params(key, input_dim, hidden_dim):
    """PyTorch-order (i,f,g,o) weights mimicking nn.LSTM / nn.Linear init."""
    H, D = hidden_dim, input_dim
    s = 1.0 / jnp.sqrt(H)
    k = jax.random.split(key, 6)
    return {
        "input_dim": D,
        "hidden_dim": H,
        "w_ih": jax.random.uniform(k[0], (4 * H, D), jnp.float32, -s, s),
        "w_hh": jax.random.uniform(k[1], (4 * H, H), jnp.float32, -s, s),
        "b_ih": jax.random.uniform(k[2], (4 * H,), jnp.float32, -s, s),
        "b_hh": jax.random.uniform(k[3], (4 * H,), jnp.float32, -s, s),
        "w_fc": jax.random.uniform(k[4], (D, H), jnp.float32, -s, s),
        "b_fc": jax.random.uniform(k[5], (D,), jnp.float32, -s, s),
    }


def prepare_kernel_params(params):
    """Merge biases and permute gate rows PyTorch [i,f,g,o] -> kernel [i,f,o,g]."""
    H = params["hidden_dim"]
    perm = jnp.concatenate([
        jnp.arange(0, 2 * H),        # i, f
        jnp.arange(3 * H, 4 * H),    # o
        jnp.arange(2 * H, 3 * H),    # g
    ])
    b_all = params["b_ih"] + params["b_hh"]
    return {
        "w_ih": params["w_ih"][perm],
        "w_hh": params["w_hh"][perm],
        "b_all": b_all[perm].reshape(4 * H, 1),
        "w_fc": params["w_fc"],
        "b_fc": params["b_fc"].reshape(-1, 1),
    }


def basic_lstm_forward(x, params):
    """Full BasicLSTM.forward.  x: (B, D+1, 12, N) f32 -> (B, D, N) f32."""
    B, C, T, N = x.shape
    D = params["input_dim"]
    assert C == D + 1 and T == 12, (x.shape, D)
    kp = prepare_kernel_params(params)
    tile_m, num_tiles = _choose_tiling(B * N)
    return _forward_impl(
        x, kp["w_ih"], kp["w_hh"], kp["b_all"], kp["w_fc"], kp["b_fc"],
        tile_m=tile_m, num_tiles=num_tiles,
    )


# --------------------------------------------------------------------------- #
# Pure-JAX reference (PyTorch gate order) for the correctness check
# --------------------------------------------------------------------------- #
def _reference_forward(x, params):
    B, C, T, N = x.shape
    D, H = params["input_dim"], params["hidden_dim"]
    seq = jnp.transpose(x[:, :D], (0, 2, 3, 1)).reshape(B * N, T, D)

    w_ih_t = params["w_ih"].T          # (D, 4H)
    w_hh_t = params["w_hh"].T          # (H, 4H)
    b_all = params["b_ih"] + params["b_hh"]

    def step(carry, xt):
        h, c = carry
        gates = xt @ w_ih_t + h @ w_hh_t + b_all
        i = jax.nn.sigmoid(gates[:, 0 * H:1 * H])
        f = jax.nn.sigmoid(gates[:, 1 * H:2 * H])
        g = jnp.tanh(gates[:, 2 * H:3 * H])
        o = jax.nn.sigmoid(gates[:, 3 * H:4 * H])
        c = f * c + i * g
        h = o * jnp.tanh(c)
        return (h, c), None

    h0 = jnp.zeros((B * N, H), jnp.float32)
    (h, _), _ = jax.lax.scan(step, (h0, h0), jnp.swapaxes(seq, 0, 1))
    flat = h @ params["w_fc"].T + params["b_fc"]
    return jnp.transpose(flat.reshape(B, N, D), (0, 2, 1))


# --------------------------------------------------------------------------- #
if __name__ == "__main__":
    B = 2
    NUM_NODES = 128        # small synthetic node count (1370 in production)
    INPUT_DIM = 8
    HIDDEN_DIM = 32        # 4*H = 128 -> lane/sublane-aligned gate matrix
    T = 12

    key = jax.random.PRNGKey(0)
    kx, kw = jax.random.split(key)
    x = jax.random.normal(kx, (B, INPUT_DIM + 1, T, NUM_NODES), jnp.float32)

    params = init_params(kw, INPUT_DIM, HIDDEN_DIM)

    y = basic_lstm_forward(x, params)
    y = jax.block_until_ready(y)
    assert y.shape == (B, INPUT_DIM, NUM_NODES), y.shape

    y_ref = jax.block_until_ready(_reference_forward(x, params))
    assert jnp.allclose(y, y_ref, atol=1e-4, rtol=1e-4), (
        float(jnp.max(jnp.abs(y - y_ref)))
    )

    print("KERNEL_OK")
</pallas_src>

<mosaic_0001>
module attributes {stable_mosaic.version = 11 : i64} {
  func.func @_lstm_fc_kernel(%arg0: i32, %arg1: memref<1x8x3072xf32, #tpu.memory_space<vmem>>, %arg2: memref<128x8xf32, #tpu.memory_space<vmem>>, %arg3: memref<128x32xf32, #tpu.memory_space<vmem>>, %arg4: memref<128x1xf32, #tpu.memory_space<vmem>>, %arg5: memref<8x32xf32, #tpu.memory_space<vmem>>, %arg6: memref<8x1xf32, #tpu.memory_space<vmem>>, %arg7: memref<8x256xf32, #tpu.memory_space<vmem>>, %arg8: memref<128x3072xf32, #tpu.memory_space<vmem>>) attributes {dimension_semantics = [#tpu.dimension_semantics<parallel>], iteration_bounds = array<i64: 1>, scalar_prefetch = 0 : i64, scratch_operands = 1 : i64, tpu.core_type = #tpu.core_type<tc>, window_params = [{transform_indices = @transform_0, window_bounds = array<i64: 1, 8, 3072>}, {pipeline_mode = #tpu.pipeline_mode<synchronous>, transform_indices = @transform_1, window_bounds = array<i64: 128, 8>}, {pipeline_mode = #tpu.pipeline_mode<synchronous>, transform_indices = @transform_2, window_bounds = array<i64: 128, 32>}, {pipeline_mode = #tpu.pipeline_mode<synchronous>, transform_indices = @transform_3, window_bounds = array<i64: 128, 1>}, {pipeline_mode = #tpu.pipeline_mode<synchronous>, transform_indices = @transform_4, window_bounds = array<i64: 8, 32>}, {pipeline_mode = #tpu.pipeline_mode<synchronous>, transform_indices = @transform_5, window_bounds = array<i64: 8, 1>}, {transform_indices = @transform_6, window_bounds = array<i64: 8, 256>}]} {
    %c0 = arith.constant 0 : index
    %c0_0 = arith.constant 0 : index
    %0 = vector.load %arg3[%c0, %c0_0] : memref<128x32xf32, #tpu.memory_space<vmem>>, vector<128x32xf32>
    %c0_1 = arith.constant 0 : index
    %c0_2 = arith.constant 0 : index
    %1 = vector.load %arg2[%c0_1, %c0_2] : memref<128x8xf32, #tpu.memory_space<vmem>>, vector<128x8xf32>
    %c0_3 = arith.constant 0 : index
    %c0_4 = arith.constant 0 : index
    %c0_5 = arith.constant 0 : index
    %2 = vector.load %arg1[%c0_3, %c0_4, %c0_5] : memref<1x8x3072xf32, #tpu.memory_space<vmem>>, vector<1x8x3072xf32>
    %3 = vector.shape_cast %2 : vector<1x8x3072xf32> to vector<8x3072xf32>
    %cst = arith.constant dense<0.000000e+00> : vector<128x3072xf32>
    %4 = tpu.matmul %1, %3, %cst {dimension_numbers = #tpu.dot_dimension_numbers<[1], [0], [0], [1], [0, 0, 1, 1], [], []>} : vector<128x8xf32>, vector<8x3072xf32>, vector<128x3072xf32> -> vector<128x3072xf32>
    %c0_6 = arith.constant 0 : index
    %c0_7 = arith.constant 0 : index
    %5 = vector.load %arg4[%c0_6, %c0_7] : memref<128x1xf32, #tpu.memory_space<vmem>>, vector<128x1xf32>
    %6 = vector.broadcast %5 : vector<128x1xf32> to vector<128x3072xf32>
    %7 = arith.addf %4, %6 : vector<128x3072xf32>
    %c0_8 = arith.constant 0 : index
    %c0_9 = arith.constant 0 : index
    %8 = vector.load %arg8[%c0_8, %c0_9] : memref<128x3072xf32, #tpu.memory_space<vmem>>, vector<128x3072xf32>
    tpu.vector_store %arg8[%c0_8, %c0_9], %7 {strides = array<i32>} : memref<128x3072xf32, #tpu.memory_space<vmem>>, vector<128x3072xf32>,
    %cst_10 = arith.constant 0.000000e+00 : f32
    %9 = vector.broadcast %cst_10 : f32 to vector<32x256xf32>
    %cst_11 = arith.constant 0.000000e+00 : f32
    %10 = vector.broadcast %cst_11 : f32 to vector<32x256xf32>
    %c0_12 = arith.constant 0 : index
    %c0_13 = arith.constant 0 : index
    %11 = vector.load %arg8[%c0_12, %c0_13] : memref<128x3072xf32, #tpu.memory_space<vmem>>, vector<128x256xf32>
    %cst_14 = arith.constant dense<0.000000e+00> : vector<128x256xf32>
    %12 = tpu.matmul %0, %9, %cst_14 {dimension_numbers = #tpu.dot_dimension_numbers<[1], [0], [0], [1], [0, 0, 1, 1], [], []>} : vector<128x32xf32>, vector<32x256xf32>, vector<128x256xf32> -> vector<128x256xf32>
    %13 = arith.addf %11, %12 : vector<128x256xf32>
    %14 = vector.extract_strided_slice %13 {offsets = [0, 0], sizes = [96, 256], strides = [1, 1]} : vector<128x256xf32> to vector<96x256xf32>
    %cst_15 = arith.constant 5.000000e-01 : f32
    %15 = vector.broadcast %cst_15 : f32 to vector<96x256xf32>
    %16 = arith.mulf %15, %14 : vector<96x256xf32>
    %17 = math.tanh %16 : vector<96x256xf32>
    %cst_16 = arith.constant 1.000000e+00 : f32
    %18 = vector.broadcast %cst_16 : f32 to vector<96x256xf32>
    %19 = arith.addf %17, %18 : vector<96x256xf32>
    %cst_17 = arith.constant 5.000000e-01 : f32
    %20 = vector.broadcast %cst_17 : f32 to vector<96x256xf32>
    %21 = arith.mulf %20, %19 : vector<96x256xf32>
    %22 = vector.extract_strided_slice %21 {offsets = [0, 0], sizes = [32, 256], strides = [1, 1]} : vector<96x256xf32> to vector<32x256xf32>
    %23 = vector.extract_strided_slice %21 {offsets = [32, 0], sizes = [32, 256], strides = [1, 1]} : vector<96x256xf32> to vector<32x256xf32>
    %24 = vector.extract_strided_slice %21 {offsets = [64, 0], sizes = [32, 256], strides = [1, 1]} : vector<96x256xf32> to vector<32x256xf32>
    %25 = vector.extract_strided_slice %13 {offsets = [96, 0], sizes = [32, 256], strides = [1, 1]} : vector<128x256xf32> to vector<32x256xf32>
    %26 = math.tanh %25 : vector<32x256xf32>
    %27 = arith.mulf %23, %10 : vector<32x256xf32>
    %28 = arith.mulf %22, %26 : vector<32x256xf32>
    %29 = arith.addf %27, %28 : vector<32x256xf32>
    %30 = math.tanh %29 : vector<32x256xf32>
    %31 = arith.mulf %24, %30 : vector<32x256xf32>
    %c0_18 = arith.constant 0 : index
    %c256 = arith.constant 256 : index
    %32 = vector.load %arg8[%c0_18, %c256] : memref<128x3072xf32, #tpu.memory_space<vmem>>, vector<128x256xf32>
    %cst_19 = arith.constant dense<0.000000e+00> : vector<128x256xf32>
    %33 = tpu.matmul %0, %31, %cst_19 {dimension_numbers = #tpu.dot_dimension_numbers<[1], [0], [0], [1], [0, 0, 1, 1], [], []>} : vector<128x32xf32>, vector<32x256xf32>, vector<128x256xf32> -> vector<128x256xf32>
    %34 = arith.addf %32, %33 : vector<128x256xf32>
    %35 = vector.extract_strided_slice %34 {offsets = [0, 0], sizes = [96, 256], strides = [1, 1]} : vector<128x256xf32> to vector<96x256xf32>
    %cst_20 = arith.constant 5.000000e-01 : f32
    %36 = vector.broadcast %cst_20 : f32 to vector<96x256xf32>
    %37 = arith.mulf %36, %35 : vector<96x256xf32>
    %38 = math.tanh %37 : vector<96x256xf32>
    %cst_21 = arith.constant 1.000000e+00 : f32
    %39 = vector.broadcast %cst_21 : f32 to vector<96x256xf32>
    %40 = arith.addf %38, %39 : vector<96x256xf32>
    %cst_22 = arith.constant 5.000000e-01 : f32
    %41 = vector.broadcast %cst_22 : f32 to vector<96x256xf32>
    %42 = arith.mulf %41, %40 : vector<96x256xf32>
    %43 = vector.extract_strided_slice %42 {offsets = [0, 0], sizes = [32, 256], strides = [1, 1]} : vector<96x256xf32> to vector<32x256xf32>
    %44 = vector.extract_strided_slice %42 {offsets = [32, 0], sizes = [32, 256], strides = [1, 1]} : vector<96x256xf32> to vector<32x256xf32>
    %45 = vector.extract_strided_slice %42 {offsets = [64, 0], sizes = [32, 256], strides = [1, 1]} : vector<96x256xf32> to vector<32x256xf32>
    %46 = vector.extract_strided_slice %34 {offsets = [96, 0], sizes = [32, 256], strides = [1, 1]} : vector<128x256xf32> to vector<32x256xf32>
    %47 = math.tanh %46 : vector<32x256xf32>
    %48 = arith.mulf %44, %29 : vector<32x256xf32>
    %49 = arith.mulf %43, %47 : vector<32x256xf32>
    %50 = arith.addf %48, %49 : vector<32x256xf32>
    %51 = math.tanh %50 : vector<32x256xf32>
    %52 = arith.mulf %45, %51 : vector<32x256xf32>
    %c0_23 = arith.constant 0 : index
    %c512 = arith.constant 512 : index
    %53 = vector.load %arg8[%c0_23, %c512] : memref<128x3072xf32, #tpu.memory_space<vmem>>, vector<128x256xf32>
    %cst_24 = arith.constant dense<0.000000e+00> : vector<128x256xf32>
    %54 = tpu.matmul %0, %52, %cst_24 {dimension_numbers = #tpu.dot_dimension_numbers<[1], [0], [0], [1], [0, 0, 1, 1], [], []>} : vector<128x32xf32>, vector<32x256xf32>, vector<128x256xf32> -> vector<128x256xf32>
    %55 = arith.addf %53, %54 : vector<128x256xf32>
    %56 = vector.extract_strided_slice %55 {offsets = [0, 0], sizes = [96, 256], strides = [1, 1]} : vector<128x256xf32> to vector<96x256xf32>
    %cst_25 = arith.constant 5.000000e-01 : f32
    %57 = vector.broadcast %cst_25 : f32 to vector<96x256xf32>
    %58 = arith.mulf %57, %56 : vector<96x256xf32>
    %59 = math.tanh %58 : vector<96x256xf32>
    %cst_26 = arith.constant 1.000000e+00 : f32
    %60 = vector.broadcast %cst_26 : f32 to vector<96x256xf32>
    %61 = arith.addf %59, %60 : vector<96x256xf32>
    %cst_27 = arith.constant 5.000000e-01 : f32
    %62 = vector.broadcast %cst_27 : f32 to vector<96x256xf32>
    %63 = arith.mulf %62, %61 : vector<96x256xf32>
    %64 = vector.extract_strided_slice %63 {offsets = [0, 0], sizes = [32, 256], strides = [1, 1]} : vector<96x256xf32> to vector<32x256xf32>
    %65 = vector.extract_strided_slice %63 {offsets = [32, 0], sizes = [32, 256], strides = [1, 1]} : vector<96x256xf32> to vector<32x256xf32>
    %66 = vector.extract_strided_slice %63 {offsets = [64, 0], sizes = [32, 256], strides = [1, 1]} : vector<96x256xf32> to vector<32x256xf32>
    %67 = vector.extract_strided_slice %55 {offsets = [96, 0], sizes = [32, 256], strides = [1, 1]} : vector<128x256xf32> to vector<32x256xf32>
    %68 = math.tanh %67 : vector<32x256xf32>
    %69 = arith.mulf %65, %50 : vector<32x256xf32>
    %70 = arith.mulf %64, %68 : vector<32x256xf32>
    %71 = arith.addf %69, %70 : vector<32x256xf32>
    %72 = math.tanh %71 : vector<32x256xf32>
    %73 = arith.mulf %66, %72 : vector<32x256xf32>
    %c0_28 = arith.constant 0 : index
    %c768 = arith.constant 768 : index
    %74 = vector.load %arg8[%c0_28, %c768] : memref<128x3072xf32, #tpu.memory_space<vmem>>, vector<128x256xf32>
    %cst_29 = arith.constant dense<0.000000e+00> : vector<128x256xf32>
    %75 = tpu.matmul %0, %73, %cst_29 {dimension_numbers = #tpu.dot_dimension_numbers<[1], [0], [0], [1], [0, 0, 1, 1], [], []>} : vector<128x32xf32>, vector<32x256xf32>, vector<128x256xf32> -> vector<128x256xf32>
    %76 = arith.addf %74, %75 : vector<128x256xf32>
    %77 = vector.extract_strided_slice %76 {offsets = [0, 0], sizes = [96, 256], strides = [1, 1]} : vector<128x256xf32> to vector<96x256xf32>
    %cst_30 = arith.constant 5.000000e-01 : f32
    %78 = vector.broadcast %cst_30 : f32 to vector<96x256xf32>
    %79 = arith.mulf %78, %77 : vector<96x256xf32>
    %80 = math.tanh %79 : vector<96x256xf32>
    %cst_31 = arith.constant 1.000000e+00 : f32
    %81 = vector.broadcast %cst_31 : f32 to vector<96x256xf32>
    %82 = arith.addf %80, %81 : vector<96x256xf32>
    %cst_32 = arith.constant 5.000000e-01 : f32
    %83 = vector.broadcast %cst_32 : f32 to vector<96x256xf32>
    %84 = arith.mulf %83, %82 : vector<96x256xf32>
    %85 = vector.extract_strided_slice %84 {offsets = [0, 0], sizes = [32, 256], strides = [1, 1]} : vector<96x256xf32> to vector<32x256xf32>
    %86 = vector.extract_strided_slice %84 {offsets = [32, 0], sizes = [32, 256], strides = [1, 1]} : vector<96x256xf32> to vector<32x256xf32>
    %87 = vector.extract_strided_slice %84 {offsets = [64, 0], sizes = [32, 256], strides = [1, 1]} : vector<96x256xf32> to vector<32x256xf32>
    %88 = vector.extract_strided_slice %76 {offsets = [96, 0], sizes = [32, 256], strides = [1, 1]} : vector<128x256xf32> to vector<32x256xf32>
    %89 = math.tanh %88 : vector<32x256xf32>
    %90 = arith.mulf %86, %71 : vector<32x256xf32>
    %91 = arith.mulf %85, %89 : vector<32x256xf32>
    %92 = arith.addf %90, %91 : vector<32x256xf32>
    %93 = math.tanh %92 : vector<32x256xf32>
    %94 = arith.mulf %87, %93 : vector<32x256xf32>
    %c0_33 = arith.constant 0 : index
    %c1024 = arith.constant 1024 : index
    %95 = vector.load %arg8[%c0_33, %c1024] : memref<128x3072xf32, #tpu.memory_space<vmem>>, vector<128x256xf32>
    %cst_34 = arith.constant dense<0.000000e+00> : vector<128x256xf32>
    %96 = tpu.matmul %0, %94, %cst_34 {dimension_numbers = #tpu.dot_dimension_numbers<[1], [0], [0], [1], [0, 0, 1, 1], [], []>} : vector<128x32xf32>, vector<32x256xf32>, vector<128x256xf32> -> vector<128x256xf32>
    %97 = arith.addf %95, %96 : vector<128x256xf32>
    %98 = vector.extract_strided_slice %97 {offsets = [0, 0], sizes = [96, 256], strides = [1, 1]} : vector<128x256xf32> to vector<96x256xf32>
    %cst_35 = arith.constant 5.000000e-01 : f32
    %99 = vector.broadcast %cst_35 : f32 to vector<96x256xf32>
    %100 = arith.mulf %99, %98 : vector<96x256xf32>
    %101 = math.tanh %100 : vector<96x256xf32>
    %cst_36 = arith.constant 1.000000e+00 : f32
    %102 = vector.broadcast %cst_36 : f32 to vector<96x256xf32>
    %103 = arith.addf %101, %102 : vector<96x256xf32>
    %cst_37 = arith.constant 5.000000e-01 : f32
    %104 = vector.broadcast %cst_37 : f32 to vector<96x256xf32>
    %105 = arith.mulf %104, %103 : vector<96x256xf32>
    %106 = vector.extract_strided_slice %105 {offsets = [0, 0], sizes = [32, 256], strides = [1, 1]} : vector<96x256xf32> to vector<32x256xf32>
    %107 = vector.extract_strided_slice %105 {offsets = [32, 0], sizes = [32, 256], strides = [1, 1]} : vector<96x256xf32> to vector<32x256xf32>
    %108 = vector.extract_strided_slice %105 {offsets = [64, 0], sizes = [32, 256], strides = [1, 1]} : vector<96x256xf32> to vector<32x256xf32>
    %109 = vector.extract_strided_slice %97 {offsets = [96, 0], sizes = [32, 256], strides = [1, 1]} : vector<128x256xf32> to vector<32x256xf32>
    %110 = math.tanh %109 : vector<32x256xf32>
    %111 = arith.mulf %107, %92 : vector<32x256xf32>
    %112 = arith.mulf %106, %110 : vector<32x256xf32>
    %113 = arith.addf %111, %112 : vector<32x256xf32>
    %114 = math.tanh %113 : vector<32x256xf32>
    %115 = arith.mulf %108, %114 : vector<32x256xf32>
    %c0_38 = arith.constant 0 : index
    %c1280 = arith.constant 1280 : index
    %116 = vector.load %arg8[%c0_38, %c1280] : memref<128x3072xf32, #tpu.memory_space<vmem>>, vector<128x256xf32>
    %cst_39 = arith.constant dense<0.000000e+00> : vector<128x256xf32>
    %117 = tpu.matmul %0, %115, %cst_39 {dimension_numbers = #tpu.dot_dimension_numbers<[1], [0], [0], [1], [0, 0, 1, 1], [], []>} : vector<128x32xf32>, vector<32x256xf32>, vector<128x256xf32> -> vector<128x256xf32>
    %118 = arith.addf %116, %117 : vector<128x256xf32>
    %119 = vector.extract_strided_slice %118 {offsets = [0, 0], sizes = [96, 256], strides = [1, 1]} : vector<128x256xf32> to vector<96x256xf32>
    %cst_40 = arith.constant 5.000000e-01 : f32
    %120 = vector.broadcast %cst_40 : f32 to vector<96x256xf32>
    %121 = arith.mulf %120, %119 : vector<96x256xf32>
    %122 = math.tanh %121 : vector<96x256xf32>
    %cst_41 = arith.constant 1.000000e+00 : f32
    %123 = vector.broadcast %cst_41 : f32 to vector<96x256xf32>
    %124 = arith.addf %122, %123 : vector<96x256xf32>
    %cst_42 = arith.constant 5.000000e-01 : f32
    %125 = vector.broadcast %cst_42 : f32 to vector<96x256xf32>
    %126 = arith.mulf %125, %124 : vector<96x256xf32>
    %127 = vector.extract_strided_slice %126 {offsets = [0, 0], sizes = [32, 256], strides = [1, 1]} : vector<96x256xf32> to vector<32x256xf32>
    %128 = vector.extract_strided_slice %126 {offsets = [32, 0], sizes = [32, 256], strides = [1, 1]} : vector<96x256xf32> to vector<32x256xf32>
    %129 = vector.extract_strided_slice %126 {offsets = [64, 0], sizes = [32, 256], strides = [1, 1]} : vector<96x256xf32> to vector<32x256xf32>
    %130 = vector.extract_strided_slice %118 {offsets = [96, 0], sizes = [32, 256], strides = [1, 1]} : vector<128x256xf32> to vector<32x256xf32>
    %131 = math.tanh %130 : vector<32x256xf32>
    %132 = arith.mulf %128, %113 : vector<32x256xf32>
    %133 = arith.mulf %127, %131 : vector<32x256xf32>
    %134 = arith.addf %132, %133 : vector<32x256xf32>
    %135 = math.tanh %134 : vector<32x256xf32>
    %136 = arith.mulf %129, %135 : vector<32x256xf32>
    %c0_43 = arith.constant 0 : index
    %c1536 = arith.constant 1536 : index
    %137 = vector.load %arg8[%c0_43, %c1536] : memref<128x3072xf32, #tpu.memory_space<vmem>>, vector<128x256xf32>
    %cst_44 = arith.constant dense<0.000000e+00> : vector<128x256xf32>
    %138 = tpu.matmul %0, %136, %cst_44 {dimension_numbers = #tpu.dot_dimension_numbers<[1], [0], [0], [1], [0, 0, 1, 1], [], []>} : vector<128x32xf32>, vector<32x256xf32>, vector<128x256xf32> -> vector<128x256xf32>
    %139 = arith.addf %137, %138 : vector<128x256xf32>
    %140 = vector.extract_strided_slice %139 {offsets = [0, 0], sizes = [96, 256], strides = [1, 1]} : vector<128x256xf32> to vector<96x256xf32>
    %cst_45 = arith.constant 5.000000e-01 : f32
    %141 = vector.broadcast %cst_45 : f32 to vector<96x256xf32>
    %142 = arith.mulf %141, %140 : vector<96x256xf32>
    %143 = math.tanh %142 : vector<96x256xf32>
    %cst_46 = arith.constant 1.000000e+00 : f32
    %144 = vector.broadcast %cst_46 : f32 to vector<96x256xf32>
    %145 = arith.addf %143, %144 : vector<96x256xf32>
    %cst_47 = arith.constant 5.000000e-01 : f32
    %146 = vector.broadcast %cst_47 : f32 to vector<96x256xf32>
    %147 = arith.mulf %146, %145 : vector<96x256xf32>
    %148 = vector.extract_strided_slice %147 {offsets = [0, 0], sizes = [32, 256], strides = [1, 1]} : vector<96x256xf32> to vector<32x256xf32>
    %149 = vector.extract_strided_slice %147 {offsets = [32, 0], sizes = [32, 256], strides = [1, 1]} : vector<96x256xf32> to vector<32x256xf32>
    %150 = vector.extract_strided_slice %147 {offsets = [64, 0], sizes = [32, 256], strides = [1, 1]} : vector<96x256xf32> to vector<32x256xf32>
    %151 = vector.extract_strided_slice %139 {offsets = [96, 0], sizes = [32, 256], strides = [1, 1]} : vector<128x256xf32> to vector<32x256xf32>
    %152 = math.tanh %151 : vector<32x256xf32>
    %153 = arith.mulf %149, %134 : vector<32x256xf32>
    %154 = arith.mulf %148, %152 : vector<32x256xf32>
    %155 = arith.addf %153, %154 : vector<32x256xf32>
    %156 = math.tanh %155 : vector<32x256xf32>
    %157 = arith.mulf %150, %156 : vector<32x256xf32>
    %c0_48 = arith.constant 0 : index
    %c1792 = arith.constant 1792 : index
    %158 = vector.load %arg8[%c0_48, %c1792] : memref<128x3072xf32, #tpu.memory_space<vmem>>, vector<128x256xf32>
    %cst_49 = arith.constant dense<0.000000e+00> : vector<128x256xf32>
    %159 = tpu.matmul %0, %157, %cst_49 {dimension_numbers = #tpu.dot_dimension_numbers<[1], [0], [0], [1], [0, 0, 1, 1], [], []>} : vector<128x32xf32>, vector<32x256xf32>, vector<128x256xf32> -> vector<128x256xf32>
    %160 = arith.addf %158, %159 : vector<128x256xf32>
    %161 = vector.extract_strided_slice %160 {offsets = [0, 0], sizes = [96, 256], strides = [1, 1]} : vector<128x256xf32> to vector<96x256xf32>
    %cst_50 = arith.constant 5.000000e-01 : f32
    %162 = vector.broadcast %cst_50 : f32 to vector<96x256xf32>
    %163 = arith.mulf %162, %161 : vector<96x256xf32>
    %164 = math.tanh %163 : vector<96x256xf32>
    %cst_51 = arith.constant 1.000000e+00 : f32
    %165 = vector.broadcast %cst_51 : f32 to vector<96x256xf32>
    %166 = arith.addf %164, %165 : vector<96x256xf32>
    %cst_52 = arith.constant 5.000000e-01 : f32
    %167 = vector.broadcast %cst_52 : f32 to vector<96x256xf32>
    %168 = arith.mulf %167, %166 : vector<96x256xf32>
    %169 = vector.extract_strided_slice %168 {offsets = [0, 0], sizes = [32, 256], strides = [1, 1]} : vector<96x256xf32> to vector<32x256xf32>
    %170 = vector.extract_strided_slice %168 {offsets = [32, 0], sizes = [32, 256], strides = [1, 1]} : vector<96x256xf32> to vector<32x256xf32>
    %171 = vector.extract_strided_slice %168 {offsets = [64, 0], sizes = [32, 256], strides = [1, 1]} : vector<96x256xf32> to vector<32x256xf32>
    %172 = vector.extract_strided_slice %160 {offsets = [96, 0], sizes = [32, 256], strides = [1, 1]} : vector<128x256xf32> to vector<32x256xf32>
    %173 = math.tanh %172 : vector<32x256xf32>
    %174 = arith.mulf %170, %155 : vector<32x256xf32>
    %175 = arith.mulf %169, %173 : vector<32x256xf32>
    %176 = arith.addf %174, %175 : vector<32x256xf32>
    %177 = math.tanh %176 : vector<32x256xf32>
    %178 = arith.mulf %171, %177 : vector<32x256xf32>
    %c0_53 = arith.constant 0 : index
    %c2048 = arith.constant 2048 : index
    %179 = vector.load %arg8[%c0_53, %c2048] : memref<128x3072xf32, #tpu.memory_space<vmem>>, vector<128x256xf32>
    %cst_54 = arith.constant dense<0.000000e+00> : vector<128x256xf32>
    %180 = tpu.matmul %0, %178, %cst_54 {dimension_numbers = #tpu.dot_dimension_numbers<[1], [0], [0], [1], [0, 0, 1, 1], [], []>} : vector<128x32xf32>, vector<32x256xf32>, vector<128x256xf32> -> vector<128x256xf32>
    %181 = arith.addf %179, %180 : vector<128x256xf32>
    %182 = vector.extract_strided_slice %181 {offsets = [0, 0], sizes = [96, 256], strides = [1, 1]} : vector<128x256xf32> to vector<96x256xf32>
    %cst_55 = arith.constant 5.000000e-01 : f32
    %183 = vector.broadcast %cst_55 : f32 to vector<96x256xf32>
    %184 = arith.mulf %183, %182 : vector<96x256xf32>
    %185 = math.tanh %184 : vector<96x256xf32>
    %cst_56 = arith.constant 1.000000e+00 : f32
    %186 = vector.broadcast %cst_56 : f32 to vector<96x256xf32>
    %187 = arith.addf %185, %186 : vector<96x256xf32>
    %cst_57 = arith.constant 5.000000e-01 : f32
    %188 = vector.broadcast %cst_57 : f32 to vector<96x256xf32>
    %189 = arith.mulf %188, %187 : vector<96x256xf32>
    %190 = vector.extract_strided_slice %189 {offsets = [0, 0], sizes = [32, 256], strides = [1, 1]} : vector<96x256xf32> to vector<32x256xf32>
    %191 = vector.extract_strided_slice %189 {offsets = [32, 0], sizes = [32, 256], strides = [1, 1]} : vector<96x256xf32> to vector<32x256xf32>
    %192 = vector.extract_strided_slice %189 {offsets = [64, 0], sizes = [32, 256], strides = [1, 1]} : vector<96x256xf32> to vector<32x256xf32>
    %193 = vector.extract_strided_slice %181 {offsets = [96, 0], sizes = [32, 256], strides = [1, 1]} : vector<128x256xf32> to vector<32x256xf32>
    %194 = math.tanh %193 : vector<32x256xf32>
    %195 = arith.mulf %191, %176 : vector<32x256xf32>
    %196 = arith.mulf %190, %194 : vector<32x256xf32>
    %197 = arith.addf %195, %196 : vector<32x256xf32>
    %198 = math.tanh %197 : vector<32x256xf32>
    %199 = arith.mulf %192, %198 : vector<32x256xf32>
    %c0_58 = arith.constant 0 : index
    %c2304 = arith.constant 2304 : index
    %200 = vector.load %arg8[%c0_58, %c2304] : memref<128x3072xf32, #tpu.memory_space<vmem>>, vector<128x256xf32>
    %cst_59 = arith.constant dense<0.000000e+00> : vector<128x256xf32>
    %201 = tpu.matmul %0, %199, %cst_59 {dimension_numbers = #tpu.dot_dimension_numbers<[1], [0], [0], [1], [0, 0, 1, 1], [], []>} : vector<128x32xf32>, vector<32x256xf32>, vector<128x256xf32> -> vector<128x256xf32>
    %202 = arith.addf %200, %201 : vector<128x256xf32>
    %203 = vector.extract_strided_slice %202 {offsets = [0, 0], sizes = [96, 256], strides = [1, 1]} : vector<128x256xf32> to vector<96x256xf32>
    %cst_60 = arith.constant 5.000000e-01 : f32
    %204 = vector.broadcast %cst_60 : f32 to vector<96x256xf32>
    %205 = arith.mulf %204, %203 : vector<96x256xf32>
    %206 = math.tanh %205 : vector<96x256xf32>
    %cst_61 = arith.constant 1.000000e+00 : f32
    %207 = vector.broadcast %cst_61 : f32 to vector<96x256xf32>
    %208 = arith.addf %206, %207 : vector<96x256xf32>
    %cst_62 = arith.constant 5.000000e-01 : f32
    %209 = vector.broadcast %cst_62 : f32 to vector<96x256xf32>
    %210 = arith.mulf %209, %208 : vector<96x256xf32>
    %211 = vector.extract_strided_slice %210 {offsets = [0, 0], sizes = [32, 256], strides = [1, 1]} : vector<96x256xf32> to vector<32x256xf32>
    %212 = vector.extract_strided_slice %210 {offsets = [32, 0], sizes = [32, 256], strides = [1, 1]} : vector<96x256xf32> to vector<32x256xf32>
    %213 = vector.extract_strided_slice %210 {offsets = [64, 0], sizes = [32, 256], strides = [1, 1]} : vector<96x256xf32> to vector<32x256xf32>
    %214 = vector.extract_strided_slice %202 {offsets = [96, 0], sizes = [32, 256], strides = [1, 1]} : vector<128x256xf32> to vector<32x256xf32>
    %215 = math.tanh %214 : vector<32x256xf32>
    %216 = arith.mulf %212, %197 : vector<32x256xf32>
    %217 = arith.mulf %211, %215 : vector<32x256xf32>
    %218 = arith.addf %216, %217 : vector<32x256xf32>
    %219 = math.tanh %218 : vector<32x256xf32>
    %220 = arith.mulf %213, %219 : vector<32x256xf32>
    %c0_63 = arith.constant 0 : index
    %c2560 = arith.constant 2560 : index
    %221 = vector.load %arg8[%c0_63, %c2560] : memref<128x3072xf32, #tpu.memory_space<vmem>>, vector<128x256xf32>
    %cst_64 = arith.constant dense<0.000000e+00> : vector<128x256xf32>
    %222 = tpu.matmul %0, %220, %cst_64 {dimension_numbers = #tpu.dot_dimension_numbers<[1], [0], [0], [1], [0, 0, 1, 1], [], []>} : vector<128x32xf32>, vector<32x256xf32>, vector<128x256xf32> -> vector<128x256xf32>
    %223 = arith.addf %221, %222 : vector<128x256xf32>
    %224 = vector.extract_strided_slice %223 {offsets = [0, 0], sizes = [96, 256], strides = [1, 1]} : vector<128x256xf32> to vector<96x256xf32>
    %cst_65 = arith.constant 5.000000e-01 : f32
    %225 = vector.broadcast %cst_65 : f32 to vector<96x256xf32>
    %226 = arith.mulf %225, %224 : vector<96x256xf32>
    %227 = math.tanh %226 : vector<96x256xf32>
    %cst_66 = arith.constant 1.000000e+00 : f32
    %228 = vector.broadcast %cst_66 : f32 to vector<96x256xf32>
    %229 = arith.addf %227, %228 : vector<96x256xf32>
    %cst_67 = arith.constant 5.000000e-01 : f32
    %230 = vector.broadcast %cst_67 : f32 to vector<96x256xf32>
    %231 = arith.mulf %230, %229 : vector<96x256xf32>
    %232 = vector.extract_strided_slice %231 {offsets = [0, 0], sizes = [32, 256], strides = [1, 1]} : vector<96x256xf32> to vector<32x256xf32>
    %233 = vector.extract_strided_slice %231 {offsets = [32, 0], sizes = [32, 256], strides = [1, 1]} : vector<96x256xf32> to vector<32x256xf32>
    %234 = vector.extract_strided_slice %231 {offsets = [64, 0], sizes = [32, 256], strides = [1, 1]} : vector<96x256xf32> to vector<32x256xf32>
    %235 = vector.extract_strided_slice %223 {offsets = [96, 0], sizes = [32, 256], strides = [1, 1]} : vector<128x256xf32> to vector<32x256xf32>
    %236 = math.tanh %235 : vector<32x256xf32>
    %237 = arith.mulf %233, %218 : vector<32x256xf32>
    %238 = arith.mulf %232, %236 : vector<32x256xf32>
    %239 = arith.addf %237, %238 : vector<32x256xf32>
    %240 = math.tanh %239 : vector<32x256xf32>
    %241 = arith.mulf %234, %240 : vector<32x256xf32>
    %c0_68 = arith.constant 0 : index
    %c2816 = arith.constant 2816 : index
    %242 = vector.load %arg8[%c0_68, %c2816] : memref<128x3072xf32, #tpu.memory_space<vmem>>, vector<128x256xf32>
    %cst_69 = arith.constant dense<0.000000e+00> : vector<128x256xf32>
    %243 = tpu.matmul %0, %241, %cst_69 {dimension_numbers = #tpu.dot_dimension_numbers<[1], [0], [0], [1], [0, 0, 1, 1], [], []>} : vector<128x32xf32>, vector<32x256xf32>, vector<128x256xf32> -> vector<128x256xf32>
    %244 = arith.addf %242, %243 : vector<128x256xf32>
    %245 = vector.extract_strided_slice %244 {offsets = [0, 0], sizes = [96, 256], strides = [1, 1]} : vector<128x256xf32> to vector<96x256xf32>
    %cst_70 = arith.constant 5.000000e-01 : f32
    %246 = vector.broadcast %cst_70 : f32 to vector<96x256xf32>
    %247 = arith.mulf %246, %245 : vector<96x256xf32>
    %248 = math.tanh %247 : vector<96x256xf32>
    %cst_71 = arith.constant 1.000000e+00 : f32
    %249 = vector.broadcast %cst_71 : f32 to vector<96x256xf32>
    %250 = arith.addf %248, %249 : vector<96x256xf32>
    %cst_72 = arith.constant 5.000000e-01 : f32
    %251 = vector.broadcast %cst_72 : f32 to vector<96x256xf32>
    %252 = arith.mulf %251, %250 : vector<96x256xf32>
    %253 = vector.extract_strided_slice %252 {offsets = [0, 0], sizes = [32, 256], strides = [1, 1]} : vector<96x256xf32> to vector<32x256xf32>
    %254 = vector.extract_strided_slice %252 {offsets = [32, 0], sizes = [32, 256], strides = [1, 1]} : vector<96x256xf32> to vector<32x256xf32>
    %255 = vector.extract_strided_slice %252 {offsets = [64, 0], sizes = [32, 256], strides = [1, 1]} : vector<96x256xf32> to vector<32x256xf32>
    %256 = vector.extract_strided_slice %244 {offsets = [96, 0], sizes = [32, 256], strides = [1, 1]} : vector<128x256xf32> to vector<32x256xf32>
    %257 = math.tanh %256 : vector<32x256xf32>
    %258 = arith.mulf %254, %239 : vector<32x256xf32>
    %259 = arith.mulf %253, %257 : vector<32x256xf32>
    %260 = arith.addf %258, %259 : vector<32x256xf32>
    %261 = math.tanh %260 : vector<32x256xf32>
    %262 = arith.mulf %255, %261 : vector<32x256xf32>
    %c0_73 = arith.constant 0 : index
    %c0_74 = arith.constant 0 : index
    %263 = vector.load %arg5[%c0_73, %c0_74] : memref<8x32xf32, #tpu.memory_space<vmem>>, vector<8x32xf32>
    %cst_75 = arith.constant dense<0.000000e+00> : vector<8x256xf32>
    %264 = tpu.matmul %263, %262, %cst_75 {dimension_numbers = #tpu.dot_dimension_numbers<[1], [0], [0], [1], [0, 0, 1, 1], [], []>} : vector<8x32xf32>, vector<32x256xf32>, vector<8x256xf32> -> vector<8x256xf32>
    %c0_76 = arith.constant 0 : index
    %c0_77 = arith.constant 0 : index
    %265 = vector.load %arg6[%c0_76, %c0_77] : memref<8x1xf32, #tpu.memory_space<vmem>>, vector<8x1xf32>
    %266 = vector.broadcast %265 : vector<8x1xf32> to vector<8x256xf32>
    %267 = arith.addf %264, %266 : vector<8x256xf32>
    %c0_78 = arith.constant 0 : index
    %c0_79 = arith.constant 0 : index
    %268 = vector.load %arg7[%c0_78, %c0_79] : memref<8x256xf32, #tpu.memory_space<vmem>>, vector<8x256xf32>
    tpu.vector_store %arg7[%c0_78, %c0_79], %267 {strides = array<i32>} : memref<8x256xf32, #tpu.memory_space<vmem>>, vector<8x256xf32>,
    return
  }
  func.func @transform_0(%arg0: i32) -> (i32, i32, i32) {
    %c0_i32 = arith.constant 0 : i32
    %c0_i32_0 = arith.constant 0 : i32
    %c0_i32_1 = arith.constant 0 : i32
    return %arg0, %c0_i32, %c0_i32_0 : i32, i32, i32
  }
  func.func @transform_1(%arg0: i32) -> (i32, i32) {
    %c0_i32 = arith.constant 0 : i32
    %c0_i32_0 = arith.constant 0 : i32
    %c0_i32_1 = arith.constant 0 : i32
    return %c0_i32, %c0_i32_0 : i32, i32
  }
  func.func @transform_2(%arg0: i32) -> (i32, i32) {
    %c0_i32 = arith.constant 0 : i32
    %c0_i32_0 = arith.constant 0 : i32
    %c0_i32_1 = arith.constant 0 : i32
    return %c0_i32, %c0_i32_0 : i32, i32
  }
  func.func @transform_3(%arg0: i32) -> (i32, i32) {
    %c0_i32 = arith.constant 0 : i32
    %c0_i32_0 = arith.constant 0 : i32
    %c0_i32_1 = arith.constant 0 : i32
    return %c0_i32, %c0_i32_0 : i32, i32
  }
  func.func @transform_4(%arg0: i32) -> (i32, i32) {
    %c0_i32 = arith.constant 0 : i32
    %c0_i32_0 = arith.constant 0 : i32
    %c0_i32_1 = arith.constant 0 : i32
    return %c0_i32, %c0_i32_0 : i32, i32
  }
  func.func @transform_5(%arg0: i32) -> (i32, i32) {
    %c0_i32 = arith.constant 0 : i32
    %c0_i32_0 = arith.constant 0 : i32
    %c0_i32_1 = arith.constant 0 : i32
    return %c0_i32, %c0_i32_0 : i32, i32
  }
  func.func @transform_6(%arg0: i32) -> (i32, i32) {
    %c0_i32 = arith.constant 0 : i32
    %c0_i32_0 = arith.constant 0 : i32
    return %c0_i32, %arg0 : i32, i32
  }
}

</mosaic_0001>

<bundles_post_ra>
// kernel: _forward_impl.1
= control target key start
LH: loop header
LB: loop body
LE: loop exit
PB: predicated region body
PF: predicated region fallthrough
CT: control target
= control target key end

     0   :  { %vm176_vm0 = vcmask 64512   ;;  %v12913_v3 = vmov 0.0   ;;  %v8629_v5 = vmov 0   ;;  %s12906_s0 = inlined_call_operand.vmem [shape: f32[1,8,3072], index: 0, kind: input, shape index: {}]   ;;  %s12907_s1 = inlined_call_operand.vmem [shape: f32[128,8], index: 1, kind: input, shape index: {}]   ;;  %s12908_s2 = inlined_call_operand.vmem [shape: f32[128,32], index: 2, kind: input, shape index: {}]   ;;  %s12909_s3 = inlined_call_operand.vmem [shape: f32[128,1], index: 3, kind: input, shape index: {}]   ;;  %s12910_s4 = inlined_call_operand.vmem [shape: f32[8,32], index: 4, kind: input, shape index: {}]   ;;  %s12911_s5 = inlined_call_operand.vmem [shape: f32[8,1], index: 5, kind: input, shape index: {}]   ;;  %s12912_s6 = inlined_call_operand.hbm [shape: f32[8,256], index: 6, kind: output, shape index: {}]  }
   0x1   :  { %v57_v0 = vld [vmem:[%s12906_s0 + $0x8] sm:$0xff]  ;;  %v56_v1 = vld [vmem:[%s12906_s0] sm:$0xff]  ;;  %289 = vmatprep.mubr.f32.mxu0 %v12913_v3  ;;  %468 = vmatprep.mubr.f32.mxu1 %v12913_v3  ;;  %v59_v4 = vld [vmem:[%s12906_s0 + $0x18] sm:$0xff] }
   0x2   :  { %v8675_v2 = vld [vmem:[%s12907_s1] sm:$0xff]  ;;  %255 = vmatprep.subr.mxu0 %v57_v0  ;;  %7548 = vset.pattern.permute.xlu0 %v8629_v5  ;;  %v8688_v6 = vld [vmem:[%s12907_s1 + $0x8] sm:$0xff]  ;;  %v58_v7 = vld [vmem:[%s12906_s0 + $0x10] sm:$0xff] }
   0x3   :  { %256 = vmatpush1.msra.mxu0 %v56_v1  ;;  %7543 = vmatprep.subr.mxu1 %v59_v4  ;;  %v8696_v8 = vld [vmem:[%s12907_s1 + $0x18] sm:$0xff]  ;;  %v8710_v10 = vld [vmem:[%s12907_s1 + $0x10] sm:$0xff]  ;;  %v61_v12 = vld [vmem:[%s12906_s0 + $0x28] sm:$0xff] }
   0x4   :  { %7115 = vmatmul.mubr.msk.f32.vlgmr.msra.gmra.mxu0 %vm176_vm0, %v8675_v2  ;;  %7544 = vmatpush1.msra.mxu1 %v58_v7  ;;  %v83_v9 = vld [vmem:[%s12909_s3 + $0x18] sm:$0xff]  ;;  %v82_v11 = vld [vmem:[%s12909_s3 + $0x10] sm:$0xff]  ;;  %v8721_v13 = vld [vmem:[%s12907_s1 + $0x20] sm:$0xff] }
   0x5   :  { %295 = vmatprep.mubr.f32.mxu0 %v12913_v3  ;;  %416 = vmatprep.subr.mxu0 %v59_v4  ;;  %v87_v14 = vld [vmem:[%s12909_s3 + $0x38] sm:$0xff]  ;;  %v86_v16 = vld [vmem:[%s12909_s3 + $0x30] sm:$0xff]  ;;  %v8741_v17 = vld [vmem:[%s12907_s1 + $0x28] sm:$0xff] }
   0x6   :  { %7134 = vmatmul.mubr.msk.f32.vlgmr.msra.gmra.mxu1 %vm176_vm0, %v8696_v8  ;;  %417 = vmatpush1.msra.mxu0 %v58_v7  ;;  %v63_v15 = vld [vmem:[%s12906_s0 + $0x38] sm:$0xff]  ;;  %v81_v18 = vld [vmem:[%s12909_s3 + $0x8] sm:$0xff]  ;;  %v62_v19 = vld [vmem:[%s12906_s0 + $0x30] sm:$0xff] }
   0x7   :  { %474 = vmatprep.mubr.f32.mxu1 %v12913_v3  ;;  %113 = vperm.xlu0 %7548, %v83_v9  }
   0x8   :  { %7116 = vmatmul.mubr.msk.f32.gmra.mxu0 %vm176_vm0, %v8688_v6  ;;  %7549 = vset.pattern.permute.xlu1 %v8629_v5 }
   0x9   :  { %301 = vmatprep.mubr.f32.mxu0 %v12913_v3  ;;  %577 = vmatprep.subr.mxu0 %v61_v12 }
   0xa   :  { %7135 = vmatmul.mubr.msk.f32.gmra.mxu1 %vm176_vm0, %v8721_v13  ;;  %108 = vperm.xlu1 %7549, %v82_v11  }
   0xb   :  { %480 = vmatprep.mubr.f32.mxu1 %v12913_v3  ;;  %133 = vperm.xlu0 %7548, %v87_v14  }
   0xc   :  { %7117 = vmatmul.mubr.msk.f32.gmra.mxu0 %vm176_vm0, %v8710_v10  ;;  %738 = vmatprep.subr.mxu1 %v63_v15 }
   0xd   :  { %307 = vmatprep.mubr.f32.mxu0 %v12913_v3 }
   0xe   :  { %7136 = vmatmul.mubr.msk.f32.gmra.mxu1 %vm176_vm0, %v8741_v17  ;;  %128 = vperm.xlu1 %7549, %v86_v16  }
   0xf   :  { %11 = vsyncpa [#allocation4], 0  ;;  %486 = vmatprep.mubr.f32.mxu1 %v12913_v3  ;;  %v85_v20 = vld [vmem:[%s12909_s3 + $0x28] sm:$0xff]  ;;  %103 = vperm.xlu0 %7548, %v81_v18   ;;  %v8761_v21 = vld [vmem:[%s12907_s1 + $0x30] sm:$0xff]  ;;  %vm2573_vm1 = vcmask 261120   ;;  %s8630_s15 = smov [#allocation3]  }
  0x10   :  { %7118 = vmatmul.mubr.msk.f32.gmra.mxu0 %vm176_vm0, %v8696_v8  ;;  %v80_v22 = vld [vmem:[%s12909_s3] sm:$0xff]  ;;  %739 = vmatpush1.msra.mxu1 %v62_v19  ;;  %v8778_v24 = vld [vmem:[%s12907_s1 + $0x38] sm:$0xff]  ;;  %v94_v26 = vld [vmem:[%s12909_s3 + $0x70] sm:$0xff] }
  0x11   :  { %313 = vmatprep.mubr.f32.mxu0 %v12913_v3  ;;  %v84_v23 = vld [vmem:[%s12909_s3 + $0x20] sm:$0xff]  ;;  %v95_v25 = vld [vmem:[%s12909_s3 + $0x78] sm:$0xff]  ;;  %v93_v29 = vld [vmem:[%s12909_s3 + $0x68] sm:$0xff] }
  0x12   :  { %7137 = vmatmul.mubr.msk.f32.gmra.mxu1 %vm176_vm0, %v8761_v21  ;;  %123 = vperm.xlu1 %7549, %v85_v20   ;;  %v67_v27 = vld [vmem:[%s12906_s0 + $0x58] sm:$0xff]  ;;  %v8798_v28 = vld [vmem:[%s12907_s1 + $0x40] sm:$0xff]  ;;  %v8815_v31 = vld [vmem:[%s12907_s1 + $0x48] sm:$0xff] }
  0x13   :  { %492 = vmatprep.mubr.f32.mxu1 %v12913_v3  ;;  %98 = vperm.xlu0 %7548, %v80_v22   ;;  %v92_v30 = vld [vmem:[%s12909_s3 + $0x60] sm:$0xff]  ;;  %v91_v32 = vld [vmem:[%s12909_s3 + $0x58] sm:$0xff]  ;;  %v90_v33 = vld [vmem:[%s12909_s3 + $0x50] sm:$0xff] }
  0x14   :  { %7119 = vmatmul.mubr.msk.f32.gmra.mxu0 %vm176_vm0, %v8721_v13  ;;  %1060 = vmatprep.subr.mxu1 %v67_v27  ;;  %v8832_v34 = vld [vmem:[%s12907_s1 + $0x50] sm:$0xff]  ;;  %v89_v35 = vld [vmem:[%s12909_s3 + $0x48] sm:$0xff]  ;;  %v88_v36 = vld [vmem:[%s12909_s3 + $0x40] sm:$0xff] }
  0x15   :  { %319 = vmatprep.mubr.f32.mxu0 %v12913_v3  ;;  %v8849_v37 = vld [vmem:[%s12907_s1 + $0x58] sm:$0xff]  ;;  %v8860_v38 = vld [vmem:[%s12907_s1 + $0x60] sm:$0xff]  ;;  %v8871_v39 = vld [vmem:[%s12907_s1 + $0x68] sm:$0xff] }
  0x16   :  { %7138 = vmatmul.mubr.msk.f32.gmra.mxu1 %vm176_vm0, %v8778_v24  ;;  %118 = vperm.xlu1 %7549, %v84_v23   ;;  %v8882_v40 = vld [vmem:[%s12907_s1 + $0x70] sm:$0xff]  ;;  %v8893_v41 = vld [vmem:[%s12907_s1 + $0x78] sm:$0xff]  ;;  %v60_v43 = vld [vmem:[%s12906_s0 + $0x20] sm:$0xff] }
  0x17   :  { %498 = vmatprep.mubr.f32.mxu1 %v12913_v3  ;;  %173 = vperm.xlu0 %7548, %v95_v25   ;;  %v66_v42 = vld [vmem:[%s12906_s0 + $0x50] sm:$0xff]  ;;  %v65_v44 = vld [vmem:[%s12906_s0 + $0x48] sm:$0xff]  ;;  %v64_v45 = vld [vmem:[%s12906_s0 + $0x40] sm:$0xff] }
  0x18   :  { %7120 = vmatmul.mubr.msk.f32.gmra.mxu0 %vm176_vm0, %v8741_v17  ;;  %v69_v46 = vld [vmem:[%s12906_s0 + $0x68] sm:$0xff]  ;;  %v71_v47 = vld [vmem:[%s12906_s0 + $0x78] sm:$0xff]  ;;  %v70_v48 = vld [vmem:[%s12906_s0 + $0x70] sm:$0xff] }
  0x19   :  { %325 = vmatprep.mubr.f32.mxu0 %v12913_v3  ;;  %v68_v49 = vld [vmem:[%s12906_s0 + $0x60] sm:$0xff]  ;;  %v73_v50 = vld [vmem:[%s12906_s0 + $0x88] sm:$0xff]  ;;  %v75_v51 = vld [vmem:[%s12906_s0 + $0x98] sm:$0xff] }
  0x1a   :  { %7139 = vmatmul.mubr.msk.f32.gmra.mxu1 %vm176_vm0, %v8798_v28  ;;  %168 = vperm.xlu1 %7549, %v94_v26   ;;  %v74_v52 = vld [vmem:[%s12906_s0 + $0x90] sm:$0xff]  ;;  %v79_v53 = vld [vmem:[%s12906_s0 + $0xb8] sm:$0xff]  ;;  %v72_v0 = vld [vmem:[%s12906_s0 + $0x80] sm:$0xff] }
  0x1b   :  { %504 = vmatprep.mubr.f32.mxu1 %v12913_v3  ;;  %163 = vperm.xlu0 %7548, %v93_v29   ;;  %v77_v4 = vld [vmem:[%s12906_s0 + $0xa8] sm:$0xff] }
  0x1c   :  { %7121 = vmatmul.mubr.msk.f32.gmra.mxu0 %vm176_vm0, %v8761_v21 }
  0x1d   :  { %331 = vmatprep.mubr.f32.mxu0 %v12913_v3 }
  0x1e   :  { %7140 = vmatmul.mubr.msk.f32.gmra.mxu1 %vm176_vm0, %v8815_v31  ;;  %158 = vperm.xlu1 %7549, %v92_v30  }
  0x1f   :  { %510 = vmatprep.mubr.f32.mxu1 %v12913_v3  ;;  %153 = vperm.xlu0 %7548, %v91_v32  }
  0x20   :  { %7122 = vmatmul.mubr.msk.f32.gmra.mxu0 %vm176_vm0, %v8778_v24 }
  0x21   :  { %337 = vmatprep.mubr.f32.mxu0 %v12913_v3 }
  0x22   :  { %7141 = vmatmul.mubr.msk.f32.gmra.mxu1 %vm176_vm0, %v8832_v34  ;;  %148 = vperm.xlu1 %7549, %v90_v33  }
  0x23   :  { %516 = vmatprep.mubr.f32.mxu1 %v12913_v3  ;;  %143 = vperm.xlu0 %7548, %v89_v35  }
  0x24   :  { %7123 = vmatmul.mubr.msk.f32.gmra.mxu0 %vm176_vm0, %v8798_v28 }
  0x25   :  { %343 = vmatprep.mubr.f32.mxu0 %v12913_v3 }
  0x26   :  { %7142 = vmatmul.mubr.msk.f32.gmra.mxu1 %vm176_vm0, %v8849_v37  ;;  %138 = vperm.xlu1 %7549, %v88_v36  }
  0x27   :  { %522 = vmatprep.mubr.f32.mxu1 %v12913_v3 }
  0x28   :  { %7124 = vmatmul.mubr.msk.f32.gmra.mxu0 %vm176_vm0, %v8815_v31 }
  0x29   :  { %349 = vmatprep.mubr.f32.mxu0 %v12913_v3 }
  0x2a   :  { %7143 = vmatmul.mubr.msk.f32.gmra.mxu1 %vm176_vm0, %v8860_v38 }
  0x2b   :  { %528 = vmatprep.mubr.f32.mxu1 %v12913_v3 }
  0x2c   :  { %7125 = vmatmul.mubr.msk.f32.gmra.mxu0 %vm176_vm0, %v8832_v34 }
  0x2d   :  { %355 = vmatprep.mubr.f32.mxu0 %v12913_v3 }
  0x2e   :  { %7144 = vmatmul.mubr.msk.f32.gmra.mxu1 %vm176_vm0, %v8871_v39 }
  0x2f   :  { %534 = vmatprep.mubr.f32.mxu1 %v12913_v3 }
  0x30   :  { %7126 = vmatmul.mubr.msk.f32.gmra.mxu0 %vm176_vm0, %v8849_v37 }
  0x31   :  { %361 = vmatprep.mubr.f32.mxu0 %v12913_v3 }
  0x32   :  { %7145 = vmatmul.mubr.msk.f32.gmra.mxu1 %vm176_vm0, %v8882_v40 }
  0x33   :  { %540 = vmatprep.mubr.f32.mxu1 %v12913_v3 }
  0x34   :  { %7127 = vmatmul.mubr.msk.f32.gmra.mxu0 %vm176_vm0, %v8860_v38 }
  0x35   :  { %367 = vmatprep.mubr.f32.mxu0 %v12913_v3 }
  0x36   :  { %7146 = vmatmul.mubr.msk.f32.gmra.mxu1 %vm176_vm0, %v8893_v41 }
  0x37   :  { %772 = vmatprep.mubr.f32.mxu1 %v12913_v3 }
  0x38   :  { %7128 = vmatmul.mubr.msk.f32.gmra.mxu0 %vm176_vm0, %v8871_v39 }
  0x39   :  { %373 = vmatprep.mubr.f32.mxu0 %v12913_v3 }
  0x3a   :  { %7163 = vmatmul.mubr.msk.f32.vlgmr.msra.gmra.mxu1 %vm176_vm0, %v8675_v2 }
  0x3b   :  { %778 = vmatprep.mubr.f32.mxu1 %v12913_v3  ;;  %1061 = vmatpush1.msra.mxu1 %v66_v42 }
  0x3c   :  { %7129 = vmatmul.mubr.msk.f32.gmra.mxu0 %vm176_vm0, %v8882_v40  ;;  %1382 = vmatprep.subr.mxu1 %v71_v47 }
  0x3d   :  { %379 = vmatprep.mubr.f32.mxu0 %v12913_v3 }
  0x3e   :  { %7164 = vmatmul.mubr.msk.f32.gmra.mxu1 %vm176_vm0, %v8688_v6 }
  0x3f   :  { %784 = vmatprep.mubr.f32.mxu1 %v12913_v3 }
  0x40   :  { %7130 = vmatmul.mubr.msk.f32.gmra.mxu0 %vm176_vm0, %v8893_v41 }
  0x41   :  { %450 = vmatprep.mubr.f32.mxu0 %v12913_v3 }
  0x42   :  { %7165 = vmatmul.mubr.msk.f32.gmra.mxu1 %vm176_vm0, %v8710_v10 }
  0x43   :  { %790 = vmatprep.mubr.f32.mxu1 %v12913_v3 }
  0x44   :  { %7131 = vmatmul.mubr.msk.f32.vlgmr.msra.gmra.mxu0 %vm176_vm0, %v8675_v2 }
  0x45   :  { %456 = vmatprep.mubr.f32.mxu0 %v12913_v3  ;;  %578 = vmatpush1.msra.mxu0 %v60_v43 }
  0x46   :  { %899 = vmatprep.subr.mxu0 %v65_v44  ;;  %7166 = vmatmul.mubr.msk.f32.gmra.mxu1 %vm176_vm0, %v8696_v8 }
  0x47   :  { %796 = vmatprep.mubr.f32.mxu1 %v12913_v3 }
  0x48   :  { %7132 = vmatmul.mubr.msk.f32.gmra.mxu0 %vm176_vm0, %v8688_v6 }
  0x49   :  { %462 = vmatprep.mubr.f32.mxu0 %v12913_v3 }
  0x4a   :  { %7167 = vmatmul.mubr.msk.f32.gmra.mxu1 %vm176_vm0, %v8721_v13 }
  0x4b   :  { %802 = vmatprep.mubr.f32.mxu1 %v12913_v3 }
  0x4c   :  { %7133 = vmatmul.mubr.msk.f32.gmra.mxu0 %vm176_vm0, %v8710_v10 }
  0x4d   :  { %611 = vmatprep.mubr.f32.mxu0 %v12913_v3 }
  0x4e   :  { %7168 = vmatmul.mubr.msk.f32.gmra.mxu1 %vm176_vm0, %v8741_v17 }
  0x4f   :  { %808 = vmatprep.mubr.f32.mxu1 %v12913_v3 }
  0x50   :  { %7147 = vmatmul.mubr.msk.f32.vlgmr.msra.gmra.mxu0 %vm176_vm0, %v8675_v2 }
  0x51   :  { %617 = vmatprep.mubr.f32.mxu0 %v12913_v3  ;;  %900 = vmatpush1.msra.mxu0 %v64_v45 }
  0x52   :  { %1221 = vmatprep.subr.mxu0 %v69_v46  ;;  %7169 = vmatmul.mubr.msk.f32.gmra.mxu1 %vm176_vm0, %v8761_v21 }
  0x53   :  { %814 = vmatprep.mubr.f32.mxu1 %v12913_v3 }
  0x54   :  { %7148 = vmatmul.mubr.msk.f32.gmra.mxu0 %vm176_vm0, %v8688_v6 }
  0x55   :  { %623 = vmatprep.mubr.f32.mxu0 %v12913_v3 }
  0x56   :  { %7170 = vmatmul.mubr.msk.f32.gmra.mxu1 %vm176_vm0, %v8778_v24 }
  0x57   :  { %820 = vmatprep.mubr.f32.mxu1 %v12913_v3 }
  0x58   :  { %7149 = vmatmul.mubr.msk.f32.gmra.mxu0 %vm176_vm0, %v8710_v10 }
  0x59   :  { %629 = vmatprep.mubr.f32.mxu0 %v12913_v3 }
  0x5a   :  { %7171 = vmatmul.mubr.msk.f32.gmra.mxu1 %vm176_vm0, %v8798_v28 }
  0x5b   :  { %826 = vmatprep.mubr.f32.mxu1 %v12913_v3 }
  0x5c   :  { %7150 = vmatmul.mubr.msk.f32.gmra.mxu0 %vm176_vm0, %v8696_v8 }
  0x5d   :  { %635 = vmatprep.mubr.f32.mxu0 %v12913_v3 }
  0x5e   :  { %7172 = vmatmul.mubr.msk.f32.gmra.mxu1 %vm176_vm0, %v8815_v31 }
  0x5f   :  { %832 = vmatprep.mubr.f32.mxu1 %v12913_v3 }
  0x60   :  { %7151 = vmatmul.mubr.msk.f32.gmra.mxu0 %vm176_vm0, %v8721_v13 }
  0x61   :  { %641 = vmatprep.mubr.f32.mxu0 %v12913_v3 }
  0x62   :  { %7173 = vmatmul.mubr.msk.f32.gmra.mxu1 %vm176_vm0, %v8832_v34 }
  0x63   :  { %838 = vmatprep.mubr.f32.mxu1 %v12913_v3 }
  0x64   :  { %7152 = vmatmul.mubr.msk.f32.gmra.mxu0 %vm176_vm0, %v8741_v17 }
  0x65   :  { %647 = vmatprep.mubr.f32.mxu0 %v12913_v3 }
  0x66   :  { %7174 = vmatmul.mubr.msk.f32.gmra.mxu1 %vm176_vm0, %v8849_v37 }
  0x67   :  { %844 = vmatprep.mubr.f32.mxu1 %v12913_v3 }
  0x68   :  { %7153 = vmatmul.mubr.msk.f32.gmra.mxu0 %vm176_vm0, %v8761_v21 }
  0x69   :  { %653 = vmatprep.mubr.f32.mxu0 %v12913_v3 }
  0x6a   :  { %7175 = vmatmul.mubr.msk.f32.gmra.mxu1 %vm176_vm0, %v8860_v38 }
  0x6b   :  { %850 = vmatprep.mubr.f32.mxu1 %v12913_v3 }
  0x6c   :  { %7154 = vmatmul.mubr.msk.f32.gmra.mxu0 %vm176_vm0, %v8778_v24 }
  0x6d   :  { %659 = vmatprep.mubr.f32.mxu0 %v12913_v3 }
  0x6e   :  { %7176 = vmatmul.mubr.msk.f32.gmra.mxu1 %vm176_vm0, %v8871_v39 }
  0x6f   :  { %856 = vmatprep.mubr.f32.mxu1 %v12913_v3 }
  0x70   :  { %7155 = vmatmul.mubr.msk.f32.gmra.mxu0 %vm176_vm0, %v8798_v28 }
  0x71   :  { %665 = vmatprep.mubr.f32.mxu0 %v12913_v3 }
  0x72   :  { %7177 = vmatmul.mubr.msk.f32.gmra.mxu1 %vm176_vm0, %v8882_v40 }
  0x73   :  { %862 = vmatprep.mubr.f32.mxu1 %v12913_v3 }
  0x74   :  { %7156 = vmatmul.mubr.msk.f32.gmra.mxu0 %vm176_vm0, %v8815_v31 }
  0x75   :  { %671 = vmatprep.mubr.f32.mxu0 %v12913_v3 }
  0x76   :  { %7178 = vmatmul.mubr.msk.f32.gmra.mxu1 %vm176_vm0, %v8893_v41 }
  0x77   :  { %1094 = vmatprep.mubr.f32.mxu1 %v12913_v3 }
  0x78   :  { %7157 = vmatmul.mubr.msk.f32.gmra.mxu0 %vm176_vm0, %v8832_v34 }
  0x79   :  { %677 = vmatprep.mubr.f32.mxu0 %v12913_v3 }
  0x7a   :  { %7195 = vmatmul.mubr.msk.f32.vlgmr.msra.gmra.mxu1 %vm176_vm0, %v8675_v2 }
  0x7b   :  { %1100 = vmatprep.mubr.f32.mxu1 %v12913_v3  ;;  %1383 = vmatpush1.msra.mxu1 %v70_v48 }
  0x7c   :  { %7158 = vmatmul.mubr.msk.f32.gmra.mxu0 %vm176_vm0, %v8849_v37  ;;  %1704 = vmatprep.subr.mxu1 %v75_v51 }
  0x7d   :  { %683 = vmatprep.mubr.f32.mxu0 %v12913_v3 }
  0x7e   :  { %7196 = vmatmul.mubr.msk.f32.gmra.mxu1 %vm176_vm0, %v8688_v6 }
  0x7f   :  { %1106 = vmatprep.mubr.f32.mxu1 %v12913_v3 }
  0x80   :  { %7159 = vmatmul.mubr.msk.f32.gmra.mxu0 %vm176_vm0, %v8860_v38 }
  0x81   :  { %689 = vmatprep.mubr.f32.mxu0 %v12913_v3 }
  0x82   :  { %7197 = vmatmul.mubr.msk.f32.gmra.mxu1 %vm176_vm0, %v8710_v10  ;;  %v9213_v16 = vpop.permute.xlu0 %113 }
  0x83   :  { %1112 = vmatprep.mubr.f32.mxu1 %v12913_v3  ;;  %13109 = vst [vmem:[#allocation15_spill] sm:$0xff] %v9213_v16 }
  0x84   :  { %7160 = vmatmul.mubr.msk.f32.gmra.mxu0 %vm176_vm0, %v8871_v39 }
  0x85   :  { %695 = vmatprep.mubr.f32.mxu0 %v12913_v3  ;;  %v9203_v12 = vpop.permute.xlu1 %108 }
  0x86   :  { %7198 = vmatmul.mubr.msk.f32.gmra.mxu1 %vm176_vm0, %v8696_v8  ;;  %13107 = vst [vmem:[#allocation13_spill] sm:$0xff] %v9203_v12  ;;  %v9233_v27 = vpop.permute.xlu0 %133 }
  0x87   :  { %1118 = vmatprep.mubr.f32.mxu1 %v12913_v3  ;;  %13114 = vst [vmem:[#allocation20_spill] sm:$0xff] %v9233_v27 }
  0x88   :  { %7161 = vmatmul.mubr.msk.f32.gmra.mxu0 %vm176_vm0, %v8882_v40 }
  0x89   :  { %701 = vmatprep.mubr.f32.mxu0 %v12913_v3  ;;  %v9227_v23 = vpop.permute.xlu1 %128 }
  0x8a   :  { %7199 = vmatmul.mubr.msk.f32.gmra.mxu1 %vm176_vm0, %v8721_v13  ;;  %13112 = vst [vmem:[#allocation18_spill] sm:$0xff] %v9227_v23  ;;  %v9257_v43 = vpop.permute.xlu0 %103 }
  0x8b   :  { %1124 = vmatprep.mubr.f32.mxu1 %v12913_v3  ;;  %13119 = vst [vmem:[#allocation25_spill] sm:$0xff] %v9257_v43 }
  0x8c   :  { %7162 = vmatmul.mubr.msk.f32.gmra.mxu0 %vm176_vm0, %v8893_v41 }
  0x8d   :  { %933 = vmatprep.mubr.f32.mxu0 %v12913_v3  ;;  %v9247_v35 = vpop.permute.xlu1 %123 }
  0x8e   :  { %7200 = vmatmul.mubr.msk.f32.gmra.mxu1 %vm176_vm0, %v8741_v17  ;;  %13117 = vst [vmem:[#allocation23_spill] sm:$0xff] %v9247_v35 }
  0x8f   :  { %1130 = vmatprep.mubr.f32.mxu1 %v12913_v3 }
  0x90   :  { %7179 = vmatmul.mubr.msk.f32.vlgmr.msra.gmra.mxu0 %vm176_vm0, %v8675_v2 }
  0x91   :  { %939 = vmatprep.mubr.f32.mxu0 %v12913_v3  ;;  %1222 = vmatpush1.msra.mxu0 %v68_v49  ;;  %v9271_v48 = vpop.permute.xlu1 %118 }
  0x92   :  { %1543 = vmatprep.subr.mxu0 %v73_v50  ;;  %7201 = vmatmul.mubr.msk.f32.gmra.mxu1 %vm176_vm0, %v8761_v21  ;;  %13123 = vst [vmem:[#allocation29_spill] sm:$0xff] %v9271_v48 }
  0x93   :  { %1136 = vmatprep.mubr.f32.mxu1 %v12913_v3 }
  0x94   :  { %7180 = vmatmul.mubr.msk.f32.gmra.mxu0 %vm176_vm0, %v8688_v6 }
  0x95   :  { %945 = vmatprep.mubr.f32.mxu0 %v12913_v3 }
  0x96   :  { %7202 = vmatmul.mubr.msk.f32.gmra.mxu1 %vm176_vm0, %v8778_v24 }
  0x97   :  { %1142 = vmatprep.mubr.f32.mxu1 %v12913_v3 }
  0x98   :  { %7181 = vmatmul.mubr.msk.f32.gmra.mxu0 %vm176_vm0, %v8710_v10 }
  0x99   :  { %951 = vmatprep.mubr.f32.mxu0 %v12913_v3 }
  0x9a   :  { %7203 = vmatmul.mubr.msk.f32.gmra.mxu1 %vm176_vm0, %v8798_v28 }
  0x9b   :  { %1148 = vmatprep.mubr.f32.mxu1 %v12913_v3 }
  0x9c   :  { %7182 = vmatmul.mubr.msk.f32.gmra.mxu0 %vm176_vm0, %v8696_v8 }
  0x9d   :  { %957 = vmatprep.mubr.f32.mxu0 %v12913_v3 }
  0x9e   :  { %7204 = vmatmul.mubr.msk.f32.gmra.mxu1 %vm176_vm0, %v8815_v31 }
  0x9f   :  { %1154 = vmatprep.mubr.f32.mxu1 %v12913_v3 }
  0xa0   :  { %7183 = vmatmul.mubr.msk.f32.gmra.mxu0 %vm176_vm0, %v8721_v13 }
  0xa1   :  { %963 = vmatprep.mubr.f32.mxu0 %v12913_v3 }
  0xa2   :  { %7205 = vmatmul.mubr.msk.f32.gmra.mxu1 %vm176_vm0, %v8832_v34 }
  0xa3   :  { %1160 = vmatprep.mubr.f32.mxu1 %v12913_v3 }
  0xa4   :  { %7184 = vmatmul.mubr.msk.f32.gmra.mxu0 %vm176_vm0, %v8741_v17 }
  0xa5   :  { %969 = vmatprep.mubr.f32.mxu0 %v12913_v3 }
  0xa6   :  { %7206 = vmatmul.mubr.msk.f32.gmra.mxu1 %vm176_vm0, %v8849_v37 }
  0xa7   :  { %1166 = vmatprep.mubr.f32.mxu1 %v12913_v3 }
  0xa8   :  { %7185 = vmatmul.mubr.msk.f32.gmra.mxu0 %vm176_vm0, %v8761_v21 }
  0xa9   :  { %975 = vmatprep.mubr.f32.mxu0 %v12913_v3 }
  0xaa   :  { %7207 = vmatmul.mubr.msk.f32.gmra.mxu1 %vm176_vm0, %v8860_v38 }
  0xab   :  { %1172 = vmatprep.mubr.f32.mxu1 %v12913_v3 }
  0xac   :  { %7186 = vmatmul.mubr.msk.f32.gmra.mxu0 %vm176_vm0, %v8778_v24 }
  0xad   :  { %981 = vmatprep.mubr.f32.mxu0 %v12913_v3 }
  0xae   :  { %7208 = vmatmul.mubr.msk.f32.gmra.mxu1 %vm176_vm0, %v8871_v39 }
  0xaf   :  { %1178 = vmatprep.mubr.f32.mxu1 %v12913_v3 }
  0xb0   :  { %7187 = vmatmul.mubr.msk.f32.gmra.mxu0 %vm176_vm0, %v8798_v28 }
  0xb1   :  { %987 = vmatprep.mubr.f32.mxu0 %v12913_v3 }
  0xb2   :  { %7209 = vmatmul.mubr.msk.f32.gmra.mxu1 %vm176_vm0, %v8882_v40 }
  0xb3   :  { %1184 = vmatprep.mubr.f32.mxu1 %v12913_v3 }
  0xb4   :  { %7188 = vmatmul.mubr.msk.f32.gmra.mxu0 %vm176_vm0, %v8815_v31 }
  0xb5   :  { %993 = vmatprep.mubr.f32.mxu0 %v12913_v3 }
  0xb6   :  { %7210 = vmatmul.mubr.msk.f32.gmra.mxu1 %vm176_vm0, %v8893_v41 }
  0xb7   :  { %1416 = vmatprep.mubr.f32.mxu1 %v12913_v3 }
  0xb8   :  { %7189 = vmatmul.mubr.msk.f32.gmra.mxu0 %vm176_vm0, %v8832_v34 }
  0xb9   :  { %999 = vmatprep.mubr.f32.mxu0 %v12913_v3 }
  0xba   :  { %7227 = vmatmul.mubr.msk.f32.vlgmr.msra.gmra.mxu1 %vm176_vm0, %v8675_v2 }
  0xbb   :  { %1422 = vmatprep.mubr.f32.mxu1 %v12913_v3  ;;  %1705 = vmatpush1.msra.mxu1 %v74_v52  ;;  %v9280_v52 = vpop.permute.xlu0 %98 }
  0xbc   :  { %7190 = vmatmul.mubr.msk.f32.gmra.mxu0 %vm176_vm0, %v8849_v37  ;;  %2026 = vmatprep.subr.mxu1 %v79_v53  ;;  %13125 = vst [vmem:[#allocation31_spill] sm:$0xff] %v9280_v52 }
  0xbd   :  { %1005 = vmatprep.mubr.f32.mxu0 %v12913_v3 }
  0xbe   :  { %7228 = vmatmul.mubr.msk.f32.gmra.mxu1 %vm176_vm0, %v8688_v6 }
  0xbf   :  { %1428 = vmatprep.mubr.f32.mxu1 %v12913_v3 }
  0xc0   :  { %7191 = vmatmul.mubr.msk.f32.gmra.mxu0 %vm176_vm0, %v8860_v38 }
  0xc1   :  { %1011 = vmatprep.mubr.f32.mxu0 %v12913_v3 }
  0xc2   :  { %7229 = vmatmul.mubr.msk.f32.gmra.mxu1 %vm176_vm0, %v8710_v10 }
  0xc3   :  { %1434 = vmatprep.mubr.f32.mxu1 %v12913_v3 }
  0xc4   :  { %v9143_v54 = vpop.f32.mrf.mxu0  ;;  %7192 = vmatmul.mubr.msk.f32.gmra.mxu0 %vm176_vm0, %v8871_v39 }
  0xc5   :  { %1017 = vmatprep.mubr.f32.mxu0 %v12913_v3 }
  0xc6   :  { %v9149_v55 = vpop.f32.mrf.mxu0  ;;  %v9151_v56 = vpop.f32.mrf.mxu1  ;;  %7230 = vmatmul.mubr.msk.f32.gmra.mxu1 %vm176_vm0, %v8696_v8 }
  0xc7   :  { %13100 = vst [vmem:[#allocation6_spill] sm:$0xff] %v9151_v56  ;;  %1440 = vmatprep.mubr.f32.mxu1 %v12913_v3 }
  0xc8   :  { %v9155_v57 = vpop.f32.mrf.mxu0  ;;  %7193 = vmatmul.mubr.msk.f32.gmra.mxu0 %vm176_vm0, %v8882_v40  ;;  %v9161_v58 = vpop.f32.mrf.mxu1 }
  0xc9   :  { %1023 = vmatprep.mubr.f32.mxu0 %v12913_v3  ;;  %13101 = vst [vmem:[#allocation7_spill] sm:$0xff] %v9161_v58 }
  0xca   :  { %v9163_v59 = vpop.f32.mrf.mxu0  ;;  %v9165_v60 = vpop.f32.mrf.mxu1  ;;  %7231 = vmatmul.mubr.msk.f32.gmra.mxu1 %vm176_vm0, %v8721_v13 }
  0xcb   :  { %13102 = vst [vmem:[#allocation8_spill] sm:$0xff] %v9165_v60  ;;  %1446 = vmatprep.mubr.f32.mxu1 %v12913_v3 }
  0xcc   :  { %v9169_v61 = vpop.f32.mrf.mxu0  ;;  %7194 = vmatmul.mubr.msk.f32.gmra.mxu0 %vm176_vm0, %v8893_v41  ;;  %v9175_v62 = vpop.f32.mrf.mxu1 }
  0xcd   :  { %1255 = vmatprep.mubr.f32.mxu0 %v12913_v3  ;;  %13103 = vst [vmem:[#allocation9_spill] sm:$0xff] %v9175_v62 }
  0xce   :  { %v9177_v63 = vpop.f32.mrf.mxu0  ;;  %v9182_v1 = vpop.f32.mrf.mxu1  ;;  %7232 = vmatmul.mubr.msk.f32.gmra.mxu1 %vm176_vm0, %v8741_v17 }
  0xcf   :  { %13104 = vst [vmem:[#allocation10_spill] sm:$0xff] %v9182_v1  ;;  %1452 = vmatprep.mubr.f32.mxu1 %v12913_v3 }
  0xd0   :  { %v9189_v5 = vpop.f32.mrf.mxu0  ;;  %7211 = vmatmul.mubr.msk.f32.vlgmr.msra.gmra.mxu0 %vm176_vm0, %v8675_v2  ;;  %v9195_v7 = vpop.f32.mrf.mxu1 }
  0xd1   :  { %1261 = vmatprep.mubr.f32.mxu0 %v12913_v3  ;;  %13105 = vst [vmem:[#allocation11_spill] sm:$0xff] %v9195_v7  ;;  %1544 = vmatpush1.msra.mxu0 %v72_v0  ;;  %v294_v0 = vadd.f32 %v9149_v55, %v9280_v52 }
  0xd2   :  { %v9197_v9 = vpop.f32.mrf.mxu0  ;;  %1865 = vmatprep.subr.mxu0 %v77_v4  ;;  %v9199_v11 = vpop.f32.mrf.mxu1  ;;  %7233 = vmatmul.mubr.msk.f32.gmra.mxu1 %vm176_vm0, %v8761_v21 }
  0xd3   :  { %13106 = vst [vmem:[#allocation12_spill] sm:$0xff] %v9199_v11  ;;  %1458 = vmatprep.mubr.f32.mxu1 %v12913_v3  ;;  %v2816_v55 = vmul.f32 0.5, %v294_v0  ;;  %v306_v0 = vadd.f32 %v9177_v63, %v9203_v12 }
  0xd4   :  { %v9205_v14 = vpop.f32.mrf.mxu0  ;;  %7212 = vmatmul.mubr.msk.f32.gmra.mxu0 %vm176_vm0, %v8688_v6  ;;  %v9211_v15 = vpop.f32.mrf.mxu1 }
  0xd5   :  { %1267 = vmatprep.mubr.f32.mxu0 %v12913_v3  ;;  %13108 = vst [vmem:[#allocation14_spill] sm:$0xff] %v9211_v15 }
  0xd6   :  { %v317_v18 = vpop.f32.mrf.mxu0  ;;  %v9215_v19 = vpop.f32.mrf.mxu1  ;;  %7234 = vmatmul.mubr.msk.f32.gmra.mxu1 %vm176_vm0, %v8778_v24 }
  0xd7   :  { %13110 = vst [vmem:[#allocation16_spill] sm:$0xff] %v9215_v19  ;;  %1464 = vmatprep.mubr.f32.mxu1 %v12913_v3  ;;  %v318_v50 = vadd.f32 %v317_v18, %v9271_v48 }
  0xd8   :  { %v9219_v20 = vpop.f32.mrf.mxu0  ;;  %7213 = vmatmul.mubr.msk.f32.gmra.mxu0 %vm176_vm0, %v8710_v10  ;;  %v9225_v22 = vpop.f32.mrf.mxu1 }
  0xd9   :  { %1273 = vmatprep.mubr.f32.mxu0 %v12913_v3  ;;  %13111 = vst [vmem:[#allocation17_spill] sm:$0xff] %v9225_v22  ;;  %v2820_v22 = vmul.f32 0.5, %v306_v0 }
  0xda   :  { %v323_v25 = vpop.f32.mrf.mxu0  ;;  %v9229_v26 = vpop.f32.mrf.mxu1  ;;  %7235 = vmatmul.mubr.msk.f32.gmra.mxu1 %vm176_vm0, %v8798_v28 }
  0xdb   :  { %13113 = vst [vmem:[#allocation19_spill] sm:$0xff] %v9229_v26  ;;  %1470 = vmatprep.mubr.f32.mxu1 %v12913_v3  ;;  %v324_v18 = vadd.f32 %v323_v25, %v9247_v35 }
  0xdc   :  { %v9235_v29 = vpop.f32.mrf.mxu0  ;;  %7214 = vmatmul.mubr.msk.f32.gmra.mxu0 %vm176_vm0, %v8696_v8  ;;  %v9241_v30 = vpop.f32.mrf.mxu1 }
  0xdd   :  { %1279 = vmatprep.mubr.f32.mxu0 %v12913_v3  ;;  %13115 = vst [vmem:[#allocation21_spill] sm:$0xff] %v9241_v30 }
  0xde   :  { %v329_v32 = vpop.f32.mrf.mxu0  ;;  %v9243_v33 = vpop.f32.mrf.mxu1  ;;  %7236 = vmatmul.mubr.msk.f32.gmra.mxu1 %vm176_vm0, %v8815_v31 }
  0xdf   :  { %13116 = vst [vmem:[#allocation22_spill] sm:$0xff] %v9243_v33  ;;  %1476 = vmatprep.mubr.f32.mxu1 %v12913_v3  ;;  %v330_v30 = vadd.f32 %v329_v32, %v9227_v23 }
  0xe0   :  { %v9249_v36 = vpop.f32.mrf.mxu0  ;;  %7215 = vmatmul.mubr.msk.f32.gmra.mxu0 %vm176_vm0, %v8721_v13  ;;  %v9255_v42 = vpop.f32.mrf.mxu1 }
  0xe1   :  { %1285 = vmatprep.mubr.f32.mxu0 %v12913_v3  ;;  %13118 = vst [vmem:[#allocation24_spill] sm:$0xff] %v9255_v42 }
  0xe2   :  { %v335_v44 = vpop.f32.mrf.mxu0  ;;  %v9259_v45 = vpop.f32.mrf.mxu1  ;;  %7237 = vmatmul.mubr.msk.f32.gmra.mxu1 %vm176_vm0, %v8832_v34 }
  0xe3   :  { %13120 = vst [vmem:[#allocation26_spill] sm:$0xff] %v9259_v45  ;;  %1482 = vmatprep.mubr.f32.mxu1 %v12913_v3  ;;  %v336_v63 = vadd.f32 %v335_v44, %v9233_v27 }
  0xe4   :  { %v9263_v46 = vpop.f32.mrf.mxu0  ;;  %7216 = vmatmul.mubr.msk.f32.gmra.mxu0 %vm176_vm0, %v8741_v17  ;;  %v9269_v47 = vpop.f32.mrf.mxu1 }
  0xe5   :  { %13121 = vst [vmem:[#allocation27_spill] sm:$0xff] %v9263_v46  ;;  %1291 = vmatprep.mubr.f32.mxu0 %v12913_v3  ;;  %13122 = vst [vmem:[#allocation28_spill] sm:$0xff] %v9269_v47  ;;  %v2824_v47 = vmul.f32 0.5, %v318_v50  ;;  %v2826_v50 = vmul.f32 0.5, %v324_v18 }
  0xe6   :  { %v9273_v49 = vpop.f32.mrf.mxu0  ;;  %v9276_v51 = vpop.f32.mrf.mxu1  ;;  %7238 = vmatmul.mubr.msk.f32.gmra.mxu1 %vm176_vm0, %v8849_v37 }
  0xe7   :  { %13124 = vst [vmem:[#allocation30_spill] sm:$0xff] %v9276_v51  ;;  %1488 = vmatprep.mubr.f32.mxu1 %v12913_v3  ;;  %7550 = vtanh.f32 %v2824_v47 }
  0xe8   :  { %v9282_v53 = vpop.f32.mrf.mxu0  ;;  %7217 = vmatmul.mubr.msk.f32.gmra.mxu0 %vm176_vm0, %v8761_v21  ;;  %v9290_v4 = vpop.f32.mrf.mxu1  ;;  %7552 = vtanh.f32 %v2816_v55  ;;  %v312_v55 = vadd.f32 %v9197_v9, %v9213_v16 }
  0xe9   :  { %1297 = vmatprep.mubr.f32.mxu0 %v12913_v3  ;;  %13126 = vst [vmem:[#allocation32_spill] sm:$0xff] %v9290_v4  ;;  %v300_v4 = vadd.f32 %v9163_v59, %v9257_v43  ;;  %7554 = vtanh.f32 %v2826_v50  ;;  %v13135_v50 = vmov 0.0  }
  0xea   :  { %v9293_v51 = vpop.f32.mrf.mxu0  ;;  %v9295_v45 = vpop.f32.mrf.mxu1  ;;  %7239 = vmatmul.mubr.msk.f32.gmra.mxu1 %vm176_vm0, %v8860_v38  ;;  %v2822_v19 = vmul.f32 0.5, %v312_v55 }
  0xeb   :  { %13127 = vst [vmem:[#allocation33_spill] sm:$0xff] %v9293_v51  ;;  %13128 = vst [vmem:[#allocation34_spill] sm:$0xff] %v9295_v45  ;;  %1494 = vmatprep.mubr.f32.mxu1 %v12913_v3  ;;  %v9318_v45 = vpop.permute.xlu1 %168  ;;  %v2818_v47 = vmul.f32 0.5, %v300_v4  ;;  %v9337_v4 = vpop.permute.xlu0 %173 }
  0xec   :  { %v9299_v42 = vpop.f32.mrf.mxu0  ;;  %7218 = vmatmul.mubr.msk.f32.gmra.mxu0 %vm176_vm0, %v8778_v24  ;;  %v9307_v25 = vpop.f32.mrf.mxu1  ;;  %13131 = vst [vmem:[#allocation37_spill] sm:$0xff] %v9318_v45  ;;  %13134 = vst [vmem:[#allocation40_spill] sm:$0xff] %v9337_v4 }
  0xed   :  { %1303 = vmatprep.mubr.f32.mxu0 %v12913_v3  ;;  %13129 = vst [vmem:[#allocation35_spill] sm:$0xff] %v9307_v25  ;;  %7556 = vtanh.f32 %v2818_v47 }
  0xee   :  { %v9309_v33 = vpop.f32.mrf.mxu0  ;;  %v9312_v26 = vpop.f32.mrf.mxu1  ;;  %7240 = vmatmul.mubr.msk.f32.gmra.mxu1 %vm176_vm0, %v8871_v39 }
  0xef   :  { %13130 = vst [vmem:[#allocation36_spill] sm:$0xff] %v9312_v26  ;;  %1500 = vmatprep.mubr.f32.mxu1 %v12913_v3  ;;  %v2828_v26 = vmul.f32 0.5, %v330_v30  ;;  %v9347_v44 = vpop.permute.xlu1 %158  ;;  %v9362_v47 = vpop.permute.xlu0 %163 }
  0xf0   :  { %v9320_v59 = vpop.f32.mrf.mxu0  ;;  %7219 = vmatmul.mubr.msk.f32.gmra.mxu0 %vm176_vm0, %v8798_v28  ;;  %v9326_v32 = vpop.f32.mrf.mxu1  ;;  %13137 = vst [vmem:[#allocation42_spill] sm:$0xff] %v9347_v44  ;;  %13140 = vst [vmem:[#allocation45_spill] sm:$0xff] %v9362_v47 }
  0xf1   :  { %1309 = vmatprep.mubr.f32.mxu0 %v12913_v3  ;;  %13132 = vst [vmem:[#allocation38_spill] sm:$0xff] %v9326_v32  ;;  %7558 = vtanh.f32 %v2828_v26 }
  0xf2   :  { %v9328_v18 = vpop.f32.mrf.mxu0  ;;  %v9331_v25 = vpop.f32.mrf.mxu1  ;;  %7241 = vmatmul.mubr.msk.f32.gmra.mxu1 %vm176_vm0, %v8882_v40  ;;  %7560 = vtanh.f32 %v2820_v22  ;;  %v78_v22 = vld [vmem:[%s12906_s0 + $0xb0] sm:$0xff] }
  0xf3   :  { %13133 = vst [vmem:[#allocation39_spill] sm:$0xff] %v9331_v25  ;;  %1506 = vmatprep.mubr.f32.mxu1 %v13135_v50  ;;  %v2830_v25 = vmul.f32 0.5, %v336_v63 }
  0xf4   :  { %v9339_v3 = vpop.f32.mrf.mxu0  ;;  %7220 = vmatmul.mubr.msk.f32.gmra.mxu0 %vm176_vm0, %v8815_v31  ;;  %v9345_v30 = vpop.f32.mrf.mxu1 }
  0xf5   :  { %1315 = vmatprep.mubr.f32.mxu0 %v13135_v50  ;;  %13136 = vst [vmem:[#allocation41_spill] sm:$0xff] %v9345_v30 }
  0xf6   :  { %v365_v0 = vpop.f32.mrf.mxu0  ;;  %v9350_v32 = vpop.f32.mrf.mxu1  ;;  %7242 = vmatmul.mubr.msk.f32.gmra.mxu1 %vm176_vm0, %v8893_v41 }
  0xf7   :  { %v366_v9 = vadd.f32 %v365_v0, %v9347_v44  ;;  %13138 = vst [vmem:[#allocation43_spill] sm:$0xff] %v9350_v32  ;;  %1738 = vmatprep.mubr.f32.mxu1 %v13135_v50 }
  0xf8   :  { %v9354_v15 = vpop.f32.mrf.mxu0  ;;  %7221 = vmatmul.mubr.msk.f32.gmra.mxu0 %vm176_vm0, %v8832_v34  ;;  %v9360_v26 = vpop.f32.mrf.mxu1 }
  0xf9   :  { %7562 = vtanh.f32 %v366_v9  ;;  %1321 = vmatprep.mubr.f32.mxu0 %v13135_v50  ;;  %13139 = vst [vmem:[#allocation44_spill] sm:$0xff] %v9360_v26  ;;  %v7551_v9 = vpop.eup %7550 }
  0xfa   :  { %v371_v63 = vpop.f32.mrf.mxu0  ;;  %7564 = vtanh.f32 %v2830_v25  ;;  %v9368_v0 = vpop.f32.mrf.mxu1  ;;  %7259 = vmatmul.mubr.msk.f32.vlgmr.msra.gmra.mxu1 %vm176_vm0, %v8675_v2  ;;  %v2872_v30 = vadd.f32 1.0, %v7551_v9 }
  0xfb   :  { %v372_v55 = vadd.f32 %v371_v63, %v9362_v47  ;;  %13141 = vst [vmem:[#allocation46_spill] sm:$0xff] %v9368_v0  ;;  %7566 = vtanh.f32 %v2822_v19  ;;  %1744 = vmatprep.mubr.f32.mxu1 %v13135_v50  ;;  %2027 = vmatpush1.msra.mxu1 %v78_v22  ;;  %v7553_v63 = vpop.eup %7552 }
  0xfc   :  { %v9372_v32 = vpop.f32.mrf.mxu0  ;;  %7222 = vmatmul.mubr.msk.f32.gmra.mxu0 %vm176_vm0, %v8849_v37  ;;  %v9378_v25 = vpop.f32.mrf.mxu1 }
  0xfd   :  { %7568 = vtanh.f32 %v372_v55  ;;  %1327 = vmatprep.mubr.f32.mxu0 %v13135_v50  ;;  %13142 = vst [vmem:[#allocation47_spill] sm:$0xff] %v9378_v25  ;;  %v7555_v26 = vpop.eup %7554  ;;  %v2864_v55 = vadd.f32 1.0, %v7553_v63 }
  0xfe   :  { %v377_v0 = vpop.f32.mrf.mxu0  ;;  %v9381_v19 = vpop.f32.mrf.mxu1  ;;  %7260 = vmatmul.mubr.msk.f32.gmra.mxu1 %vm176_vm0, %v8688_v6 }
  0xff   :  { %v378_v2 = vadd.f32 %v377_v0, %v9318_v45  ;;  %13143 = vst [vmem:[#allocation48_spill] sm:$0xff] %v9381_v19  ;;  %1750 = vmatprep.mubr.f32.mxu1 %v13135_v50  ;;  %v7557_v9 = vpop.eup %7556  ;;  %v2874_v0 = vadd.f32 1.0, %v7555_v26  ;;  %v2896_v19 = vmul.f32 0.5, %v2872_v30 }
 0x100   :  { %v9385_v11 = vpop.f32.mrf.mxu0  ;;  %7223 = vmatmul.mubr.msk.f32.gmra.mxu0 %vm176_vm0, %v8860_v38  ;;  %v9391_v22 = vpop.f32.mrf.mxu1  ;;  %v2866_v26 = vadd.f32 1.0, %v7557_v9 }
 0x101   :  { %7570 = vtanh.f32 %v378_v2  ;;  %1333 = vmatprep.mubr.f32.mxu0 %v13135_v50  ;;  %13144 = vst [vmem:[#allocation49_spill] sm:$0xff] %v9391_v22  ;;  %v7559_v7 = vpop.eup %7558  ;;  %v2888_v2 = vmul.f32 0.5, %v2864_v55  ;;  %v9406_v22 = vpop.permute.xlu0 %153  ;;  %v2920_v62 = vmul.f32 0.0, %v2896_v19 }
 0x102   :  { %v383_v25 = vpop.f32.mrf.mxu0  ;;  %v9394_v6 = vpop.f32.mrf.mxu1  ;;  %7261 = vmatmul.mubr.msk.f32.gmra.mxu1 %vm176_vm0, %v8710_v10  ;;  %13148 = vst [vmem:[#allocation53_spill] sm:$0xff] %v9406_v22  ;;  %v2876_v60 = vadd.f32 1.0, %v7559_v7  ;;  %v360_v56 = vadd.f32 %v9328_v18, %v9406_v22  ;;  %v2890_v19 = vmul.f32 0.5, %v2866_v26 }
 0x103   :  { %v384_v58 = vadd.f32 %v383_v25, %v9337_v4  ;;  %13145 = vst [vmem:[#allocation50_spill] sm:$0xff] %v9394_v6  ;;  %1756 = vmatprep.mubr.f32.mxu1 %v13135_v50  ;;  %v7561_v63 = vpop.eup %7560  ;;  %v2898_v6 = vmul.f32 0.5, %v2874_v0 }
 0x104   :  { %v9398_v1 = vpop.f32.mrf.mxu0  ;;  %7224 = vmatmul.mubr.msk.f32.gmra.mxu0 %vm176_vm0, %v8871_v39  ;;  %v9404_v30 = vpop.f32.mrf.mxu1  ;;  %v2868_v7 = vadd.f32 1.0, %v7561_v63 }
 0x105   :  { %13146 = vst [vmem:[#allocation51_spill] sm:$0xff] %v9398_v1  ;;  %7572 = vtanh.f32 %v384_v58  ;;  %1339 = vmatprep.mubr.f32.mxu0 %v13135_v50  ;;  %13147 = vst [vmem:[#allocation52_spill] sm:$0xff] %v9404_v30 }
 0x106   :  { %v7563_v25 = vpop.eup %7562  ;;  %v9408_v10 = vpop.f32.mrf.mxu0  ;;  %7262 = vmatmul.mubr.msk.f32.gmra.mxu1 %vm176_vm0, %v8696_v8 }
 0x107   :  { %13149 = vst [vmem:[#allocation54_spill] sm:$0xff] %v9408_v10  ;;  %v2928_v1 = vmul.f32 %v7563_v25, %v2888_v2  ;;  %v9412_v46 = vpop.f32.mrf.mxu1  ;;  %v7565_v58 = vpop.eup %7564  ;;  %1762 = vmatprep.mubr.f32.mxu1 %v13135_v50  ;;  %v2922_v25 = vmul.f32 0.0, %v2898_v6 }
 0x108   :  { %13150 = vst [vmem:[#allocation55_spill] sm:$0xff] %v9412_v46  ;;  %v9416_v55 = vpop.f32.mrf.mxu0  ;;  %7225 = vmatmul.mubr.msk.f32.gmra.mxu0 %vm176_vm0, %v8882_v40  ;;  %v7567_v9 = vpop.eup %7566  ;;  %v2900_v46 = vmul.f32 0.5, %v2876_v60  ;;  %v2878_v30 = vadd.f32 1.0, %v7565_v58 }
 0x109   :  { %13151 = vst [vmem:[#allocation56_spill] sm:$0xff] %v9416_v55  ;;  %v9421_v0 = vadd.f32 %v2928_v1, %v2920_v62  ;;  %1345 = vmatprep.mubr.f32.mxu0 %v13135_v50  ;;  %v9424_v18 = vpop.f32.mrf.mxu1  ;;  %v2838_v55 = vmul.f32 0.5, %v360_v56  ;;  %v2892_v62 = vmul.f32 0.5, %v2868_v7  ;;  %v2870_v1 = vadd.f32 1.0, %v7567_v9  ;;  %v9456_v9 = vld [vmem:[%s12907_s1] sm:$0xff] }
 0x10a   :  { %13152 = vst [vmem:[#allocation57_spill] sm:$0xff] %v9424_v18  ;;  %v7569_v2 = vpop.eup %7568  ;;  %v9426_v8 = vpop.f32.mrf.mxu0  ;;  %7263 = vmatmul.mubr.msk.f32.gmra.mxu1 %vm176_vm0, %v8721_v13  ;;  %v76_v13 = vld [vmem:[%s12906_s0 + $0xa0] sm:$0xff]  ;;  %v2924_v58 = vmul.f32 0.0, %v2900_v46 }
 0x10b   :  { %13153 = vst [vmem:[#allocation58_spill] sm:$0xff] %v9426_v8  ;;  %v2930_v10 = vmul.f32 %v7569_v2, %v2890_v19  ;;  %v9428_v51 = vpop.f32.mrf.mxu1  ;;  %1768 = vmatprep.mubr.f32.mxu1 %v13135_v50  ;;  %v2902_v19 = vmul.f32 0.5, %v2878_v30  ;;  %7574 = vtanh.f32 %v2838_v55  ;;  %v2894_v46 = vmul.f32 0.5, %v2870_v1 }
 0x10c   :  { %13154 = vst [vmem:[#allocation59_spill] sm:$0xff] %v9428_v51  ;;  %v9432_v63 = vpop.f32.mrf.mxu0  ;;  %7226 = vmatmul.mubr.msk.f32.gmra.mxu0 %vm176_vm0, %v8893_v41  ;;  %v334_v8 = vadd.f32 %v9249_v36, %v9233_v27  ;;  %v304_v36 = vadd.f32 %v9169_v61, %v9203_v12 }
 0x10d   :  { %13155 = vst [vmem:[#allocation60_spill] sm:$0xff] %v9432_v63  ;;  %v9437_v6 = vadd.f32 %v2930_v10, %v2922_v25  ;;  %1577 = vmatprep.mubr.f32.mxu0 %v13135_v50  ;;  %v9440_v56 = vpop.f32.mrf.mxu1  ;;  %v2926_v25 = vmul.f32 0.0, %v2902_v19 }
 0x10e   :  { %13156 = vst [vmem:[#allocation61_spill] sm:$0xff] %v9440_v56  ;;  %v7571_v60 = vpop.eup %7570  ;;  %v9442_v26 = vpop.f32.mrf.mxu0  ;;  %7264 = vmatmul.mubr.msk.f32.gmra.mxu1 %vm176_vm0, %v8741_v17  ;;  %v9538_v56 = vld [vmem:[%s12907_s1 + $0x20] sm:$0xff] }
 0x10f   :  { %13157 = vst [vmem:[#allocation62_spill] sm:$0xff] %v9442_v26  ;;  %v2932_v2 = vmul.f32 %v7571_v60, %v2892_v62  ;;  %v9447_v18 = vpop.f32.mrf.mxu1  ;;  %1774 = vmatprep.mubr.f32.mxu1 %v13135_v50 }
 0x110   :  { %13158 = vst [vmem:[#allocation63_spill] sm:$0xff] %v9447_v18  ;;  %v9451_v10 = vpop.f32.mrf.mxu0  ;;  %7243 = vmatmul.mubr.msk.f32.vlgmr.msra.gmra.mxu0 %vm176_vm0, %v9456_v9 }
 0x111   :  { %13159 = vst [vmem:[#allocation64_spill] sm:$0xff] %v9451_v10  ;;  %v9461_v30 = vadd.f32 %v2932_v2, %v2924_v58  ;;  %1583 = vmatprep.mubr.f32.mxu0 %v13135_v50  ;;  %v9464_v55 = vpop.f32.mrf.mxu1  ;;  %1866 = vmatpush1.msra.mxu0 %v76_v13  ;;  %v9478_v58 = vld [vmem:[%s12907_s1 + $0x8] sm:$0xff] }
 0x112   :  { %13160 = vst [vmem:[#allocation65_spill] sm:$0xff] %v9464_v55  ;;  %v7573_v17 = vpop.eup %7572  ;;  %v9466_v7 = vpop.f32.mrf.mxu0  ;;  %7517 = vmatprep.subr.mxu0 %v13135_v50  ;;  %7265 = vmatmul.mubr.msk.f32.gmra.mxu1 %vm176_vm0, %v8761_v21 }
 0x113   :  { %13161 = vst [vmem:[#allocation66_spill] sm:$0xff] %v9466_v7  ;;  %v2934_v62 = vmul.f32 %v7573_v17, %v2894_v46  ;;  %v9469_v60 = vpop.f32.mrf.mxu1  ;;  %1780 = vmatprep.mubr.f32.mxu1 %v13135_v50  ;;  %v9500_v17 = vld [vmem:[%s12907_s1 + $0x10] sm:$0xff] }
 0x114   :  { %13162 = vst [vmem:[#allocation67_spill] sm:$0xff] %v9469_v60  ;;  %v9473_v1 = vpop.f32.mrf.mxu0  ;;  %7244 = vmatmul.mubr.msk.f32.gmra.mxu0 %vm176_vm0, %v9478_v58  ;;  %v9519_v60 = vld [vmem:[%s12907_s1 + $0x18] sm:$0xff] }
 0x115   :  { %13163 = vst [vmem:[#allocation68_spill] sm:$0xff] %v9473_v1  ;;  %v9483_v13 = vadd.f32 %v2934_v62, %v2926_v25  ;;  %1589 = vmatprep.mubr.f32.mxu0 %v13135_v50  ;;  %v9486_v19 = vpop.f32.mrf.mxu1 }
 0x116   :  { %13165 = vst [vmem:[#allocation70_spill] sm:$0xff] %v9486_v19  ;;  %v9488_v2 = vpop.f32.mrf.mxu0  ;;  %7266 = vmatmul.mubr.msk.f32.gmra.mxu1 %vm176_vm0, %v8778_v24 }
 0x117   :  { %13164 = vst [vmem:[#allocation69_spill] sm:$0xff] %v9483_v13  ;;  %13166 = vst [vmem:[#allocation71_spill] sm:$0xff] %v9488_v2  ;;  %7576 = vtanh.f32 %v9483_v13  ;;  %v9491_v21 = vpop.f32.mrf.mxu1  ;;  %1786 = vmatprep.mubr.f32.mxu1 %v13135_v50 }
 0x118   :  { %13167 = vst [vmem:[#allocation72_spill] sm:$0xff] %v9491_v21  ;;  %v9495_v46 = vpop.f32.mrf.mxu0  ;;  %7245 = vmatmul.mubr.msk.f32.gmra.mxu0 %vm176_vm0, %v9500_v17  ;;  %v7575_v24 = vpop.eup %7574 }
 0x119   :  { %13168 = vst [vmem:[#allocation73_spill] sm:$0xff] %v9495_v46  ;;  %1595 = vmatprep.mubr.f32.mxu0 %v13135_v50  ;;  %v9506_v25 = vpop.f32.mrf.mxu1 }
 0x11a   :  { %13169 = vst [vmem:[#allocation74_spill] sm:$0xff] %v9506_v25  ;;  %v9508_v62 = vpop.f32.mrf.mxu0  ;;  %7267 = vmatmul.mubr.msk.f32.gmra.mxu1 %vm176_vm0, %v8798_v28  ;;  %v2886_v28 = vadd.f32 1.0, %v7575_v24 }
 0x11b   :  { %13170 = vst [vmem:[#allocation75_spill] sm:$0xff] %v9508_v62  ;;  %v9510_v21 = vpop.f32.mrf.mxu1  ;;  %1792 = vmatprep.mubr.f32.mxu1 %v13135_v50 }
 0x11c   :  { %13171 = vst [vmem:[#allocation76_spill] sm:$0xff] %v9510_v21  ;;  %v9514_v19 = vpop.f32.mrf.mxu0  ;;  %7246 = vmatmul.mubr.msk.f32.gmra.mxu0 %vm176_vm0, %v9519_v60 }
 0x11d   :  { %13172 = vst [vmem:[#allocation77_spill] sm:$0xff] %v9514_v19  ;;  %1601 = vmatprep.mubr.f32.mxu0 %v13135_v50  ;;  %v9525_v25 = vpop.f32.mrf.mxu1 }
 0x11e   :  { %13173 = vst [vmem:[#allocation78_spill] sm:$0xff] %v9525_v25  ;;  %v9527_v21 = vpop.f32.mrf.mxu0  ;;  %7268 = vmatmul.mubr.msk.f32.gmra.mxu1 %vm176_vm0, %v8815_v31  ;;  %v2910_v25 = vmul.f32 0.5, %v2886_v28 }
 0x11f   :  { %13174 = vst [vmem:[#allocation79_spill] sm:$0xff] %v9527_v21  ;;  %v9529_v55 = vpop.f32.mrf.mxu1  ;;  %1798 = vmatprep.mubr.f32.mxu1 %v13135_v50 }
 0x120   :  { %13175 = vst [vmem:[#allocation80_spill] sm:$0xff] %v9529_v55  ;;  %v9533_v18 = vpop.f32.mrf.mxu0  ;;  %7247 = vmatmul.mubr.msk.f32.gmra.mxu0 %vm176_vm0, %v9538_v56 }
 0x121   :  { %13176 = vst [vmem:[#allocation81_spill] sm:$0xff] %v9533_v18  ;;  %1607 = vmatprep.mubr.f32.mxu0 %v13135_v50  ;;  %v9544_v24 = vpop.f32.mrf.mxu1  ;;  %v9557_v18 = vld [vmem:[%s12907_s1 + $0x28] sm:$0xff] }
 0x122   :  { %13177 = vst [vmem:[#allocation82_spill] sm:$0xff] %v9544_v24  ;;  %v9546_v55 = vpop.f32.mrf.mxu0  ;;  %7269 = vmatmul.mubr.msk.f32.gmra.mxu1 %vm176_vm0, %v8832_v34 }
 0x123   :  { %13178 = vst [vmem:[#allocation83_spill] sm:$0xff] %v9546_v55  ;;  %v9548_v31 = vpop.f32.mrf.mxu1  ;;  %1804 = vmatprep.mubr.f32.mxu1 %v13135_v50  ;;  %v9576_v55 = vld [vmem:[%s12907_s1 + $0x30] sm:$0xff] }
 0x124   :  { %13179 = vst [vmem:[#allocation84_spill] sm:$0xff] %v9548_v31  ;;  %v7577_v51 = vpop.eup %7576  ;;  %v9552_v21 = vpop.f32.mrf.mxu0  ;;  %7248 = vmatmul.mubr.msk.f32.gmra.mxu0 %vm176_vm0, %v9557_v18 }
 0x125   :  { %13180 = vst [vmem:[#allocation85_spill] sm:$0xff] %v9552_v21  ;;  %1613 = vmatprep.mubr.f32.mxu0 %v13135_v50  ;;  %v2958_v28 = vmul.f32 %v7577_v51, %v2910_v25  ;;  %v9563_v31 = vpop.f32.mrf.mxu1 }
 0x126   :  { %13181 = vst [vmem:[#allocation86_spill] sm:$0xff] %v9563_v31  ;;  %v9565_v24 = vpop.f32.mrf.mxu0  ;;  %7270 = vmatmul.mubr.msk.f32.gmra.mxu1 %vm176_vm0, %v8849_v37 }
 0x127   :  { %13182 = vst [vmem:[#allocation87_spill] sm:$0xff] %v9565_v24  ;;  %3015 = vmatprep.subr.mxu1 %v2958_v28  ;;  %v9567_v34 = vpop.f32.mrf.mxu1  ;;  %1810 = vmatprep.mubr.f32.mxu1 %v13135_v50  ;;  %v9739_v24 = vld [vmem:[%s12907_s1 + $0x78] sm:$0xff] }
 0x128   :  { %13183 = vst [vmem:[#allocation88_spill] sm:$0xff] %v9567_v34  ;;  %v9571_v21 = vpop.f32.mrf.mxu0  ;;  %7249 = vmatmul.mubr.msk.f32.gmra.mxu0 %vm176_vm0, %v9576_v55  ;;  %v9595_v34 = vld [vmem:[%s12907_s1 + $0x38] sm:$0xff] }
 0x129   :  { %13184 = vst [vmem:[#allocation89_spill] sm:$0xff] %v9571_v21  ;;  %1619 = vmatprep.mubr.f32.mxu0 %v13135_v50  ;;  %v9582_v51 = vpop.f32.mrf.mxu1  ;;  %v9722_v21 = vld [vmem:[%s12907_s1 + $0x70] sm:$0xff] }
 0x12a   :  { %13185 = vst [vmem:[#allocation90_spill] sm:$0xff] %v9582_v51  ;;  %v9584_v25 = vpop.f32.mrf.mxu0  ;;  %7271 = vmatmul.mubr.msk.f32.gmra.mxu1 %vm176_vm0, %v8860_v38 }
 0x12b   :  { %13186 = vst [vmem:[#allocation91_spill] sm:$0xff] %v9584_v25  ;;  %v9586_v28 = vpop.f32.mrf.mxu1  ;;  %1816 = vmatprep.mubr.f32.mxu1 %v13135_v50  ;;  %v9705_v25 = vld [vmem:[%s12907_s1 + $0x68] sm:$0xff] }
 0x12c   :  { %13187 = vst [vmem:[#allocation92_spill] sm:$0xff] %v9586_v28  ;;  %v9590_v37 = vpop.f32.mrf.mxu0  ;;  %7250 = vmatmul.mubr.msk.f32.gmra.mxu0 %vm176_vm0, %v9595_v34 }
 0x12d   :  { %13188 = vst [vmem:[#allocation93_spill] sm:$0xff] %v9590_v37  ;;  %1625 = vmatprep.mubr.f32.mxu0 %v13135_v50  ;;  %v9601_v51 = vpop.f32.mrf.mxu1  ;;  %v9614_v37 = vld [vmem:[%s12907_s1 + $0x40] sm:$0xff] }
 0x12e   :  { %13189 = vst [vmem:[#allocation94_spill] sm:$0xff] %v9601_v51  ;;  %v9603_v31 = vpop.f32.mrf.mxu0  ;;  %7272 = vmatmul.mubr.msk.f32.gmra.mxu1 %vm176_vm0, %v8871_v39 }
 0x12f   :  { %13190 = vst [vmem:[#allocation95_spill] sm:$0xff] %v9603_v31  ;;  %v9605_v28 = vpop.f32.mrf.mxu1  ;;  %1822 = vmatprep.mubr.f32.mxu1 %v13135_v50 }
 0x130   :  { %13191 = vst [vmem:[#allocation96_spill] sm:$0xff] %v9605_v28  ;;  %v9609_v38 = vpop.f32.mrf.mxu0  ;;  %7251 = vmatmul.mubr.msk.f32.gmra.mxu0 %vm176_vm0, %v9614_v37 }
 0x131   :  { %13192 = vst [vmem:[#allocation97_spill] sm:$0xff] %v9609_v38  ;;  %1631 = vmatprep.mubr.f32.mxu0 %v13135_v50  ;;  %v9620_v51 = vpop.f32.mrf.mxu1  ;;  %v9633_v38 = vld [vmem:[%s12907_s1 + $0x48] sm:$0xff] }
 0x132   :  { %13193 = vst [vmem:[#allocation98_spill] sm:$0xff] %v9620_v51  ;;  %v9622_v28 = vpop.f32.mrf.mxu0  ;;  %7273 = vmatmul.mubr.msk.f32.gmra.mxu1 %vm176_vm0, %v8882_v40 }
 0x133   :  { %13194 = vst [vmem:[#allocation99_spill] sm:$0xff] %v9622_v28  ;;  %v9624_v31 = vpop.f32.mrf.mxu1  ;;  %1828 = vmatprep.mubr.f32.mxu1 %v13135_v50 }
 0x134   :  { %13195 = vst [vmem:[#allocation100_spill] sm:$0xff] %v9624_v31  ;;  %v9628_v39 = vpop.f32.mrf.mxu0  ;;  %7252 = vmatmul.mubr.msk.f32.gmra.mxu0 %vm176_vm0, %v9633_v38 }
 0x135   :  { %13196 = vst [vmem:[#allocation101_spill] sm:$0xff] %v9628_v39  ;;  %1637 = vmatprep.mubr.f32.mxu0 %v13135_v50  ;;  %v9639_v51 = vpop.f32.mrf.mxu1  ;;  %v9652_v39 = vld [vmem:[%s12907_s1 + $0x50] sm:$0xff] }
 0x136   :  { %13197 = vst [vmem:[#allocation102_spill] sm:$0xff] %v9639_v51  ;;  %v9641_v31 = vpop.f32.mrf.mxu0  ;;  %7274 = vmatmul.mubr.msk.f32.gmra.mxu1 %vm176_vm0, %v8893_v41 }
 0x137   :  { %13198 = vst [vmem:[#allocation103_spill] sm:$0xff] %v9641_v31  ;;  %v9643_v28 = vpop.f32.mrf.mxu1  ;;  %2060 = vmatprep.mubr.f32.mxu1 %v13135_v50 }
 0x138   :  { %13199 = vst [vmem:[#allocation104_spill] sm:$0xff] %v9643_v28  ;;  %v9647_v40 = vpop.f32.mrf.mxu0  ;;  %7253 = vmatmul.mubr.msk.f32.gmra.mxu0 %vm176_vm0, %v9652_v39 }
 0x139   :  { %13200 = vst [vmem:[#allocation105_spill] sm:$0xff] %v9647_v40  ;;  %1643 = vmatprep.mubr.f32.mxu0 %v13135_v50  ;;  %v9658_v51 = vpop.f32.mrf.mxu1  ;;  %v9671_v40 = vld [vmem:[%s12907_s1 + $0x58] sm:$0xff] }
 0x13a   :  { %13201 = vst [vmem:[#allocation106_spill] sm:$0xff] %v9658_v51  ;;  %v9660_v28 = vpop.f32.mrf.mxu0  ;;  %7291 = vmatmul.mubr.msk.f32.vlgmr.msra.gmra.mxu1 %vm176_vm0, %v9456_v9 }
 0x13b   :  { %13202 = vst [vmem:[#allocation107_spill] sm:$0xff] %v9660_v28  ;;  %v9662_v31 = vpop.f32.mrf.mxu1  ;;  %2066 = vmatprep.mubr.f32.mxu1 %v13135_v50  ;;  %v9688_v28 = vld [vmem:[%s12907_s1 + $0x60] sm:$0xff]  ;;  %s7107_s1 = sshll.u32 %s8630_s15, 4  ;;  %s7108_s1 = int_to_ptr.vmem [resolvable:$true] %s7107_s1 }
 0x13c   :  { %13203 = vst [vmem:[#allocation108_spill] sm:$0xff] %v9662_v31  ;;  %v9666_v41 = vpop.f32.mrf.mxu0  ;;  %7254 = vmatmul.mubr.msk.f32.gmra.mxu0 %vm176_vm0, %v9671_v40  ;;  %s8606_s16 = scalar_lea.vmem %s7108_s1, 256  ;;  %p8611_p1 = scmp.lt.s32.totalorder %s7108_s1, %s7108_s1 }
 0x13d   :  { %13204 = vst [vmem:[#allocation109_spill] sm:$0xff] %v9666_v41  ;;  %1649 = vmatprep.mubr.f32.mxu0 %v13135_v50  ;;  %v9679_v31 = vpop.f32.mrf.mxu1  ;;  %p8607_p0 = scmp.ne.s32.totalorder %s7108_s1, %s8606_s16  ;;  %p8612_p2 = scmp.lt.s32.totalorder %s8606_s16, %s8606_s16 }
 0x13e   :  { %v9677_v51 = vpop.f32.mrf.mxu0  ;;  %13206 = vst [vmem:[#allocation111_spill] sm:$0xff] %v9679_v31  ;;  %7292 = vmatmul.mubr.msk.f32.gmra.mxu1 %vm176_vm0, %v9478_v58 }
 0x13f   :  { %13205 = vst [vmem:[#allocation110_spill] sm:$0xff] %v9677_v51  ;;  %2072 = vmatprep.mubr.f32.mxu1 %v13135_v50  ;;  %v9696_v31 = vpop.f32.mrf.mxu1  ;;  %p8613_p3 = por %p8612_p2, %p8611_p1 }
 0x140   :  { %v9683_v41 = vpop.f32.mrf.mxu0  ;;  %7255 = vmatmul.mubr.msk.f32.gmra.mxu0 %vm176_vm0, %v9688_v28  ;;  %13209 = vst [vmem:[#allocation114_spill] sm:$0xff] %v9696_v31 }
 0x141   :  { %13207 = vst [vmem:[#allocation112_spill] sm:$0xff] %v9683_v41  ;;  %1655 = vmatprep.mubr.f32.mxu0 %v13135_v50  ;;  %v9713_v31 = vpop.f32.mrf.mxu1  ;;  %p8614_p4 = pnand %p8613_p3, %p8607_p0 }
 0x142   :  { %v9694_v51 = vpop.f32.mrf.mxu0  ;;  %7293 = vmatmul.mubr.msk.f32.gmra.mxu1 %vm176_vm0, %v9500_v17  ;;  %13212 = vst [vmem:[#allocation117_spill] sm:$0xff] %v9713_v31 }
 0x143   :  { %13208 = vst [vmem:[#allocation113_spill] sm:$0xff] %v9694_v51  ;;  %2078 = vmatprep.mubr.f32.mxu1 %v13135_v50  ;;  %v9730_v31 = vpop.f32.mrf.mxu1 }
 0x144   :  { %v9700_v41 = vpop.f32.mrf.mxu0  ;;  %7256 = vmatmul.mubr.msk.f32.gmra.mxu0 %vm176_vm0, %v9705_v25  ;;  %13215 = vst [vmem:[#allocation120_spill] sm:$0xff] %v9730_v31 }
 0x145   :  { %13210 = vst [vmem:[#allocation115_spill] sm:$0xff] %v9700_v41  ;;  %1661 = vmatprep.mubr.f32.mxu0 %v13135_v50  ;;  %v9747_v31 = vpop.f32.mrf.mxu1 }
 0x146   :  { %v9711_v51 = vpop.f32.mrf.mxu0  ;;  %7294 = vmatmul.mubr.msk.f32.gmra.mxu1 %vm176_vm0, %v9519_v60  ;;  %13218 = vst [vmem:[#allocation123_spill] sm:$0xff] %v9747_v31 }
 0x147   :  { %13211 = vst [vmem:[#allocation116_spill] sm:$0xff] %v9711_v51  ;;  %2084 = vmatprep.mubr.f32.mxu1 %v13135_v50  ;;  %v9760_v62 = vpop.f32.mrf.mxu1 }
 0x148   :  { %v9717_v41 = vpop.f32.mrf.mxu0  ;;  %7257 = vmatmul.mubr.msk.f32.gmra.mxu0 %vm176_vm0, %v9722_v21  ;;  %13221 = vst [vmem:[#allocation126_spill] sm:$0xff] %v9760_v62 }
 0x149   :  { %13213 = vst [vmem:[#allocation118_spill] sm:$0xff] %v9717_v41  ;;  %1667 = vmatprep.mubr.f32.mxu0 %v13135_v50 }
 0x14a   :  { %v9728_v51 = vpop.f32.mrf.mxu0  ;;  %7295 = vmatmul.mubr.msk.f32.gmra.mxu1 %vm176_vm0, %v9538_v56 }
 0x14b   :  { %13214 = vst [vmem:[#allocation119_spill] sm:$0xff] %v9728_v51  ;;  %2090 = vmatprep.mubr.f32.mxu1 %v13135_v50 }
 0x14c   :  { %v9734_v41 = vpop.f32.mrf.mxu0  ;;  %7258 = vmatmul.mubr.msk.f32.gmra.mxu0 %vm176_vm0, %v9739_v24 }
 0x14d   :  { %13216 = vst [vmem:[#allocation121_spill] sm:$0xff] %v9734_v41  ;;  %1899 = vmatprep.mubr.f32.mxu0 %v13135_v50 }
 0x14e   :  { %v9745_v51 = vpop.f32.mrf.mxu0  ;;  %7296 = vmatmul.mubr.msk.f32.gmra.mxu1 %vm176_vm0, %v9557_v18 }
 0x14f   :  { %13217 = vst [vmem:[#allocation122_spill] sm:$0xff] %v9745_v51  ;;  %2096 = vmatprep.mubr.f32.mxu1 %v13135_v50 }
 0x150   :  { %v9751_v41 = vpop.f32.mrf.mxu0  ;;  %7275 = vmatmul.mubr.msk.f32.vlgmr.msra.gmra.mxu0 %vm176_vm0, %v9456_v9 }
 0x151   :  { %13219 = vst [vmem:[#allocation124_spill] sm:$0xff] %v9751_v41  ;;  %1905 = vmatprep.mubr.f32.mxu0 %v13135_v50  ;;  %7518 = vmatpush3.msra.mxu0 %v13135_v50  ;;  %v9772_v41 = vpop.f32.mrf.mxu1 }
 0x152   :  { %v9758_v19 = vpop.f32.mrf.mxu0  ;;  %7297 = vmatmul.mubr.msk.f32.gmra.mxu1 %vm176_vm0, %v9576_v55  ;;  %13224 = vst [vmem:[#allocation129_spill] sm:$0xff] %v9772_v41 }
 0x153   :  { %13220 = vst [vmem:[#allocation125_spill] sm:$0xff] %v9758_v19  ;;  %2102 = vmatprep.mubr.f32.mxu1 %v13135_v50 }
 0x154   :  { %v9764_v31 = vpop.f32.mrf.mxu0  ;;  %7276 = vmatmul.mubr.msk.f32.gmra.mxu0 %vm176_vm0, %v9478_v58 }
 0x155   :  { %13222 = vst [vmem:[#allocation127_spill] sm:$0xff] %v9764_v31  ;;  %1911 = vmatprep.mubr.f32.mxu0 %v13135_v50  ;;  %v9784_v31 = vpop.f32.mrf.mxu1 }
 0x156   :  { %v9770_v9 = vpop.f32.mrf.mxu0  ;;  %7298 = vmatmul.mubr.msk.f32.gmra.mxu1 %vm176_vm0, %v9595_v34  ;;  %13227 = vst [vmem:[#allocation132_spill] sm:$0xff] %v9784_v31 }
 0x157   :  { %13223 = vst [vmem:[#allocation128_spill] sm:$0xff] %v9770_v9  ;;  %2108 = vmatprep.mubr.f32.mxu1 %v13135_v50  ;;  %v10059_v9 = vld [vmem:[%s12908_s2 + $0x78] sm:$0xff] }
 0x158   :  { %v9776_v62 = vpop.f32.mrf.mxu0  ;;  %7277 = vmatmul.mubr.msk.f32.gmra.mxu0 %vm176_vm0, %v9500_v17  ;;  %13279 = vst [vmem:[#allocation184_spill] sm:$0xff] %v10059_v9 }
 0x159   :  { %13225 = vst [vmem:[#allocation130_spill] sm:$0xff] %v9776_v62  ;;  %1917 = vmatprep.mubr.f32.mxu0 %v13135_v50  ;;  %v9799_v62 = vpop.f32.mrf.mxu1 }
 0x15a   :  { %v9782_v58 = vpop.f32.mrf.mxu0  ;;  %7299 = vmatmul.mubr.msk.f32.gmra.mxu1 %vm176_vm0, %v9614_v37  ;;  %13230 = vst [vmem:[#allocation135_spill] sm:$0xff] %v9799_v62 }
 0x15b   :  { %13226 = vst [vmem:[#allocation131_spill] sm:$0xff] %v9782_v58  ;;  %2114 = vmatprep.mubr.f32.mxu1 %v13135_v50  ;;  %v7019_v58 = vld [vmem:[%s12911_s5] sm:$0xff] }
 0x15c   :  { %v9788_v41 = vpop.f32.mrf.mxu0  ;;  %7278 = vmatmul.mubr.msk.f32.gmra.mxu0 %vm176_vm0, %v9519_v60  ;;  %7022 = vperm.xlu0 %7548, %v7019_v58  }
 0x15d   :  { %13228 = vst [vmem:[#allocation133_spill] sm:$0xff] %v9788_v41  ;;  %1923 = vmatprep.mubr.f32.mxu0 %v13135_v50  ;;  %v10046_v41 = vld [vmem:[%s12908_s2 + $0x70] sm:$0xff] }
 0x15e   :  { %v9794_v17 = vpop.f32.mrf.mxu0  ;;  %7300 = vmatmul.mubr.msk.f32.gmra.mxu1 %vm176_vm0, %v9633_v38  ;;  %13276 = vst [vmem:[#allocation181_spill] sm:$0xff] %v10046_v41 }
 0x15f   :  { %13229 = vst [vmem:[#allocation134_spill] sm:$0xff] %v9794_v17  ;;  %2120 = vmatprep.mubr.f32.mxu1 %v13135_v50  ;;  %v9811_v17 = vpop.f32.mrf.mxu1 }
 0x160   :  { %v9803_v31 = vpop.f32.mrf.mxu0  ;;  %7279 = vmatmul.mubr.msk.f32.gmra.mxu0 %vm176_vm0, %v9538_v56  ;;  %13233 = vst [vmem:[#allocation138_spill] sm:$0xff] %v9811_v17 }
 0x161   :  { %13231 = vst [vmem:[#allocation136_spill] sm:$0xff] %v9803_v31  ;;  %1929 = vmatprep.mubr.f32.mxu0 %v13135_v50  ;;  %v9823_v58 = vpop.f32.mrf.mxu1  ;;  %v10039_v31 = vld [vmem:[%s12908_s2 + $0x68] sm:$0xff] }
 0x162   :  { %v9809_v60 = vpop.f32.mrf.mxu0  ;;  %7301 = vmatmul.mubr.msk.f32.gmra.mxu1 %vm176_vm0, %v9652_v39  ;;  %13236 = vst [vmem:[#allocation141_spill] sm:$0xff] %v9823_v58 }
 0x163   :  { %13232 = vst [vmem:[#allocation137_spill] sm:$0xff] %v9809_v60  ;;  %2126 = vmatprep.mubr.f32.mxu1 %v13135_v50  ;;  %v10026_v60 = vld [vmem:[%s12908_s2 + $0x60] sm:$0xff] }
 0x164   :  { %v9815_v62 = vpop.f32.mrf.mxu0  ;;  %7280 = vmatmul.mubr.msk.f32.gmra.mxu0 %vm176_vm0, %v9557_v18 }
 0x165   :  { %13234 = vst [vmem:[#allocation139_spill] sm:$0xff] %v9815_v62  ;;  %1935 = vmatprep.mubr.f32.mxu0 %v13135_v50  ;;  %v9835_v62 = vpop.f32.mrf.mxu1 }
 0x166   :  { %v9821_v56 = vpop.f32.mrf.mxu0  ;;  %7302 = vmatmul.mubr.msk.f32.gmra.mxu1 %vm176_vm0, %v9671_v40  ;;  %13239 = vst [vmem:[#allocation144_spill] sm:$0xff] %v9835_v62 }
 0x167   :  { %13235 = vst [vmem:[#allocation140_spill] sm:$0xff] %v9821_v56  ;;  %2132 = vmatprep.mubr.f32.mxu1 %v13135_v50  ;;  %v10019_v56 = vld [vmem:[%s12908_s2 + $0x58] sm:$0xff] }
 0x168   :  { %v9827_v17 = vpop.f32.mrf.mxu0  ;;  %7281 = vmatmul.mubr.msk.f32.gmra.mxu0 %vm176_vm0, %v9576_v55 }
 0x169   :  { %13237 = vst [vmem:[#allocation142_spill] sm:$0xff] %v9827_v17  ;;  %1941 = vmatprep.mubr.f32.mxu0 %v13135_v50  ;;  %v9847_v17 = vpop.f32.mrf.mxu1 }
 0x16a   :  { %v9833_v18 = vpop.f32.mrf.mxu0  ;;  %7303 = vmatmul.mubr.msk.f32.gmra.mxu1 %vm176_vm0, %v9688_v28  ;;  %13242 = vst [vmem:[#allocation147_spill] sm:$0xff] %v9847_v17 }
 0x16b   :  { %13238 = vst [vmem:[#allocation143_spill] sm:$0xff] %v9833_v18  ;;  %2138 = vmatprep.mubr.f32.mxu1 %v13135_v50  ;;  %v10006_v18 = vld [vmem:[%s12908_s2 + $0x50] sm:$0xff] }
 0x16c   :  { %v9839_v58 = vpop.f32.mrf.mxu0  ;;  %7282 = vmatmul.mubr.msk.f32.gmra.mxu0 %vm176_vm0, %v9595_v34 }
 0x16d   :  { %13240 = vst [vmem:[#allocation145_spill] sm:$0xff] %v9839_v58  ;;  %1947 = vmatprep.mubr.f32.mxu0 %v13135_v50  ;;  %v9859_v58 = vpop.f32.mrf.mxu1 }
 0x16e   :  { %v9845_v55 = vpop.f32.mrf.mxu0  ;;  %7304 = vmatmul.mubr.msk.f32.gmra.mxu1 %vm176_vm0, %v9705_v25  ;;  %13245 = vst [vmem:[#allocation150_spill] sm:$0xff] %v9859_v58 }
 0x16f   :  { %13241 = vst [vmem:[#allocation146_spill] sm:$0xff] %v9845_v55  ;;  %2144 = vmatprep.mubr.f32.mxu1 %v13135_v50  ;;  %v9999_v55 = vld [vmem:[%s12908_s2 + $0x48] sm:$0xff] }
 0x170   :  { %v9851_v62 = vpop.f32.mrf.mxu0  ;;  %7283 = vmatmul.mubr.msk.f32.gmra.mxu0 %vm176_vm0, %v9614_v37 }
 0x171   :  { %13243 = vst [vmem:[#allocation148_spill] sm:$0xff] %v9851_v62  ;;  %1953 = vmatprep.mubr.f32.mxu0 %v13135_v50  ;;  %v9871_v62 = vpop.f32.mrf.mxu1 }
 0x172   :  { %v9857_v34 = vpop.f32.mrf.mxu0  ;;  %7305 = vmatmul.mubr.msk.f32.gmra.mxu1 %vm176_vm0, %v9722_v21  ;;  %13248 = vst [vmem:[#allocation153_spill] sm:$0xff] %v9871_v62 }
 0x173   :  { %13244 = vst [vmem:[#allocation149_spill] sm:$0xff] %v9857_v34  ;;  %2150 = vmatprep.mubr.f32.mxu1 %v13135_v50 }
 0x174   :  { %v9863_v17 = vpop.f32.mrf.mxu0  ;;  %7284 = vmatmul.mubr.msk.f32.gmra.mxu0 %vm176_vm0, %v9633_v38 }
 0x175   :  { %13246 = vst [vmem:[#allocation151_spill] sm:$0xff] %v9863_v17  ;;  %1959 = vmatprep.mubr.f32.mxu0 %v13135_v50 }
 0x176   :  { %v9869_v37 = vpop.f32.mrf.mxu0  ;;  %7306 = vmatmul.mubr.msk.f32.gmra.mxu1 %vm176_vm0, %v9739_v24 }
 0x177   :  { %13247 = vst [vmem:[#allocation152_spill] sm:$0xff] %v9869_v37  ;;  %3055 = vmatprep.mubr.f32.mxu1 %v13135_v50 }
 0x178   :  { %v9875_v58 = vpop.f32.mrf.mxu0  ;;  %7285 = vmatmul.mubr.msk.f32.gmra.mxu0 %vm176_vm0, %v9652_v39 }
 0x179   :  { %13249 = vst [vmem:[#allocation154_spill] sm:$0xff] %v9875_v58  ;;  %1965 = vmatprep.mubr.f32.mxu0 %v13135_v50 }
 0x17a   :  { %v9881_v38 = vpop.f32.mrf.mxu0 }
 0x17b   :  { %13250 = vst [vmem:[#allocation155_spill] sm:$0xff] %v9881_v38  ;;  %v9932_v38 = vld [vmem:[%s12908_s2 + $0x10] sm:$0xff] }
 0x17c   :  { %v9883_v17 = vpop.f32.mrf.mxu0  ;;  %7286 = vmatmul.mubr.msk.f32.gmra.mxu0 %vm176_vm0, %v9671_v40 }
 0x17d   :  { %13251 = vst [vmem:[#allocation156_spill] sm:$0xff] %v9883_v17  ;;  %1971 = vmatprep.mubr.f32.mxu0 %v13135_v50 }
 0x17e   :  { %v9888_v62 = vpop.f32.mrf.mxu0 }
 0x17f   :  { %13252 = vst [vmem:[#allocation157_spill] sm:$0xff] %v9888_v62  ;;  %v9914_v62 = vld [vmem:[%s12908_s2] sm:$0xff] }
 0x180   :  { %v9890_v37 = vpop.f32.mrf.mxu0  ;;  %7287 = vmatmul.mubr.msk.f32.gmra.mxu0 %vm176_vm0, %v9688_v28 }
 0x181   :  { %13253 = vst [vmem:[#allocation158_spill] sm:$0xff] %v9890_v37  ;;  %1977 = vmatprep.mubr.f32.mxu0 %v13135_v50  ;;  %v9988_v37 = vpop.f32.mrf.mxu1 }
 0x182   :  { %v9895_v39 = vpop.f32.mrf.mxu0  ;;  %13267 = vst [vmem:[#allocation172_spill] sm:$0xff] %v9988_v37 }
 0x183   :  { %13254 = vst [vmem:[#allocation159_spill] sm:$0xff] %v9895_v39  ;;  %v10008_v37 = vpop.f32.mrf.mxu1 }
 0x184   :  { %v9897_v58 = vpop.f32.mrf.mxu0  ;;  %7288 = vmatmul.mubr.msk.f32.gmra.mxu0 %vm176_vm0, %v9705_v25  ;;  %13270 = vst [vmem:[#allocation175_spill] sm:$0xff] %v10008_v37 }
 0x185   :  { %13255 = vst [vmem:[#allocation160_spill] sm:$0xff] %v9897_v58  ;;  %1983 = vmatprep.mubr.f32.mxu0 %v13135_v50  ;;  %v10028_v37 = vpop.f32.mrf.mxu1 }
 0x186   :  { %v9902_v40 = vpop.f32.mrf.mxu0  ;;  %13273 = vst [vmem:[#allocation178_spill] sm:$0xff] %v10028_v37 }
 0x187   :  { %13256 = vst [vmem:[#allocation161_spill] sm:$0xff] %v9902_v40  ;;  %v10048_v37 = vpop.f32.mrf.mxu1 }
 0x188   :  { %v9904_v17 = vpop.f32.mrf.mxu0  ;;  %7289 = vmatmul.mubr.msk.f32.gmra.mxu0 %vm176_vm0, %v9722_v21  ;;  %v9925_v21 = vld [vmem:[%s12908_s2 + $0x8] sm:$0xff]  ;;  %13277 = vst [vmem:[#allocation182_spill] sm:$0xff] %v10048_v37 }
 0x189   :  { %13257 = vst [vmem:[#allocation162_spill] sm:$0xff] %v9904_v17  ;;  %1989 = vmatprep.mubr.f32.mxu0 %v13135_v50  ;;  %v10063_v19 = vpop.f32.mrf.mxu1 }
 0x18a   :  { %v9909_v28 = vpop.f32.mrf.mxu0  ;;  %13281 = vst [vmem:[#allocation186_spill] sm:$0xff] %v10063_v19 }
 0x18b   :  { %13258 = vst [vmem:[#allocation163_spill] sm:$0xff] %v9909_v28  ;;  %v10072_v37 = vpop.f32.mrf.mxu1 }
 0x18c   :  { %v9916_v25 = vpop.f32.mrf.mxu0  ;;  %7290 = vmatmul.mubr.msk.f32.gmra.mxu0 %vm176_vm0, %v9739_v24  ;;  %v9943_v24 = vld [vmem:[%s12908_s2 + $0x18] sm:$0xff]  ;;  %13284 = vst [vmem:[#allocation189_spill] sm:$0xff] %v10072_v37 }
 0x18d   :  { %13259 = vst [vmem:[#allocation164_spill] sm:$0xff] %v9916_v25  ;;  %7519 = vmatprep.mubr.msk.f32.mxu0 %vm2573_vm1, %v9914_v62  ;;  %v10078_v1 = vpop.f32.mrf.mxu1 }
 0x18e   :  { %v9927_v28 = vpop.f32.mrf.mxu0  ;;  %13287 = vst [vmem:[#allocation192_spill] sm:$0xff] %v10078_v1 }
 0x18f   :  { %13260 = vst [vmem:[#allocation165_spill] sm:$0xff] %v9927_v28  ;;  %v9950_v28 = vld [vmem:[%s12908_s2 + $0x20] sm:$0xff] }
 0x190   :  { %v9934_v17 = vpop.f32.mrf.mxu0  ;;  %7520 = vmatmul.mubr.msk.f32.vlgmr.msra.gmra.mxu0 %vm2573_vm1, %v9925_v21 }
 0x191   :  { %13261 = vst [vmem:[#allocation166_spill] sm:$0xff] %v9934_v17  ;;  %7522 = vmatprep.mubr.msk.f32.mxu0 %vm2573_vm1, %v9932_v38  ;;  %v9961_v17 = vld [vmem:[%s12908_s2 + $0x28] sm:$0xff] }
 0x192   :  { %v9945_v25 = vpop.f32.mrf.mxu0 }
 0x193   :  { %13262 = vst [vmem:[#allocation167_spill] sm:$0xff] %v9945_v25  ;;  %v9968_v25 = vld [vmem:[%s12908_s2 + $0x30] sm:$0xff] }
 0x194   :  { %v9952_v40 = vpop.f32.mrf.mxu0  ;;  %7523 = vmatmul.mubr.msk.f32.gmra.mxu0 %vm2573_vm1, %v9943_v24 }
 0x195   :  { %13263 = vst [vmem:[#allocation168_spill] sm:$0xff] %v9952_v40  ;;  %7525 = vmatprep.mubr.msk.f32.mxu0 %vm2573_vm1, %v9950_v28  ;;  %v9979_v40 = vld [vmem:[%s12908_s2 + $0x38] sm:$0xff] }
 0x196   :  { %v9963_v34 = vpop.f32.mrf.mxu0 }
 0x197   :  { %13264 = vst [vmem:[#allocation169_spill] sm:$0xff] %v9963_v34  ;;  %v9986_v34 = vld [vmem:[%s12908_s2 + $0x40] sm:$0xff] }
 0x198   :  { %v9970_v58 = vpop.f32.mrf.mxu0  ;;  %7526 = vmatmul.mubr.msk.f32.gmra.mxu0 %vm2573_vm1, %v9961_v17 }
 0x199   :  { %13265 = vst [vmem:[#allocation170_spill] sm:$0xff] %v9970_v58  ;;  %7528 = vmatprep.mubr.msk.f32.mxu0 %vm2573_vm1, %v9968_v25 }
 0x19a   :  { %v9981_v39 = vpop.f32.mrf.mxu0 }
 0x19b   :  { %13266 = vst [vmem:[#allocation171_spill] sm:$0xff] %v9981_v39 }
 0x19c   :  { %v9990_v58 = vpop.f32.mrf.mxu0  ;;  %7529 = vmatmul.mubr.msk.f32.gmra.mxu0 %vm2573_vm1, %v9979_v40 }
 0x19d   :  { %13268 = vst [vmem:[#allocation173_spill] sm:$0xff] %v9990_v58  ;;  %7531 = vmatprep.mubr.msk.f32.mxu0 %vm2573_vm1, %v9986_v34 }
 0x19e   :  { %v10001_v39 = vpop.f32.mrf.mxu0 }
 0x19f   :  { %13269 = vst [vmem:[#allocation174_spill] sm:$0xff] %v10001_v39 }
 0x1a0   :  { %v10010_v58 = vpop.f32.mrf.mxu0  ;;  %7532 = vmatmul.mubr.msk.f32.gmra.mxu0 %vm2573_vm1, %v9999_v55 }
 0x1a1   :  { %13271 = vst [vmem:[#allocation176_spill] sm:$0xff] %v10010_v58  ;;  %7534 = vmatprep.mubr.msk.f32.mxu0 %vm2573_vm1, %v10006_v18 }
 0x1a2   :  { %v10021_v39 = vpop.f32.mrf.mxu0 }
 0x1a3   :  { %13272 = vst [vmem:[#allocation177_spill] sm:$0xff] %v10021_v39 }
 0x1a4   :  { %v10030_v58 = vpop.f32.mrf.mxu0  ;;  %7535 = vmatmul.mubr.msk.f32.gmra.mxu0 %vm2573_vm1, %v10019_v56 }
 0x1a5   :  { %13274 = vst [vmem:[#allocation179_spill] sm:$0xff] %v10030_v58  ;;  %7537 = vmatprep.mubr.msk.f32.mxu0 %vm2573_vm1, %v10026_v60 }
 0x1a6   :  { %v10041_v39 = vpop.f32.mrf.mxu0 }
 0x1a7   :  { %13275 = vst [vmem:[#allocation180_spill] sm:$0xff] %v10041_v39 }
 0x1a8   :  { %v10050_v58 = vpop.f32.mrf.mxu0  ;;  %7538 = vmatmul.mubr.msk.f32.gmra.mxu0 %vm2573_vm1, %v10039_v31 }
 0x1a9   :  { %13278 = vst [vmem:[#allocation183_spill] sm:$0xff] %v10050_v58  ;;  %7540 = vmatprep.mubr.msk.f32.mxu0 %vm2573_vm1, %v10046_v41 }
 0x1aa   :  { %v10061_v39 = vpop.f32.mrf.mxu0 }
 0x1ab   :  { %13280 = vst [vmem:[#allocation185_spill] sm:$0xff] %v10061_v39 }
 0x1ac   :  { %v10065_v51 = vpop.f32.mrf.mxu0  ;;  %7541 = vmatmul.mubr.msk.f32.gmra.mxu0 %vm2573_vm1, %v10059_v9 }
 0x1ad   :  { %13282 = vst [vmem:[#allocation187_spill] sm:$0xff] %v10065_v51  ;;  %3424 = vmatprep.mubr.f32.mxu0 %v13135_v50  ;;  %v10084_v51 = vpop.f32.mrf.mxu1 }
 0x1ae   :  { %v10070_v58 = vpop.f32.mrf.mxu0  ;;  %13290 = vst [vmem:[#allocation195_spill] sm:$0xff] %v10084_v51 }
 0x1af   :  { %13283 = vst [vmem:[#allocation188_spill] sm:$0xff] %v10070_v58  ;;  %v10090_v13 = vpop.f32.mrf.mxu1 }
 0x1b0   :  { %v10074_v46 = vpop.f32.mrf.mxu0  ;;  %13293 = vst [vmem:[#allocation198_spill] sm:$0xff] %v10090_v13 }
 0x1b1   :  { %13285 = vst [vmem:[#allocation190_spill] sm:$0xff] %v10074_v46  ;;  %v10096_v46 = vpop.f32.mrf.mxu1 }
 0x1b2   :  { %v10076_v2 = vpop.f32.mrf.mxu0  ;;  %13296 = vst [vmem:[#allocation201_spill] sm:$0xff] %v10096_v46 }
 0x1b3   :  { %13286 = vst [vmem:[#allocation191_spill] sm:$0xff] %v10076_v2 }
 0x1b4   :  { %v10080_v39 = vpop.f32.mrf.mxu0 }
 0x1b5   :  { %13288 = vst [vmem:[#allocation193_spill] sm:$0xff] %v10080_v39  ;;  %v10102_v39 = vpop.f32.mrf.mxu1 }
 0x1b6   :  { %v10082_v19 = vpop.f32.mrf.mxu0  ;;  %13299 = vst [vmem:[#allocation204_spill] sm:$0xff] %v10102_v39 }
 0x1b7   :  { %13289 = vst [vmem:[#allocation194_spill] sm:$0xff] %v10082_v19 }
 0x1b8   :  { %v10086_v7 = vpop.f32.mrf.mxu0 }
 0x1b9   :  { %13291 = vst [vmem:[#allocation196_spill] sm:$0xff] %v10086_v7  ;;  %v10108_v7 = vpop.f32.mrf.mxu1 }
 0x1ba   :  { %v10088_v10 = vpop.f32.mrf.mxu0  ;;  %13302 = vst [vmem:[#allocation207_spill] sm:$0xff] %v10108_v7 }
 0x1bb   :  { %13292 = vst [vmem:[#allocation197_spill] sm:$0xff] %v10088_v10 }
 0x1bc   :  { %v10092_v58 = vpop.f32.mrf.mxu0 }
 0x1bd   :  { %13294 = vst [vmem:[#allocation199_spill] sm:$0xff] %v10092_v58  ;;  %v10114_v58 = vpop.f32.mrf.mxu1 }
 0x1be   :  { %v10094_v37 = vpop.f32.mrf.mxu0  ;;  %13305 = vst [vmem:[#allocation210_spill] sm:$0xff] %v10114_v58 }
 0x1bf   :  { %13295 = vst [vmem:[#allocation200_spill] sm:$0xff] %v10094_v37 }
 0x1c0   :  { %v10098_v2 = vpop.f32.mrf.mxu0 }
 0x1c1   :  { %13297 = vst [vmem:[#allocation202_spill] sm:$0xff] %v10098_v2  ;;  %v10120_v2 = vpop.f32.mrf.mxu1 }
 0x1c2   :  { %v10100_v1 = vpop.f32.mrf.mxu0  ;;  %13308 = vst [vmem:[#allocation213_spill] sm:$0xff] %v10120_v2 }
 0x1c3   :  { %13298 = vst [vmem:[#allocation203_spill] sm:$0xff] %v10100_v1 }
 0x1c4   :  { %v10104_v19 = vpop.f32.mrf.mxu0 }
 0x1c5   :  { %13300 = vst [vmem:[#allocation205_spill] sm:$0xff] %v10104_v19  ;;  %v10126_v19 = vpop.f32.mrf.mxu1 }
 0x1c6   :  { %v10106_v51 = vpop.f32.mrf.mxu0  ;;  %13311 = vst [vmem:[#allocation216_spill] sm:$0xff] %v10126_v19 }
 0x1c7   :  { %13301 = vst [vmem:[#allocation206_spill] sm:$0xff] %v10106_v51 }
 0x1c8   :  { %v10110_v10 = vpop.f32.mrf.mxu0 }
 0x1c9   :  { %13303 = vst [vmem:[#allocation208_spill] sm:$0xff] %v10110_v10  ;;  %v10132_v10 = vpop.f32.mrf.mxu1 }
 0x1ca   :  { %v10112_v13 = vpop.f32.mrf.mxu0  ;;  %13314 = vst [vmem:[#allocation219_spill] sm:$0xff] %v10132_v10 }
 0x1cb   :  { %13304 = vst [vmem:[#allocation209_spill] sm:$0xff] %v10112_v13 }
 0x1cc   :  { %v10116_v37 = vpop.f32.mrf.mxu0 }
 0x1cd   :  { %13306 = vst [vmem:[#allocation211_spill] sm:$0xff] %v10116_v37  ;;  %v10138_v37 = vpop.f32.mrf.mxu1 }
 0x1ce   :  { %v10118_v46 = vpop.f32.mrf.mxu0  ;;  %13317 = vst [vmem:[#allocation222_spill] sm:$0xff] %v10138_v37 }
 0x1cf   :  { %13307 = vst [vmem:[#allocation212_spill] sm:$0xff] %v10118_v46 }
 0x1d0   :  { %v10122_v1 = vpop.f32.mrf.mxu0 }
 0x1d1   :  { %13309 = vst [vmem:[#allocation214_spill] sm:$0xff] %v10122_v1  ;;  %v10144_v1 = vpop.f32.mrf.mxu1 }
 0x1d2   :  { %v10124_v39 = vpop.f32.mrf.mxu0  ;;  %13320 = vst [vmem:[#allocation225_spill] sm:$0xff] %v10144_v1 }
 0x1d3   :  { %13310 = vst [vmem:[#allocation215_spill] sm:$0xff] %v10124_v39 }
 0x1d4   :  { %v10128_v51 = vpop.f32.mrf.mxu0 }
 0x1d5   :  { %13312 = vst [vmem:[#allocation217_spill] sm:$0xff] %v10128_v51  ;;  %v10150_v51 = vpop.f32.mrf.mxu1 }
 0x1d6   :  { %v10130_v7 = vpop.f32.mrf.mxu0  ;;  %13323 = vst [vmem:[#allocation228_spill] sm:$0xff] %v10150_v51 }
 0x1d7   :  { %13313 = vst [vmem:[#allocation218_spill] sm:$0xff] %v10130_v7 }
 0x1d8   :  { %v10134_v13 = vpop.f32.mrf.mxu0 }
 0x1d9   :  { %13315 = vst [vmem:[#allocation220_spill] sm:$0xff] %v10134_v13  ;;  %v10156_v13 = vpop.f32.mrf.mxu1 }
 0x1da   :  { %v10136_v58 = vpop.f32.mrf.mxu0  ;;  %13326 = vst [vmem:[#allocation231_spill] sm:$0xff] %v10156_v13 }
 0x1db   :  { %13316 = vst [vmem:[#allocation221_spill] sm:$0xff] %v10136_v58 }
 0x1dc   :  { %v10140_v46 = vpop.f32.mrf.mxu0 }
 0x1dd   :  { %13318 = vst [vmem:[#allocation223_spill] sm:$0xff] %v10140_v46  ;;  %v10162_v46 = vpop.f32.mrf.mxu1 }
 0x1de   :  { %v10142_v2 = vpop.f32.mrf.mxu0  ;;  %13329 = vst [vmem:[#allocation234_spill] sm:$0xff] %v10162_v46 }
 0x1df   :  { %13319 = vst [vmem:[#allocation224_spill] sm:$0xff] %v10142_v2 }
 0x1e0   :  { %v10146_v39 = vpop.f32.mrf.mxu0 }
 0x1e1   :  { %13321 = vst [vmem:[#allocation226_spill] sm:$0xff] %v10146_v39  ;;  %v10168_v39 = vpop.f32.mrf.mxu1 }
 0x1e2   :  { %v10148_v19 = vpop.f32.mrf.mxu0  ;;  %13332 = vst [vmem:[#allocation237_spill] sm:$0xff] %v10168_v39 }
 0x1e3   :  { %13322 = vst [vmem:[#allocation227_spill] sm:$0xff] %v10148_v19 }
 0x1e4   :  { %v10152_v7 = vpop.f32.mrf.mxu0 }
 0x1e5   :  { %13324 = vst [vmem:[#allocation229_spill] sm:$0xff] %v10152_v7  ;;  %v10174_v7 = vpop.f32.mrf.mxu1 }
 0x1e6   :  { %v10154_v10 = vpop.f32.mrf.mxu0  ;;  %13335 = vst [vmem:[#allocation240_spill] sm:$0xff] %v10174_v7 }
 0x1e7   :  { %13325 = vst [vmem:[#allocation230_spill] sm:$0xff] %v10154_v10 }
 0x1e8   :  { %v10158_v58 = vpop.f32.mrf.mxu0 }
 0x1e9   :  { %13327 = vst [vmem:[#allocation232_spill] sm:$0xff] %v10158_v58  ;;  %v10180_v58 = vpop.f32.mrf.mxu1 }
 0x1ea   :  { %v10160_v37 = vpop.f32.mrf.mxu0  ;;  %13338 = vst [vmem:[#allocation243_spill] sm:$0xff] %v10180_v58 }
 0x1eb   :  { %13328 = vst [vmem:[#allocation233_spill] sm:$0xff] %v10160_v37 }
 0x1ec   :  { %v10164_v2 = vpop.f32.mrf.mxu0 }
 0x1ed   :  { %13330 = vst [vmem:[#allocation235_spill] sm:$0xff] %v10164_v2  ;;  %v10186_v2 = vpop.f32.mrf.mxu1 }
 0x1ee   :  { %v10166_v1 = vpop.f32.mrf.mxu0  ;;  %13341 = vst [vmem:[#allocation246_spill] sm:$0xff] %v10186_v2 }
 0x1ef   :  { %13331 = vst [vmem:[#allocation236_spill] sm:$0xff] %v10166_v1 }
 0x1f0   :  { %v10170_v19 = vpop.f32.mrf.mxu0 }
 0x1f1   :  { %13333 = vst [vmem:[#allocation238_spill] sm:$0xff] %v10170_v19  ;;  %v10192_v19 = vpop.f32.mrf.mxu1 }
 0x1f2   :  { %v10172_v51 = vpop.f32.mrf.mxu0  ;;  %13344 = vst [vmem:[#allocation249_spill] sm:$0xff] %v10192_v19 }
 0x1f3   :  { %13334 = vst [vmem:[#allocation239_spill] sm:$0xff] %v10172_v51 }
 0x1f4   :  { %v10176_v10 = vpop.f32.mrf.mxu0 }
 0x1f5   :  { %13336 = vst [vmem:[#allocation241_spill] sm:$0xff] %v10176_v10  ;;  %v10198_v10 = vpop.f32.mrf.mxu1 }
 0x1f6   :  { %v10178_v13 = vpop.f32.mrf.mxu0  ;;  %13347 = vst [vmem:[#allocation252_spill] sm:$0xff] %v10198_v10 }
 0x1f7   :  { %13337 = vst [vmem:[#allocation242_spill] sm:$0xff] %v10178_v13 }
 0x1f8   :  { %v10182_v37 = vpop.f32.mrf.mxu0 }
 0x1f9   :  { %13339 = vst [vmem:[#allocation244_spill] sm:$0xff] %v10182_v37  ;;  %v10204_v37 = vpop.f32.mrf.mxu1 }
 0x1fa   :  { %v10184_v46 = vpop.f32.mrf.mxu0  ;;  %13350 = vst [vmem:[#allocation255_spill] sm:$0xff] %v10204_v37 }
 0x1fb   :  { %13340 = vst [vmem:[#allocation245_spill] sm:$0xff] %v10184_v46 }
 0x1fc   :  { %v10188_v1 = vpop.f32.mrf.mxu0 }
 0x1fd   :  { %13342 = vst [vmem:[#allocation247_spill] sm:$0xff] %v10188_v1  ;;  %v10210_v1 = vpop.f32.mrf.mxu1 }
 0x1fe   :  { %v10190_v39 = vpop.f32.mrf.mxu0  ;;  %13353 = vst [vmem:[#allocation258_spill] sm:$0xff] %v10210_v1 }
 0x1ff   :  { %13343 = vst [vmem:[#allocation248_spill] sm:$0xff] %v10190_v39 }
 0x200   :  { %v10194_v51 = vpop.f32.mrf.mxu0 }
 0x201   :  { %13345 = vst [vmem:[#allocation250_spill] sm:$0xff] %v10194_v51  ;;  %v10216_v51 = vpop.f32.mrf.mxu1 }
 0x202   :  { %v10196_v7 = vpop.f32.mrf.mxu0  ;;  %13356 = vst [vmem:[#allocation261_spill] sm:$0xff] %v10216_v51 }
 0x203   :  { %13346 = vst [vmem:[#allocation251_spill] sm:$0xff] %v10196_v7 }
 0x204   :  { %v10200_v13 = vpop.f32.mrf.mxu0 }
 0x205   :  { %13348 = vst [vmem:[#allocation253_spill] sm:$0xff] %v10200_v13  ;;  %v10222_v13 = vpop.f32.mrf.mxu1 }
 0x206   :  { %v10202_v58 = vpop.f32.mrf.mxu0  ;;  %13359 = vst [vmem:[#allocation264_spill] sm:$0xff] %v10222_v13 }
 0x207   :  { %13349 = vst [vmem:[#allocation254_spill] sm:$0xff] %v10202_v58 }
 0x208   :  { %v10206_v46 = vpop.f32.mrf.mxu0 }
 0x209   :  { %13351 = vst [vmem:[#allocation256_spill] sm:$0xff] %v10206_v46  ;;  %v10228_v46 = vpop.f32.mrf.mxu1 }
 0x20a   :  { %v10208_v2 = vpop.f32.mrf.mxu0  ;;  %13362 = vst [vmem:[#allocation267_spill] sm:$0xff] %v10228_v46 }
 0x20b   :  { %13352 = vst [vmem:[#allocation257_spill] sm:$0xff] %v10208_v2 }
 0x20c   :  { %v10212_v39 = vpop.f32.mrf.mxu0 }
 0x20d   :  { %13354 = vst [vmem:[#allocation259_spill] sm:$0xff] %v10212_v39  ;;  %v10234_v39 = vpop.f32.mrf.mxu1 }
 0x20e   :  { %v10214_v19 = vpop.f32.mrf.mxu0  ;;  %13365 = vst [vmem:[#allocation270_spill] sm:$0xff] %v10234_v39 }
 0x20f   :  { %13355 = vst [vmem:[#allocation260_spill] sm:$0xff] %v10214_v19 }
 0x210   :  { %v10218_v7 = vpop.f32.mrf.mxu0 }
 0x211   :  { %13357 = vst [vmem:[#allocation262_spill] sm:$0xff] %v10218_v7  ;;  %v10240_v7 = vpop.f32.mrf.mxu1 }
 0x212   :  { %v10220_v10 = vpop.f32.mrf.mxu0  ;;  %13368 = vst [vmem:[#allocation273_spill] sm:$0xff] %v10240_v7 }
 0x213   :  { %13358 = vst [vmem:[#allocation263_spill] sm:$0xff] %v10220_v10 }
 0x214   :  { %v10224_v58 = vpop.f32.mrf.mxu0 }
 0x215   :  { %13360 = vst [vmem:[#allocation265_spill] sm:$0xff] %v10224_v58  ;;  %v10246_v58 = vpop.f32.mrf.mxu1 }
 0x216   :  { %v10226_v37 = vpop.f32.mrf.mxu0  ;;  %13371 = vst [vmem:[#allocation276_spill] sm:$0xff] %v10246_v58 }
 0x217   :  { %13361 = vst [vmem:[#allocation266_spill] sm:$0xff] %v10226_v37 }
 0x218   :  { %v10230_v2 = vpop.f32.mrf.mxu0 }
 0x219   :  { %13363 = vst [vmem:[#allocation268_spill] sm:$0xff] %v10230_v2  ;;  %v10252_v2 = vpop.f32.mrf.mxu1 }
 0x21a   :  { %v10232_v1 = vpop.f32.mrf.mxu0  ;;  %13374 = vst [vmem:[#allocation279_spill] sm:$0xff] %v10252_v2 }
 0x21b   :  { %13364 = vst [vmem:[#allocation269_spill] sm:$0xff] %v10232_v1 }
 0x21c   :  { %v10236_v19 = vpop.f32.mrf.mxu0 }
 0x21d   :  { %13366 = vst [vmem:[#allocation271_spill] sm:$0xff] %v10236_v19  ;;  %v10258_v19 = vpop.f32.mrf.mxu1 }
 0x21e   :  { %v10238_v51 = vpop.f32.mrf.mxu0  ;;  %13377 = vst [vmem:[#allocation282_spill] sm:$0xff] %v10258_v19 }
 0x21f   :  { %13367 = vst [vmem:[#allocation272_spill] sm:$0xff] %v10238_v51 }
 0x220   :  { %v10242_v10 = vpop.f32.mrf.mxu0 }
 0x221   :  { %13369 = vst [vmem:[#allocation274_spill] sm:$0xff] %v10242_v10  ;;  %v10264_v10 = vpop.f32.mrf.mxu1 }
 0x222   :  { %v10244_v13 = vpop.f32.mrf.mxu0  ;;  %13380 = vst [vmem:[#allocation285_spill] sm:$0xff] %v10264_v10 }
 0x223   :  { %13370 = vst [vmem:[#allocation275_spill] sm:$0xff] %v10244_v13 }
 0x224   :  { %v10248_v37 = vpop.f32.mrf.mxu0 }
 0x225   :  { %13372 = vst [vmem:[#allocation277_spill] sm:$0xff] %v10248_v37  ;;  %v10270_v37 = vpop.f32.mrf.mxu1 }
 0x226   :  { %v10250_v46 = vpop.f32.mrf.mxu0  ;;  %13383 = vst [vmem:[#allocation288_spill] sm:$0xff] %v10270_v37 }
 0x227   :  { %13373 = vst [vmem:[#allocation278_spill] sm:$0xff] %v10250_v46 }
 0x228   :  { %v10254_v1 = vpop.f32.mrf.mxu0 }
 0x229   :  { %13375 = vst [vmem:[#allocation280_spill] sm:$0xff] %v10254_v1  ;;  %v10276_v1 = vpop.f32.mrf.mxu1 }
 0x22a   :  { %v10256_v39 = vpop.f32.mrf.mxu0  ;;  %13386 = vst [vmem:[#allocation291_spill] sm:$0xff] %v10276_v1 }
 0x22b   :  { %13376 = vst [vmem:[#allocation281_spill] sm:$0xff] %v10256_v39 }
 0x22c   :  { %v10260_v51 = vpop.f32.mrf.mxu0 }
 0x22d   :  { %13378 = vst [vmem:[#allocation283_spill] sm:$0xff] %v10260_v51  ;;  %v10282_v51 = vpop.f32.mrf.mxu1 }
 0x22e   :  { %v10262_v7 = vpop.f32.mrf.mxu0  ;;  %13389 = vst [vmem:[#allocation294_spill] sm:$0xff] %v10282_v51 }
 0x22f   :  { %13379 = vst [vmem:[#allocation284_spill] sm:$0xff] %v10262_v7 }
 0x230   :  { %v10266_v13 = vpop.f32.mrf.mxu0 }
 0x231   :  { %13381 = vst [vmem:[#allocation286_spill] sm:$0xff] %v10266_v13  ;;  %v10288_v13 = vpop.f32.mrf.mxu1 }
 0x232   :  { %v10268_v58 = vpop.f32.mrf.mxu0  ;;  %13392 = vst [vmem:[#allocation297_spill] sm:$0xff] %v10288_v13 }
 0x233   :  { %13382 = vst [vmem:[#allocation287_spill] sm:$0xff] %v10268_v58 }
 0x234   :  { %v10272_v46 = vpop.f32.mrf.mxu0 }
 0x235   :  { %13384 = vst [vmem:[#allocation289_spill] sm:$0xff] %v10272_v46  ;;  %v10294_v46 = vpop.f32.mrf.mxu1 }
 0x236   :  { %v10274_v2 = vpop.f32.mrf.mxu0  ;;  %13395 = vst [vmem:[#allocation300_spill] sm:$0xff] %v10294_v46 }
 0x237   :  { %13385 = vst [vmem:[#allocation290_spill] sm:$0xff] %v10274_v2 }
 0x238   :  { %v10278_v39 = vpop.f32.mrf.mxu0 }
 0x239   :  { %13387 = vst [vmem:[#allocation292_spill] sm:$0xff] %v10278_v39  ;;  %v10300_v39 = vpop.f32.mrf.mxu1 }
 0x23a   :  { %v10280_v19 = vpop.f32.mrf.mxu0  ;;  %13398 = vst [vmem:[#allocation303_spill] sm:$0xff] %v10300_v39  ;;  %v298_v39 = vadd.f32 %v9155_v57, %v9257_v43 }
 0x23b   :  { %13388 = vst [vmem:[#allocation293_spill] sm:$0xff] %v10280_v19 }
 0x23c   :  { %v10284_v7 = vpop.f32.mrf.mxu0 }
 0x23d   :  { %13390 = vst [vmem:[#allocation295_spill] sm:$0xff] %v10284_v7  ;;  %v10306_v7 = vpop.f32.mrf.mxu1 }
 0x23e   :  { %v10286_v10 = vpop.f32.mrf.mxu0  ;;  %13401 = vst [vmem:[#allocation306_spill] sm:$0xff] %v10306_v7 }
 0x23f   :  { %13391 = vst [vmem:[#allocation296_spill] sm:$0xff] %v10286_v10 }
 0x240   :  { %v10290_v58 = vpop.f32.mrf.mxu0 }
 0x241   :  { %13393 = vst [vmem:[#allocation298_spill] sm:$0xff] %v10290_v58  ;;  %v10312_v58 = vpop.f32.mrf.mxu1 }
 0x242   :  { %v10292_v37 = vpop.f32.mrf.mxu0  ;;  %13404 = vst [vmem:[#allocation309_spill] sm:$0xff] %v10312_v58  ;;  %v292_v58 = vadd.f32 %v9143_v54, %v9280_v52 }
 0x243   :  { %13394 = vst [vmem:[#allocation299_spill] sm:$0xff] %v10292_v37  ;;  %v10314_v26 = vpop.f32.mrf.mxu1 }
 0x244   :  { %v10296_v2 = vpop.f32.mrf.mxu0  ;;  %13405 = vst [vmem:[#allocation310_spill] sm:$0xff] %v10314_v26 }
 0x245   :  { %13396 = vst [vmem:[#allocation301_spill] sm:$0xff] %v10296_v2 }
 0x246   :  { %v10298_v1 = vpop.f32.mrf.mxu0 }
 0x247   :  { %13397 = vst [vmem:[#allocation302_spill] sm:$0xff] %v10298_v1 }
 0x248   :  { %v10302_v19 = vpop.f32.mrf.mxu0 }
 0x249   :  { %13399 = vst [vmem:[#allocation304_spill] sm:$0xff] %v10302_v19  ;;  %v10318_v19 = vpop.f32.mrf.mxu1 }
 0x24a   :  { %v10304_v51 = vpop.f32.mrf.mxu0  ;;  %13406 = vst [vmem:[#allocation311_spill] sm:$0xff] %v10318_v19 }
 0x24b   :  { %13400 = vst [vmem:[#allocation305_spill] sm:$0xff] %v10304_v51  ;;  %v322_v51 = vadd.f32 %v9219_v20, %v9247_v35  ;;  %v10328_v9 = vpop.f32.mrf.mxu1  ;;  %v310_v20 = vadd.f32 %v9189_v5, %v9213_v16 }
 0x24c   :  { %v10308_v10 = vpop.f32.mrf.mxu0  ;;  %13407 = vst [vmem:[#allocation312_spill] sm:$0xff] %v10328_v9 }
 0x24d   :  { %13402 = vst [vmem:[#allocation307_spill] sm:$0xff] %v10308_v10 }
 0x24e   :  { %v10310_v13 = vpop.f32.mrf.mxu0 }
 0x24f   :  { %13403 = vst [vmem:[#allocation308_spill] sm:$0xff] %v10310_v13  ;;  %v316_v13 = vadd.f32 %v9205_v14, %v9271_v48  ;;  %v328_v14 = vadd.f32 %v9235_v29, %v9227_v23 }
 0x250   :  { %v7521_v37 = vpop.f32.mrf.mxu0 }
 0x251   :  { %v2785_v10 = vadd.f32 %v7521_v37, %v298_v39 }
 0x252   :  { %v2688_v46 = vpop.f32.mrf.mxu0 }
 0x253   :  { %v2783_v19 = vadd.f32 %v2688_v46, %v292_v58  ;;  %v2817_v35 = vmul.f32 0.5, %v2785_v10 }
 0x254   :  { %v7524_v2 = vpop.f32.mrf.mxu0 }
 0x255   :  { %7578 = vtanh.f32 %v2817_v35 }
 0x256   :  { %v2700_v1 = vpop.f32.mrf.mxu0 }
 0x257   :  { %v2787_v10 = vadd.f32 %v2700_v1, %v304_v36  ;;  %v364_v1 = vadd.f32 %v9339_v3, %v9347_v44 }
 0x258   :  { %v7527_v7 = vpop.f32.mrf.mxu0 }
 0x259   :  { %v2793_v63 = vadd.f32 %v7527_v7, %v322_v51  ;;  %v10334_v7 = vpop.f32.mrf.mxu1  ;;  %v2789_v51 = vadd.f32 %v7524_v2, %v310_v20  ;;  %v2819_v58 = vmul.f32 0.5, %v2787_v10 }
 0x25a   :  { %v2712_v26 = vpop.f32.mrf.mxu0  ;;  %13408 = vst [vmem:[#allocation313_spill] sm:$0xff] %v10334_v7 }
 0x25b   :  { %v2791_v57 = vadd.f32 %v2712_v26, %v316_v13  ;;  %v2825_v37 = vmul.f32 0.5, %v2793_v63  ;;  %v2815_v26 = vmul.f32 0.5, %v2783_v19  ;;  %v10342_v29 = vpop.f32.mrf.mxu1  ;;  %v370_v19 = vadd.f32 %v9354_v15, %v9362_v47 }
 0x25c   :  { %v7530_v43 = vpop.f32.mrf.mxu0  ;;  %13409 = vst [vmem:[#allocation314_spill] sm:$0xff] %v10342_v29 }
 0x25d   :  { %v2797_v41 = vadd.f32 %v7530_v43, %v334_v8  ;;  %v2823_v39 = vmul.f32 0.5, %v2791_v57  ;;  %7580 = vtanh.f32 %v2825_v37  ;;  %v2821_v8 = vmul.f32 0.5, %v2789_v51  ;;  %v10346_v57 = vpop.f32.mrf.mxu1  ;;  %v10354_v51 = vpop.permute.xlu1 %148 }
 0x25e   :  { %v2724_v54 = vpop.f32.mrf.mxu0  ;;  %13410 = vst [vmem:[#allocation315_spill] sm:$0xff] %v10346_v57  ;;  %13412 = vst [vmem:[#allocation317_spill] sm:$0xff] %v10354_v51 }
 0x25f   :  { %v2795_v13 = vadd.f32 %v2724_v54, %v328_v14  ;;  %v2829_v5 = vmul.f32 0.5, %v2797_v41  ;;  %7582 = vtanh.f32 %v2823_v39  ;;  %v382_v14 = vadd.f32 %v9385_v11, %v9337_v4  ;;  %v10352_v37 = vpop.f32.mrf.mxu1 }
 0x260   :  { %v10338_v46 = vpop.f32.mrf.mxu0  ;;  %7584 = vtanh.f32 %v2815_v26  ;;  %13411 = vst [vmem:[#allocation316_spill] sm:$0xff] %v10352_v37  ;;  %v376_v26 = vadd.f32 %v9372_v32, %v9318_v45  ;;  %v358_v11 = vadd.f32 %v9320_v59, %v9406_v22  ;;  %v352_v32 = vadd.f32 %v9299_v42, %v10354_v51  ;;  %v13418_v37 = vld [vmem:[#allocation27_spill] sm:$0xff] }
 0x261   :  { %v2827_v63 = vmul.f32 0.5, %v2795_v13  ;;  %7586 = vtanh.f32 %v2829_v5  ;;  %v354_v5 = vadd.f32 %v9309_v33, %v10354_v51  ;;  %v10362_v10 = vpop.f32.mrf.mxu1 }
 0x262   :  { %v10340_v43 = vpop.f32.mrf.mxu0  ;;  %7588 = vtanh.f32 %v2821_v8  ;;  %v7579_v36 = vpop.eup %7578  ;;  %13413 = vst [vmem:[#allocation318_spill] sm:$0xff] %v10362_v10 }
 0x263   :  { %7590 = vtanh.f32 %v2827_v63  ;;  %v2836_v59 = vmul.f32 0.5, %v354_v5 }
 0x264   :  { %v7536_v2 = vpop.f32.mrf.mxu0  ;;  %7592 = vtanh.f32 %v2819_v58 }
 0x266   :  { %v2748_v61 = vpop.f32.mrf.mxu0 }
 0x268   :  { %v7539_v35 = vpop.f32.mrf.mxu0 }
 0x269   :  { %v2809_v41 = vadd.f32 %v7539_v35, %v370_v19  ;;  %v10364_v19 = vpop.permute.xlu0 %143  ;;  %v2805_v35 = vadd.f32 %v7536_v2, %v358_v11  ;;  %v2865_v2 = vadd.f32 1.0, %v7579_v36  ;;  %v13417_v11 = vld [vmem:[#allocation33_spill] sm:$0xff] }
 0x26a   :  { %v2760_v20 = vpop.f32.mrf.mxu0  ;;  %v7581_v13 = vpop.eup %7580  ;;  %13414 = vst [vmem:[#allocation319_spill] sm:$0xff] %v10364_v19  ;;  %v348_v10 = vadd.f32 %v13417_v11, %v10364_v19 }
 0x26b   :  { %v2807_v54 = vadd.f32 %v2760_v20, %v364_v1  ;;  %7594 = vtanh.f32 %v2809_v41  ;;  %v10366_v41 = vpop.permute.xlu1 %138  ;;  %v2873_v20 = vadd.f32 1.0, %v7581_v13  ;;  %v2889_v36 = vmul.f32 0.5, %v2865_v2 }
 0x26c   :  { %v7542_v15 = vpop.f32.mrf.mxu0  ;;  %v7583_v8 = vpop.eup %7582  ;;  %13415 = vst [vmem:[#allocation320_spill] sm:$0xff] %v10366_v41  ;;  %v342_v33 = vadd.f32 %v9273_v49, %v10366_v41  ;;  %v340_v49 = vadd.f32 %v13418_v37, %v10366_v41 }
 0x26d   :  { %7596 = vtanh.f32 %v2807_v54  ;;  %v2813_v39 = vadd.f32 %v7542_v15, %v382_v14  ;;  %v7585_v58 = vpop.eup %7584  ;;  %v10372_v14 = vpop.f32.mrf.mxu1  ;;  %v2871_v54 = vadd.f32 1.0, %v7583_v8  ;;  %v2897_v5 = vmul.f32 0.5, %v2873_v20 }
 0x26e   :  { %v2772_v3 = vpop.f32.mrf.mxu0  ;;  %v7587_v1 = vpop.eup %7586  ;;  %13416 = vst [vmem:[#allocation321_spill] sm:$0xff] %v10372_v14  ;;  %v2863_v42 = vadd.f32 1.0, %v7585_v58  ;;  %v2832_v57 = vmul.f32 0.5, %v342_v33  ;;  %v2799_v11 = vadd.f32 %v10340_v43, %v340_v49 }
 0x26f   :  { %7598 = vtanh.f32 %v2813_v39  ;;  %v2811_v63 = vadd.f32 %v2772_v3, %v376_v26  ;;  %v7589_v15 = vpop.eup %7588  ;;  %v346_v39 = vadd.f32 %v9282_v53, %v10364_v19  ;;  %v2803_v26 = vadd.f32 %v2748_v61, %v352_v32  ;;  %v10381_v29 = vpop.f32.mrf.mxu1 }
 0x270   :  { %v7591_v3 = vpop.eup %7590  ;;  %v2877_v13 = vadd.f32 1.0, %v7587_v1  ;;  %13419 = vst [vmem:[#allocation33_spill] sm:$0xff] %v10381_v29  ;;  %v2869_v53 = vadd.f32 1.0, %v7589_v15  ;;  %v2895_v61 = vmul.f32 0.5, %v2871_v54  ;;  %v2887_v7 = vmul.f32 0.5, %v2863_v42 }
 0x271   :  { %7600 = vtanh.f32 %v2811_v63  ;;  %v2837_v63 = vmul.f32 0.5, %v2805_v35  ;;  %v2801_v14 = vadd.f32 %v10338_v46, %v346_v39  ;;  %v7593_v8 = vpop.eup %7592  ;;  %v2875_v32 = vadd.f32 1.0, %v7591_v3 }
 0x272   :  { %7602 = vtanh.f32 %v2836_v59  ;;  %v2835_v58 = vmul.f32 0.5, %v2803_v26  ;;  %v2834_v35 = vmul.f32 0.5, %v348_v10  ;;  %v2901_v9 = vmul.f32 0.5, %v2877_v13  ;;  %v10384_v59 = vpop.f32.mrf.mxu1 }
 0x273   :  { %7604 = vtanh.f32 %v2837_v63  ;;  %v2867_v20 = vadd.f32 1.0, %v7593_v8  ;;  %v2921_v46 = vmul.f32 0.0, %v2897_v5  ;;  %v2833_v39 = vmul.f32 0.5, %v2801_v14  ;;  %13420 = vst [vmem:[#allocation27_spill] sm:$0xff] %v10384_v59 }
 0x274   :  { %7606 = vtanh.f32 %v2832_v57  ;;  %v2893_v15 = vmul.f32 0.5, %v2869_v53  ;;  %v2919_v54 = vmul.f32 0.0, %v2895_v61  ;;  %v2899_v29 = vmul.f32 0.5, %v2875_v32  ;;  %v10390_v57 = vpop.f32.mrf.mxu1 }
 0x275   :  { %v2831_v43 = vmul.f32 0.5, %v2799_v11  ;;  %7608 = vtanh.f32 %v2835_v58  ;;  %v2925_v10 = vmul.f32 0.0, %v2901_v9  ;;  %v2891_v63 = vmul.f32 0.5, %v2867_v20  ;;  %13421 = vst [vmem:[#allocation322_spill] sm:$0xff] %v10390_v57 }
 0x276   :  { %7610 = vtanh.f32 %v2834_v35  ;;  %v10399_v9 = vpop.f32.mrf.mxu1 }
 0x277   :  { %7612 = vtanh.f32 %v2833_v39  ;;  %13422 = vst [vmem:[#allocation323_spill] sm:$0xff] %v10399_v9 }
 0x278   :  { %v7595_v1 = vpop.eup %7594  ;;  %7614 = vtanh.f32 %v9461_v30 }
 0x279   :  { %v2929_v33 = vmul.f32 %v7595_v1, %v2889_v36  ;;  %7616 = vtanh.f32 %v2831_v43 }
 0x27a   :  { %v7597_v37 = vpop.eup %7596 }
 0x27b   :  { %v2927_v2 = vmul.f32 %v7597_v37, %v2887_v7  ;;  %v10386_v26 = vadd.f32 %v2929_v33, %v2921_v46  ;;  %v2923_v7 = vmul.f32 0.0, %v2899_v29  ;;  %v10405_v29 = vpop.f32.mrf.mxu1 }
 0x27c   :  { %v7599_v3 = vpop.eup %7598  ;;  %13423 = vst [vmem:[#allocation324_spill] sm:$0xff] %v10405_v29 }
 0x27d   :  { %v10388_v42 = vadd.f32 %v2927_v2, %v2919_v54  ;;  %v2933_v13 = vmul.f32 %v7599_v3, %v2893_v15  ;;  %v10407_v37 = vpop.f32.mrf.mxu1 }
 0x27e   :  { %v7601_v14 = vpop.eup %7600  ;;  %13424 = vst [vmem:[#allocation325_spill] sm:$0xff] %v10407_v37 }
 0x27f   :  { %v10392_v49 = vadd.f32 %v2933_v13, %v2925_v10  ;;  %v2931_v5 = vmul.f32 %v7601_v14, %v2891_v63  ;;  %v7603_v53 = vpop.eup %7602  ;;  %v10409_v13 = vpop.f32.mrf.mxu1 }
 0x280   :  { %v7605_v61 = vpop.eup %7604  ;;  %v2884_v1 = vadd.f32 1.0, %v7603_v53  ;;  %13425 = vst [vmem:[#allocation326_spill] sm:$0xff] %v10409_v13 }
 0x281   :  { %7618 = vtanh.f32 %v10392_v49  ;;  %v10396_v8 = vadd.f32 %v2931_v5, %v2923_v7  ;;  %v7607_v36 = vpop.eup %7606  ;;  %v2885_v11 = vadd.f32 1.0, %v7605_v61  ;;  %v10411_v37 = vpop.f32.mrf.mxu1 }
 0x282   :  { %7620 = vtanh.f32 %v9437_v6  ;;  %v7609_v32 = vpop.eup %7608  ;;  %v2908_v3 = vmul.f32 0.5, %v2884_v1  ;;  %v2880_v10 = vadd.f32 1.0, %v7607_v36  ;;  %13426 = vst [vmem:[#allocation327_spill] sm:$0xff] %v10411_v37 }
 0x283   :  { %7622 = vtanh.f32 %v10386_v26  ;;  %v7611_v58 = vpop.eup %7610  ;;  %v2883_v46 = vadd.f32 1.0, %v7609_v32  ;;  %v2909_v15 = vmul.f32 0.5, %v2885_v11 }
 0x284   :  { %7624 = vtanh.f32 %v10396_v8  ;;  %v7613_v35 = vpop.eup %7612  ;;  %v2882_v33 = vadd.f32 1.0, %v7611_v58 }
 0x285   :  { %7626 = vtanh.f32 %v9421_v0  ;;  %v7615_v20 = vpop.eup %7614  ;;  %v2881_v2 = vadd.f32 1.0, %v7613_v35  ;;  %v2907_v5 = vmul.f32 0.5, %v2883_v46  ;;  %v2904_v35 = vmul.f32 0.5, %v2880_v10 }
 0x286   :  { %7628 = vtanh.f32 %v10388_v42  ;;  %v7617_v39 = vpop.eup %7616  ;;  %v2956_v53 = vmul.f32 %v7615_v20, %v2908_v3  ;;  %v2906_v57 = vmul.f32 0.5, %v2882_v33  ;;  %v10413_v20 = vpop.f32.mrf.mxu1  ;;  %v13442_v33 = vld [vmem:[#allocation181_spill] sm:$0xff] }
 0x287   :  { %v2879_v7 = vadd.f32 1.0, %v7617_v39  ;;  %v2905_v32 = vmul.f32 0.5, %v2881_v2  ;;  %13427 = vst [vmem:[#allocation328_spill] sm:$0xff] %v10413_v20 }
 0x288   :  { %v10418_v39 = vpop.f32.mrf.mxu1 }
 0x289   :  { %v2903_v36 = vmul.f32 0.5, %v2879_v7  ;;  %13428 = vst [vmem:[#allocation329_spill] sm:$0xff] %v10418_v39 }
 0x28e   :  { %v7619_v54 = vpop.eup %7618 }
 0x28f   :  { %v7621_v43 = vpop.eup %7620  ;;  %v2957_v63 = vmul.f32 %v7619_v54, %v2909_v15  ;;  %v13444_v54 = vld [vmem:[#allocation184_spill] sm:$0xff] }
 0x290   :  { %v7623_v14 = vpop.eup %7622  ;;  %v2954_v1 = vmul.f32 %v7621_v43, %v2906_v57  ;;  %v10423_v57 = vpop.f32.mrf.mxu1 }
 0x291   :  { %v7625_v61 = vpop.eup %7624  ;;  %3016 = vmatpush1.msra.mxu1 %v2957_v63  ;;  %v2953_v13 = vmul.f32 %v7623_v14, %v2905_v32  ;;  %13429 = vst [vmem:[#allocation330_spill] sm:$0xff] %v10423_v57 }
 0x292   :  { %v7627_v29 = vpop.eup %7626  ;;  %3017 = vmatprep.subr.mxu1 %v2956_v53  ;;  %v2955_v58 = vmul.f32 %v7625_v61, %v2907_v5 }
 0x293   :  { %v7629_v11 = vpop.eup %7628  ;;  %v2952_v15 = vmul.f32 %v7627_v29, %v2904_v35  ;;  %v10428_v29 = vpop.f32.mrf.mxu1 }
 0x294   :  { %3018 = vmatpush1.msra.mxu1 %v2955_v58  ;;  %v2951_v46 = vmul.f32 %v7629_v11, %v2903_v36  ;;  %13430 = vst [vmem:[#allocation331_spill] sm:$0xff] %v10428_v29 }
 0x295   :  { %3019 = vmatprep.subr.mxu1 %v2954_v1 }
 0x296   :  { %3020 = vmatpush1.msra.mxu1 %v2953_v13 }
 0x297   :  { %3021 = vmatprep.subr.mxu1 %v2952_v15 }
 0x298   :  { %3022 = vmatpush1.msra.mxu1 %v2951_v46 }
 0x299   :  { %7323 = vmatmul.mubr.msk.f32.vlgmr.msra.gmra.mxu1 %vm2573_vm1, %v9914_v62  ;;  %v10433_v62 = vpop.f32.mrf.mxu1 }
 0x29a   :  { %3061 = vmatprep.mubr.f32.mxu1 %v13135_v50  ;;  %13431 = vst [vmem:[#allocation332_spill] sm:$0xff] %v10433_v62 }
 0x29d   :  { %7324 = vmatmul.mubr.msk.f32.gmra.mxu1 %vm2573_vm1, %v9925_v21  ;;  %v10438_v21 = vpop.f32.mrf.mxu1 }
 0x29e   :  { %3067 = vmatprep.mubr.f32.mxu1 %v13135_v50  ;;  %13432 = vst [vmem:[#allocation333_spill] sm:$0xff] %v10438_v21 }
 0x2a1   :  { %7325 = vmatmul.mubr.msk.f32.gmra.mxu1 %vm2573_vm1, %v9932_v38  ;;  %v10443_v38 = vpop.f32.mrf.mxu1 }
 0x2a2   :  { %3073 = vmatprep.mubr.f32.mxu1 %v13135_v50  ;;  %13433 = vst [vmem:[#allocation334_spill] sm:$0xff] %v10443_v38  ;;  %v13484_v38 = vld [vmem:[#allocation62_spill] sm:$0xff] }
 0x2a5   :  { %7326 = vmatmul.mubr.msk.f32.gmra.mxu1 %vm2573_vm1, %v9943_v24  ;;  %v10448_v24 = vpop.f32.mrf.mxu1 }
 0x2a6   :  { %3079 = vmatprep.mubr.f32.mxu1 %v13135_v50  ;;  %13434 = vst [vmem:[#allocation335_spill] sm:$0xff] %v10448_v24  ;;  %v13483_v24 = vld [vmem:[#allocation60_spill] sm:$0xff] }
 0x2a9   :  { %7327 = vmatmul.mubr.msk.f32.gmra.mxu1 %vm2573_vm1, %v9950_v28  ;;  %v10453_v28 = vpop.f32.mrf.mxu1 }
 0x2aa   :  { %3085 = vmatprep.mubr.f32.mxu1 %v13135_v50  ;;  %13435 = vst [vmem:[#allocation336_spill] sm:$0xff] %v10453_v28 }
 0x2ad   :  { %7328 = vmatmul.mubr.msk.f32.gmra.mxu1 %vm2573_vm1, %v9961_v17  ;;  %v10458_v17 = vpop.f32.mrf.mxu1 }
 0x2ae   :  { %3091 = vmatprep.mubr.f32.mxu1 %v13135_v50  ;;  %13436 = vst [vmem:[#allocation337_spill] sm:$0xff] %v10458_v17  ;;  %v13509_v17 = vld [vmem:[#allocation41_spill] sm:$0xff] }
 0x2af   :  { %v539_v20 = vadd.f32 %v13509_v17, %v9318_v45 }
 0x2b1   :  { %7329 = vmatmul.mubr.msk.f32.gmra.mxu1 %vm2573_vm1, %v9968_v25  ;;  %v10463_v25 = vpop.f32.mrf.mxu1 }
 0x2b2   :  { %3097 = vmatprep.mubr.f32.mxu1 %v13135_v50  ;;  %13437 = vst [vmem:[#allocation338_spill] sm:$0xff] %v10463_v25  ;;  %v465_v25 = vadd.f32 %v13483_v24, %v9203_v12  ;;  %v13487_v24 = vld [vmem:[#allocation9_spill] sm:$0xff] }
 0x2b5   :  { %7330 = vmatmul.mubr.msk.f32.gmra.mxu1 %vm2573_vm1, %v9979_v40  ;;  %v10468_v40 = vpop.f32.mrf.mxu1 }
 0x2b6   :  { %3103 = vmatprep.mubr.f32.mxu1 %v13135_v50  ;;  %13438 = vst [vmem:[#allocation339_spill] sm:$0xff] %v10468_v40 }
 0x2b9   :  { %7331 = vmatmul.mubr.msk.f32.gmra.mxu1 %vm2573_vm1, %v9986_v34  ;;  %v10473_v34 = vpop.f32.mrf.mxu1 }
 0x2ba   :  { %3109 = vmatprep.mubr.f32.mxu1 %v13135_v50  ;;  %13439 = vst [vmem:[#allocation340_spill] sm:$0xff] %v10473_v34 }
 0x2bd   :  { %7332 = vmatmul.mubr.msk.f32.gmra.mxu1 %vm2573_vm1, %v9999_v55  ;;  %v10478_v55 = vpop.f32.mrf.mxu1 }
 0x2be   :  { %3115 = vmatprep.mubr.f32.mxu1 %v13135_v50  ;;  %13440 = vst [vmem:[#allocation341_spill] sm:$0xff] %v10478_v55 }
 0x2c1   :  { %7333 = vmatmul.mubr.msk.f32.gmra.mxu1 %vm2573_vm1, %v10006_v18  ;;  %v10483_v18 = vpop.f32.mrf.mxu1 }
 0x2c2   :  { %3121 = vmatprep.mubr.f32.mxu1 %v13135_v50  ;;  %13441 = vst [vmem:[#allocation342_spill] sm:$0xff] %v10483_v18 }
 0x2c5   :  { %7334 = vmatmul.mubr.msk.f32.gmra.mxu1 %vm2573_vm1, %v10019_v56  ;;  %v10488_v56 = vpop.f32.mrf.mxu1 }
 0x2c6   :  { %3127 = vmatprep.mubr.f32.mxu1 %v13135_v50  ;;  %13443 = vst [vmem:[#allocation181_spill] sm:$0xff] %v10488_v56 }
 0x2c9   :  { %7335 = vmatmul.mubr.msk.f32.gmra.mxu1 %vm2573_vm1, %v10026_v60  ;;  %v10493_v60 = vpop.f32.mrf.mxu1 }
 0x2ca   :  { %3133 = vmatprep.mubr.f32.mxu1 %v13135_v50  ;;  %13445 = vst [vmem:[#allocation184_spill] sm:$0xff] %v10493_v60  ;;  %v13482_v60 = vld [vmem:[#allocation58_spill] sm:$0xff] }
 0x2cb   :  { %v10495_v2 = vpop.f32.mrf.mxu1 }
 0x2cc   :  { %13446 = vst [vmem:[#allocation343_spill] sm:$0xff] %v10495_v2 }
 0x2cd   :  { %7336 = vmatmul.mubr.msk.f32.gmra.mxu1 %vm2573_vm1, %v10039_v31  ;;  %v10497_v31 = vpop.f32.mrf.mxu1 }
 0x2ce   :  { %3139 = vmatprep.mubr.f32.mxu1 %v13135_v50  ;;  %13447 = vst [vmem:[#allocation344_spill] sm:$0xff] %v10497_v31 }
 0x2cf   :  { %v10499_v3 = vpop.f32.mrf.mxu1 }
 0x2d0   :  { %13448 = vst [vmem:[#allocation345_spill] sm:$0xff] %v10499_v3  ;;  %v13481_v3 = vld [vmem:[#allocation56_spill] sm:$0xff] }
 0x2d1   :  { %7337 = vmatmul.mubr.msk.f32.gmra.mxu1 %vm2573_vm1, %v13442_v33  ;;  %v10501_v43 = vpop.f32.mrf.mxu1 }
 0x2d2   :  { %3145 = vmatprep.mubr.f32.mxu1 %v13135_v50  ;;  %13449 = vst [vmem:[#allocation346_spill] sm:$0xff] %v10501_v43 }
 0x2d3   :  { %v10503_v10 = vpop.f32.mrf.mxu1 }
 0x2d4   :  { %13450 = vst [vmem:[#allocation347_spill] sm:$0xff] %v10503_v10 }
 0x2d5   :  { %7338 = vmatmul.mubr.msk.f32.gmra.mxu1 %vm2573_vm1, %v13444_v54  ;;  %v10505_v13 = vpop.f32.mrf.mxu1 }
 0x2d6   :  { %3793 = vmatprep.mubr.f32.mxu1 %v13135_v50  ;;  %13451 = vst [vmem:[#allocation348_spill] sm:$0xff] %v10505_v13 }
 0x2d7   :  { %v10507_v63 = vpop.f32.mrf.mxu1 }
 0x2d8   :  { %13452 = vst [vmem:[#allocation349_spill] sm:$0xff] %v10507_v63 }
 0x2d9   :  { %v10509_v14 = vpop.f32.mrf.mxu1 }
 0x2da   :  { %13453 = vst [vmem:[#allocation350_spill] sm:$0xff] %v10509_v14 }
 0x2db   :  { %v10511_v7 = vpop.f32.mrf.mxu1 }
 0x2dc   :  { %13454 = vst [vmem:[#allocation351_spill] sm:$0xff] %v10511_v7  ;;  %v13480_v7 = vld [vmem:[#allocation25_spill] sm:$0xff] }
 0x2dd   :  { %v10513_v5 = vpop.f32.mrf.mxu1  ;;  %v459_v31 = vadd.f32 %v13481_v3, %v13480_v7  ;;  %v461_v56 = vadd.f32 %v13482_v60, %v13480_v7 }
 0x2de   :  { %13455 = vst [vmem:[#allocation352_spill] sm:$0xff] %v10513_v5 }
 0x2df   :  { %v10515_v53 = vpop.f32.mrf.mxu1 }
 0x2e0   :  { %13456 = vst [vmem:[#allocation353_spill] sm:$0xff] %v10515_v53 }
 0x2e1   :  { %v10517_v61 = vpop.f32.mrf.mxu1 }
 0x2e2   :  { %13457 = vst [vmem:[#allocation354_spill] sm:$0xff] %v10517_v61 }
 0x2e3   :  { %v10519_v32 = vpop.f32.mrf.mxu1 }
 0x2e4   :  { %13458 = vst [vmem:[#allocation355_spill] sm:$0xff] %v10519_v32 }
 0x2e5   :  { %v10521_v58 = vpop.f32.mrf.mxu1 }
 0x2e6   :  { %13459 = vst [vmem:[#allocation356_spill] sm:$0xff] %v10521_v58 }
 0x2e7   :  { %v10523_v11 = vpop.f32.mrf.mxu1 }
 0x2e8   :  { %13460 = vst [vmem:[#allocation357_spill] sm:$0xff] %v10523_v11 }
 0x2e9   :  { %v10525_v1 = vpop.f32.mrf.mxu1 }
 0x2ea   :  { %13461 = vst [vmem:[#allocation358_spill] sm:$0xff] %v10525_v1 }
 0x2eb   :  { %v10527_v35 = vpop.f32.mrf.mxu1 }
 0x2ec   :  { %13462 = vst [vmem:[#allocation359_spill] sm:$0xff] %v10527_v35 }
 0x2ed   :  { %v10529_v36 = vpop.f32.mrf.mxu1 }
 0x2ee   :  { %13463 = vst [vmem:[#allocation360_spill] sm:$0xff] %v10529_v36 }
 0x2ef   :  { %v10531_v15 = vpop.f32.mrf.mxu1 }
 0x2f0   :  { %13464 = vst [vmem:[#allocation361_spill] sm:$0xff] %v10531_v15 }
 0x2f1   :  { %v10533_v46 = vpop.f32.mrf.mxu1 }
 0x2f2   :  { %13465 = vst [vmem:[#allocation362_spill] sm:$0xff] %v10533_v46 }
 0x2f3   :  { %v10535_v33 = vpop.f32.mrf.mxu1 }
 0x2f4   :  { %13466 = vst [vmem:[#allocation363_spill] sm:$0xff] %v10535_v33 }
 0x2f5   :  { %v10537_v54 = vpop.f32.mrf.mxu1 }
 0x2f6   :  { %13467 = vst [vmem:[#allocation364_spill] sm:$0xff] %v10537_v54 }
 0x2f7   :  { %v10539_v5 = vpop.f32.mrf.mxu1 }
 0x2f8   :  { %13468 = vst [vmem:[#allocation365_spill] sm:$0xff] %v10539_v5 }
 0x2f9   :  { %v10541_v61 = vpop.f32.mrf.mxu1 }
 0x2fa   :  { %13469 = vst [vmem:[#allocation366_spill] sm:$0xff] %v10541_v61 }
 0x2fb   :  { %v10543_v58 = vpop.f32.mrf.mxu1 }
 0x2fc   :  { %13470 = vst [vmem:[#allocation367_spill] sm:$0xff] %v10543_v58 }
 0x2fd   :  { %v10545_v11 = vpop.f32.mrf.mxu1 }
 0x2fe   :  { %13471 = vst [vmem:[#allocation368_spill] sm:$0xff] %v10545_v11 }
 0x2ff   :  { %v10547_v1 = vpop.f32.mrf.mxu1 }
 0x300   :  { %13472 = vst [vmem:[#allocation369_spill] sm:$0xff] %v10547_v1 }
 0x301   :  { %v10549_v35 = vpop.f32.mrf.mxu1 }
 0x302   :  { %13473 = vst [vmem:[#allocation370_spill] sm:$0xff] %v10549_v35 }
 0x303   :  { %v10551_v36 = vpop.f32.mrf.mxu1 }
 0x304   :  { %13474 = vst [vmem:[#allocation371_spill] sm:$0xff] %v10551_v36  ;;  %v13478_v36 = vld [vmem:[#allocation51_spill] sm:$0xff] }
 0x305   :  { %v10553_v15 = vpop.f32.mrf.mxu1 }
 0x306   :  { %13475 = vst [vmem:[#allocation372_spill] sm:$0xff] %v10553_v15  ;;  %v453_v15 = vadd.f32 %v13478_v36, %v9280_v52  ;;  %v467_v36 = vadd.f32 %v13484_v38, %v9203_v12  ;;  %v13488_v38 = vld [vmem:[#allocation23_spill] sm:$0xff] }
 0x307   :  { %v10555_v46 = vpop.f32.mrf.mxu1 }
 0x308   :  { %13476 = vst [vmem:[#allocation373_spill] sm:$0xff] %v10555_v46  ;;  %v13479_v46 = vld [vmem:[#allocation54_spill] sm:$0xff] }
 0x309   :  { %v10557_v33 = vpop.f32.mrf.mxu1  ;;  %v455_v43 = vadd.f32 %v13479_v46, %v9280_v52  ;;  %v13485_v46 = vld [vmem:[#allocation6_spill] sm:$0xff] }
 0x30a   :  { %13477 = vst [vmem:[#allocation374_spill] sm:$0xff] %v10557_v33  ;;  %v471_v62 = vadd.f32 %v13485_v46, %v9213_v16 }
 0x359   :  { %v3057_v54 = vpop.f32.mrf.mxu1 }
 0x35a   :  { %v3152_v2 = vadd.f32 %v3057_v54, %v453_v15  ;;  %v13486_v15 = vld [vmem:[#allocation8_spill] sm:$0xff] }
 0x35b   :  { %v3059_v5 = vpop.f32.mrf.mxu1  ;;  %v477_v54 = vadd.f32 %v13486_v15, %v9271_v48 }
 0x35c   :  { %v3153_v18 = vadd.f32 %v3059_v5, %v455_v43  ;;  %v3184_v29 = vmul.f32 0.5, %v3152_v2 }
 0x35d   :  { %v3063_v32 = vpop.f32.mrf.mxu1 }
 0x35e   :  { %v3154_v55 = vadd.f32 %v3063_v32, %v459_v31  ;;  %v3185_v60 = vmul.f32 0.5, %v3153_v18  ;;  %v479_v31 = vadd.f32 %v13487_v24, %v9271_v48  ;;  %7630 = vtanh.f32 %v3184_v29  ;;  %v13490_v18 = vld [vmem:[#allocation11_spill] sm:$0xff]  ;;  %v13492_v29 = vld [vmem:[#allocation12_spill] sm:$0xff] }
 0x35f   :  { %v3065_v61 = vpop.f32.mrf.mxu1 }
 0x360   :  { %v3155_v21 = vadd.f32 %v3065_v61, %v461_v56  ;;  %v3186_v32 = vmul.f32 0.5, %v3154_v55  ;;  %v13489_v56 = vld [vmem:[#allocation10_spill] sm:$0xff]  ;;  %7632 = vtanh.f32 %v3185_v60  ;;  %v13491_v55 = vld [vmem:[#allocation7_spill] sm:$0xff] }
 0x361   :  { %v3069_v14 = vpop.f32.mrf.mxu1  ;;  %v483_v61 = vadd.f32 %v13489_v56, %v13488_v38  ;;  %v13493_v60 = vld [vmem:[#allocation14_spill] sm:$0xff] }
 0x362   :  { %v3156_v3 = vadd.f32 %v3069_v14, %v465_v25  ;;  %v3187_v39 = vmul.f32 0.5, %v3155_v21  ;;  %v485_v14 = vadd.f32 %v13490_v18, %v13488_v38  ;;  %7634 = vtanh.f32 %v3186_v32 }
 0x363   :  { %v3071_v58 = vpop.f32.mrf.mxu1 }
 0x364   :  { %v3157_v43 = vadd.f32 %v3071_v58, %v467_v36  ;;  %v3188_v25 = vmul.f32 0.5, %v3156_v3  ;;  %7636 = vtanh.f32 %v3187_v39 }
 0x365   :  { %v3075_v63 = vpop.f32.mrf.mxu1 }
 0x366   :  { %v3158_v57 = vadd.f32 %v3075_v63, %v471_v62  ;;  %v3189_v58 = vmul.f32 0.5, %v3157_v43  ;;  %v473_v63 = vadd.f32 %v13491_v55, %v9213_v16  ;;  %7638 = vtanh.f32 %v3188_v25  ;;  %v13495_v25 = vld [vmem:[#allocation17_spill] sm:$0xff] }
 0x367   :  { %v3077_v11 = vpop.f32.mrf.mxu1 }
 0x368   :  { %v3190_v62 = vmul.f32 0.5, %v3158_v57  ;;  %7640 = vtanh.f32 %v3189_v58  ;;  %v3159_v43 = vadd.f32 %v3077_v11, %v473_v63 }
 0x369   :  { %v3081_v13 = vpop.f32.mrf.mxu1 }
 0x36a   :  { %v3160_v40 = vadd.f32 %v3081_v13, %v477_v54  ;;  %7642 = vtanh.f32 %v3190_v62  ;;  %v3191_v18 = vmul.f32 0.5, %v3159_v43  ;;  %v13498_v43 = vld [vmem:[#allocation36_spill] sm:$0xff] }
 0x36b   :  { %v3083_v1 = vpop.f32.mrf.mxu1  ;;  %v7631_v63 = vpop.eup %7630 }
 0x36c   :  { %v3161_v2 = vadd.f32 %v3083_v1, %v479_v31  ;;  %v3192_v21 = vmul.f32 0.5, %v3160_v40  ;;  %v489_v1 = vadd.f32 %v13492_v29, %v9227_v23  ;;  %v13494_v31 = vld [vmem:[#allocation16_spill] sm:$0xff] }
 0x36d   :  { %v3087_v10 = vpop.f32.mrf.mxu1  ;;  %v495_v39 = vadd.f32 %v13494_v31, %v9233_v27 }
 0x36e   :  { %v3162_v36 = vadd.f32 %v3087_v10, %v483_v61  ;;  %v3193_v3 = vmul.f32 0.5, %v3161_v2  ;;  %v491_v10 = vadd.f32 %v13493_v60, %v9227_v23  ;;  %7644 = vtanh.f32 %v3192_v21  ;;  %v7633_v21 = vpop.eup %7632 }
 0x36f   :  { %v3089_v35 = vpop.f32.mrf.mxu1  ;;  %v497_v2 = vadd.f32 %v13495_v25, %v9233_v27  ;;  %v13500_v25 = vld [vmem:[#allocation21_spill] sm:$0xff] }
 0x370   :  { %v3163_v13 = vadd.f32 %v3089_v35, %v485_v14  ;;  %v3194_v24 = vmul.f32 0.5, %v3162_v36  ;;  %7646 = vtanh.f32 %v3193_v3  ;;  %v7635_v3 = vpop.eup %7634 }
 0x371   :  { %v3093_v53 = vpop.f32.mrf.mxu1  ;;  %v3234_v59 = vadd.f32 1.0, %v7635_v3 }
 0x372   :  { %v3164_v40 = vadd.f32 %v3093_v53, %v489_v1  ;;  %v3195_v35 = vmul.f32 0.5, %v3163_v13  ;;  %7648 = vtanh.f32 %v3194_v24  ;;  %v13496_v53 = vld [vmem:[#allocation34_spill] sm:$0xff]  ;;  %v13497_v13 = vld [vmem:[#allocation35_spill] sm:$0xff]  ;;  %v531_v24 = vadd.f32 %v13498_v43, %v9362_v47 }
 0x373   :  { %v3095_v33 = vpop.f32.mrf.mxu1  ;;  %v527_v29 = vadd.f32 %v13497_v13, %v9347_v44  ;;  %v13504_v13 = vld [vmem:[#allocation26_spill] sm:$0xff]  ;;  %v13505_v43 = vld [vmem:[#allocation39_spill] sm:$0xff] }
 0x374   :  { %v3165_v32 = vadd.f32 %v3095_v33, %v491_v10  ;;  %v3196_v14 = vmul.f32 0.5, %v3164_v40  ;;  %7650 = vtanh.f32 %v3195_v35  ;;  %v525_v33 = vadd.f32 %v13496_v53, %v9347_v44  ;;  %v13499_v40 = vld [vmem:[#allocation19_spill] sm:$0xff]  ;;  %v13502_v53 = vld [vmem:[#allocation22_spill] sm:$0xff] }
 0x375   :  { %v3099_v28 = vpop.f32.mrf.mxu1  ;;  %7652 = vtanh.f32 %v3191_v18  ;;  %v501_v35 = vadd.f32 %v13499_v40, %v10366_v41  ;;  %v13501_v18 = vld [vmem:[#allocation38_spill] sm:$0xff] }
 0x376   :  { %v3166_v61 = vadd.f32 %v3099_v28, %v495_v39  ;;  %v3197_v58 = vmul.f32 0.5, %v3165_v32  ;;  %7654 = vtanh.f32 %v3196_v14  ;;  %v533_v14 = vadd.f32 %v13501_v18, %v9362_v47 }
 0x377   :  { %v3101_v34 = vpop.f32.mrf.mxu1 }
 0x378   :  { %v3167_v36 = vadd.f32 %v3101_v34, %v497_v2  ;;  %v3198_v55 = vmul.f32 0.5, %v3166_v61  ;;  %7656 = vtanh.f32 %v3197_v58  ;;  %v7637_v34 = vpop.eup %7636  ;;  %v503_v2 = vadd.f32 %v13500_v25, %v10366_v41  ;;  %v13506_v25 = vld [vmem:[#allocation28_spill] sm:$0xff] }
 0x379   :  { %v10575_v5 = vpop.f32.mrf.mxu1  ;;  %v7639_v39 = vpop.eup %7638  ;;  %v10635_v18 = vadd.f32 %v13506_v25, %v10354_v51  ;;  %v13511_v25 = vld [vmem:[#allocation44_spill] sm:$0xff] }
 0x37a   :  { %v3199_v60 = vmul.f32 0.5, %v3167_v36  ;;  %7658 = vtanh.f32 %v3198_v55  ;;  %v7641_v61 = vpop.eup %7640  ;;  %v13503_v55 = vld [vmem:[#allocation24_spill] sm:$0xff]  ;;  %v545_v9 = vadd.f32 %v13511_v25, %v9337_v4 }
 0x37b   :  { %v10581_v46 = vpop.f32.mrf.mxu1  ;;  %v7643_v36 = vpop.eup %7642  ;;  %v3237_v47 = vadd.f32 1.0, %v7641_v61 }
 0x37c   :  { %v3238_v44 = vadd.f32 1.0, %v7643_v36 }
 0x37d   :  { %v10585_v15 = vpop.f32.mrf.mxu1  ;;  %v3261_v36 = vmul.f32 0.5, %v3237_v47 }
 0x37f   :  { %v10589_v54 = vpop.f32.mrf.mxu1 }
 0x381   :  { %v10595_v57 = vpop.f32.mrf.mxu1 }
 0x383   :  { %v10599_v56 = vpop.f32.mrf.mxu1 }
 0x385   :  { %v10603_v11 = vpop.f32.mrf.mxu1 }
 0x387   :  { %v10605_v62 = vpop.f32.mrf.mxu1 }
 0x389   :  { %v3129_v28 = vpop.f32.mrf.mxu1 }
 0x38a   :  { %v3176_v1 = vadd.f32 %v3129_v28, %v525_v33  ;;  %v10621_v33 = vadd.f32 %v13502_v53, %v10364_v19  ;;  %v10625_v28 = vadd.f32 %v13503_v55, %v10364_v19  ;;  %v13507_v53 = vld [vmem:[#allocation30_spill] sm:$0xff] }
 0x38b   :  { %v3131_v10 = vpop.f32.mrf.mxu1  ;;  %v10639_v55 = vadd.f32 %v13507_v53, %v9406_v22  ;;  %v3235_v53 = vadd.f32 1.0, %v7637_v34  ;;  %v3258_v34 = vmul.f32 0.5, %v3234_v59 }
 0x38c   :  { %v3177_v31 = vadd.f32 %v3131_v10, %v527_v29  ;;  %7660 = vtanh.f32 %v3176_v1  ;;  %v10629_v29 = vadd.f32 %v13504_v13, %v10354_v51  ;;  %v7645_v10 = vpop.eup %7644  ;;  %v13508_v13 = vld [vmem:[#allocation32_spill] sm:$0xff] }
 0x38d   :  { %v3135_v32 = vpop.f32.mrf.mxu1  ;;  %v3240_v51 = vadd.f32 1.0, %v7645_v10  ;;  %v3259_v10 = vmul.f32 0.5, %v3235_v53 }
 0x38e   :  { %7662 = vtanh.f32 %v3177_v31  ;;  %v3178_v58 = vadd.f32 %v3135_v32, %v531_v24  ;;  %v537_v31 = vadd.f32 %v13505_v43, %v9318_v45  ;;  %v3232_v24 = vadd.f32 1.0, %v7631_v63  ;;  %v7647_v32 = vpop.eup %7646  ;;  %v13510_v63 = vld [vmem:[#allocation43_spill] sm:$0xff] }
 0x38f   :  { %7664 = vtanh.f32 %v3199_v60  ;;  %v3137_v1 = vpop.f32.mrf.mxu1  ;;  %v521_v60 = vadd.f32 %v13508_v13, %v9406_v22  ;;  %v7649_v43 = vpop.eup %7648  ;;  %v3241_v22 = vadd.f32 1.0, %v7647_v32  ;;  %v3236_v45 = vadd.f32 1.0, %v7639_v39 }
 0x390   :  { %7666 = vtanh.f32 %v3178_v58  ;;  %v3179_v40 = vadd.f32 %v3137_v1, %v533_v14  ;;  %v543_v14 = vadd.f32 %v13510_v63, %v9337_v4  ;;  %v3233_v58 = vadd.f32 1.0, %v7633_v21  ;;  %v7651_v41 = vpop.eup %7650 }
 0x391   :  { %v3141_v37 = vpop.f32.mrf.mxu1  ;;  %v3256_v13 = vmul.f32 0.5, %v3232_v24  ;;  %v3242_v27 = vadd.f32 1.0, %v7649_v43  ;;  %v7653_v21 = vpop.eup %7652  ;;  %v3264_v25 = vmul.f32 0.5, %v3240_v51  ;;  %v3243_v4 = vadd.f32 1.0, %v7651_v41 }
 0x392   :  { %7668 = vtanh.f32 %v3179_v40  ;;  %v3180_v1 = vadd.f32 %v3141_v37, %v537_v31  ;;  %v3257_v40 = vmul.f32 0.5, %v3233_v58  ;;  %v3168_v37 = vadd.f32 %v10575_v5, %v501_v35  ;;  %v7655_v3 = vpop.eup %7654 }
 0x393   :  { %v3143_v19 = vpop.f32.mrf.mxu1  ;;  %v7657_v32 = vpop.eup %7656  ;;  %v3260_v61 = vmul.f32 0.5, %v3236_v45  ;;  %v3262_v43 = vmul.f32 0.5, %v3238_v44  ;;  %v3266_v58 = vmul.f32 0.5, %v3242_v27  ;;  %v3239_v35 = vadd.f32 1.0, %v7653_v21 }
 0x394   :  { %7670 = vtanh.f32 %v3180_v1  ;;  %v3181_v17 = vadd.f32 %v3143_v19, %v539_v20  ;;  %v3265_v1 = vmul.f32 0.5, %v3241_v22  ;;  %v3169_v19 = vadd.f32 %v10581_v46, %v503_v2  ;;  %v7659_v39 = vpop.eup %7658 }
 0x395   :  { %v3147_v63 = vpop.f32.mrf.mxu1  ;;  %v3288_v51 = vmul.f32 %v3264_v25, %v10388_v42  ;;  %v3267_v41 = vmul.f32 0.5, %v3243_v4  ;;  %v3245_v53 = vadd.f32 1.0, %v7657_v32  ;;  %v3175_v45 = vadd.f32 %v10605_v62, %v521_v60 }
 0x396   :  { %7672 = vtanh.f32 %v3181_v17  ;;  %v3182_v31 = vadd.f32 %v3147_v63, %v543_v14  ;;  %v3244_v14 = vadd.f32 1.0, %v7655_v3  ;;  %v3200_v17 = vmul.f32 0.5, %v3168_v37 }
 0x397   :  { %v3149_v24 = vpop.f32.mrf.mxu1  ;;  %v3289_v46 = vmul.f32 %v3265_v1, %v9421_v0  ;;  %v3290_v27 = vmul.f32 %v3266_v58, %v10386_v26  ;;  %v3173_v2 = vadd.f32 %v10599_v56, %v10635_v18  ;;  %v3174_v21 = vadd.f32 %v10603_v11, %v10639_v55 }
 0x398   :  { %7674 = vtanh.f32 %v3182_v31  ;;  %v3183_v20 = vadd.f32 %v3149_v24, %v545_v9  ;;  %v3201_v9 = vmul.f32 0.5, %v3169_v19  ;;  %v3268_v4 = vmul.f32 0.5, %v3244_v14 }
 0x399   :  { %v7661_v5 = vpop.eup %7660  ;;  %v3291_v62 = vmul.f32 %v3267_v41, %v9437_v6  ;;  %v3269_v60 = vmul.f32 0.5, %v3245_v53  ;;  %v3171_v26 = vadd.f32 %v10589_v54, %v10625_v28  ;;  %v3172_v56 = vadd.f32 %v10595_v57, %v10629_v29 }
 0x39a   :  { %7676 = vtanh.f32 %v3183_v20  ;;  %v3296_v22 = vmul.f32 %v7661_v5, %v3256_v13  ;;  %v3246_v13 = vadd.f32 1.0, %v7659_v39  ;;  %v3205_v25 = vmul.f32 0.5, %v3173_v2 }
 0x39b   :  { %v7663_v59 = vpop.eup %7662  ;;  %7678 = vtanh.f32 %v3200_v17  ;;  %v3206_v24 = vmul.f32 0.5, %v3174_v21  ;;  %v3292_v6 = vmul.f32 %v3268_v4, %v10396_v8  ;;  %v3293_v57 = vmul.f32 %v3269_v60, %v9461_v30  ;;  %v13512_v30 = vld [vmem:[#allocation69_spill] sm:$0xff] }
 0x39c   :  { %v7665_v63 = vpop.eup %7664  ;;  %v3297_v47 = vmul.f32 %v7663_v59, %v3257_v40  ;;  %v10659_v42 = vadd.f32 %v3296_v22, %v3288_v51  ;;  %v3207_v40 = vmul.f32 0.5, %v3175_v45  ;;  %v3270_v32 = vmul.f32 0.5, %v3246_v13 }
 0x39d   :  { %v7667_v44 = vpop.eup %7666  ;;  %v3247_v18 = vadd.f32 1.0, %v7665_v63  ;;  %7680 = vtanh.f32 %v3201_v9  ;;  %v3203_v29 = vmul.f32 0.5, %v3171_v26  ;;  %v3204_v19 = vmul.f32 0.5, %v3172_v56 }
 0x39e   :  { %v10661_v37 = vadd.f32 %v3297_v47, %v3289_v46  ;;  %v3298_v0 = vmul.f32 %v7667_v44, %v3258_v34  ;;  %v3170_v34 = vadd.f32 %v10585_v15, %v10621_v33  ;;  %7682 = vtanh.f32 %v3207_v40 }
 0x39f   :  { %v7669_v31 = vpop.eup %7668  ;;  %v3263_v33 = vmul.f32 0.5, %v3239_v35  ;;  %7684 = vtanh.f32 %v3206_v24  ;;  %v3294_v8 = vmul.f32 %v3270_v32, %v10392_v49 }
 0x3a0   :  { %v10668_v11 = vadd.f32 %v3298_v0, %v3290_v27  ;;  %v3299_v55 = vmul.f32 %v7669_v31, %v3259_v10  ;;  %v3271_v10 = vmul.f32 0.5, %v3247_v18  ;;  %v3202_v58 = vmul.f32 0.5, %v3170_v34 }
 0x3a1   :  { %v7671_v3 = vpop.eup %7670  ;;  %7686 = vtanh.f32 %v3205_v25 }
 0x3a2   :  { %v10673_v1 = vadd.f32 %v3299_v55, %v3291_v62  ;;  %v3300_v54 = vmul.f32 %v7671_v3, %v3260_v61  ;;  %7688 = vtanh.f32 %v3204_v19  ;;  %v3295_v17 = vmul.f32 %v3271_v10, %v13512_v30  ;;  %v10737_v30 = vld [vmem:[%s12908_s2 + $0x28] sm:$0xff] }
 0x3a3   :  { %v7673_v28 = vpop.eup %7672  ;;  %7690 = vtanh.f32 %v3203_v29 }
 0x3a4   :  { %v10676_v20 = vadd.f32 %v3300_v54, %v3292_v6  ;;  %v3301_v39 = vmul.f32 %v7673_v28, %v3261_v36  ;;  %7692 = vtanh.f32 %v3202_v58  ;;  %v10705_v58 = vld [vmem:[%s12908_s2 + $0x8] sm:$0xff] }
 0x3a5   :  { %v7675_v15 = vpop.eup %7674 }
 0x3a6   :  { %v10679_v5 = vadd.f32 %v3301_v39, %v3293_v57  ;;  %v3302_v61 = vmul.f32 %v7675_v15, %v3262_v43 }
 0x3a7   :  { %v7677_v14 = vpop.eup %7676 }
 0x3a8   :  { %v10682_v59 = vadd.f32 %v3302_v61, %v3294_v8  ;;  %v3303_v51 = vmul.f32 %v7677_v14, %v3263_v33  ;;  %7694 = vtanh.f32 %v10679_v5  ;;  %v7679_v49 = vpop.eup %7678  ;;  %v10697_v33 = vld [vmem:[%s12908_s2] sm:$0xff]  ;;  %v10713_v8 = vld [vmem:[%s12908_s2 + $0x10] sm:$0xff]  ;;  %v10721_v61 = vld [vmem:[%s12908_s2 + $0x18] sm:$0xff] }
 0x3a9   :  { %v3248_v40 = vadd.f32 1.0, %v7679_v49  ;;  %v10729_v14 = vld [vmem:[%s12908_s2 + $0x20] sm:$0xff] }
 0x3aa   :  { %v10684_v36 = vadd.f32 %v3303_v51, %v3295_v17  ;;  %7696 = vtanh.f32 %v10682_v59  ;;  %v7681_v43 = vpop.eup %7680  ;;  %v10745_v17 = vld [vmem:[%s12908_s2 + $0x30] sm:$0xff]  ;;  %v10753_v51 = vld [vmem:[%s12908_s2 + $0x38] sm:$0xff]  ;;  %v10761_v49 = vld [vmem:[%s12908_s2 + $0x40] sm:$0xff] }
 0x3ab   :  { %v7683_v35 = vpop.eup %7682  ;;  %v3249_v60 = vadd.f32 1.0, %v7681_v43  ;;  %v3272_v19 = vmul.f32 0.5, %v3248_v40  ;;  %13513 = vst [vmem:[#allocation51_spill] sm:$0xff] %v10745_v17  ;;  %13514 = vst [vmem:[#allocation54_spill] sm:$0xff] %v10753_v51  ;;  %v10769_v43 = vld [vmem:[%s12908_s2 + $0x48] sm:$0xff] }
 0x3ac   :  { %7698 = vtanh.f32 %v10684_v36  ;;  %v7685_v41 = vpop.eup %7684  ;;  %v3255_v63 = vadd.f32 1.0, %v7683_v35  ;;  %13515 = vst [vmem:[#allocation56_spill] sm:$0xff] %v10761_v49  ;;  %13516 = vst [vmem:[#allocation58_spill] sm:$0xff] %v10769_v43  ;;  %v10777_v35 = vld [vmem:[%s12908_s2 + $0x50] sm:$0xff] }
 0x3ad   :  { %7700 = vtanh.f32 %v10676_v20  ;;  %v3254_v9 = vadd.f32 1.0, %v7685_v41  ;;  %v3273_v29 = vmul.f32 0.5, %v3249_v60  ;;  %13517 = vst [vmem:[#allocation60_spill] sm:$0xff] %v10777_v35  ;;  %v10785_v41 = vld [vmem:[%s12908_s2 + $0x58] sm:$0xff] }
 0x3ae   :  { %7702 = vtanh.f32 %v10673_v1  ;;  %v7687_v53 = vpop.eup %7686  ;;  %v3279_v4 = vmul.f32 0.5, %v3255_v63  ;;  %13518 = vst [vmem:[#allocation62_spill] sm:$0xff] %v10785_v41  ;;  %v10809_v63 = vld [vmem:[%s12908_s2 + $0x70] sm:$0xff] }
 0x3af   :  { %7704 = vtanh.f32 %v10668_v11  ;;  %v7689_v22 = vpop.eup %7688  ;;  %v3253_v47 = vadd.f32 1.0, %v7687_v53  ;;  %v3278_v31 = vmul.f32 0.5, %v3254_v9  ;;  %v10793_v53 = vld [vmem:[%s12908_s2 + $0x60] sm:$0xff]  ;;  %13521 = vst [vmem:[#allocation9_spill] sm:$0xff] %v10809_v63 }
 0x3b0   :  { %7706 = vtanh.f32 %v10661_v37  ;;  %v7691_v46 = vpop.eup %7690  ;;  %v3252_v27 = vadd.f32 1.0, %v7689_v22  ;;  %13519 = vst [vmem:[#allocation6_spill] sm:$0xff] %v10793_v53  ;;  %v10801_v22 = vld [vmem:[%s12908_s2 + $0x68] sm:$0xff] }
 0x3b1   :  { %7708 = vtanh.f32 %v10659_v42  ;;  %v7693_v45 = vpop.eup %7692  ;;  %v3251_v21 = vadd.f32 1.0, %v7691_v46  ;;  %v3277_v56 = vmul.f32 0.5, %v3253_v47  ;;  %13520 = vst [vmem:[#allocation8_spill] sm:$0xff] %v10801_v22  ;;  %v10817_v46 = vld [vmem:[%s12908_s2 + $0x78] sm:$0xff] }
 0x3b2   :  { %v3250_v0 = vadd.f32 1.0, %v7693_v45  ;;  %v3276_v55 = vmul.f32 0.5, %v3252_v27  ;;  %13522 = vst [vmem:[#allocation10_spill] sm:$0xff] %v10817_v46 }
 0x3b3   :  { %v3275_v24 = vmul.f32 0.5, %v3251_v21 }
 0x3b4   :  { %v3274_v32 = vmul.f32 0.5, %v3250_v0 }
 0x3b5   :  { %v7695_v44 = vpop.eup %7694 }
 0x3b6   :  { %v3325_v25 = vmul.f32 %v7695_v44, %v3277_v56 }
 0x3b7   :  { %v7697_v2 = vpop.eup %7696 }
 0x3b8   :  { %v3326_v3 = vmul.f32 %v7697_v2, %v3278_v31 }
 0x3b9   :  { %v7699_v13 = vpop.eup %7698 }
 0x3ba   :  { %v7701_v62 = vpop.eup %7700  ;;  %v3327_v26 = vmul.f32 %v7699_v13, %v3279_v4 }
 0x3bb   :  { %v7703_v18 = vpop.eup %7702  ;;  %v3324_v54 = vmul.f32 %v7701_v62, %v3276_v55 }
 0x3bc   :  { %v7705_v34 = vpop.eup %7704  ;;  %3384 = vmatprep.subr.mxu0 %v3327_v26  ;;  %v3323_v57 = vmul.f32 %v7703_v18, %v3275_v24  ;;  %v13523_v26 = vld [vmem:[#allocation64_spill] sm:$0xff]  ;;  %v13524_v18 = vld [vmem:[#allocation66_spill] sm:$0xff]  ;;  %v13526_v24 = vld [vmem:[#allocation71_spill] sm:$0xff] }
 0x3bd   :  { %v7707_v6 = vpop.eup %7706  ;;  %3385 = vmatpush1.msra.mxu0 %v3326_v3  ;;  %v3322_v10 = vmul.f32 %v7705_v34, %v3274_v32  ;;  %v614_v56 = vadd.f32 %v13523_v26, %v9280_v52  ;;  %v616_v40 = vadd.f32 %v13524_v18, %v9280_v52  ;;  %v13525_v3 = vld [vmem:[#allocation68_spill] sm:$0xff]  ;;  %v13529_v26 = vld [vmem:[#allocation77_spill] sm:$0xff] }
 0x3be   :  { %v7709_v28 = vpop.eup %7708  ;;  %3386 = vmatprep.subr.mxu0 %v3325_v25  ;;  %v3321_v39 = vmul.f32 %v7707_v6, %v3273_v29  ;;  %v620_v34 = vadd.f32 %v13525_v3, %v13480_v7  ;;  %v622_v6 = vadd.f32 %v13526_v24, %v13480_v7  ;;  %v632_v18 = vadd.f32 %v13529_v26, %v9213_v16 }
 0x3bf   :  { %3387 = vmatpush1.msra.mxu0 %v3324_v54  ;;  %v3320_v15 = vmul.f32 %v7709_v28, %v3272_v19  ;;  %v13527_v28 = vld [vmem:[#allocation73_spill] sm:$0xff]  ;;  %v13528_v19 = vld [vmem:[#allocation75_spill] sm:$0xff] }
 0x3c0   :  { %3388 = vmatprep.subr.mxu0 %v3323_v57  ;;  %v626_v57 = vadd.f32 %v13527_v28, %v9203_v12  ;;  %v13531_v28 = vld [vmem:[#allocation83_spill] sm:$0xff] }
 0x3c1   :  { %3389 = vmatpush1.msra.mxu0 %v3322_v10  ;;  %v628_v10 = vadd.f32 %v13528_v19, %v9203_v12 }
 0x3c2   :  { %3390 = vmatprep.subr.mxu0 %v3321_v39 }
 0x3c3   :  { %3391 = vmatpush1.msra.mxu0 %v3320_v15 }
 0x3c4   :  { %7339 = vmatmul.mubr.msk.f32.vlgmr.msra.gmra.mxu0 %vm2573_vm1, %v10697_v33 }
 0x3c5   :  { %3430 = vmatprep.mubr.f32.mxu0 %v13135_v50 }
 0x3c8   :  { %7340 = vmatmul.mubr.msk.f32.gmra.mxu0 %vm2573_vm1, %v10705_v58 }
 0x3c9   :  { %3436 = vmatprep.mubr.f32.mxu0 %v13135_v50 }
 0x3cc   :  { %7341 = vmatmul.mubr.msk.f32.gmra.mxu0 %vm2573_vm1, %v10713_v8 }
 0x3cd   :  { %3442 = vmatprep.mubr.f32.mxu0 %v13135_v50 }
 0x3d0   :  { %7342 = vmatmul.mubr.msk.f32.gmra.mxu0 %vm2573_vm1, %v10721_v61 }
 0x3d1   :  { %3448 = vmatprep.mubr.f32.mxu0 %v13135_v50 }
 0x3d4   :  { %7343 = vmatmul.mubr.msk.f32.gmra.mxu0 %vm2573_vm1, %v10729_v14 }
 0x3d5   :  { %3454 = vmatprep.mubr.f32.mxu0 %v13135_v50 }
 0x3d8   :  { %7344 = vmatmul.mubr.msk.f32.gmra.mxu0 %vm2573_vm1, %v10737_v30 }
 0x3d9   :  { %3460 = vmatprep.mubr.f32.mxu0 %v13135_v50 }
 0x3dc   :  { %7345 = vmatmul.mubr.msk.f32.gmra.mxu0 %vm2573_vm1, %v10745_v17 }
 0x3dd   :  { %3466 = vmatprep.mubr.f32.mxu0 %v13135_v50 }
 0x3e0   :  { %7346 = vmatmul.mubr.msk.f32.gmra.mxu0 %vm2573_vm1, %v10753_v51 }
 0x3e1   :  { %3472 = vmatprep.mubr.f32.mxu0 %v13135_v50 }
 0x3e4   :  { %7347 = vmatmul.mubr.msk.f32.gmra.mxu0 %vm2573_vm1, %v10761_v49 }
 0x3e5   :  { %3478 = vmatprep.mubr.f32.mxu0 %v13135_v50 }
 0x3e8   :  { %7348 = vmatmul.mubr.msk.f32.gmra.mxu0 %vm2573_vm1, %v10769_v43 }
 0x3e9   :  { %3484 = vmatprep.mubr.f32.mxu0 %v13135_v50 }
 0x3ec   :  { %7349 = vmatmul.mubr.msk.f32.gmra.mxu0 %vm2573_vm1, %v10777_v35 }
 0x3ed   :  { %3490 = vmatprep.mubr.f32.mxu0 %v13135_v50 }
 0x3f0   :  { %7350 = vmatmul.mubr.msk.f32.gmra.mxu0 %vm2573_vm1, %v10785_v41 }
 0x3f1   :  { %3496 = vmatprep.mubr.f32.mxu0 %v13135_v50 }
 0x3f4   :  { %7351 = vmatmul.mubr.msk.f32.gmra.mxu0 %vm2573_vm1, %v10793_v53 }
 0x3f5   :  { %3502 = vmatprep.mubr.f32.mxu0 %v13135_v50 }
 0x3f8   :  { %7352 = vmatmul.mubr.msk.f32.gmra.mxu0 %vm2573_vm1, %v10801_v22 }
 0x3f9   :  { %3508 = vmatprep.mubr.f32.mxu0 %v13135_v50 }
 0x3fc   :  { %7353 = vmatmul.mubr.msk.f32.gmra.mxu0 %vm2573_vm1, %v10809_v63 }
 0x3fd   :  { %3514 = vmatprep.mubr.f32.mxu0 %v13135_v50 }
 0x400   :  { %7354 = vmatmul.mubr.msk.f32.gmra.mxu0 %vm2573_vm1, %v10817_v46 }
 0x401   :  { %4162 = vmatprep.mubr.f32.mxu0 %v13135_v50 }
 0x484   :  { %v3426_v9 = vpop.f32.mrf.mxu0 }
 0x485   :  { %v3521_v25 = vadd.f32 %v3426_v9, %v614_v56  ;;  %v13530_v9 = vld [vmem:[#allocation81_spill] sm:$0xff] }
 0x486   :  { %v3428_v45 = vpop.f32.mrf.mxu0  ;;  %v638_v56 = vadd.f32 %v13530_v9, %v9271_v48 }
 0x487   :  { %v3522_v32 = vadd.f32 %v3428_v45, %v616_v40  ;;  %v3553_v52 = vmul.f32 0.5, %v3521_v25 }
 0x488   :  { %v3432_v47 = vpop.f32.mrf.mxu0 }
 0x489   :  { %v3523_v29 = vadd.f32 %v3432_v47, %v620_v34  ;;  %v3554_v24 = vmul.f32 0.5, %v3522_v32  ;;  %v640_v47 = vadd.f32 %v13531_v28, %v9271_v48  ;;  %7710 = vtanh.f32 %v3553_v52  ;;  %v13533_v32 = vld [vmem:[#allocation87_spill] sm:$0xff]  ;;  %v13535_v52 = vld [vmem:[#allocation89_spill] sm:$0xff] }
 0x48a   :  { %v3434_v44 = vpop.f32.mrf.mxu0 }
 0x48b   :  { %v3524_v39 = vadd.f32 %v3434_v44, %v622_v6  ;;  %v3555_v34 = vmul.f32 0.5, %v3523_v29  ;;  %v13532_v44 = vld [vmem:[#allocation85_spill] sm:$0xff]  ;;  %7712 = vtanh.f32 %v3554_v24  ;;  %v13534_v29 = vld [vmem:[#allocation79_spill] sm:$0xff] }
 0x48c   :  { %v3438_v27 = vpop.f32.mrf.mxu0  ;;  %v644_v6 = vadd.f32 %v13532_v44, %v13488_v38  ;;  %v13536_v24 = vld [vmem:[#allocation91_spill] sm:$0xff] }
 0x48d   :  { %v3525_v3 = vadd.f32 %v3438_v27, %v626_v57  ;;  %v3556_v19 = vmul.f32 0.5, %v3524_v39  ;;  %7714 = vtanh.f32 %v3555_v34  ;;  %v13538_v34 = vld [vmem:[#allocation93_spill] sm:$0xff] }
 0x48e   :  { %v3440_v2 = vpop.f32.mrf.mxu0 }
 0x48f   :  { %v3526_v45 = vadd.f32 %v3440_v2, %v628_v10  ;;  %v3557_v27 = vmul.f32 0.5, %v3525_v3  ;;  %v646_v2 = vadd.f32 %v13533_v32, %v13488_v38  ;;  %7716 = vtanh.f32 %v3556_v19 }
 0x490   :  { %v3444_v21 = vpop.f32.mrf.mxu0 }
 0x491   :  { %v3527_v7 = vadd.f32 %v3444_v21, %v632_v18  ;;  %v3558_v57 = vmul.f32 0.5, %v3526_v45  ;;  %v634_v18 = vadd.f32 %v13534_v29, %v9213_v16  ;;  %7718 = vtanh.f32 %v3557_v27  ;;  %v13560_v16 = vld [vmem:[#allocation119_spill] sm:$0xff] }
 0x492   :  { %v3446_v4 = vpop.f32.mrf.mxu0 }
 0x493   :  { %v3559_v21 = vmul.f32 0.5, %v3527_v7  ;;  %7720 = vtanh.f32 %v3558_v57  ;;  %v3528_v45 = vadd.f32 %v3446_v4, %v634_v18  ;;  %v13541_v18 = vld [vmem:[#allocation112_spill] sm:$0xff] }
 0x494   :  { %v3450_v13 = vpop.f32.mrf.mxu0 }
 0x495   :  { %v3529_v12 = vadd.f32 %v3450_v13, %v638_v56  ;;  %7722 = vtanh.f32 %v3559_v21 }
 0x496   :  { %v3452_v0 = vpop.f32.mrf.mxu0 }
 0x497   :  { %v3530_v25 = vadd.f32 %v3452_v0, %v640_v47  ;;  %v3561_v13 = vmul.f32 0.5, %v3529_v12  ;;  %v650_v0 = vadd.f32 %v13535_v52, %v9227_v23  ;;  %v13537_v47 = vld [vmem:[#allocation20_spill] sm:$0xff] }
 0x498   :  { %v3456_v31 = vpop.f32.mrf.mxu0  ;;  %v656_v44 = vadd.f32 %v13538_v34, %v13537_v47  ;;  %v13543_v34 = vld [vmem:[#allocation45_spill] sm:$0xff] }
 0x499   :  { %v3531_v10 = vadd.f32 %v3456_v31, %v644_v6  ;;  %v3562_v3 = vmul.f32 0.5, %v3530_v25  ;;  %v652_v31 = vadd.f32 %v13536_v24, %v9227_v23  ;;  %7724 = vtanh.f32 %v3561_v13  ;;  %v13539_v25 = vld [vmem:[#allocation95_spill] sm:$0xff]  ;;  %v13554_v23 = vld [vmem:[#allocation37_spill] sm:$0xff] }
 0x49a   :  { %v3458_v62 = vpop.f32.mrf.mxu0  ;;  %v658_v32 = vadd.f32 %v13539_v25, %v13537_v47  ;;  %v13546_v25 = vld [vmem:[#allocation97_spill] sm:$0xff]  ;;  %v700_v46 = vadd.f32 %v13560_v16, %v13554_v23 }
 0x49b   :  { %v3532_v39 = vadd.f32 %v3458_v62, %v646_v2  ;;  %v3563_v28 = vmul.f32 0.5, %v3531_v10  ;;  %7726 = vtanh.f32 %v3562_v3  ;;  %v3560_v2 = vmul.f32 0.5, %v3528_v45 }
 0x49c   :  { %v3462_v60 = vpop.f32.mrf.mxu0 }
 0x49d   :  { %v3533_v12 = vadd.f32 %v3462_v60, %v650_v0  ;;  %v3564_v62 = vmul.f32 0.5, %v3532_v39  ;;  %7728 = vtanh.f32 %v3563_v28  ;;  %v13540_v60 = vld [vmem:[#allocation42_spill] sm:$0xff]  ;;  %v7711_v39 = vpop.eup %7710  ;;  %v13542_v0 = vld [vmem:[#allocation113_spill] sm:$0xff] }
 0x49e   :  { %v3464_v55 = vpop.f32.mrf.mxu0  ;;  %v7713_v52 = vpop.eup %7712  ;;  %v688_v3 = vadd.f32 %v13542_v0, %v13540_v60 }
 0x49f   :  { %v3534_v6 = vadd.f32 %v3464_v55, %v652_v31  ;;  %v3565_v57 = vmul.f32 0.5, %v3533_v12  ;;  %7730 = vtanh.f32 %v3564_v62  ;;  %v686_v55 = vadd.f32 %v13541_v18, %v13540_v60  ;;  %v7715_v31 = vpop.eup %7714  ;;  %v13549_v60 = vld [vmem:[#allocation319_spill] sm:$0xff] }
 0x4a0   :  { %v3468_v54 = vpop.f32.mrf.mxu0  ;;  %7732 = vtanh.f32 %v3560_v2  ;;  %v3603_v53 = vadd.f32 1.0, %v7715_v31 }
 0x4a1   :  { %v3535_v27 = vadd.f32 %v3468_v54, %v656_v44  ;;  %v3566_v10 = vmul.f32 0.5, %v3534_v6  ;;  %7734 = vtanh.f32 %v3565_v57  ;;  %v13544_v44 = vld [vmem:[#allocation115_spill] sm:$0xff] }
 0x4a2   :  { %v3470_v15 = vpop.f32.mrf.mxu0  ;;  %v692_v12 = vadd.f32 %v13544_v44, %v13543_v34  ;;  %v13547_v57 = vld [vmem:[#allocation99_spill] sm:$0xff]  ;;  %v13550_v44 = vld [vmem:[#allocation101_spill] sm:$0xff] }
 0x4a3   :  { %v3536_v29 = vadd.f32 %v3470_v15, %v658_v32  ;;  %v3567_v13 = vmul.f32 0.5, %v3535_v27  ;;  %7736 = vtanh.f32 %v3566_v10  ;;  %v7717_v15 = vpop.eup %7716  ;;  %v13545_v27 = vld [vmem:[#allocation320_spill] sm:$0xff] }
 0x4a4   :  { %v10838_v40 = vpop.f32.mrf.mxu0  ;;  %v7719_v6 = vpop.eup %7718  ;;  %v662_v32 = vadd.f32 %v13546_v25, %v13545_v27  ;;  %v13548_v10 = vld [vmem:[#allocation116_spill] sm:$0xff]  ;;  %v13553_v25 = vld [vmem:[#allocation105_spill] sm:$0xff] }
 0x4a5   :  { %v3568_v45 = vmul.f32 0.5, %v3536_v29  ;;  %7738 = vtanh.f32 %v3567_v13  ;;  %v7721_v18 = vpop.eup %7720  ;;  %v694_v29 = vadd.f32 %v13548_v10, %v13543_v34  ;;  %v10884_v13 = vadd.f32 %v13550_v44, %v13549_v60  ;;  %v13555_v10 = vld [vmem:[#allocation118_spill] sm:$0xff]  ;;  %v13556_v44 = vld [vmem:[#allocation107_spill] sm:$0xff] }
 0x4a6   :  { %v10844_v26 = vpop.f32.mrf.mxu0  ;;  %v7723_v0 = vpop.eup %7722  ;;  %v3606_v49 = vadd.f32 1.0, %v7721_v18 }
 0x4a7   :  { %v3607_v51 = vadd.f32 1.0, %v7723_v0 }
 0x4a8   :  { %v10848_v9 = vpop.f32.mrf.mxu0  ;;  %v3630_v0 = vmul.f32 0.5, %v3606_v49 }
 0x4aa   :  { %v10852_v56 = vpop.f32.mrf.mxu0 }
 0x4ac   :  { %v10858_v7 = vpop.f32.mrf.mxu0 }
 0x4ae   :  { %v10862_v19 = vpop.f32.mrf.mxu0 }
 0x4b0   :  { %v10866_v4 = vpop.f32.mrf.mxu0 }
 0x4b2   :  { %v10868_v21 = vpop.f32.mrf.mxu0 }
 0x4b4   :  { %v3498_v54 = vpop.f32.mrf.mxu0 }
 0x4b5   :  { %v3545_v24 = vadd.f32 %v3498_v54, %v686_v55  ;;  %v664_v55 = vadd.f32 %v13547_v57, %v13545_v27  ;;  %v7725_v27 = vpop.eup %7724 }
 0x4b6   :  { %v3500_v28 = vpop.f32.mrf.mxu0  ;;  %v7727_v34 = vpop.eup %7726  ;;  %v3609_v41 = vadd.f32 1.0, %v7725_v27 }
 0x4b7   :  { %v3546_v62 = vadd.f32 %v3500_v28, %v688_v3  ;;  %7740 = vtanh.f32 %v3545_v24  ;;  %v13551_v3 = vld [vmem:[#allocation103_spill] sm:$0xff]  ;;  %v13552_v24 = vld [vmem:[#allocation317_spill] sm:$0xff] }
 0x4b8   :  { %v3504_v2 = vpop.f32.mrf.mxu0  ;;  %v10888_v28 = vadd.f32 %v13551_v3, %v13549_v60  ;;  %v10892_v47 = vadd.f32 %v13553_v25, %v13552_v24  ;;  %v10898_v38 = vadd.f32 %v13556_v44, %v13552_v24  ;;  %v13557_v3 = vld [vmem:[#allocation53_spill] sm:$0xff]  ;;  %v13559_v25 = vld [vmem:[#allocation110_spill] sm:$0xff] }
 0x4b9   :  { %7742 = vtanh.f32 %v3546_v62  ;;  %v3547_v54 = vadd.f32 %v3504_v2, %v692_v12  ;;  %v698_v62 = vadd.f32 %v13555_v10, %v13554_v23  ;;  %v3601_v12 = vadd.f32 1.0, %v7711_v39  ;;  %v13558_v60 = vld [vmem:[#allocation109_spill] sm:$0xff]  ;;  %v7729_v10 = vpop.eup %7728  ;;  %v13561_v39 = vld [vmem:[#allocation40_spill] sm:$0xff]  ;;  %v13563_v44 = vld [vmem:[#allocation122_spill] sm:$0xff] }
 0x4ba   :  { %7744 = vtanh.f32 %v3568_v45  ;;  %v3506_v57 = vpop.f32.mrf.mxu0  ;;  %v10902_v48 = vadd.f32 %v13558_v60, %v13557_v3  ;;  %v682_v45 = vadd.f32 %v13559_v25, %v13557_v3  ;;  %v706_v24 = vadd.f32 %v13563_v44, %v13561_v39  ;;  %v7731_v43 = vpop.eup %7730 }
 0x4bb   :  { %7746 = vtanh.f32 %v3547_v54  ;;  %v3548_v2 = vadd.f32 %v3506_v57, %v694_v29  ;;  %v13562_v54 = vld [vmem:[#allocation121_spill] sm:$0xff]  ;;  %v3602_v57 = vadd.f32 1.0, %v7713_v52  ;;  %v3604_v60 = vadd.f32 1.0, %v7717_v15  ;;  %v7733_v52 = vpop.eup %7732 }
 0x4bc   :  { %v3510_v63 = vpop.f32.mrf.mxu0  ;;  %v704_v29 = vadd.f32 %v13562_v54, %v13561_v39  ;;  %v3625_v25 = vmul.f32 0.5, %v3601_v12  ;;  %v3610_v3 = vadd.f32 1.0, %v7727_v34  ;;  %v3605_v23 = vadd.f32 1.0, %v7719_v6  ;;  %v7735_v31 = vpop.eup %7734 }
 0x4bd   :  { %7748 = vtanh.f32 %v3548_v2  ;;  %v3549_v22 = vadd.f32 %v3510_v63, %v698_v62  ;;  %v3611_v17 = vadd.f32 1.0, %v7729_v10  ;;  %v3626_v2 = vmul.f32 0.5, %v3602_v57  ;;  %v7737_v34 = vpop.eup %7736 }
 0x4be   :  { %v3512_v35 = vpop.f32.mrf.mxu0  ;;  %v3537_v63 = vadd.f32 %v10838_v40, %v662_v32  ;;  %v3627_v15 = vmul.f32 0.5, %v3603_v53  ;;  %v3628_v27 = vmul.f32 0.5, %v3604_v60  ;;  %v3633_v44 = vmul.f32 0.5, %v3609_v41  ;;  %v7739_v6 = vpop.eup %7738 }
 0x4bf   :  { %7750 = vtanh.f32 %v3549_v22  ;;  %v3550_v16 = vadd.f32 %v3512_v35, %v700_v46  ;;  %v3612_v39 = vadd.f32 1.0, %v7731_v43  ;;  %v3634_v22 = vmul.f32 0.5, %v3610_v3 }
 0x4c0   :  { %v3516_v54 = vpop.f32.mrf.mxu0  ;;  %v3538_v35 = vadd.f32 %v10844_v26, %v664_v55  ;;  %v3629_v18 = vmul.f32 0.5, %v3605_v23  ;;  %v3631_v10 = vmul.f32 0.5, %v3607_v51  ;;  %v3635_v57 = vmul.f32 0.5, %v3611_v17 }
 0x4c1   :  { %7752 = vtanh.f32 %v3550_v16  ;;  %v3551_v62 = vadd.f32 %v3516_v54, %v704_v29  ;;  %v3608_v32 = vadd.f32 1.0, %v7733_v52  ;;  %v3613_v29 = vadd.f32 1.0, %v7735_v31 }
 0x4c2   :  { %v3518_v12 = vpop.f32.mrf.mxu0  ;;  %v3569_v16 = vmul.f32 0.5, %v3537_v63  ;;  %v3657_v43 = vmul.f32 %v3633_v44, %v10659_v42  ;;  %v3636_v41 = vmul.f32 0.5, %v3612_v39  ;;  %v3614_v60 = vadd.f32 1.0, %v7737_v34 }
 0x4c3   :  { %7754 = vtanh.f32 %v3551_v62  ;;  %v3552_v46 = vadd.f32 %v3518_v12, %v706_v24  ;;  %v3658_v26 = vmul.f32 %v3634_v22, %v10661_v37  ;;  %v3570_v55 = vmul.f32 0.5, %v3538_v35 }
 0x4c4   :  { %v7741_v40 = vpop.eup %7740  ;;  %v3544_v23 = vadd.f32 %v10868_v21, %v682_v45  ;;  %v3659_v17 = vmul.f32 %v3635_v57, %v10668_v11  ;;  %v3542_v24 = vadd.f32 %v10862_v19, %v10898_v38  ;;  %v3543_v52 = vadd.f32 %v10866_v4, %v10902_v48 }
 0x4c5   :  { %7756 = vtanh.f32 %v3552_v46  ;;  %v3665_v3 = vmul.f32 %v7741_v40, %v3625_v25  ;;  %v3637_v39 = vmul.f32 0.5, %v3613_v29  ;;  %v3615_v25 = vadd.f32 1.0, %v7739_v6 }
 0x4c6   :  { %v7743_v53 = vpop.eup %7742  ;;  %v3660_v21 = vmul.f32 %v3636_v41, %v10673_v1  ;;  %v3638_v45 = vmul.f32 0.5, %v3614_v60  ;;  %v3540_v11 = vadd.f32 %v10852_v56, %v10888_v28  ;;  %v3541_v38 = vadd.f32 %v10858_v7, %v10892_v47 }
 0x4c7   :  { %v7745_v54 = vpop.eup %7744  ;;  %v3666_v49 = vmul.f32 %v7743_v53, %v3626_v2  ;;  %v10922_v42 = vadd.f32 %v3665_v3, %v3657_v43  ;;  %v3576_v2 = vmul.f32 0.5, %v3544_v23  ;;  %7758 = vtanh.f32 %v3569_v16 }
 0x4c8   :  { %v7747_v51 = vpop.eup %7746  ;;  %v3616_v19 = vadd.f32 1.0, %v7745_v54  ;;  %v3574_v44 = vmul.f32 0.5, %v3542_v24  ;;  %v3575_v12 = vmul.f32 0.5, %v3543_v52  ;;  %v3661_v1 = vmul.f32 %v3637_v39, %v10676_v20 }
 0x4c9   :  { %v10924_v63 = vadd.f32 %v3666_v49, %v3658_v26  ;;  %v3667_v37 = vmul.f32 %v7747_v51, %v3627_v15  ;;  %v3539_v15 = vadd.f32 %v10848_v9, %v10884_v13  ;;  %v3639_v34 = vmul.f32 0.5, %v3615_v25 }
 0x4ca   :  { %v7749_v62 = vpop.eup %7748  ;;  %v3662_v7 = vmul.f32 %v3638_v45, %v10679_v5  ;;  %7760 = vtanh.f32 %v3570_v55  ;;  %v3572_v47 = vmul.f32 0.5, %v3540_v11  ;;  %v3573_v35 = vmul.f32 0.5, %v3541_v38 }
 0x4cb   :  { %v10931_v48 = vadd.f32 %v3667_v37, %v3659_v17  ;;  %v3668_v4 = vmul.f32 %v7749_v62, %v3628_v27  ;;  %v3640_v27 = vmul.f32 0.5, %v3616_v19  ;;  %7762 = vtanh.f32 %v3576_v2 }
 0x4cc   :  { %v7751_v31 = vpop.eup %7750  ;;  %v3632_v13 = vmul.f32 0.5, %v3608_v32  ;;  %v3571_v57 = vmul.f32 0.5, %v3539_v15  ;;  %7764 = vtanh.f32 %v3575_v12  ;;  %v3663_v20 = vmul.f32 %v3639_v34, %v10682_v59 }
 0x4cd   :  { %v10936_v22 = vadd.f32 %v3668_v4, %v3660_v21  ;;  %v3669_v56 = vmul.f32 %v7751_v31, %v3629_v18  ;;  %7766 = vtanh.f32 %v3574_v44  ;;  %v3664_v5 = vmul.f32 %v3640_v27, %v10684_v36 }
 0x4ce   :  { %v7753_v28 = vpop.eup %7752  ;;  %7768 = vtanh.f32 %v3573_v35 }
 0x4cf   :  { %v10939_v46 = vadd.f32 %v3669_v56, %v3661_v1  ;;  %v3670_v6 = vmul.f32 %v7753_v28, %v3630_v0  ;;  %7770 = vtanh.f32 %v3572_v47 }
 0x4d0   :  { %v7755_v9 = vpop.eup %7754  ;;  %7772 = vtanh.f32 %v3571_v57  ;;  %v13573_v57 = vld [vmem:[#allocation10_spill] sm:$0xff] }
 0x4d1   :  { %v10942_v40 = vadd.f32 %v3670_v6, %v3662_v7  ;;  %v3671_v18 = vmul.f32 %v7755_v9, %v3631_v10  ;;  %v13570_v6 = vld [vmem:[#allocation6_spill] sm:$0xff]  ;;  %v13571_v9 = vld [vmem:[#allocation8_spill] sm:$0xff] }
 0x4d2   :  { %v7757_v29 = vpop.eup %7756 }
 0x4d3   :  { %v10945_v16 = vadd.f32 %v3671_v18, %v3663_v20  ;;  %v3672_v53 = vmul.f32 %v7757_v29, %v3632_v13  ;;  %7774 = vtanh.f32 %v10942_v40  ;;  %v13572_v13 = vld [vmem:[#allocation9_spill] sm:$0xff] }
 0x4d4   :  { %v7759_v59 = vpop.eup %7758 }
 0x4d5   :  { %v10947_v0 = vadd.f32 %v3672_v53, %v3664_v5  ;;  %7776 = vtanh.f32 %v10945_v16  ;;  %v3617_v38 = vadd.f32 1.0, %v7759_v59 }
 0x4d7   :  { %7778 = vtanh.f32 %v10947_v0  ;;  %v7761_v36 = vpop.eup %7760  ;;  %v3641_v7 = vmul.f32 0.5, %v3617_v38 }
 0x4d8   :  { %7780 = vtanh.f32 %v10939_v46  ;;  %v7763_v10 = vpop.eup %7762  ;;  %v3618_v62 = vadd.f32 1.0, %v7761_v36 }
 0x4d9   :  { %7782 = vtanh.f32 %v10936_v22  ;;  %v7765_v32 = vpop.eup %7764  ;;  %v3624_v60 = vadd.f32 1.0, %v7763_v10 }
 0x4da   :  { %7784 = vtanh.f32 %v10931_v48  ;;  %v7767_v43 = vpop.eup %7766  ;;  %v3623_v54 = vadd.f32 1.0, %v7765_v32  ;;  %v3642_v28 = vmul.f32 0.5, %v3618_v62 }
 0x4db   :  { %7786 = vtanh.f32 %v10924_v63  ;;  %v7769_v41 = vpop.eup %7768  ;;  %v3622_v55 = vadd.f32 1.0, %v7767_v43  ;;  %v3648_v24 = vmul.f32 0.5, %v3624_v60 }
 0x4dc   :  { %7788 = vtanh.f32 %v10922_v42  ;;  %v7771_v3 = vpop.eup %7770  ;;  %v3621_v49 = vadd.f32 1.0, %v7769_v41  ;;  %v3647_v25 = vmul.f32 0.5, %v3623_v54  ;;  %v13574_v54 = vld [vmem:[#allocation31_spill] sm:$0xff] }
 0x4dd   :  { %v7773_v26 = vpop.eup %7772  ;;  %v3620_v17 = vadd.f32 1.0, %v7771_v3  ;;  %v3646_v45 = vmul.f32 0.5, %v3622_v55 }
 0x4de   :  { %v3619_v39 = vadd.f32 1.0, %v7773_v26  ;;  %v3645_v19 = vmul.f32 0.5, %v3621_v49  ;;  %v13575_v26 = vld [vmem:[#allocation46_spill] sm:$0xff] }
 0x4df   :  { %v3644_v15 = vmul.f32 0.5, %v3620_v17  ;;  %v775_v55 = vadd.f32 %v13575_v26, %v13574_v54  ;;  %v13577_v17 = vld [vmem:[#allocation25_spill] sm:$0xff] }
 0x4e0   :  { %v7775_v23 = vpop.eup %7774  ;;  %v3643_v12 = vmul.f32 0.5, %v3619_v39 }
 0x4e1   :  { %v3694_v31 = vmul.f32 %v7775_v23, %v3646_v45  ;;  %v13576_v23 = vld [vmem:[#allocation47_spill] sm:$0xff]  ;;  %v13580_v45 = vld [vmem:[#allocation13_spill] sm:$0xff] }
 0x4e2   :  { %v7777_v51 = vpop.eup %7776  ;;  %v777_v49 = vadd.f32 %v13576_v23, %v13574_v54  ;;  %v13591_v23 = vld [vmem:[#allocation57_spill] sm:$0xff] }
 0x4e3   :  { %v3695_v2 = vmul.f32 %v7777_v51, %v3647_v25  ;;  %v13579_v25 = vld [vmem:[#allocation49_spill] sm:$0xff] }
 0x4e4   :  { %v7779_v52 = vpop.eup %7778 }
 0x4e5   :  { %v7781_v37 = vpop.eup %7780  ;;  %v3696_v21 = vmul.f32 %v7779_v52, %v3648_v24  ;;  %v13578_v24 = vld [vmem:[#allocation48_spill] sm:$0xff] }
 0x4e6   :  { %v7783_v11 = vpop.eup %7782  ;;  %v3693_v1 = vmul.f32 %v7781_v37, %v3645_v19  ;;  %v781_v52 = vadd.f32 %v13578_v24, %v13577_v17  ;;  %v783_v37 = vadd.f32 %v13579_v25, %v13577_v17 }
 0x4e7   :  { %v7785_v4 = vpop.eup %7784  ;;  %3753 = vmatprep.subr.mxu1 %v3696_v21  ;;  %v3692_v56 = vmul.f32 %v7783_v11, %v3644_v15  ;;  %v13581_v11 = vld [vmem:[#allocation50_spill] sm:$0xff] }
 0x4e8   :  { %v7787_v44 = vpop.eup %7786  ;;  %3754 = vmatpush1.msra.mxu1 %v3695_v2  ;;  %v3691_v47 = vmul.f32 %v7785_v4, %v3643_v12  ;;  %v787_v38 = vadd.f32 %v13581_v11, %v13580_v45  ;;  %v13582_v2 = vld [vmem:[#allocation52_spill] sm:$0xff]  ;;  %v13584_v12 = vld [vmem:[#allocation55_spill] sm:$0xff] }
 0x4e9   :  { %v7789_v34 = vpop.eup %7788  ;;  %3755 = vmatprep.subr.mxu1 %v3694_v31  ;;  %v3690_v35 = vmul.f32 %v7787_v44, %v3642_v28  ;;  %v789_v4 = vadd.f32 %v13582_v2, %v13580_v45  ;;  %v13583_v44 = vld [vmem:[#allocation15_spill] sm:$0xff]  ;;  %v13585_v28 = vld [vmem:[#allocation29_spill] sm:$0xff]  ;;  %v13595_v2 = vld [vmem:[#allocation20_spill] sm:$0xff] }
 0x4ea   :  { %3756 = vmatpush1.msra.mxu1 %v3693_v1  ;;  %v3689_v27 = vmul.f32 %v7789_v34, %v3641_v7  ;;  %v793_v1 = vadd.f32 %v13584_v12, %v13583_v44  ;;  %v13586_v7 = vld [vmem:[#allocation59_spill] sm:$0xff] }
 0x4eb   :  { %3757 = vmatprep.subr.mxu1 %v3692_v56 }
 0x4ec   :  { %3758 = vmatpush1.msra.mxu1 %v3691_v47  ;;  %v799_v47 = vadd.f32 %v13586_v7, %v13585_v28  ;;  %v13597_v7 = vld [vmem:[#allocation74_spill] sm:$0xff] }
 0x4ed   :  { %3759 = vmatprep.subr.mxu1 %v3690_v35 }
 0x4ee   :  { %3760 = vmatpush1.msra.mxu1 %v3689_v27 }
 0x4ef   :  { %7355 = vmatmul.mubr.msk.f32.vlgmr.msra.gmra.mxu1 %vm2573_vm1, %v10697_v33  ;;  %v13564_v33 = vld [vmem:[#allocation51_spill] sm:$0xff] }
 0x4f0   :  { %3799 = vmatprep.mubr.f32.mxu1 %v13135_v50 }
 0x4f3   :  { %7356 = vmatmul.mubr.msk.f32.gmra.mxu1 %vm2573_vm1, %v10705_v58  ;;  %v13565_v58 = vld [vmem:[#allocation54_spill] sm:$0xff] }
 0x4f4   :  { %3805 = vmatprep.mubr.f32.mxu1 %v13135_v50 }
 0x4f7   :  { %7357 = vmatmul.mubr.msk.f32.gmra.mxu1 %vm2573_vm1, %v10713_v8  ;;  %v13566_v8 = vld [vmem:[#allocation56_spill] sm:$0xff] }
 0x4f8   :  { %3811 = vmatprep.mubr.f32.mxu1 %v13135_v50 }
 0x4fb   :  { %7358 = vmatmul.mubr.msk.f32.gmra.mxu1 %vm2573_vm1, %v10721_v61  ;;  %v13567_v61 = vld [vmem:[#allocation58_spill] sm:$0xff] }
 0x4fc   :  { %3817 = vmatprep.mubr.f32.mxu1 %v13135_v50 }
 0x4ff   :  { %7359 = vmatmul.mubr.msk.f32.gmra.mxu1 %vm2573_vm1, %v10729_v14  ;;  %v13568_v14 = vld [vmem:[#allocation60_spill] sm:$0xff] }
 0x500   :  { %3823 = vmatprep.mubr.f32.mxu1 %v13135_v50 }
 0x503   :  { %7360 = vmatmul.mubr.msk.f32.gmra.mxu1 %vm2573_vm1, %v10737_v30  ;;  %v13569_v30 = vld [vmem:[#allocation62_spill] sm:$0xff] }
 0x504   :  { %3829 = vmatprep.mubr.f32.mxu1 %v13135_v50 }
 0x507   :  { %7361 = vmatmul.mubr.msk.f32.gmra.mxu1 %vm2573_vm1, %v13564_v33 }
 0x508   :  { %3835 = vmatprep.mubr.f32.mxu1 %v13135_v50 }
 0x50b   :  { %7362 = vmatmul.mubr.msk.f32.gmra.mxu1 %vm2573_vm1, %v13565_v58  ;;  %v13587_v58 = vld [vmem:[#allocation61_spill] sm:$0xff] }
 0x50c   :  { %3841 = vmatprep.mubr.f32.mxu1 %v13135_v50 }
 0x50f   :  { %7363 = vmatmul.mubr.msk.f32.gmra.mxu1 %vm2573_vm1, %v13566_v8  ;;  %v801_v8 = vadd.f32 %v13587_v58, %v13585_v28 }
 0x510   :  { %3847 = vmatprep.mubr.f32.mxu1 %v13135_v50 }
 0x513   :  { %7364 = vmatmul.mubr.msk.f32.gmra.mxu1 %vm2573_vm1, %v13567_v61 }
 0x514   :  { %3853 = vmatprep.mubr.f32.mxu1 %v13135_v50 }
 0x517   :  { %7365 = vmatmul.mubr.msk.f32.gmra.mxu1 %vm2573_vm1, %v13568_v14 }
 0x518   :  { %3859 = vmatprep.mubr.f32.mxu1 %v13135_v50 }
 0x51b   :  { %7366 = vmatmul.mubr.msk.f32.gmra.mxu1 %vm2573_vm1, %v13569_v30  ;;  %v13588_v30 = vld [vmem:[#allocation23_spill] sm:$0xff] }
 0x51c   :  { %3865 = vmatprep.mubr.f32.mxu1 %v13135_v50 }
 0x51f   :  { %7367 = vmatmul.mubr.msk.f32.gmra.mxu1 %vm2573_vm1, %v13570_v6  ;;  %v13589_v6 = vld [vmem:[#allocation63_spill] sm:$0xff] }
 0x520   :  { %3871 = vmatprep.mubr.f32.mxu1 %v13135_v50 }
 0x523   :  { %7368 = vmatmul.mubr.msk.f32.gmra.mxu1 %vm2573_vm1, %v13571_v9  ;;  %v805_v9 = vadd.f32 %v13589_v6, %v13588_v30 }
 0x524   :  { %3877 = vmatprep.mubr.f32.mxu1 %v13135_v50 }
 0x527   :  { %7369 = vmatmul.mubr.msk.f32.gmra.mxu1 %vm2573_vm1, %v13572_v13 }
 0x528   :  { %3883 = vmatprep.mubr.f32.mxu1 %v13135_v50 }
 0x52b   :  { %7370 = vmatmul.mubr.msk.f32.gmra.mxu1 %vm2573_vm1, %v13573_v57 }
 0x52c   :  { %4531 = vmatprep.mubr.f32.mxu1 %v13135_v50 }
 0x5af   :  { %v3795_v20 = vpop.f32.mrf.mxu1 }
 0x5b0   :  { %v3890_v39 = vadd.f32 %v3795_v20, %v775_v55 }
 0x5b1   :  { %v3797_v18 = vpop.f32.mrf.mxu1 }
 0x5b2   :  { %v3891_v62 = vadd.f32 %v3797_v18, %v777_v49  ;;  %v3922_v34 = vmul.f32 0.5, %v3890_v39  ;;  %v795_v49 = vadd.f32 %v13591_v23, %v13583_v44  ;;  %v13592_v39 = vld [vmem:[#allocation18_spill] sm:$0xff] }
 0x5b3   :  { %v3801_v29 = vpop.f32.mrf.mxu1 }
 0x5b4   :  { %v3892_v19 = vadd.f32 %v3801_v29, %v781_v52  ;;  %v3923_v35 = vmul.f32 0.5, %v3891_v62  ;;  %7790 = vtanh.f32 %v3922_v34  ;;  %v13594_v62 = vld [vmem:[#allocation70_spill] sm:$0xff] }
 0x5b5   :  { %v3803_v5 = vpop.f32.mrf.mxu1 }
 0x5b6   :  { %v3893_v31 = vadd.f32 %v3803_v5, %v783_v37  ;;  %v3924_v61 = vmul.f32 0.5, %v3892_v19  ;;  %v13590_v5 = vld [vmem:[#allocation65_spill] sm:$0xff]  ;;  %7792 = vtanh.f32 %v3923_v35 }
 0x5b7   :  { %v3807_v53 = vpop.f32.mrf.mxu1 }
 0x5b8   :  { %v3894_v56 = vadd.f32 %v3807_v53, %v787_v38  ;;  %v3925_v13 = vmul.f32 0.5, %v3893_v31  ;;  %v807_v53 = vadd.f32 %v13590_v5, %v13588_v30  ;;  %7794 = vtanh.f32 %v3924_v61 }
 0x5b9   :  { %v3809_v59 = vpop.f32.mrf.mxu1 }
 0x5ba   :  { %v3895_v27 = vadd.f32 %v3809_v59, %v789_v4  ;;  %v3926_v18 = vmul.f32 0.5, %v3894_v56  ;;  %7796 = vtanh.f32 %v3925_v13  ;;  %v13596_v4 = vld [vmem:[#allocation72_spill] sm:$0xff] }
 0x5bb   :  { %v3813_v36 = vpop.f32.mrf.mxu1  ;;  %v817_v31 = vadd.f32 %v13596_v4, %v13595_v2 }
 0x5bc   :  { %v3896_v14 = vadd.f32 %v3813_v36, %v793_v1  ;;  %v3927_v59 = vmul.f32 0.5, %v3895_v27  ;;  %7798 = vtanh.f32 %v3926_v18 }
 0x5bd   :  { %v3815_v10 = vpop.f32.mrf.mxu1 }
 0x5be   :  { %v3928_v36 = vmul.f32 0.5, %v3896_v14  ;;  %7800 = vtanh.f32 %v3927_v59  ;;  %v3897_v11 = vadd.f32 %v3815_v10, %v795_v49  ;;  %v13599_v14 = vld [vmem:[#allocation92_spill] sm:$0xff] }
 0x5bf   :  { %v3819_v32 = vpop.f32.mrf.mxu1 }
 0x5c0   :  { %v3898_v57 = vadd.f32 %v3819_v32, %v799_v47  ;;  %7802 = vtanh.f32 %v3928_v36  ;;  %v819_v47 = vadd.f32 %v13597_v7, %v13595_v2  ;;  %v3929_v35 = vmul.f32 0.5, %v3897_v11  ;;  %v13602_v36 = vld [vmem:[#allocation96_spill] sm:$0xff]  ;;  %v13609_v7 = vld [vmem:[#allocation82_spill] sm:$0xff] }
 0x5c1   :  { %v3821_v43 = vpop.f32.mrf.mxu1 }
 0x5c2   :  { %v3899_v29 = vadd.f32 %v3821_v43, %v801_v8  ;;  %v3930_v32 = vmul.f32 0.5, %v3898_v57  ;;  %v13593_v43 = vld [vmem:[#allocation67_spill] sm:$0xff]  ;;  %v13600_v57 = vld [vmem:[#allocation94_spill] sm:$0xff] }
 0x5c3   :  { %v3825_v41 = vpop.f32.mrf.mxu1  ;;  %v811_v25 = vadd.f32 %v13593_v43, %v13592_v39  ;;  %v13604_v43 = vld [vmem:[#allocation76_spill] sm:$0xff] }
 0x5c4   :  { %v3900_v26 = vadd.f32 %v3825_v41, %v805_v9  ;;  %v3931_v37 = vmul.f32 0.5, %v3899_v29  ;;  %v813_v41 = vadd.f32 %v13594_v62, %v13592_v39  ;;  %7804 = vtanh.f32 %v3930_v32  ;;  %v7791_v9 = vpop.eup %7790 }
 0x5c5   :  { %v3827_v60 = vpop.f32.mrf.mxu1  ;;  %v7793_v13 = vpop.eup %7792 }
 0x5c6   :  { %v3901_v24 = vadd.f32 %v3827_v60, %v807_v53  ;;  %v3932_v38 = vmul.f32 0.5, %v3900_v26  ;;  %7806 = vtanh.f32 %v3931_v37  ;;  %v7795_v5 = vpop.eup %7794  ;;  %v13601_v26 = vld [vmem:[#allocation45_spill] sm:$0xff] }
 0x5c7   :  { %v3831_v3 = vpop.f32.mrf.mxu1  ;;  %v853_v23 = vadd.f32 %v13602_v36, %v13601_v26 }
 0x5c8   :  { %v3902_v60 = vadd.f32 %v3831_v3, %v811_v25  ;;  %v3933_v12 = vmul.f32 0.5, %v3901_v24  ;;  %7808 = vtanh.f32 %v3932_v38  ;;  %v13598_v3 = vld [vmem:[#allocation42_spill] sm:$0xff]  ;;  %v13603_v24 = vld [vmem:[#allocation320_spill] sm:$0xff] }
 0x5c9   :  { %v3833_v51 = vpop.f32.mrf.mxu1  ;;  %v849_v18 = vadd.f32 %v13600_v57, %v13598_v3  ;;  %v823_v25 = vadd.f32 %v13604_v43, %v13603_v24  ;;  %v13606_v38 = vld [vmem:[#allocation98_spill] sm:$0xff]  ;;  %v3970_v57 = vadd.f32 1.0, %v7791_v9  ;;  %v13619_v9 = vld [vmem:[#allocation40_spill] sm:$0xff] }
 0x5ca   :  { %v3903_v1 = vadd.f32 %v3833_v51, %v813_v41  ;;  %v3934_v27 = vmul.f32 0.5, %v3902_v60  ;;  %7810 = vtanh.f32 %v3933_v12  ;;  %v847_v51 = vadd.f32 %v13599_v14, %v13598_v3  ;;  %v13605_v41 = vld [vmem:[#allocation78_spill] sm:$0xff]  ;;  %v13607_v12 = vld [vmem:[#allocation319_spill] sm:$0xff] }
 0x5cb   :  { %v3837_v21 = vpop.f32.mrf.mxu1  ;;  %7812 = vtanh.f32 %v3929_v35  ;;  %v825_v11 = vadd.f32 %v13605_v41, %v13603_v24  ;;  %v855_v4 = vadd.f32 %v13606_v38, %v13601_v26  ;;  %v13610_v35 = vld [vmem:[#allocation317_spill] sm:$0xff]  ;;  %v13618_v41 = vld [vmem:[#allocation102_spill] sm:$0xff] }
 0x5cc   :  { %v3904_v56 = vadd.f32 %v3837_v21, %v817_v31  ;;  %v3935_v58 = vmul.f32 0.5, %v3903_v1  ;;  %7814 = vtanh.f32 %v3934_v27  ;;  %v13608_v1 = vld [vmem:[#allocation80_spill] sm:$0xff] }
 0x5cd   :  { %v3839_v15 = vpop.f32.mrf.mxu1  ;;  %v13611_v27 = vld [vmem:[#allocation84_spill] sm:$0xff] }
 0x5ce   :  { %v3905_v8 = vadd.f32 %v3839_v15, %v819_v47  ;;  %v3936_v6 = vmul.f32 0.5, %v3904_v56  ;;  %7816 = vtanh.f32 %v3935_v58  ;;  %v7797_v15 = vpop.eup %7796  ;;  %v11067_v56 = vadd.f32 %v13608_v1, %v13607_v12 }
 0x5cf   :  { %v11021_v33 = vpop.f32.mrf.mxu1  ;;  %v7799_v32 = vpop.eup %7798  ;;  %v11071_v47 = vadd.f32 %v13609_v7, %v13607_v12  ;;  %v11075_v58 = vadd.f32 %v13611_v27, %v13610_v35  ;;  %v3971_v27 = vadd.f32 1.0, %v7793_v13 }
 0x5d0   :  { %v3937_v53 = vmul.f32 0.5, %v3905_v8  ;;  %7818 = vtanh.f32 %v3936_v6  ;;  %v7801_v62 = vpop.eup %7800  ;;  %v13613_v6 = vld [vmem:[#allocation100_spill] sm:$0xff] }
 0x5d1   :  { %v11027_v20 = vpop.f32.mrf.mxu1  ;;  %v7803_v60 = vpop.eup %7802  ;;  %v3975_v3 = vadd.f32 1.0, %v7801_v62 }
 0x5d2   :  { %v7805_v14 = vpop.eup %7804  ;;  %v3976_v2 = vadd.f32 1.0, %v7803_v60 }
 0x5d3   :  { %v11031_v55 = vpop.f32.mrf.mxu1  ;;  %v3978_v12 = vadd.f32 1.0, %v7805_v14 }
 0x5d5   :  { %v11035_v52 = vpop.f32.mrf.mxu1 }
 0x5d7   :  { %v11041_v19 = vpop.f32.mrf.mxu1 }
 0x5d9   :  { %v11045_v34 = vpop.f32.mrf.mxu1 }
 0x5db   :  { %v11049_v10 = vpop.f32.mrf.mxu1 }
 0x5dd   :  { %v11051_v61 = vpop.f32.mrf.mxu1 }
 0x5df   :  { %v3867_v21 = vpop.f32.mrf.mxu1 }
 0x5e0   :  { %v3914_v29 = vadd.f32 %v3867_v21, %v847_v51  ;;  %v13612_v51 = vld [vmem:[#allocation37_spill] sm:$0xff] }
 0x5e1   :  { %v3869_v59 = vpop.f32.mrf.mxu1  ;;  %v859_v21 = vadd.f32 %v13613_v6, %v13612_v51  ;;  %v861_v38 = vadd.f32 %v13618_v41, %v13612_v51  ;;  %v13621_v6 = vld [vmem:[#allocation106_spill] sm:$0xff]  ;;  %v3974_v51 = vadd.f32 1.0, %v7799_v32  ;;  %v3907_v32 = vadd.f32 %v11027_v20, %v825_v11 }
 0x5e2   :  { %v3915_v49 = vadd.f32 %v3869_v59, %v849_v18  ;;  %7820 = vtanh.f32 %v3914_v29  ;;  %v7807_v29 = vpop.eup %7806  ;;  %v13614_v59 = vld [vmem:[#allocation86_spill] sm:$0xff] }
 0x5e3   :  { %v3873_v37 = vpop.f32.mrf.mxu1  ;;  %v11081_v36 = vadd.f32 %v13614_v59, %v13610_v35  ;;  %v7809_v7 = vpop.eup %7808  ;;  %v867_v59 = vadd.f32 %v13621_v6, %v13619_v9  ;;  %v3972_v35 = vadd.f32 1.0, %v7795_v5  ;;  %v4002_v6 = vmul.f32 0.5, %v3978_v12 }
 0x5e4   :  { %7822 = vtanh.f32 %v3915_v49  ;;  %v3916_v31 = vadd.f32 %v3873_v37, %v853_v23  ;;  %v13615_v23 = vld [vmem:[#allocation53_spill] sm:$0xff]  ;;  %v13616_v49 = vld [vmem:[#allocation88_spill] sm:$0xff]  ;;  %v13617_v37 = vld [vmem:[#allocation90_spill] sm:$0xff]  ;;  %v7811_v26 = vpop.eup %7810  ;;  %v3980_v39 = vadd.f32 1.0, %v7809_v7  ;;  %v3998_v60 = vmul.f32 0.5, %v3974_v51 }
 0x5e5   :  { %7824 = vtanh.f32 %v3937_v53  ;;  %v3875_v8 = vpop.f32.mrf.mxu1  ;;  %v11085_v43 = vadd.f32 %v13616_v49, %v13615_v23  ;;  %v843_v53 = vadd.f32 %v13617_v37, %v13615_v23  ;;  %v3973_v49 = vadd.f32 1.0, %v7797_v15  ;;  %v7813_v13 = vpop.eup %7812 }
 0x5e6   :  { %7826 = vtanh.f32 %v3916_v31  ;;  %v3917_v18 = vadd.f32 %v3875_v8, %v855_v4  ;;  %v13620_v31 = vld [vmem:[#allocation104_spill] sm:$0xff]  ;;  %v3994_v37 = vmul.f32 0.5, %v3970_v57  ;;  %v3979_v23 = vadd.f32 1.0, %v7807_v29  ;;  %v7815_v5 = vpop.eup %7814 }
 0x5e7   :  { %v3879_v1 = vpop.f32.mrf.mxu1  ;;  %v865_v4 = vadd.f32 %v13620_v31, %v13619_v9  ;;  %v3996_v15 = vmul.f32 0.5, %v3972_v35  ;;  %v3997_v14 = vmul.f32 0.5, %v3973_v49  ;;  %v3981_v9 = vadd.f32 1.0, %v7811_v26  ;;  %v7817_v29 = vpop.eup %7816 }
 0x5e8   :  { %7828 = vtanh.f32 %v3917_v18  ;;  %v3918_v8 = vadd.f32 %v3879_v1, %v859_v21  ;;  %v3995_v18 = vmul.f32 0.5, %v3971_v27  ;;  %v3906_v21 = vadd.f32 %v11021_v33, %v823_v25  ;;  %v7819_v62 = vpop.eup %7818 }
 0x5e9   :  { %v3881_v24 = vpop.f32.mrf.mxu1  ;;  %v4000_v7 = vmul.f32 0.5, %v3976_v2  ;;  %v4004_v27 = vmul.f32 0.5, %v3980_v39  ;;  %v3977_v25 = vadd.f32 1.0, %v7813_v13  ;;  %v4026_v26 = vmul.f32 %v4002_v6, %v10922_v42 }
 0x5ea   :  { %7830 = vtanh.f32 %v3918_v8  ;;  %v3919_v41 = vadd.f32 %v3881_v24, %v861_v38  ;;  %v4003_v8 = vmul.f32 0.5, %v3979_v23  ;;  %v3999_v38 = vmul.f32 0.5, %v3975_v3 }
 0x5eb   :  { %v3885_v31 = vpop.f32.mrf.mxu1  ;;  %v4005_v12 = vmul.f32 0.5, %v3981_v9  ;;  %v3983_v49 = vadd.f32 1.0, %v7817_v29  ;;  %v3939_v11 = vmul.f32 0.5, %v3907_v32  ;;  %v3913_v51 = vadd.f32 %v11051_v61, %v843_v53 }
 0x5ec   :  { %7832 = vtanh.f32 %v3919_v41  ;;  %v3920_v1 = vadd.f32 %v3885_v31, %v865_v4  ;;  %v3982_v4 = vadd.f32 1.0, %v7815_v5  ;;  %v3938_v41 = vmul.f32 0.5, %v3906_v21 }
 0x5ed   :  { %v3887_v57 = vpop.f32.mrf.mxu1  ;;  %v4027_v20 = vmul.f32 %v4003_v8, %v10924_v63  ;;  %v4028_v39 = vmul.f32 %v4004_v27, %v10931_v48  ;;  %v3912_v13 = vadd.f32 %v11049_v10, %v11085_v43  ;;  %v4029_v61 = vmul.f32 %v4005_v12, %v10936_v22 }
 0x5ee   :  { %7834 = vtanh.f32 %v3920_v1  ;;  %v3921_v24 = vadd.f32 %v3887_v57, %v867_v59  ;;  %v3911_v59 = vadd.f32 %v11045_v34, %v11081_v36  ;;  %v4006_v9 = vmul.f32 0.5, %v3982_v4 }
 0x5ef   :  { %v7821_v33 = vpop.eup %7820  ;;  %v4007_v53 = vmul.f32 0.5, %v3983_v49  ;;  %v3909_v48 = vadd.f32 %v11035_v52, %v11071_v47  ;;  %v3910_v34 = vadd.f32 %v11041_v19, %v11075_v58  ;;  %v3944_v57 = vmul.f32 0.5, %v3912_v13 }
 0x5f0   :  { %7836 = vtanh.f32 %v3921_v24  ;;  %v4034_v23 = vmul.f32 %v7821_v33, %v3994_v37  ;;  %v3984_v37 = vadd.f32 1.0, %v7819_v62  ;;  %v3943_v6 = vmul.f32 0.5, %v3911_v59 }
 0x5f1   :  { %v7823_v35 = vpop.eup %7822  ;;  %7838 = vtanh.f32 %v3938_v41  ;;  %v4030_v22 = vmul.f32 %v4006_v9, %v10939_v46  ;;  %v4031_v19 = vmul.f32 %v4007_v53, %v10942_v40  ;;  %v3941_v58 = vmul.f32 0.5, %v3909_v48 }
 0x5f2   :  { %v7825_v31 = vpop.eup %7824  ;;  %v4035_v3 = vmul.f32 %v7823_v35, %v3995_v18  ;;  %v11105_v42 = vadd.f32 %v4034_v23, %v4026_v26  ;;  %v3945_v18 = vmul.f32 0.5, %v3913_v51  ;;  %v4008_v29 = vmul.f32 0.5, %v3984_v37 }
 0x5f3   :  { %v7827_v2 = vpop.eup %7826  ;;  %v3985_v36 = vadd.f32 1.0, %v7825_v31  ;;  %7840 = vtanh.f32 %v3939_v11  ;;  %v3942_v32 = vmul.f32 0.5, %v3910_v34 }
 0x5f4   :  { %v11107_v21 = vadd.f32 %v4035_v3, %v4027_v20  ;;  %v4036_v63 = vmul.f32 %v7827_v2, %v3996_v15  ;;  %v3908_v15 = vadd.f32 %v11031_v55, %v11067_v56  ;;  %7842 = vtanh.f32 %v3945_v18 }
 0x5f5   :  { %v7829_v1 = vpop.eup %7828  ;;  %v4001_v56 = vmul.f32 0.5, %v3977_v25  ;;  %7844 = vtanh.f32 %v3944_v57  ;;  %v4032_v46 = vmul.f32 %v4008_v29, %v10945_v16 }
 0x5f6   :  { %v11114_v10 = vadd.f32 %v4036_v63, %v4028_v39  ;;  %v4037_v43 = vmul.f32 %v7829_v1, %v3997_v14  ;;  %v4009_v14 = vmul.f32 0.5, %v3985_v36  ;;  %v3940_v27 = vmul.f32 0.5, %v3908_v15 }
 0x5f7   :  { %v7831_v5 = vpop.eup %7830  ;;  %7846 = vtanh.f32 %v3943_v6 }
 0x5f8   :  { %v11119_v8 = vadd.f32 %v4037_v43, %v4029_v61  ;;  %v4038_v52 = vmul.f32 %v7831_v5, %v3998_v60  ;;  %7848 = vtanh.f32 %v3942_v32  ;;  %v4033_v40 = vmul.f32 %v4009_v14, %v10947_v0 }
 0x5f9   :  { %v7833_v47 = vpop.eup %7832  ;;  %7850 = vtanh.f32 %v3941_v58 }
 0x5fa   :  { %v11122_v24 = vadd.f32 %v4038_v52, %v4030_v22  ;;  %v4039_v62 = vmul.f32 %v7833_v47, %v3999_v38  ;;  %7852 = vtanh.f32 %v3940_v27  ;;  %v11167_v27 = vld [vmem:[%s12908_s2 + $0x18] sm:$0xff] }
 0x5fb   :  { %v7835_v55 = vpop.eup %7834 }
 0x5fc   :  { %v11125_v33 = vadd.f32 %v4039_v62, %v4031_v19  ;;  %v4040_v60 = vmul.f32 %v7835_v55, %v4000_v7  ;;  %v11143_v62 = vld [vmem:[%s12908_s2] sm:$0xff]  ;;  %v11151_v55 = vld [vmem:[%s12908_s2 + $0x8] sm:$0xff] }
 0x5fd   :  { %v7837_v4 = vpop.eup %7836 }
 0x5fe   :  { %v11128_v41 = vadd.f32 %v4040_v60, %v4032_v46  ;;  %v4041_v35 = vmul.f32 %v7837_v4, %v4001_v56  ;;  %7854 = vtanh.f32 %v11125_v33  ;;  %v7839_v16 = vpop.eup %7838  ;;  %v11159_v56 = vld [vmem:[%s12908_s2 + $0x10] sm:$0xff]  ;;  %v11175_v46 = vld [vmem:[%s12908_s2 + $0x20] sm:$0xff]  ;;  %v11183_v60 = vld [vmem:[%s12908_s2 + $0x28] sm:$0xff] }
 0x5ff   :  { %v3986_v34 = vadd.f32 1.0, %v7839_v16  ;;  %v11191_v4 = vld [vmem:[%s12908_s2 + $0x30] sm:$0xff]  ;;  %v11215_v16 = vld [vmem:[%s12908_s2 + $0x48] sm:$0xff] }
 0x600   :  { %v11130_v38 = vadd.f32 %v4041_v35, %v4033_v40  ;;  %7856 = vtanh.f32 %v11128_v41  ;;  %v7841_v0 = vpop.eup %7840  ;;  %13622 = vst [vmem:[#allocation11_spill] sm:$0xff] %v11191_v4  ;;  %v11199_v40 = vld [vmem:[%s12908_s2 + $0x38] sm:$0xff]  ;;  %v11207_v35 = vld [vmem:[%s12908_s2 + $0x40] sm:$0xff]  ;;  %13625 = vst [vmem:[#allocation14_spill] sm:$0xff] %v11215_v16 }
 0x601   :  { %v7843_v7 = vpop.eup %7842  ;;  %v3987_v1 = vadd.f32 1.0, %v7841_v0  ;;  %v4010_v19 = vmul.f32 0.5, %v3986_v34  ;;  %13623 = vst [vmem:[#allocation7_spill] sm:$0xff] %v11199_v40  ;;  %13624 = vst [vmem:[#allocation12_spill] sm:$0xff] %v11207_v35  ;;  %v11223_v0 = vld [vmem:[%s12908_s2 + $0x50] sm:$0xff] }
 0x602   :  { %7858 = vtanh.f32 %v11130_v38  ;;  %v7845_v25 = vpop.eup %7844  ;;  %v3993_v49 = vadd.f32 1.0, %v7843_v7  ;;  %13626 = vst [vmem:[#allocation16_spill] sm:$0xff] %v11223_v0  ;;  %v11231_v7 = vld [vmem:[%s12908_s2 + $0x58] sm:$0xff] }
 0x603   :  { %7860 = vtanh.f32 %v11122_v24  ;;  %v3992_v31 = vadd.f32 1.0, %v7845_v25  ;;  %v4011_v47 = vmul.f32 0.5, %v3987_v1  ;;  %13627 = vst [vmem:[#allocation17_spill] sm:$0xff] %v11231_v7  ;;  %v11239_v25 = vld [vmem:[%s12908_s2 + $0x60] sm:$0xff] }
 0x604   :  { %7862 = vtanh.f32 %v11119_v8  ;;  %v7847_v26 = vpop.eup %7846  ;;  %v4017_v59 = vmul.f32 0.5, %v3993_v49  ;;  %13628 = vst [vmem:[#allocation34_spill] sm:$0xff] %v11239_v25  ;;  %v11263_v49 = vld [vmem:[%s12908_s2 + $0x78] sm:$0xff]  ;;  %v13632_v1 = vld [vmem:[#allocation124_spill] sm:$0xff] }
 0x605   :  { %7864 = vtanh.f32 %v11114_v10  ;;  %v7849_v12 = vpop.eup %7848  ;;  %v3991_v11 = vadd.f32 1.0, %v7847_v26  ;;  %v4016_v37 = vmul.f32 0.5, %v3992_v31  ;;  %v11247_v26 = vld [vmem:[%s12908_s2 + $0x68] sm:$0xff]  ;;  %13631 = vst [vmem:[#allocation19_spill] sm:$0xff] %v11263_v49 }
 0x606   :  { %7866 = vtanh.f32 %v11107_v21  ;;  %v7851_v23 = vpop.eup %7850  ;;  %v3990_v3 = vadd.f32 1.0, %v7849_v12  ;;  %13629 = vst [vmem:[#allocation35_spill] sm:$0xff] %v11247_v26  ;;  %v11255_v12 = vld [vmem:[%s12908_s2 + $0x70] sm:$0xff] }
 0x607   :  { %7868 = vtanh.f32 %v11105_v42  ;;  %v7853_v20 = vpop.eup %7852  ;;  %v3989_v39 = vadd.f32 1.0, %v7851_v23  ;;  %v4015_v53 = vmul.f32 0.5, %v3991_v11  ;;  %13630 = vst [vmem:[#allocation36_spill] sm:$0xff] %v11255_v12 }
 0x608   :  { %v3988_v9 = vadd.f32 1.0, %v7853_v20  ;;  %v4014_v36 = vmul.f32 0.5, %v3990_v3 }
 0x609   :  { %v4013_v15 = vmul.f32 0.5, %v3989_v39 }
 0x60a   :  { %v4012_v57 = vmul.f32 0.5, %v3988_v9 }
 0x60b   :  { %v7855_v51 = vpop.eup %7854 }
 0x60c   :  { %v4063_v5 = vmul.f32 %v7855_v51, %v4015_v53  ;;  %v13633_v53 = vld [vmem:[#allocation125_spill] sm:$0xff] }
 0x60d   :  { %v7857_v2 = vpop.eup %7856 }
 0x60e   :  { %v4064_v18 = vmul.f32 %v7857_v2, %v4016_v37 }
 0x60f   :  { %v7859_v13 = vpop.eup %7858 }
 0x610   :  { %v7861_v63 = vpop.eup %7860  ;;  %v4065_v61 = vmul.f32 %v7859_v13, %v4017_v59 }
 0x611   :  { %v7863_v48 = vpop.eup %7862  ;;  %v4062_v22 = vmul.f32 %v7861_v63, %v4014_v36  ;;  %v13634_v36 = vld [vmem:[#allocation127_spill] sm:$0xff] }
 0x612   :  { %v7865_v43 = vpop.eup %7864  ;;  %4122 = vmatprep.subr.mxu0 %v4065_v61  ;;  %v4061_v52 = vmul.f32 %v7863_v48, %v4013_v15  ;;  %v936_v61 = vadd.f32 %v13632_v1, %v13574_v54  ;;  %v938_v48 = vadd.f32 %v13633_v53, %v13574_v54  ;;  %v13670_v54 = vld [vmem:[#allocation163_spill] sm:$0xff] }
 0x613   :  { %v7867_v6 = vpop.eup %7866  ;;  %4123 = vmatpush1.msra.mxu0 %v4064_v18  ;;  %v4060_v58 = vmul.f32 %v7865_v43, %v4012_v57  ;;  %v942_v18 = vadd.f32 %v13634_v36, %v13577_v17 }
 0x614   :  { %v7869_v29 = vpop.eup %7868  ;;  %4124 = vmatprep.subr.mxu0 %v4063_v5  ;;  %v4059_v32 = vmul.f32 %v7867_v6, %v4011_v47  ;;  %v13635_v5 = vld [vmem:[#allocation128_spill] sm:$0xff]  ;;  %v13637_v47 = vld [vmem:[#allocation131_spill] sm:$0xff] }
 0x615   :  { %4125 = vmatpush1.msra.mxu0 %v4062_v22  ;;  %v4058_v14 = vmul.f32 %v7869_v29, %v4010_v19  ;;  %v944_v15 = vadd.f32 %v13635_v5, %v13577_v17  ;;  %v13636_v22 = vld [vmem:[#allocation130_spill] sm:$0xff]  ;;  %v950_v19 = vadd.f32 %v13637_v47, %v13580_v45 }
 0x616   :  { %4126 = vmatprep.subr.mxu0 %v4061_v52  ;;  %v948_v29 = vadd.f32 %v13636_v22, %v13580_v45  ;;  %v13640_v22 = vld [vmem:[#allocation137_spill] sm:$0xff] }
 0x617   :  { %4127 = vmatpush1.msra.mxu0 %v4060_v58 }
 0x618   :  { %4128 = vmatprep.subr.mxu0 %v4059_v32 }
 0x619   :  { %4129 = vmatpush1.msra.mxu0 %v4058_v14  ;;  %v13638_v14 = vld [vmem:[#allocation133_spill] sm:$0xff] }
 0x61a   :  { %7371 = vmatmul.mubr.msk.f32.vlgmr.msra.gmra.mxu0 %vm2573_vm1, %v11143_v62  ;;  %v954_v1 = vadd.f32 %v13638_v14, %v13583_v44 }
 0x61b   :  { %4168 = vmatprep.mubr.f32.mxu0 %v13135_v50 }
 0x61e   :  { %7372 = vmatmul.mubr.msk.f32.gmra.mxu0 %vm2573_vm1, %v11151_v55 }
 0x61f   :  { %4174 = vmatprep.mubr.f32.mxu0 %v13135_v50 }
 0x622   :  { %7373 = vmatmul.mubr.msk.f32.gmra.mxu0 %vm2573_vm1, %v11159_v56 }
 0x623   :  { %4180 = vmatprep.mubr.f32.mxu0 %v13135_v50 }
 0x626   :  { %7374 = vmatmul.mubr.msk.f32.gmra.mxu0 %vm2573_vm1, %v11167_v27 }
 0x627   :  { %4186 = vmatprep.mubr.f32.mxu0 %v13135_v50 }
 0x62a   :  { %7375 = vmatmul.mubr.msk.f32.gmra.mxu0 %vm2573_vm1, %v11175_v46 }
 0x62b   :  { %4192 = vmatprep.mubr.f32.mxu0 %v13135_v50 }
 0x62e   :  { %7376 = vmatmul.mubr.msk.f32.gmra.mxu0 %vm2573_vm1, %v11183_v60 }
 0x62f   :  { %4198 = vmatprep.mubr.f32.mxu0 %v13135_v50 }
 0x632   :  { %7377 = vmatmul.mubr.msk.f32.gmra.mxu0 %vm2573_vm1, %v11191_v4 }
 0x633   :  { %4204 = vmatprep.mubr.f32.mxu0 %v13135_v50 }
 0x636   :  { %7378 = vmatmul.mubr.msk.f32.gmra.mxu0 %vm2573_vm1, %v11199_v40 }
 0x637   :  { %4210 = vmatprep.mubr.f32.mxu0 %v13135_v50 }
 0x63a   :  { %7379 = vmatmul.mubr.msk.f32.gmra.mxu0 %vm2573_vm1, %v11207_v35 }
 0x63b   :  { %4216 = vmatprep.mubr.f32.mxu0 %v13135_v50 }
 0x63e   :  { %7380 = vmatmul.mubr.msk.f32.gmra.mxu0 %vm2573_vm1, %v11215_v16 }
 0x63f   :  { %4222 = vmatprep.mubr.f32.mxu0 %v13135_v50 }
 0x642   :  { %7381 = vmatmul.mubr.msk.f32.gmra.mxu0 %vm2573_vm1, %v11223_v0 }
 0x643   :  { %4228 = vmatprep.mubr.f32.mxu0 %v13135_v50 }
 0x646   :  { %7382 = vmatmul.mubr.msk.f32.gmra.mxu0 %vm2573_vm1, %v11231_v7 }
 0x647   :  { %4234 = vmatprep.mubr.f32.mxu0 %v13135_v50 }
 0x64a   :  { %7383 = vmatmul.mubr.msk.f32.gmra.mxu0 %vm2573_vm1, %v11239_v25 }
 0x64b   :  { %4240 = vmatprep.mubr.f32.mxu0 %v13135_v50 }
 0x64e   :  { %7384 = vmatmul.mubr.msk.f32.gmra.mxu0 %vm2573_vm1, %v11247_v26 }
 0x64f   :  { %4246 = vmatprep.mubr.f32.mxu0 %v13135_v50 }
 0x652   :  { %7385 = vmatmul.mubr.msk.f32.gmra.mxu0 %vm2573_vm1, %v11255_v12 }
 0x653   :  { %4252 = vmatprep.mubr.f32.mxu0 %v13135_v50 }
 0x656   :  { %7386 = vmatmul.mubr.msk.f32.gmra.mxu0 %vm2573_vm1, %v11263_v49 }
 0x657   :  { %4900 = vmatprep.mubr.f32.mxu0 %v13135_v50 }
 0x6da   :  { %v4164_v23 = vpop.f32.mrf.mxu0 }
 0x6db   :  { %v4259_v43 = vadd.f32 %v4164_v23, %v936_v61  ;;  %v13639_v23 = vld [vmem:[#allocation136_spill] sm:$0xff] }
 0x6dc   :  { %v4166_v31 = vpop.f32.mrf.mxu0  ;;  %v960_v61 = vadd.f32 %v13639_v23, %v13585_v28 }
 0x6dd   :  { %v4260_v6 = vadd.f32 %v4166_v31, %v938_v48  ;;  %v4291_v53 = vmul.f32 0.5, %v4259_v43 }
 0x6de   :  { %v4170_v20 = vpop.f32.mrf.mxu0 }
 0x6df   :  { %v4261_v52 = vadd.f32 %v4170_v20, %v942_v18  ;;  %v4292_v5 = vmul.f32 0.5, %v4260_v6  ;;  %v962_v20 = vadd.f32 %v13640_v22, %v13585_v28  ;;  %7870 = vtanh.f32 %v4291_v53  ;;  %v13642_v6 = vld [vmem:[#allocation140_spill] sm:$0xff]  ;;  %v13644_v53 = vld [vmem:[#allocation18_spill] sm:$0xff] }
 0x6e0   :  { %v4172_v11 = vpop.f32.mrf.mxu0 }
 0x6e1   :  { %v4262_v58 = vadd.f32 %v4172_v11, %v944_v15  ;;  %v4293_v18 = vmul.f32 0.5, %v4261_v52  ;;  %v13641_v11 = vld [vmem:[#allocation139_spill] sm:$0xff]  ;;  %7872 = vtanh.f32 %v4292_v5  ;;  %v13643_v52 = vld [vmem:[#allocation134_spill] sm:$0xff] }
 0x6e2   :  { %v4176_v51 = vpop.f32.mrf.mxu0  ;;  %v966_v15 = vadd.f32 %v13641_v11, %v13588_v30  ;;  %v13646_v5 = vld [vmem:[#allocation143_spill] sm:$0xff]  ;;  %v13648_v11 = vld [vmem:[#allocation145_spill] sm:$0xff] }
 0x6e3   :  { %v4263_v36 = vadd.f32 %v4176_v51, %v948_v29  ;;  %v4294_v47 = vmul.f32 0.5, %v4262_v58  ;;  %7874 = vtanh.f32 %v4293_v18  ;;  %v13647_v18 = vld [vmem:[#allocation20_spill] sm:$0xff] }
 0x6e4   :  { %v4178_v3 = vpop.f32.mrf.mxu0 }
 0x6e5   :  { %v4264_v31 = vadd.f32 %v4178_v3, %v950_v19  ;;  %v4295_v51 = vmul.f32 0.5, %v4263_v36  ;;  %v968_v3 = vadd.f32 %v13642_v6, %v13588_v30  ;;  %7876 = vtanh.f32 %v4294_v47  ;;  %v13664_v30 = vld [vmem:[#allocation37_spill] sm:$0xff] }
 0x6e6   :  { %v4182_v2 = vpop.f32.mrf.mxu0  ;;  %v1022_v49 = vadd.f32 %v13670_v54, %v13664_v30 }
 0x6e7   :  { %v4265_v17 = vadd.f32 %v4182_v2, %v954_v1  ;;  %v4296_v29 = vmul.f32 0.5, %v4264_v31  ;;  %v956_v1 = vadd.f32 %v13643_v52, %v13583_v44  ;;  %7878 = vtanh.f32 %v4295_v51 }
 0x6e8   :  { %v4184_v39 = vpop.f32.mrf.mxu0 }
 0x6e9   :  { %v4297_v2 = vmul.f32 0.5, %v4265_v17  ;;  %7880 = vtanh.f32 %v4296_v29  ;;  %v4266_v31 = vadd.f32 %v4184_v39, %v956_v1 }
 0x6ea   :  { %v4188_v59 = vpop.f32.mrf.mxu0 }
 0x6eb   :  { %v4267_v45 = vadd.f32 %v4188_v59, %v960_v61  ;;  %7882 = vtanh.f32 %v4297_v2  ;;  %v4298_v29 = vmul.f32 0.5, %v4266_v31 }
 0x6ec   :  { %v4190_v13 = vpop.f32.mrf.mxu0 }
 0x6ed   :  { %v4268_v43 = vadd.f32 %v4190_v13, %v962_v20  ;;  %v4299_v59 = vmul.f32 0.5, %v4267_v45  ;;  %v13645_v13 = vld [vmem:[#allocation142_spill] sm:$0xff] }
 0x6ee   :  { %v4194_v9 = vpop.f32.mrf.mxu0  ;;  %v972_v36 = vadd.f32 %v13645_v13, %v13644_v53  ;;  %v7871_v13 = vpop.eup %7870 }
 0x6ef   :  { %v4269_v19 = vadd.f32 %v4194_v9, %v966_v15  ;;  %v4300_v22 = vmul.f32 0.5, %v4268_v43  ;;  %v974_v9 = vadd.f32 %v13646_v5, %v13644_v53  ;;  %v978_v15 = vadd.f32 %v13648_v11, %v13647_v18  ;;  %v13649_v43 = vld [vmem:[#allocation146_spill] sm:$0xff] }
 0x6f0   :  { %v4196_v37 = vpop.f32.mrf.mxu0  ;;  %7884 = vtanh.f32 %v4299_v59  ;;  %v13651_v59 = vld [vmem:[#allocation158_spill] sm:$0xff] }
 0x6f1   :  { %v4270_v58 = vadd.f32 %v4196_v37, %v968_v3  ;;  %v4301_v20 = vmul.f32 0.5, %v4269_v19  ;;  %7886 = vtanh.f32 %v4300_v22  ;;  %v980_v3 = vadd.f32 %v13649_v43, %v13647_v18  ;;  %v13652_v22 = vld [vmem:[#allocation159_spill] sm:$0xff]  ;;  %v13655_v43 = vld [vmem:[#allocation320_spill] sm:$0xff] }
 0x6f2   :  { %v4200_v63 = vpop.f32.mrf.mxu0 }
 0x6f3   :  { %v4271_v45 = vadd.f32 %v4200_v63, %v972_v36  ;;  %v4302_v37 = vmul.f32 0.5, %v4270_v58  ;;  %7888 = vtanh.f32 %v4301_v20  ;;  %v13650_v63 = vld [vmem:[#allocation42_spill] sm:$0xff]  ;;  %v7873_v36 = vpop.eup %7872 }
 0x6f4   :  { %v4202_v34 = vpop.f32.mrf.mxu0  ;;  %v1010_v5 = vadd.f32 %v13652_v22, %v13650_v63  ;;  %v7875_v31 = vpop.eup %7874 }
 0x6f5   :  { %v4272_v47 = vadd.f32 %v4202_v34, %v974_v9  ;;  %v4303_v19 = vmul.f32 0.5, %v4271_v45  ;;  %7890 = vtanh.f32 %v4302_v37  ;;  %v1008_v34 = vadd.f32 %v13651_v59, %v13650_v63  ;;  %v13654_v45 = vld [vmem:[#allocation160_spill] sm:$0xff]  ;;  %v13659_v63 = vld [vmem:[#allocation319_spill] sm:$0xff] }
 0x6f6   :  { %v4206_v57 = vpop.f32.mrf.mxu0  ;;  %7892 = vtanh.f32 %v4298_v29  ;;  %v4341_v25 = vadd.f32 1.0, %v7875_v31 }
 0x6f7   :  { %v4273_v51 = vadd.f32 %v4206_v57, %v978_v15  ;;  %v4304_v52 = vmul.f32 0.5, %v4272_v47  ;;  %7894 = vtanh.f32 %v4303_v19  ;;  %v13653_v15 = vld [vmem:[#allocation45_spill] sm:$0xff] }
 0x6f8   :  { %v4208_v32 = vpop.f32.mrf.mxu0  ;;  %v1014_v37 = vadd.f32 %v13654_v45, %v13653_v15  ;;  %v13657_v19 = vld [vmem:[#allocation149_spill] sm:$0xff]  ;;  %v13660_v45 = vld [vmem:[#allocation151_spill] sm:$0xff] }
 0x6f9   :  { %v4274_v1 = vadd.f32 %v4208_v32, %v980_v3  ;;  %v4305_v58 = vmul.f32 0.5, %v4273_v51  ;;  %7896 = vtanh.f32 %v4304_v52  ;;  %v7877_v32 = vpop.eup %7876  ;;  %v13656_v3 = vld [vmem:[#allocation148_spill] sm:$0xff]  ;;  %v13658_v52 = vld [vmem:[#allocation161_spill] sm:$0xff] }
 0x6fa   :  { %v11284_v48 = vpop.f32.mrf.mxu0  ;;  %v7879_v51 = vpop.eup %7878  ;;  %v984_v29 = vadd.f32 %v13656_v3, %v13655_v43  ;;  %v13663_v3 = vld [vmem:[#allocation154_spill] sm:$0xff] }
 0x6fb   :  { %v4306_v20 = vmul.f32 0.5, %v4274_v1  ;;  %7898 = vtanh.f32 %v4305_v58  ;;  %v7881_v18 = vpop.eup %7880  ;;  %v1016_v1 = vadd.f32 %v13658_v52, %v13653_v15  ;;  %v11330_v58 = vadd.f32 %v13660_v45, %v13659_v63  ;;  %v13665_v52 = vld [vmem:[#allocation162_spill] sm:$0xff]  ;;  %v13666_v45 = vld [vmem:[#allocation155_spill] sm:$0xff] }
 0x6fc   :  { %v11290_v14 = vpop.f32.mrf.mxu0  ;;  %v7883_v22 = vpop.eup %7882  ;;  %v4344_v35 = vadd.f32 1.0, %v7881_v18 }
 0x6fd   :  { %v4345_v40 = vadd.f32 1.0, %v7883_v22 }
 0x6fe   :  { %v11294_v23 = vpop.f32.mrf.mxu0  ;;  %v4368_v22 = vmul.f32 0.5, %v4344_v35 }
 0x700   :  { %v11298_v61 = vpop.f32.mrf.mxu0 }
 0x702   :  { %v11304_v17 = vpop.f32.mrf.mxu0 }
 0x704   :  { %v11308_v6 = vpop.f32.mrf.mxu0 }
 0x706   :  { %v11312_v39 = vpop.f32.mrf.mxu0 }
 0x708   :  { %v11314_v2 = vpop.f32.mrf.mxu0 }
 0x70a   :  { %v4236_v57 = vpop.f32.mrf.mxu0 }
 0x70b   :  { %v4283_v9 = vadd.f32 %v4236_v57, %v1008_v34  ;;  %v986_v34 = vadd.f32 %v13657_v19, %v13655_v43  ;;  %v7885_v43 = vpop.eup %7884 }
 0x70c   :  { %v4238_v11 = vpop.f32.mrf.mxu0  ;;  %v7887_v15 = vpop.eup %7886  ;;  %v4347_v7 = vadd.f32 1.0, %v7885_v43 }
 0x70d   :  { %v4284_v47 = vadd.f32 %v4238_v11, %v1010_v5  ;;  %7900 = vtanh.f32 %v4283_v9  ;;  %v13661_v5 = vld [vmem:[#allocation152_spill] sm:$0xff]  ;;  %v13662_v9 = vld [vmem:[#allocation317_spill] sm:$0xff] }
 0x70e   :  { %v4242_v59 = vpop.f32.mrf.mxu0  ;;  %v11334_v11 = vadd.f32 %v13661_v5, %v13659_v63  ;;  %v11338_v53 = vadd.f32 %v13663_v3, %v13662_v9  ;;  %v11344_v28 = vadd.f32 %v13666_v45, %v13662_v9  ;;  %v13667_v5 = vld [vmem:[#allocation53_spill] sm:$0xff]  ;;  %v13668_v63 = vld [vmem:[#allocation156_spill] sm:$0xff] }
 0x70f   :  { %7902 = vtanh.f32 %v4284_v47  ;;  %v4285_v57 = vadd.f32 %v4242_v59, %v1014_v37  ;;  %v1020_v47 = vadd.f32 %v13665_v52, %v13664_v30  ;;  %v4339_v37 = vadd.f32 1.0, %v7871_v13  ;;  %v13669_v3 = vld [vmem:[#allocation157_spill] sm:$0xff]  ;;  %v7889_v52 = vpop.eup %7888  ;;  %v13671_v13 = vld [vmem:[#allocation40_spill] sm:$0xff] }
 0x710   :  { %7904 = vtanh.f32 %v4306_v20  ;;  %v4244_v19 = vpop.f32.mrf.mxu0  ;;  %v11348_v44 = vadd.f32 %v13668_v63, %v13667_v5  ;;  %v1004_v20 = vadd.f32 %v13669_v3, %v13667_v5  ;;  %v13673_v45 = vld [vmem:[#allocation165_spill] sm:$0xff]  ;;  %v4342_v63 = vadd.f32 1.0, %v7877_v32  ;;  %v7891_v16 = vpop.eup %7890 }
 0x711   :  { %7906 = vtanh.f32 %v4285_v57  ;;  %v4286_v59 = vadd.f32 %v4244_v19, %v1016_v1  ;;  %v13672_v57 = vld [vmem:[#allocation164_spill] sm:$0xff]  ;;  %v4340_v19 = vadd.f32 1.0, %v7873_v36  ;;  %v1028_v9 = vadd.f32 %v13673_v45, %v13671_v13  ;;  %v7893_v36 = vpop.eup %7892 }
 0x712   :  { %v4248_v12 = vpop.f32.mrf.mxu0  ;;  %v1026_v1 = vadd.f32 %v13672_v57, %v13671_v13  ;;  %v4363_v3 = vmul.f32 0.5, %v4339_v37  ;;  %v4348_v5 = vadd.f32 1.0, %v7887_v15  ;;  %v4343_v30 = vadd.f32 1.0, %v7879_v51  ;;  %v7895_v31 = vpop.eup %7894 }
 0x713   :  { %7908 = vtanh.f32 %v4286_v59  ;;  %v4287_v26 = vadd.f32 %v4248_v12, %v1020_v47  ;;  %v4349_v4 = vadd.f32 1.0, %v7889_v52  ;;  %v4364_v59 = vmul.f32 0.5, %v4340_v19  ;;  %v7897_v15 = vpop.eup %7896 }
 0x714   :  { %v4250_v0 = vpop.f32.mrf.mxu0  ;;  %v4275_v12 = vadd.f32 %v11284_v48, %v984_v29  ;;  %v4365_v32 = vmul.f32 0.5, %v4341_v25  ;;  %v4366_v43 = vmul.f32 0.5, %v4342_v63  ;;  %v4371_v45 = vmul.f32 0.5, %v4347_v7  ;;  %v7899_v18 = vpop.eup %7898 }
 0x715   :  { %7910 = vtanh.f32 %v4287_v26  ;;  %v4288_v54 = vadd.f32 %v4250_v0, %v1022_v49  ;;  %v4350_v13 = vadd.f32 1.0, %v7891_v16  ;;  %v4372_v26 = vmul.f32 0.5, %v4348_v5 }
 0x716   :  { %v4254_v57 = vpop.f32.mrf.mxu0  ;;  %v4276_v0 = vadd.f32 %v11290_v14, %v986_v34  ;;  %v4367_v51 = vmul.f32 0.5, %v4343_v30  ;;  %v4369_v52 = vmul.f32 0.5, %v4345_v40  ;;  %v4373_v19 = vmul.f32 0.5, %v4349_v4 }
 0x717   :  { %7912 = vtanh.f32 %v4288_v54  ;;  %v4289_v47 = vadd.f32 %v4254_v57, %v1026_v1  ;;  %v4346_v29 = vadd.f32 1.0, %v7893_v36  ;;  %v4351_v1 = vadd.f32 1.0, %v7895_v31 }
 0x718   :  { %v4256_v37 = vpop.f32.mrf.mxu0  ;;  %v4307_v54 = vmul.f32 0.5, %v4275_v12  ;;  %v4395_v16 = vmul.f32 %v4371_v45, %v11105_v42  ;;  %v4374_v7 = vmul.f32 0.5, %v4350_v13  ;;  %v4352_v63 = vadd.f32 1.0, %v7897_v15 }
 0x719   :  { %7914 = vtanh.f32 %v4289_v47  ;;  %v4290_v49 = vadd.f32 %v4256_v37, %v1028_v9  ;;  %v4396_v14 = vmul.f32 %v4372_v26, %v11107_v21  ;;  %v4308_v34 = vmul.f32 0.5, %v4276_v0 }
 0x71a   :  { %v7901_v48 = vpop.eup %7900  ;;  %v4282_v30 = vadd.f32 %v11314_v2, %v1004_v20  ;;  %v4397_v4 = vmul.f32 %v4373_v19, %v11114_v10  ;;  %v4280_v9 = vadd.f32 %v11308_v6, %v11344_v28  ;;  %v4281_v36 = vadd.f32 %v11312_v39, %v11348_v44 }
 0x71b   :  { %7916 = vtanh.f32 %v4290_v49  ;;  %v4403_v5 = vmul.f32 %v7901_v48, %v4363_v3  ;;  %v4375_v13 = vmul.f32 0.5, %v4351_v1  ;;  %v4353_v3 = vadd.f32 1.0, %v7899_v18 }
 0x71c   :  { %v7903_v25 = vpop.eup %7902  ;;  %v4398_v2 = vmul.f32 %v4374_v7, %v11119_v8  ;;  %v4376_v20 = vmul.f32 0.5, %v4352_v63  ;;  %v4278_v10 = vadd.f32 %v11298_v61, %v11334_v11  ;;  %v4279_v28 = vadd.f32 %v11304_v17, %v11338_v53 }
 0x71d   :  { %v7905_v57 = vpop.eup %7904  ;;  %v4404_v35 = vmul.f32 %v7903_v25, %v4364_v59  ;;  %v11368_v42 = vadd.f32 %v4403_v5, %v4395_v16  ;;  %v4314_v59 = vmul.f32 0.5, %v4282_v30  ;;  %7918 = vtanh.f32 %v4307_v54 }
 0x71e   :  { %v7907_v40 = vpop.eup %7906  ;;  %v4354_v6 = vadd.f32 1.0, %v7905_v57  ;;  %v4312_v45 = vmul.f32 0.5, %v4280_v9  ;;  %v4313_v37 = vmul.f32 0.5, %v4281_v36  ;;  %v4399_v8 = vmul.f32 %v4375_v13, %v11122_v24 }
 0x71f   :  { %v11370_v12 = vadd.f32 %v4404_v35, %v4396_v14  ;;  %v4405_v21 = vmul.f32 %v7907_v40, %v4365_v32  ;;  %v4277_v32 = vadd.f32 %v11294_v23, %v11330_v58  ;;  %v4377_v15 = vmul.f32 0.5, %v4353_v3 }
 0x720   :  { %v7909_v47 = vpop.eup %7908  ;;  %v4400_v53 = vmul.f32 %v4376_v20, %v11125_v33  ;;  %7920 = vtanh.f32 %v4308_v34  ;;  %v4310_v17 = vmul.f32 0.5, %v4278_v10  ;;  %v4311_v0 = vmul.f32 0.5, %v4279_v28 }
 0x721   :  { %v11377_v44 = vadd.f32 %v4405_v21, %v4397_v4  ;;  %v4406_v39 = vmul.f32 %v7909_v47, %v4366_v43  ;;  %v4378_v43 = vmul.f32 0.5, %v4354_v6  ;;  %7922 = vtanh.f32 %v4314_v59 }
 0x722   :  { %v7911_v31 = vpop.eup %7910  ;;  %v4370_v58 = vmul.f32 0.5, %v4346_v29  ;;  %v4309_v19 = vmul.f32 0.5, %v4277_v32  ;;  %7924 = vtanh.f32 %v4313_v37  ;;  %v4401_v24 = vmul.f32 %v4377_v15, %v11128_v41 }
 0x723   :  { %v11382_v26 = vadd.f32 %v4406_v39, %v4398_v2  ;;  %v4407_v61 = vmul.f32 %v7911_v31, %v4367_v51  ;;  %7926 = vtanh.f32 %v4312_v45  ;;  %v4402_v33 = vmul.f32 %v4378_v43, %v11130_v38 }
 0x724   :  { %v7913_v11 = vpop.eup %7912  ;;  %7928 = vtanh.f32 %v4311_v0 }
 0x725   :  { %v11385_v49 = vadd.f32 %v4407_v61, %v4399_v8  ;;  %v4408_v18 = vmul.f32 %v7913_v11, %v4368_v22  ;;  %7930 = vtanh.f32 %v4310_v17 }
 0x726   :  { %v7915_v23 = vpop.eup %7914  ;;  %7932 = vtanh.f32 %v4309_v19  ;;  %v13683_v19 = vld [vmem:[#allocation19_spill] sm:$0xff] }
 0x727   :  { %v11388_v48 = vadd.f32 %v4408_v18, %v4400_v53  ;;  %v4409_v51 = vmul.f32 %v7915_v23, %v4369_v52  ;;  %v13680_v18 = vld [vmem:[#allocation34_spill] sm:$0xff]  ;;  %v13681_v23 = vld [vmem:[#allocation35_spill] sm:$0xff] }
 0x728   :  { %v7917_v1 = vpop.eup %7916 }
 0x729   :  { %v11391_v54 = vadd.f32 %v4409_v51, %v4401_v24  ;;  %v4410_v25 = vmul.f32 %v7917_v1, %v4370_v58  ;;  %7934 = vtanh.f32 %v11388_v48  ;;  %v13682_v58 = vld [vmem:[#allocation36_spill] sm:$0xff] }
 0x72a   :  { %v7919_v41 = vpop.eup %7918 }
 0x72b   :  { %v11393_v22 = vadd.f32 %v4410_v25, %v4402_v33  ;;  %7936 = vtanh.f32 %v11391_v54  ;;  %v4355_v28 = vadd.f32 1.0, %v7919_v41 }
 0x72d   :  { %7938 = vtanh.f32 %v11393_v22  ;;  %v7921_v38 = vpop.eup %7920  ;;  %v4379_v53 = vmul.f32 0.5, %v4355_v28 }
 0x72e   :  { %7940 = vtanh.f32 %v11385_v49  ;;  %v7923_v52 = vpop.eup %7922  ;;  %v4356_v47 = vadd.f32 1.0, %v7921_v38 }
 0x72f   :  { %7942 = vtanh.f32 %v11382_v26  ;;  %v7925_v29 = vpop.eup %7924  ;;  %v4362_v63 = vadd.f32 1.0, %v7923_v52 }
 0x730   :  { %7944 = vtanh.f32 %v11377_v44  ;;  %v7927_v16 = vpop.eup %7926  ;;  %v4361_v57 = vadd.f32 1.0, %v7925_v29  ;;  %v4380_v11 = vmul.f32 0.5, %v4356_v47 }
 0x731   :  { %7946 = vtanh.f32 %v11370_v12  ;;  %v7929_v7 = vpop.eup %7928  ;;  %v4360_v34 = vadd.f32 1.0, %v7927_v16  ;;  %v4386_v9 = vmul.f32 0.5, %v4362_v63 }
 0x732   :  { %7948 = vtanh.f32 %v11368_v42  ;;  %v7931_v5 = vpop.eup %7930  ;;  %v4359_v35 = vadd.f32 1.0, %v7929_v7  ;;  %v4385_v3 = vmul.f32 0.5, %v4361_v57  ;;  %v13684_v57 = vld [vmem:[#allocation31_spill] sm:$0xff] }
 0x733   :  { %v7933_v14 = vpop.eup %7932  ;;  %v4358_v4 = vadd.f32 1.0, %v7931_v5  ;;  %v4384_v2 = vmul.f32 0.5, %v4360_v34 }
 0x734   :  { %v4357_v13 = vadd.f32 1.0, %v7933_v14  ;;  %v4383_v6 = vmul.f32 0.5, %v4359_v35  ;;  %v13685_v14 = vld [vmem:[#allocation108_spill] sm:$0xff] }
 0x735   :  { %v4382_v31 = vmul.f32 0.5, %v4358_v4  ;;  %v1097_v34 = vadd.f32 %v13685_v14, %v13684_v57  ;;  %v13687_v4 = vld [vmem:[#allocation25_spill] sm:$0xff] }
 0x736   :  { %v7935_v30 = vpop.eup %7934  ;;  %v4381_v37 = vmul.f32 0.5, %v4357_v13 }
 0x737   :  { %v4432_v32 = vmul.f32 %v7935_v30, %v4384_v2  ;;  %v13686_v30 = vld [vmem:[#allocation111_spill] sm:$0xff] }
 0x738   :  { %v7937_v40 = vpop.eup %7936  ;;  %v1099_v35 = vadd.f32 %v13686_v30, %v13684_v57  ;;  %v13701_v30 = vld [vmem:[#allocation129_spill] sm:$0xff] }
 0x739   :  { %v4433_v59 = vmul.f32 %v7937_v40, %v4385_v3  ;;  %v13689_v3 = vld [vmem:[#allocation117_spill] sm:$0xff] }
 0x73a   :  { %v7939_v36 = vpop.eup %7938 }
 0x73b   :  { %v7941_v21 = vpop.eup %7940  ;;  %v4434_v20 = vmul.f32 %v7939_v36, %v4386_v9  ;;  %v13688_v9 = vld [vmem:[#allocation114_spill] sm:$0xff] }
 0x73c   :  { %v7943_v10 = vpop.eup %7942  ;;  %v4431_v8 = vmul.f32 %v7941_v21, %v4383_v6  ;;  %v1103_v36 = vadd.f32 %v13688_v9, %v13687_v4  ;;  %v1105_v21 = vadd.f32 %v13689_v3, %v13687_v4 }
 0x73d   :  { %v7945_v39 = vpop.eup %7944  ;;  %4491 = vmatprep.subr.mxu1 %v4434_v20  ;;  %v4430_v61 = vmul.f32 %v7943_v10, %v4382_v31  ;;  %v13690_v20 = vld [vmem:[#allocation13_spill] sm:$0xff]  ;;  %v13691_v10 = vld [vmem:[#allocation120_spill] sm:$0xff] }
 0x73e   :  { %v7947_v45 = vpop.eup %7946  ;;  %4492 = vmatpush1.msra.mxu1 %v4433_v59  ;;  %v4429_v17 = vmul.f32 %v7945_v39, %v4381_v37  ;;  %v1109_v28 = vadd.f32 %v13691_v10, %v13690_v20  ;;  %v13692_v59 = vld [vmem:[#allocation123_spill] sm:$0xff]  ;;  %v13694_v37 = vld [vmem:[#allocation126_spill] sm:$0xff] }
 0x73f   :  { %v7949_v15 = vpop.eup %7948  ;;  %4493 = vmatprep.subr.mxu1 %v4432_v32  ;;  %v4428_v0 = vmul.f32 %v7947_v45, %v4380_v11  ;;  %v1111_v39 = vadd.f32 %v13692_v59, %v13690_v20  ;;  %v13693_v45 = vld [vmem:[#allocation15_spill] sm:$0xff]  ;;  %v13695_v11 = vld [vmem:[#allocation29_spill] sm:$0xff]  ;;  %v13705_v59 = vld [vmem:[#allocation20_spill] sm:$0xff] }
 0x740   :  { %4494 = vmatpush1.msra.mxu1 %v4431_v8  ;;  %v4427_v43 = vmul.f32 %v7949_v15, %v4379_v53  ;;  %v1115_v8 = vadd.f32 %v13694_v37, %v13693_v45  ;;  %v13696_v53 = vld [vmem:[#allocation132_spill] sm:$0xff] }
 0x741   :  { %4495 = vmatprep.subr.mxu1 %v4430_v61 }
 0x742   :  { %4496 = vmatpush1.msra.mxu1 %v4429_v17  ;;  %v1121_v17 = vadd.f32 %v13696_v53, %v13695_v11  ;;  %v13707_v53 = vld [vmem:[#allocation153_spill] sm:$0xff] }
 0x743   :  { %4497 = vmatprep.subr.mxu1 %v4428_v0 }
 0x744   :  { %4498 = vmatpush1.msra.mxu1 %v4427_v43 }
 0x745   :  { %7387 = vmatmul.mubr.msk.f32.vlgmr.msra.gmra.mxu1 %vm2573_vm1, %v11143_v62  ;;  %v13674_v62 = vld [vmem:[#allocation11_spill] sm:$0xff] }
 0x746   :  { %4537 = vmatprep.mubr.f32.mxu1 %v13135_v50 }
 0x749   :  { %7388 = vmatmul.mubr.msk.f32.gmra.mxu1 %vm2573_vm1, %v11151_v55  ;;  %v13675_v55 = vld [vmem:[#allocation7_spill] sm:$0xff] }
 0x74a   :  { %4543 = vmatprep.mubr.f32.mxu1 %v13135_v50 }
 0x74d   :  { %7389 = vmatmul.mubr.msk.f32.gmra.mxu1 %vm2573_vm1, %v11159_v56  ;;  %v13676_v56 = vld [vmem:[#allocation12_spill] sm:$0xff] }
 0x74e   :  { %4549 = vmatprep.mubr.f32.mxu1 %v13135_v50 }
 0x751   :  { %7390 = vmatmul.mubr.msk.f32.gmra.mxu1 %vm2573_vm1, %v11167_v27  ;;  %v13677_v27 = vld [vmem:[#allocation14_spill] sm:$0xff] }
 0x752   :  { %4555 = vmatprep.mubr.f32.mxu1 %v13135_v50 }
 0x755   :  { %7391 = vmatmul.mubr.msk.f32.gmra.mxu1 %vm2573_vm1, %v11175_v46  ;;  %v13678_v46 = vld [vmem:[#allocation16_spill] sm:$0xff] }
 0x756   :  { %4561 = vmatprep.mubr.f32.mxu1 %v13135_v50 }
 0x759   :  { %7392 = vmatmul.mubr.msk.f32.gmra.mxu1 %vm2573_vm1, %v11183_v60  ;;  %v13679_v60 = vld [vmem:[#allocation17_spill] sm:$0xff] }
 0x75a   :  { %4567 = vmatprep.mubr.f32.mxu1 %v13135_v50 }
 0x75d   :  { %7393 = vmatmul.mubr.msk.f32.gmra.mxu1 %vm2573_vm1, %v13674_v62 }
 0x75e   :  { %4573 = vmatprep.mubr.f32.mxu1 %v13135_v50 }
 0x761   :  { %7394 = vmatmul.mubr.msk.f32.gmra.mxu1 %vm2573_vm1, %v13675_v55  ;;  %v13697_v55 = vld [vmem:[#allocation135_spill] sm:$0xff] }
 0x762   :  { %4579 = vmatprep.mubr.f32.mxu1 %v13135_v50 }
 0x765   :  { %7395 = vmatmul.mubr.msk.f32.gmra.mxu1 %vm2573_vm1, %v13676_v56  ;;  %v1123_v56 = vadd.f32 %v13697_v55, %v13695_v11 }
 0x766   :  { %4585 = vmatprep.mubr.f32.mxu1 %v13135_v50 }
 0x769   :  { %7396 = vmatmul.mubr.msk.f32.gmra.mxu1 %vm2573_vm1, %v13677_v27 }
 0x76a   :  { %4591 = vmatprep.mubr.f32.mxu1 %v13135_v50 }
 0x76d   :  { %7397 = vmatmul.mubr.msk.f32.gmra.mxu1 %vm2573_vm1, %v13678_v46 }
 0x76e   :  { %4597 = vmatprep.mubr.f32.mxu1 %v13135_v50 }
 0x771   :  { %7398 = vmatmul.mubr.msk.f32.gmra.mxu1 %vm2573_vm1, %v13679_v60  ;;  %v13698_v60 = vld [vmem:[#allocation23_spill] sm:$0xff] }
 0x772   :  { %4603 = vmatprep.mubr.f32.mxu1 %v13135_v50 }
 0x775   :  { %7399 = vmatmul.mubr.msk.f32.gmra.mxu1 %vm2573_vm1, %v13680_v18  ;;  %v13699_v18 = vld [vmem:[#allocation138_spill] sm:$0xff] }
 0x776   :  { %4609 = vmatprep.mubr.f32.mxu1 %v13135_v50 }
 0x779   :  { %7400 = vmatmul.mubr.msk.f32.gmra.mxu1 %vm2573_vm1, %v13681_v23  ;;  %v1127_v23 = vadd.f32 %v13699_v18, %v13698_v60 }
 0x77a   :  { %4615 = vmatprep.mubr.f32.mxu1 %v13135_v50 }
 0x77d   :  { %7401 = vmatmul.mubr.msk.f32.gmra.mxu1 %vm2573_vm1, %v13682_v58 }
 0x77e   :  { %4621 = vmatprep.mubr.f32.mxu1 %v13135_v50 }
 0x781   :  { %7402 = vmatmul.mubr.msk.f32.gmra.mxu1 %vm2573_vm1, %v13683_v19 }
 0x782   :  { %5269 = vmatprep.mubr.f32.mxu1 %v13135_v50 }
 0x805   :  { %v4533_v24 = vpop.f32.mrf.mxu1 }
 0x806   :  { %v4628_v13 = vadd.f32 %v4533_v24, %v1097_v34 }
 0x807   :  { %v4535_v51 = vpop.f32.mrf.mxu1 }
 0x808   :  { %v4629_v47 = vadd.f32 %v4535_v51, %v1099_v35  ;;  %v4660_v15 = vmul.f32 0.5, %v4628_v13  ;;  %v1117_v35 = vadd.f32 %v13701_v30, %v13693_v45  ;;  %v13702_v13 = vld [vmem:[#allocation18_spill] sm:$0xff] }
 0x809   :  { %v4539_v1 = vpop.f32.mrf.mxu1 }
 0x80a   :  { %v4630_v6 = vadd.f32 %v4539_v1, %v1103_v36  ;;  %v4661_v0 = vmul.f32 0.5, %v4629_v47  ;;  %7950 = vtanh.f32 %v4660_v15  ;;  %v13704_v47 = vld [vmem:[#allocation147_spill] sm:$0xff] }
 0x80b   :  { %v4541_v33 = vpop.f32.mrf.mxu1 }
 0x80c   :  { %v4631_v31 = vadd.f32 %v4541_v33, %v1105_v21  ;;  %v4662_v27 = vmul.f32 0.5, %v4630_v6  ;;  %v13700_v33 = vld [vmem:[#allocation141_spill] sm:$0xff]  ;;  %7952 = vtanh.f32 %v4661_v0 }
 0x80d   :  { %v4545_v25 = vpop.f32.mrf.mxu1 }
 0x80e   :  { %v4632_v61 = vadd.f32 %v4545_v25, %v1109_v28  ;;  %v4663_v58 = vmul.f32 0.5, %v4631_v31  ;;  %v1129_v25 = vadd.f32 %v13700_v33, %v13698_v60  ;;  %7954 = vtanh.f32 %v4662_v27 }
 0x80f   :  { %v4547_v41 = vpop.f32.mrf.mxu1 }
 0x810   :  { %v4633_v43 = vadd.f32 %v4547_v41, %v1111_v39  ;;  %v4664_v51 = vmul.f32 0.5, %v4632_v61  ;;  %7956 = vtanh.f32 %v4663_v58  ;;  %v13706_v39 = vld [vmem:[#allocation150_spill] sm:$0xff] }
 0x811   :  { %v4551_v38 = vpop.f32.mrf.mxu1  ;;  %v1139_v31 = vadd.f32 %v13706_v39, %v13705_v59 }
 0x812   :  { %v4634_v46 = vadd.f32 %v4551_v38, %v1115_v8  ;;  %v4665_v41 = vmul.f32 0.5, %v4633_v43  ;;  %7958 = vtanh.f32 %v4664_v51 }
 0x813   :  { %v4553_v52 = vpop.f32.mrf.mxu1 }
 0x814   :  { %v4666_v38 = vmul.f32 0.5, %v4634_v46  ;;  %7960 = vtanh.f32 %v4665_v41  ;;  %v4635_v10 = vadd.f32 %v4553_v52, %v1117_v35  ;;  %v13709_v46 = vld [vmem:[#allocation198_spill] sm:$0xff] }
 0x815   :  { %v4557_v29 = vpop.f32.mrf.mxu1 }
 0x816   :  { %v4636_v19 = vadd.f32 %v4557_v29, %v1121_v17  ;;  %7962 = vtanh.f32 %v4666_v38  ;;  %v1141_v17 = vadd.f32 %v13707_v53, %v13705_v59  ;;  %v4667_v0 = vmul.f32 0.5, %v4635_v10  ;;  %v13712_v38 = vld [vmem:[#allocation204_spill] sm:$0xff]  ;;  %v13719_v53 = vld [vmem:[#allocation182_spill] sm:$0xff] }
 0x817   :  { %v4559_v16 = vpop.f32.mrf.mxu1 }
 0x818   :  { %v4637_v1 = vadd.f32 %v4559_v16, %v1123_v56  ;;  %v4668_v29 = vmul.f32 0.5, %v4636_v19  ;;  %v13703_v16 = vld [vmem:[#allocation144_spill] sm:$0xff]  ;;  %v13710_v19 = vld [vmem:[#allocation201_spill] sm:$0xff] }
 0x819   :  { %v4563_v7 = vpop.f32.mrf.mxu1  ;;  %v1133_v3 = vadd.f32 %v13703_v16, %v13702_v13  ;;  %v13714_v16 = vld [vmem:[#allocation172_spill] sm:$0xff] }
 0x81a   :  { %v4638_v14 = vadd.f32 %v4563_v7, %v1127_v23  ;;  %v4669_v21 = vmul.f32 0.5, %v4637_v1  ;;  %v1135_v7 = vadd.f32 %v13704_v47, %v13702_v13  ;;  %7964 = vtanh.f32 %v4668_v29  ;;  %v7951_v23 = vpop.eup %7950 }
 0x81b   :  { %v4565_v63 = vpop.f32.mrf.mxu1  ;;  %v7953_v58 = vpop.eup %7952 }
 0x81c   :  { %v4639_v9 = vadd.f32 %v4565_v63, %v1129_v25  ;;  %v4670_v28 = vmul.f32 0.5, %v4638_v14  ;;  %7966 = vtanh.f32 %v4669_v21  ;;  %v7955_v33 = vpop.eup %7954  ;;  %v13711_v14 = vld [vmem:[#allocation45_spill] sm:$0xff] }
 0x81d   :  { %v4569_v5 = vpop.f32.mrf.mxu1  ;;  %v1175_v30 = vadd.f32 %v13712_v38, %v13711_v14 }
 0x81e   :  { %v4640_v63 = vadd.f32 %v4569_v5, %v1133_v3  ;;  %v4671_v37 = vmul.f32 0.5, %v4639_v9  ;;  %7968 = vtanh.f32 %v4670_v28  ;;  %v13708_v5 = vld [vmem:[#allocation42_spill] sm:$0xff]  ;;  %v13713_v9 = vld [vmem:[#allocation320_spill] sm:$0xff]  ;;  %v13716_v28 = vld [vmem:[#allocation207_spill] sm:$0xff] }
 0x81f   :  { %v4571_v40 = vpop.f32.mrf.mxu1  ;;  %v1171_v51 = vadd.f32 %v13710_v19, %v13708_v5  ;;  %v1145_v3 = vadd.f32 %v13714_v16, %v13713_v9  ;;  %v1177_v39 = vadd.f32 %v13716_v28, %v13711_v14  ;;  %v4708_v19 = vadd.f32 1.0, %v7951_v23  ;;  %v13729_v23 = vld [vmem:[#allocation40_spill] sm:$0xff] }
 0x820   :  { %v4641_v8 = vadd.f32 %v4571_v40, %v1135_v7  ;;  %v4672_v43 = vmul.f32 0.5, %v4640_v63  ;;  %7970 = vtanh.f32 %v4671_v37  ;;  %v1169_v40 = vadd.f32 %v13709_v46, %v13708_v5  ;;  %v13715_v7 = vld [vmem:[#allocation175_spill] sm:$0xff] }
 0x821   :  { %v4575_v2 = vpop.f32.mrf.mxu1  ;;  %7972 = vtanh.f32 %v4667_v0  ;;  %v1147_v10 = vadd.f32 %v13715_v7, %v13713_v9  ;;  %v13717_v37 = vld [vmem:[#allocation319_spill] sm:$0xff]  ;;  %v13720_v0 = vld [vmem:[#allocation317_spill] sm:$0xff] }
 0x822   :  { %v4642_v61 = vadd.f32 %v4575_v2, %v1139_v31  ;;  %v4673_v55 = vmul.f32 0.5, %v4641_v8  ;;  %7974 = vtanh.f32 %v4672_v43  ;;  %v13718_v8 = vld [vmem:[#allocation178_spill] sm:$0xff]  ;;  %v13728_v7 = vld [vmem:[#allocation213_spill] sm:$0xff] }
 0x823   :  { %v4577_v32 = vpop.f32.mrf.mxu1  ;;  %v13721_v43 = vld [vmem:[#allocation186_spill] sm:$0xff] }
 0x824   :  { %v4643_v56 = vadd.f32 %v4577_v32, %v1141_v17  ;;  %v4674_v18 = vmul.f32 0.5, %v4642_v61  ;;  %7976 = vtanh.f32 %v4673_v55  ;;  %v7957_v32 = vpop.eup %7956  ;;  %v11513_v61 = vadd.f32 %v13718_v8, %v13717_v37 }
 0x825   :  { %v11467_v62 = vpop.f32.mrf.mxu1  ;;  %v7959_v29 = vpop.eup %7958  ;;  %v11517_v17 = vadd.f32 %v13719_v53, %v13717_v37  ;;  %v11521_v55 = vadd.f32 %v13721_v43, %v13720_v0  ;;  %v4709_v43 = vadd.f32 1.0, %v7953_v58 }
 0x826   :  { %v4675_v25 = vmul.f32 0.5, %v4643_v56  ;;  %7978 = vtanh.f32 %v4674_v18  ;;  %v7961_v47 = vpop.eup %7960  ;;  %v13723_v18 = vld [vmem:[#allocation210_spill] sm:$0xff] }
 0x827   :  { %v11473_v24 = vpop.f32.mrf.mxu1  ;;  %v7963_v63 = vpop.eup %7962  ;;  %v4713_v5 = vadd.f32 1.0, %v7961_v47 }
 0x828   :  { %v7965_v46 = vpop.eup %7964  ;;  %v4714_v59 = vadd.f32 1.0, %v7963_v63 }
 0x829   :  { %v11477_v34 = vpop.f32.mrf.mxu1  ;;  %v4716_v37 = vadd.f32 1.0, %v7965_v46 }
 0x82b   :  { %v11481_v36 = vpop.f32.mrf.mxu1 }
 0x82d   :  { %v11487_v6 = vpop.f32.mrf.mxu1 }
 0x82f   :  { %v11491_v15 = vpop.f32.mrf.mxu1 }
 0x831   :  { %v11495_v52 = vpop.f32.mrf.mxu1 }
 0x833   :  { %v11497_v27 = vpop.f32.mrf.mxu1 }
 0x835   :  { %v4605_v2 = vpop.f32.mrf.mxu1 }
 0x836   :  { %v4652_v1 = vadd.f32 %v4605_v2, %v1169_v40  ;;  %v13722_v40 = vld [vmem:[#allocation37_spill] sm:$0xff] }
 0x837   :  { %v4607_v41 = vpop.f32.mrf.mxu1  ;;  %v1181_v2 = vadd.f32 %v13723_v18, %v13722_v40  ;;  %v1183_v28 = vadd.f32 %v13728_v7, %v13722_v40  ;;  %v13731_v18 = vld [vmem:[#allocation219_spill] sm:$0xff]  ;;  %v4712_v40 = vadd.f32 1.0, %v7959_v29  ;;  %v4645_v29 = vadd.f32 %v11473_v24, %v1147_v10 }
 0x838   :  { %v4653_v35 = vadd.f32 %v4607_v41, %v1171_v51  ;;  %7980 = vtanh.f32 %v4652_v1  ;;  %v7967_v1 = vpop.eup %7966  ;;  %v13724_v41 = vld [vmem:[#allocation189_spill] sm:$0xff] }
 0x839   :  { %v4611_v21 = vpop.f32.mrf.mxu1  ;;  %v11527_v38 = vadd.f32 %v13724_v41, %v13720_v0  ;;  %v7969_v53 = vpop.eup %7968  ;;  %v1189_v41 = vadd.f32 %v13731_v18, %v13729_v23  ;;  %v4710_v0 = vadd.f32 1.0, %v7955_v33  ;;  %v4740_v18 = vmul.f32 0.5, %v4716_v37 }
 0x83a   :  { %7982 = vtanh.f32 %v4653_v35  ;;  %v4654_v31 = vadd.f32 %v4611_v21, %v1175_v30  ;;  %v13725_v30 = vld [vmem:[#allocation53_spill] sm:$0xff]  ;;  %v13726_v35 = vld [vmem:[#allocation192_spill] sm:$0xff]  ;;  %v13727_v21 = vld [vmem:[#allocation195_spill] sm:$0xff]  ;;  %v7971_v14 = vpop.eup %7970  ;;  %v4718_v13 = vadd.f32 1.0, %v7969_v53  ;;  %v4736_v63 = vmul.f32 0.5, %v4712_v40 }
 0x83b   :  { %7984 = vtanh.f32 %v4675_v25  ;;  %v4613_v56 = vpop.f32.mrf.mxu1  ;;  %v11531_v16 = vadd.f32 %v13726_v35, %v13725_v30  ;;  %v1165_v25 = vadd.f32 %v13727_v21, %v13725_v30  ;;  %v4711_v35 = vadd.f32 1.0, %v7957_v32  ;;  %v7973_v58 = vpop.eup %7972 }
 0x83c   :  { %7986 = vtanh.f32 %v4654_v31  ;;  %v4655_v51 = vadd.f32 %v4613_v56, %v1177_v39  ;;  %v13730_v31 = vld [vmem:[#allocation216_spill] sm:$0xff]  ;;  %v4732_v21 = vmul.f32 0.5, %v4708_v19  ;;  %v4717_v30 = vadd.f32 1.0, %v7967_v1  ;;  %v7975_v33 = vpop.eup %7974 }
 0x83d   :  { %v4617_v8 = vpop.f32.mrf.mxu1  ;;  %v1187_v39 = vadd.f32 %v13730_v31, %v13729_v23  ;;  %v4734_v32 = vmul.f32 0.5, %v4710_v0  ;;  %v4735_v46 = vmul.f32 0.5, %v4711_v35  ;;  %v4719_v23 = vadd.f32 1.0, %v7971_v14  ;;  %v7977_v1 = vpop.eup %7976 }
 0x83e   :  { %7988 = vtanh.f32 %v4655_v51  ;;  %v4656_v56 = vadd.f32 %v4617_v8, %v1181_v2  ;;  %v4733_v51 = vmul.f32 0.5, %v4709_v43  ;;  %v4644_v2 = vadd.f32 %v11467_v62, %v1145_v3  ;;  %v7979_v47 = vpop.eup %7978 }
 0x83f   :  { %v4619_v9 = vpop.f32.mrf.mxu1  ;;  %v4738_v53 = vmul.f32 0.5, %v4714_v59  ;;  %v4742_v43 = vmul.f32 0.5, %v4718_v13  ;;  %v4715_v3 = vadd.f32 1.0, %v7973_v58  ;;  %v4764_v14 = vmul.f32 %v4740_v18, %v11368_v42 }
 0x840   :  { %7990 = vtanh.f32 %v4656_v56  ;;  %v4657_v7 = vadd.f32 %v4619_v9, %v1183_v28  ;;  %v4741_v56 = vmul.f32 0.5, %v4717_v30  ;;  %v4737_v28 = vmul.f32 0.5, %v4713_v5 }
 0x841   :  { %v4623_v31 = vpop.f32.mrf.mxu1  ;;  %v4743_v37 = vmul.f32 0.5, %v4719_v23  ;;  %v4721_v35 = vadd.f32 1.0, %v7977_v1  ;;  %v4677_v10 = vmul.f32 0.5, %v4645_v29  ;;  %v4651_v40 = vadd.f32 %v11497_v27, %v1165_v25 }
 0x842   :  { %7992 = vtanh.f32 %v4657_v7  ;;  %v4658_v8 = vadd.f32 %v4623_v31, %v1187_v39  ;;  %v4720_v39 = vadd.f32 1.0, %v7975_v33  ;;  %v4676_v7 = vmul.f32 0.5, %v4644_v2 }
 0x843   :  { %v4625_v19 = vpop.f32.mrf.mxu1  ;;  %v4765_v24 = vmul.f32 %v4741_v56, %v11370_v12  ;;  %v4766_v13 = vmul.f32 %v4742_v43, %v11377_v44  ;;  %v4650_v58 = vadd.f32 %v11495_v52, %v11531_v16  ;;  %v4767_v27 = vmul.f32 %v4743_v37, %v11382_v26 }
 0x844   :  { %7994 = vtanh.f32 %v4658_v8  ;;  %v4659_v9 = vadd.f32 %v4625_v19, %v1189_v41  ;;  %v4649_v41 = vadd.f32 %v11491_v15, %v11527_v38  ;;  %v4744_v23 = vmul.f32 0.5, %v4720_v39 }
 0x845   :  { %v7981_v62 = vpop.eup %7980  ;;  %v4745_v25 = vmul.f32 0.5, %v4721_v35  ;;  %v4647_v44 = vadd.f32 %v11481_v36, %v11517_v17  ;;  %v4648_v15 = vadd.f32 %v11487_v6, %v11521_v55  ;;  %v4682_v19 = vmul.f32 0.5, %v4650_v58 }
 0x846   :  { %7996 = vtanh.f32 %v4659_v9  ;;  %v4772_v30 = vmul.f32 %v7981_v62, %v4732_v21  ;;  %v4722_v21 = vadd.f32 1.0, %v7979_v47  ;;  %v4681_v18 = vmul.f32 0.5, %v4649_v41 }
 0x847   :  { %v7983_v0 = vpop.eup %7982  ;;  %7998 = vtanh.f32 %v4676_v7  ;;  %v4768_v26 = vmul.f32 %v4744_v23, %v11385_v49  ;;  %v4769_v6 = vmul.f32 %v4745_v25, %v11388_v48  ;;  %v4679_v55 = vmul.f32 0.5, %v4647_v44 }
 0x848   :  { %v7985_v31 = vpop.eup %7984  ;;  %v4773_v5 = vmul.f32 %v7983_v0, %v4733_v51  ;;  %v11551_v42 = vadd.f32 %v4772_v30, %v4764_v14  ;;  %v4683_v51 = vmul.f32 0.5, %v4651_v40  ;;  %v4746_v1 = vmul.f32 0.5, %v4722_v21 }
 0x849   :  { %v7987_v59 = vpop.eup %7986  ;;  %v4723_v38 = vadd.f32 1.0, %v7985_v31  ;;  %8000 = vtanh.f32 %v4677_v10  ;;  %v4680_v29 = vmul.f32 0.5, %v4648_v15 }
 0x84a   :  { %v11553_v2 = vadd.f32 %v4773_v5, %v4765_v24  ;;  %v4774_v12 = vmul.f32 %v7987_v59, %v4734_v32  ;;  %v4646_v32 = vadd.f32 %v11477_v34, %v11513_v61  ;;  %8002 = vtanh.f32 %v4683_v51 }
 0x84b   :  { %v7989_v8 = vpop.eup %7988  ;;  %v4739_v61 = vmul.f32 0.5, %v4715_v3  ;;  %8004 = vtanh.f32 %v4682_v19  ;;  %v4770_v49 = vmul.f32 %v4746_v1, %v11391_v54 }
 0x84c   :  { %v11560_v52 = vadd.f32 %v4774_v12, %v4766_v13  ;;  %v4775_v16 = vmul.f32 %v7989_v8, %v4735_v46  ;;  %v4747_v46 = vmul.f32 0.5, %v4723_v38  ;;  %v4678_v43 = vmul.f32 0.5, %v4646_v32 }
 0x84d   :  { %v7991_v33 = vpop.eup %7990  ;;  %8006 = vtanh.f32 %v4681_v18 }
 0x84e   :  { %v11565_v56 = vadd.f32 %v4775_v16, %v4767_v27  ;;  %v4776_v36 = vmul.f32 %v7991_v33, %v4736_v63  ;;  %8008 = vtanh.f32 %v4680_v29  ;;  %v4771_v48 = vmul.f32 %v4747_v46, %v11393_v22 }
 0x84f   :  { %v7993_v17 = vpop.eup %7992  ;;  %8010 = vtanh.f32 %v4679_v55 }
 0x850   :  { %v11568_v9 = vadd.f32 %v4776_v36, %v4768_v26  ;;  %v4777_v47 = vmul.f32 %v7993_v17, %v4737_v28  ;;  %8012 = vtanh.f32 %v4678_v43  ;;  %v11613_v43 = vld [vmem:[%s12908_s2 + $0x18] sm:$0xff] }
 0x851   :  { %v7995_v34 = vpop.eup %7994 }
 0x852   :  { %v11571_v62 = vadd.f32 %v4777_v47, %v4769_v6  ;;  %v4778_v63 = vmul.f32 %v7995_v34, %v4738_v53  ;;  %v11589_v47 = vld [vmem:[%s12908_s2] sm:$0xff]  ;;  %v11597_v34 = vld [vmem:[%s12908_s2 + $0x8] sm:$0xff] }
 0x853   :  { %v7997_v39 = vpop.eup %7996 }
 0x854   :  { %v11574_v7 = vadd.f32 %v4778_v63, %v4770_v49  ;;  %v4779_v0 = vmul.f32 %v7997_v39, %v4739_v61  ;;  %8014 = vtanh.f32 %v11571_v62  ;;  %v7999_v54 = vpop.eup %7998  ;;  %v11605_v61 = vld [vmem:[%s12908_s2 + $0x10] sm:$0xff]  ;;  %v11621_v49 = vld [vmem:[%s12908_s2 + $0x20] sm:$0xff]  ;;  %v11629_v63 = vld [vmem:[%s12908_s2 + $0x28] sm:$0xff] }
 0x855   :  { %v4724_v15 = vadd.f32 1.0, %v7999_v54  ;;  %v11637_v39 = vld [vmem:[%s12908_s2 + $0x30] sm:$0xff]  ;;  %v11661_v54 = vld [vmem:[%s12908_s2 + $0x48] sm:$0xff] }
 0x856   :  { %v11576_v28 = vadd.f32 %v4779_v0, %v4771_v48  ;;  %8016 = vtanh.f32 %v11574_v7  ;;  %v8001_v22 = vpop.eup %8000  ;;  %v11645_v48 = vld [vmem:[%s12908_s2 + $0x38] sm:$0xff]  ;;  %v11653_v0 = vld [vmem:[%s12908_s2 + $0x40] sm:$0xff]  ;;  %13734 = vst [vmem:[#allocation22_spill] sm:$0xff] %v11661_v54 }
 0x857   :  { %v8003_v53 = vpop.eup %8002  ;;  %v4725_v8 = vadd.f32 1.0, %v8001_v22  ;;  %v4748_v6 = vmul.f32 0.5, %v4724_v15  ;;  %13732 = vst [vmem:[#allocation21_spill] sm:$0xff] %v11645_v48  ;;  %13733 = vst [vmem:[#allocation38_spill] sm:$0xff] %v11653_v0  ;;  %v11669_v22 = vld [vmem:[%s12908_s2 + $0x50] sm:$0xff]  ;;  %v13742_v15 = vld [vmem:[#allocation167_spill] sm:$0xff] }
 0x858   :  { %8018 = vtanh.f32 %v11576_v28  ;;  %v8005_v3 = vpop.eup %8004  ;;  %v4731_v35 = vadd.f32 1.0, %v8003_v53  ;;  %13735 = vst [vmem:[#allocation24_spill] sm:$0xff] %v11669_v22  ;;  %v11677_v53 = vld [vmem:[%s12908_s2 + $0x58] sm:$0xff] }
 0x859   :  { %8020 = vtanh.f32 %v11568_v9  ;;  %v4730_v31 = vadd.f32 1.0, %v8005_v3  ;;  %v4749_v36 = vmul.f32 0.5, %v4725_v8  ;;  %13736 = vst [vmem:[#allocation26_spill] sm:$0xff] %v11677_v53  ;;  %v11685_v3 = vld [vmem:[%s12908_s2 + $0x60] sm:$0xff] }
 0x85a   :  { %8022 = vtanh.f32 %v11565_v56  ;;  %v8007_v14 = vpop.eup %8006  ;;  %v4755_v41 = vmul.f32 0.5, %v4731_v35  ;;  %13737 = vst [vmem:[#allocation39_spill] sm:$0xff] %v11685_v3  ;;  %v11709_v35 = vld [vmem:[%s12908_s2 + $0x78] sm:$0xff] }
 0x85b   :  { %8024 = vtanh.f32 %v11560_v52  ;;  %v8009_v37 = vpop.eup %8008  ;;  %v4729_v10 = vadd.f32 1.0, %v8007_v14  ;;  %v4754_v21 = vmul.f32 0.5, %v4730_v31  ;;  %v11693_v14 = vld [vmem:[%s12908_s2 + $0x68] sm:$0xff]  ;;  %13740 = vst [vmem:[#allocation32_spill] sm:$0xff] %v11709_v35 }
 0x85c   :  { %8026 = vtanh.f32 %v11553_v2  ;;  %v8011_v30 = vpop.eup %8010  ;;  %v4728_v5 = vadd.f32 1.0, %v8009_v37  ;;  %13738 = vst [vmem:[#allocation28_spill] sm:$0xff] %v11693_v14  ;;  %v11701_v37 = vld [vmem:[%s12908_s2 + $0x70] sm:$0xff] }
 0x85d   :  { %8028 = vtanh.f32 %v11551_v42  ;;  %v8013_v24 = vpop.eup %8012  ;;  %v4727_v13 = vadd.f32 1.0, %v8011_v30  ;;  %v4753_v27 = vmul.f32 0.5, %v4729_v10  ;;  %13739 = vst [vmem:[#allocation30_spill] sm:$0xff] %v11701_v37 }
 0x85e   :  { %v4726_v23 = vadd.f32 1.0, %v8013_v24  ;;  %v4752_v38 = vmul.f32 0.5, %v4728_v5 }
 0x85f   :  { %v4751_v33 = vmul.f32 0.5, %v4727_v13 }
 0x860   :  { %v4750_v19 = vmul.f32 0.5, %v4726_v23 }
 0x861   :  { %v8015_v40 = vpop.eup %8014 }
 0x862   :  { %v4801_v32 = vmul.f32 %v8015_v40, %v4753_v27  ;;  %v13741_v27 = vld [vmem:[#allocation166_spill] sm:$0xff] }
 0x863   :  { %v8017_v59 = vpop.eup %8016 }
 0x864   :  { %v4802_v51 = vmul.f32 %v8017_v59, %v4754_v21 }
 0x865   :  { %v8019_v58 = vpop.eup %8018 }
 0x866   :  { %v8021_v12 = vpop.eup %8020  ;;  %v4803_v25 = vmul.f32 %v8019_v58, %v4755_v41 }
 0x867   :  { %v8023_v44 = vpop.eup %8022  ;;  %v4800_v26 = vmul.f32 %v8021_v12, %v4752_v38  ;;  %v1260_v38 = vadd.f32 %v13742_v15, %v13684_v57 }
 0x868   :  { %v8025_v16 = vpop.eup %8024  ;;  %4860 = vmatprep.subr.mxu0 %v4803_v25  ;;  %v4799_v17 = vmul.f32 %v8023_v44, %v4751_v33  ;;  %v1258_v25 = vadd.f32 %v13741_v27, %v13684_v57  ;;  %v13747_v27 = vld [vmem:[#allocation171_spill] sm:$0xff]  ;;  %v13749_v57 = vld [vmem:[#allocation173_spill] sm:$0xff] }
 0x869   :  { %v8027_v18 = vpop.eup %8026  ;;  %4861 = vmatpush1.msra.mxu0 %v4802_v51  ;;  %v4798_v55 = vmul.f32 %v8025_v16, %v4750_v19  ;;  %v13743_v51 = vld [vmem:[#allocation168_spill] sm:$0xff]  ;;  %v1272_v15 = vadd.f32 %v13747_v27, %v13690_v20  ;;  %v13750_v27 = vld [vmem:[#allocation174_spill] sm:$0xff] }
 0x86a   :  { %v8029_v1 = vpop.eup %8028  ;;  %4862 = vmatprep.subr.mxu0 %v4801_v32  ;;  %v4797_v29 = vmul.f32 %v8027_v18, %v4749_v36  ;;  %v1264_v16 = vadd.f32 %v13743_v51, %v13687_v4  ;;  %v13744_v18 = vld [vmem:[#allocation169_spill] sm:$0xff] }
 0x86b   :  { %4863 = vmatpush1.msra.mxu0 %v4800_v26  ;;  %v4796_v46 = vmul.f32 %v8029_v1, %v4748_v6  ;;  %v1266_v19 = vadd.f32 %v13744_v18, %v13687_v4  ;;  %v13745_v1 = vld [vmem:[#allocation176_spill] sm:$0xff]  ;;  %v13748_v18 = vld [vmem:[#allocation179_spill] sm:$0xff] }
 0x86c   :  { %4864 = vmatprep.subr.mxu0 %v4799_v17  ;;  %v1282_v36 = vadd.f32 %v13745_v1, %v13695_v11 }
 0x86d   :  { %4865 = vmatpush1.msra.mxu0 %v4798_v55  ;;  %v13746_v55 = vld [vmem:[#allocation170_spill] sm:$0xff] }
 0x86e   :  { %4866 = vmatprep.subr.mxu0 %v4797_v29  ;;  %v1270_v29 = vadd.f32 %v13746_v55, %v13690_v20  ;;  %v1276_v55 = vadd.f32 %v13749_v57, %v13693_v45  ;;  %v13751_v20 = vld [vmem:[#allocation18_spill] sm:$0xff] }
 0x86f   :  { %4867 = vmatpush1.msra.mxu0 %v4796_v46 }
 0x870   :  { %7403 = vmatmul.mubr.msk.f32.vlgmr.msra.gmra.mxu0 %vm2573_vm1, %v11589_v47 }
 0x871   :  { %4906 = vmatprep.mubr.f32.mxu0 %v13135_v50 }
 0x874   :  { %7404 = vmatmul.mubr.msk.f32.gmra.mxu0 %vm2573_vm1, %v11597_v34 }
 0x875   :  { %4912 = vmatprep.mubr.f32.mxu0 %v13135_v50 }
 0x878   :  { %7405 = vmatmul.mubr.msk.f32.gmra.mxu0 %vm2573_vm1, %v11605_v61 }
 0x879   :  { %4918 = vmatprep.mubr.f32.mxu0 %v13135_v50 }
 0x87c   :  { %7406 = vmatmul.mubr.msk.f32.gmra.mxu0 %vm2573_vm1, %v11613_v43 }
 0x87d   :  { %4924 = vmatprep.mubr.f32.mxu0 %v13135_v50 }
 0x880   :  { %7407 = vmatmul.mubr.msk.f32.gmra.mxu0 %vm2573_vm1, %v11621_v49 }
 0x881   :  { %4930 = vmatprep.mubr.f32.mxu0 %v13135_v50 }
 0x884   :  { %7408 = vmatmul.mubr.msk.f32.gmra.mxu0 %vm2573_vm1, %v11629_v63 }
 0x885   :  { %4936 = vmatprep.mubr.f32.mxu0 %v13135_v50 }
 0x888   :  { %7409 = vmatmul.mubr.msk.f32.gmra.mxu0 %vm2573_vm1, %v11637_v39 }
 0x889   :  { %4942 = vmatprep.mubr.f32.mxu0 %v13135_v50 }
 0x88c   :  { %7410 = vmatmul.mubr.msk.f32.gmra.mxu0 %vm2573_vm1, %v11645_v48 }
 0x88d   :  { %4948 = vmatprep.mubr.f32.mxu0 %v13135_v50 }
 0x890   :  { %7411 = vmatmul.mubr.msk.f32.gmra.mxu0 %vm2573_vm1, %v11653_v0 }
 0x891   :  { %4954 = vmatprep.mubr.f32.mxu0 %v13135_v50 }
 0x894   :  { %7412 = vmatmul.mubr.msk.f32.gmra.mxu0 %vm2573_vm1, %v11661_v54 }
 0x895   :  { %4960 = vmatprep.mubr.f32.mxu0 %v13135_v50 }
 0x898   :  { %7413 = vmatmul.mubr.msk.f32.gmra.mxu0 %vm2573_vm1, %v11669_v22 }
 0x899   :  { %4966 = vmatprep.mubr.f32.mxu0 %v13135_v50 }
 0x89c   :  { %7414 = vmatmul.mubr.msk.f32.gmra.mxu0 %vm2573_vm1, %v11677_v53 }
 0x89d   :  { %4972 = vmatprep.mubr.f32.mxu0 %v13135_v50 }
 0x8a0   :  { %7415 = vmatmul.mubr.msk.f32.gmra.mxu0 %vm2573_vm1, %v11685_v3 }
 0x8a1   :  { %4978 = vmatprep.mubr.f32.mxu0 %v13135_v50 }
 0x8a4   :  { %7416 = vmatmul.mubr.msk.f32.gmra.mxu0 %vm2573_vm1, %v11693_v14 }
 0x8a5   :  { %4984 = vmatprep.mubr.f32.mxu0 %v13135_v50 }
 0x8a8   :  { %7417 = vmatmul.mubr.msk.f32.gmra.mxu0 %vm2573_vm1, %v11701_v37  ;;  %v13778_v37 = vld [vmem:[#allocation200_spill] sm:$0xff] }
 0x8a9   :  { %4990 = vmatprep.mubr.f32.mxu0 %v13135_v50 }
 0x8ac   :  { %7418 = vmatmul.mubr.msk.f32.gmra.mxu0 %vm2573_vm1, %v11709_v35  ;;  %v13777_v35 = vld [vmem:[#allocation199_spill] sm:$0xff] }
 0x8ad   :  { %5638 = vmatprep.mubr.f32.mxu0 %v13135_v50 }
 0x930   :  { %v4902_v30 = vpop.f32.mrf.mxu0 }
 0x931   :  { %v4997_v33 = vadd.f32 %v4902_v30, %v1258_v25 }
 0x932   :  { %v4904_v31 = vpop.f32.mrf.mxu0 }
 0x933   :  { %v4998_v26 = vadd.f32 %v4904_v31, %v1260_v38  ;;  %v5029_v51 = vmul.f32 0.5, %v4997_v33  ;;  %v1288_v31 = vadd.f32 %v13748_v18, %v13698_v60  ;;  %v1278_v33 = vadd.f32 %v13750_v27, %v13693_v45  ;;  %v13752_v18 = vld [vmem:[#allocation183_spill] sm:$0xff] }
 0x934   :  { %v4908_v24 = vpop.f32.mrf.mxu0 }
 0x935   :  { %v4999_v17 = vadd.f32 %v4908_v24, %v1264_v16  ;;  %v5030_v38 = vmul.f32 0.5, %v4998_v26  ;;  %8030 = vtanh.f32 %v5029_v51  ;;  %v1294_v26 = vadd.f32 %v13752_v18, %v13751_v20 }
 0x936   :  { %v4910_v10 = vpop.f32.mrf.mxu0 }
 0x937   :  { %v5000_v46 = vadd.f32 %v4910_v10, %v1266_v19  ;;  %v5031_v1 = vmul.f32 0.5, %v4999_v17  ;;  %8032 = vtanh.f32 %v5030_v38  ;;  %v13753_v17 = vld [vmem:[#allocation185_spill] sm:$0xff] }
 0x938   :  { %v4914_v40 = vpop.f32.mrf.mxu0 }
 0x939   :  { %v5001_v4 = vadd.f32 %v4914_v40, %v1270_v29  ;;  %v5032_v10 = vmul.f32 0.5, %v5000_v46  ;;  %v1296_v29 = vadd.f32 %v13753_v17, %v13751_v20  ;;  %8034 = vtanh.f32 %v5031_v1  ;;  %v13771_v20 = vld [vmem:[#allocation196_spill] sm:$0xff] }
 0x93a   :  { %v4916_v5 = vpop.f32.mrf.mxu0 }
 0x93b   :  { %v5002_v24 = vadd.f32 %v4916_v5, %v1272_v15  ;;  %v5033_v40 = vmul.f32 0.5, %v5001_v4  ;;  %v13754_v15 = vld [vmem:[#allocation180_spill] sm:$0xff]  ;;  %8036 = vtanh.f32 %v5032_v10 }
 0x93c   :  { %v4920_v59 = vpop.f32.mrf.mxu0  ;;  %v1290_v51 = vadd.f32 %v13754_v15, %v13698_v60  ;;  %v13755_v4 = vld [vmem:[#allocation20_spill] sm:$0xff] }
 0x93d   :  { %v5003_v5 = vadd.f32 %v4920_v59, %v1276_v55  ;;  %v5034_v57 = vmul.f32 0.5, %v5002_v24  ;;  %v13756_v59 = vld [vmem:[#allocation187_spill] sm:$0xff] }
 0x93e   :  { %v4922_v13 = vpop.f32.mrf.mxu0  ;;  %v1300_v38 = vadd.f32 %v13756_v59, %v13755_v4 }
 0x93f   :  { %v5004_v46 = vadd.f32 %v4922_v13, %v1278_v33  ;;  %v5035_v55 = vmul.f32 0.5, %v5003_v5  ;;  %v13757_v13 = vld [vmem:[#allocation188_spill] sm:$0xff]  ;;  %v13760_v5 = vld [vmem:[#allocation202_spill] sm:$0xff] }
 0x940   :  { %v4926_v41 = vpop.f32.mrf.mxu0  ;;  %v1302_v24 = vadd.f32 %v13757_v13, %v13755_v4 }
 0x941   :  { %v5005_v30 = vadd.f32 %v4926_v41, %v1282_v36  ;;  %v5036_v33 = vmul.f32 0.5, %v5004_v46 }
 0x942   :  { %v11714_v58 = vpop.f32.mrf.mxu0  ;;  %v8031_v59 = vpop.eup %8030 }
 0x943   :  { %v5037_v41 = vmul.f32 0.5, %v5005_v30  ;;  %v5077_v60 = vadd.f32 1.0, %v8031_v59 }
 0x944   :  { %v4932_v23 = vpop.f32.mrf.mxu0  ;;  %v8033_v13 = vpop.eup %8032 }
 0x945   :  { %v5007_v19 = vadd.f32 %v4932_v23, %v1288_v31  ;;  %8038 = vtanh.f32 %v5037_v41  ;;  %v5078_v3 = vadd.f32 1.0, %v8033_v13 }
 0x946   :  { %v4934_v21 = vpop.f32.mrf.mxu0  ;;  %8040 = vtanh.f32 %v5033_v40  ;;  %v13759_v40 = vld [vmem:[#allocation42_spill] sm:$0xff] }
 0x947   :  { %v5039_v30 = vmul.f32 0.5, %v5007_v19  ;;  %v5008_v1 = vadd.f32 %v4934_v21, %v1290_v51  ;;  %8042 = vtanh.f32 %v5034_v57  ;;  %v1330_v21 = vadd.f32 %v13760_v5, %v13759_v40  ;;  %v13767_v5 = vld [vmem:[#allocation193_spill] sm:$0xff] }
 0x948   :  { %v4938_v12 = vpop.f32.mrf.mxu0 }
 0x949   :  { %v5009_v31 = vadd.f32 %v4938_v12, %v1294_v26  ;;  %8044 = vtanh.f32 %v5039_v30  ;;  %v5040_v15 = vmul.f32 0.5, %v5008_v1  ;;  %v8035_v1 = vpop.eup %8034 }
 0x94a   :  { %v4940_v8 = vpop.f32.mrf.mxu0  ;;  %8046 = vtanh.f32 %v5035_v55  ;;  %v5079_v53 = vadd.f32 1.0, %v8035_v1 }
 0x94b   :  { %v5010_v27 = vadd.f32 %v4940_v8, %v1296_v29  ;;  %v5041_v10 = vmul.f32 0.5, %v5009_v31  ;;  %v13758_v8 = vld [vmem:[#allocation177_spill] sm:$0xff]  ;;  %8048 = vtanh.f32 %v5036_v33  ;;  %v13763_v33 = vld [vmem:[#allocation320_spill] sm:$0xff] }
 0x94c   :  { %v4944_v44 = vpop.f32.mrf.mxu0  ;;  %v1284_v19 = vadd.f32 %v13758_v8, %v13695_v11  ;;  %v13764_v8 = vld [vmem:[#allocation190_spill] sm:$0xff]  ;;  %v13776_v11 = vld [vmem:[#allocation53_spill] sm:$0xff] }
 0x94d   :  { %v5011_v12 = vadd.f32 %v4944_v44, %v1300_v38  ;;  %v5042_v41 = vmul.f32 0.5, %v5010_v27  ;;  %8050 = vtanh.f32 %v5041_v10  ;;  %v13761_v27 = vld [vmem:[#allocation45_spill] sm:$0xff]  ;;  %v13765_v10 = vld [vmem:[#allocation191_spill] sm:$0xff]  ;;  %v1326_v14 = vadd.f32 %v13778_v37, %v13776_v11 }
 0x94e   :  { %v4946_v32 = vpop.f32.mrf.mxu0  ;;  %v5006_v57 = vadd.f32 %v11714_v58, %v1284_v19  ;;  %v1306_v58 = vadd.f32 %v13764_v8, %v13763_v33  ;;  %v13770_v8 = vld [vmem:[#allocation317_spill] sm:$0xff]  ;;  %v5101_v37 = vmul.f32 0.5, %v5077_v60 }
 0x94f   :  { %v5012_v26 = vadd.f32 %v4946_v32, %v1302_v24  ;;  %v5043_v51 = vmul.f32 0.5, %v5011_v12  ;;  %8052 = vtanh.f32 %v5042_v41  ;;  %v13762_v32 = vld [vmem:[#allocation205_spill] sm:$0xff]  ;;  %v1308_v12 = vadd.f32 %v13765_v10, %v13763_v33  ;;  %v8037_v41 = vpop.eup %8036  ;;  %v13774_v10 = vld [vmem:[#allocation208_spill] sm:$0xff] }
 0x950   :  { %v11726_v6 = vpop.f32.mrf.mxu0  ;;  %v1336_v38 = vadd.f32 %v13762_v32, %v13761_v27  ;;  %8054 = vtanh.f32 %v5040_v15  ;;  %v5038_v24 = vmul.f32 0.5, %v5006_v57  ;;  %v13768_v15 = vld [vmem:[#allocation194_spill] sm:$0xff]  ;;  %v11783_v45 = vadd.f32 %v13771_v20, %v13770_v8 }
 0x951   :  { %v5044_v44 = vmul.f32 0.5, %v5012_v26  ;;  %v13766_v26 = vld [vmem:[#allocation319_spill] sm:$0xff]  ;;  %v13769_v57 = vld [vmem:[#allocation206_spill] sm:$0xff]  ;;  %v1324_v20 = vadd.f32 %v13777_v35, %v13776_v11  ;;  %v5080_v11 = vadd.f32 1.0, %v8037_v41  ;;  %v5013_v60 = vadd.f32 %v11726_v6, %v1306_v58 }
 0x952   :  { %v11732_v25 = vpop.f32.mrf.mxu0  ;;  %v8039_v4 = vpop.eup %8038 }
 0x953   :  { %v8041_v33 = vpop.eup %8040  ;;  %v5085_v22 = vadd.f32 1.0, %v8039_v4 }
 0x954   :  { %v11736_v16 = vpop.f32.mrf.mxu0  ;;  %v5081_v48 = vadd.f32 1.0, %v8041_v33 }
 0x956   :  { %v11742_v36 = vpop.f32.mrf.mxu0 }
 0x958   :  { %v11748_v23 = vpop.f32.mrf.mxu0 }
 0x95a   :  { %v11752_v18 = vpop.f32.mrf.mxu0 }
 0x95c   :  { %v11758_v17 = vpop.f32.mrf.mxu0 }
 0x95e   :  { %v11762_v29 = vpop.f32.mrf.mxu0 }
 0x960   :  { %v4974_v46 = vpop.f32.mrf.mxu0 }
 0x961   :  { %v5021_v30 = vadd.f32 %v4974_v46, %v1330_v21  ;;  %v11775_v21 = vadd.f32 %v13767_v5, %v13766_v26  ;;  %v1314_v46 = vadd.f32 %v13768_v15, %v13766_v26  ;;  %v13775_v15 = vld [vmem:[#allocation203_spill] sm:$0xff] }
 0x962   :  { %v4976_v31 = vpop.f32.mrf.mxu0  ;;  %v1332_v26 = vadd.f32 %v13775_v15, %v13759_v40  ;;  %v13782_v40 = vld [vmem:[#allocation212_spill] sm:$0xff] }
 0x963   :  { %8056 = vtanh.f32 %v5021_v30  ;;  %v1338_v30 = vadd.f32 %v13769_v57, %v13761_v27  ;;  %v8043_v27 = vpop.eup %8042 }
 0x964   :  { %v4980_v55 = vpop.f32.mrf.mxu0  ;;  %8058 = vtanh.f32 %v5043_v51  ;;  %v13772_v51 = vld [vmem:[#allocation197_spill] sm:$0xff]  ;;  %v5022_v15 = vadd.f32 %v4976_v31, %v1332_v26  ;;  %v5082_v13 = vadd.f32 1.0, %v8043_v27  ;;  %v11801_v26 = vmul.f32 0.5, %v5078_v3 }
 0x965   :  { %v5023_v19 = vadd.f32 %v4980_v55, %v1336_v38  ;;  %8060 = vtanh.f32 %v5044_v44  ;;  %v1320_v38 = vadd.f32 %v13772_v51, %v13770_v8  ;;  %v13773_v55 = vld [vmem:[#allocation37_spill] sm:$0xff]  ;;  %v5105_v27 = vmul.f32 0.5, %v5081_v48 }
 0x966   :  { %v4982_v32 = vpop.f32.mrf.mxu0  ;;  %v1342_v5 = vadd.f32 %v13774_v10, %v13773_v55  ;;  %v13779_v51 = vld [vmem:[#allocation209_spill] sm:$0xff]  ;;  %v5045_v48 = vmul.f32 0.5, %v5013_v60 }
 0x967   :  { %8062 = vtanh.f32 %v5023_v19  ;;  %v5024_v44 = vadd.f32 %v4982_v32, %v1338_v30  ;;  %v1344_v8 = vadd.f32 %v13779_v51, %v13773_v55  ;;  %v8045_v19 = vpop.eup %8044  ;;  %v13781_v30 = vld [vmem:[#allocation211_spill] sm:$0xff]  ;;  %v5103_v51 = vmul.f32 0.5, %v5079_v53 }
 0x968   :  { %8064 = vtanh.f32 %v5038_v24  ;;  %v4986_v57 = vpop.f32.mrf.mxu0  ;;  %v13780_v24 = vld [vmem:[#allocation40_spill] sm:$0xff]  ;;  %v8047_v0 = vpop.eup %8046  ;;  %v5087_v1 = vadd.f32 1.0, %v8045_v19  ;;  %v5014_v19 = vadd.f32 %v11732_v25, %v1308_v12  ;;  %v5018_v6 = vadd.f32 %v11752_v18, %v1320_v38 }
 0x969   :  { %v5025_v10 = vadd.f32 %v4986_v57, %v1342_v5  ;;  %v1348_v32 = vadd.f32 %v13781_v30, %v13780_v24  ;;  %v1350_v54 = vadd.f32 %v13782_v40, %v13780_v24  ;;  %v8049_v57 = vpop.eup %8048  ;;  %v5109_v30 = vmul.f32 0.5, %v5085_v22 }
 0x96a   :  { %v4988_v59 = vpop.f32.mrf.mxu0  ;;  %v8051_v31 = vpop.eup %8050  ;;  %v5111_v53 = vmul.f32 0.5, %v5087_v1  ;;  %v5020_v25 = vadd.f32 %v11762_v29, %v1326_v14 }
 0x96b   :  { %8066 = vtanh.f32 %v5025_v10  ;;  %v5026_v35 = vadd.f32 %v4988_v59, %v1344_v8  ;;  %v8053_v10 = vpop.eup %8052  ;;  %v5083_v8 = vadd.f32 1.0, %v8047_v0  ;;  %v5016_v59 = vadd.f32 %v11742_v36, %v1314_v46 }
 0x96c   :  { %8068 = vtanh.f32 %v5024_v44  ;;  %v4992_v5 = vpop.f32.mrf.mxu0  ;;  %v8055_v41 = vpop.eup %8054  ;;  %v11804_v44 = vmul.f32 0.5, %v5080_v11  ;;  %v5089_v22 = vadd.f32 1.0, %v8051_v31  ;;  %v5133_v0 = vmul.f32 %v5109_v30, %v11551_v42 }
 0x96d   :  { %8070 = vtanh.f32 %v5026_v35  ;;  %v5027_v4 = vadd.f32 %v4992_v5, %v1348_v32  ;;  %v5106_v32 = vmul.f32 0.5, %v5082_v13  ;;  %v5090_v35 = vadd.f32 1.0, %v8053_v10 }
 0x96e   :  { %8072 = vtanh.f32 %v5022_v15  ;;  %v4994_v40 = vpop.f32.mrf.mxu0  ;;  %v5107_v11 = vmul.f32 0.5, %v5083_v8  ;;  %v5084_v5 = vadd.f32 1.0, %v8049_v57  ;;  %v5046_v36 = vmul.f32 0.5, %v5014_v19 }
 0x96f   :  { %8074 = vtanh.f32 %v5027_v4  ;;  %v5028_v33 = vadd.f32 %v4994_v40, %v1350_v54  ;;  %v5048_v46 = vmul.f32 0.5, %v5016_v59  ;;  %v5019_v13 = vadd.f32 %v11758_v17, %v1324_v20 }
 0x970   :  { %v8057_v3 = vpop.eup %8056  ;;  %v5135_v42 = vmul.f32 %v5111_v53, %v11560_v52  ;;  %v5113_v31 = vmul.f32 0.5, %v5089_v22  ;;  %v5088_v38 = vadd.f32 1.0, %v8055_v41  ;;  %v5017_v57 = vadd.f32 %v11748_v23, %v11783_v45 }
 0x971   :  { %8076 = vtanh.f32 %v5028_v33  ;;  %v8059_v15 = vpop.eup %8058  ;;  %v5141_v54 = vmul.f32 %v8057_v3, %v5101_v37  ;;  %v5114_v37 = vmul.f32 0.5, %v5090_v35  ;;  %v5050_v40 = vmul.f32 0.5, %v5018_v6 }
 0x972   :  { %v8061_v58 = vpop.eup %8060  ;;  %v5091_v30 = vadd.f32 1.0, %v8059_v15  ;;  %8078 = vtanh.f32 %v5045_v48  ;;  %v5052_v29 = vmul.f32 0.5, %v5020_v25  ;;  %v5015_v52 = vadd.f32 %v11736_v16, %v11775_v21 }
 0x973   :  { %v11812_v1 = vadd.f32 %v5141_v54, %v5133_v0  ;;  %v5092_v14 = vadd.f32 1.0, %v8061_v58  ;;  %8080 = vtanh.f32 %v5046_v36  ;;  %v5051_v8 = vmul.f32 0.5, %v5019_v13 }
 0x974   :  { %v8063_v12 = vpop.eup %8062  ;;  %v5115_v33 = vmul.f32 0.5, %v5091_v30  ;;  %8082 = vtanh.f32 %v5048_v46  ;;  %v5112_v23 = vmul.f32 0.5, %v5088_v38  ;;  %v5138_v19 = vmul.f32 %v5114_v37, %v11571_v62 }
 0x975   :  { %v8065_v4 = vpop.eup %8064  ;;  %v5143_v18 = vmul.f32 %v8063_v12, %v5103_v51  ;;  %v5137_v51 = vmul.f32 %v5113_v31, %v11568_v9  ;;  %v5049_v59 = vmul.f32 0.5, %v5017_v57  ;;  %8084 = vtanh.f32 %v5050_v40 }
 0x976   :  { %v5086_v20 = vadd.f32 1.0, %v8065_v4  ;;  %v5116_v53 = vmul.f32 0.5, %v5092_v14  ;;  %8086 = vtanh.f32 %v5052_v29  ;;  %v5108_v21 = vmul.f32 0.5, %v5084_v5 }
 0x977   :  { %v11817_v10 = vadd.f32 %v5143_v18, %v5135_v42  ;;  %v5047_v35 = vmul.f32 0.5, %v5015_v52  ;;  %8088 = vtanh.f32 %v5051_v8  ;;  %v5139_v9 = vmul.f32 %v5115_v33, %v11574_v7 }
 0x978   :  { %v8067_v17 = vpop.eup %8066  ;;  %v5110_v0 = vmul.f32 0.5, %v5086_v20  ;;  %v5136_v58 = vmul.f32 %v5112_v23, %v11565_v56  ;;  %8090 = vtanh.f32 %v5049_v59  ;;  %v5140_v48 = vmul.f32 %v5116_v53, %v11576_v28 }
 0x979   :  { %v8069_v60 = vpop.eup %8068  ;;  %v5145_v41 = vmul.f32 %v8067_v17, %v5105_v27  ;;  %8092 = vtanh.f32 %v5047_v35 }
 0x97a   :  { %v8071_v45 = vpop.eup %8070  ;;  %v5144_v27 = vmul.f32 %v8069_v60, %v11804_v44  ;;  %v5134_v12 = vmul.f32 %v5110_v0, %v11553_v2 }
 0x97b   :  { %v8073_v3 = vpop.eup %8072  ;;  %v11823_v22 = vadd.f32 %v5145_v41, %v5137_v51  ;;  %v5146_v15 = vmul.f32 %v8071_v45, %v5106_v32 }
 0x97c   :  { %v8075_v16 = vpop.eup %8074  ;;  %v5142_v32 = vmul.f32 %v8073_v3, %v11801_v26  ;;  %v11835_v7 = vadd.f32 %v5144_v27, %v5136_v58  ;;  %v13791_v58 = vld [vmem:[#allocation32_spill] sm:$0xff] }
 0x97d   :  { %v11827_v6 = vadd.f32 %v5146_v15, %v5138_v19  ;;  %v5147_v62 = vmul.f32 %v8075_v16, %v5107_v11 }
 0x97e   :  { %v8077_v54 = vpop.eup %8076  ;;  %v11841_v56 = vadd.f32 %v5142_v32, %v5134_v12 }
 0x97f   :  { %v11832_v25 = vadd.f32 %v5147_v62, %v5139_v9  ;;  %v5148_v5 = vmul.f32 %v8077_v54, %v5108_v21  ;;  %8094 = vtanh.f32 %v11827_v6  ;;  %v8079_v28 = vpop.eup %8078  ;;  %v13790_v54 = vld [vmem:[#allocation30_spill] sm:$0xff] }
 0x980   :  { %v8081_v26 = vpop.eup %8080  ;;  %v5093_v33 = vadd.f32 1.0, %v8079_v28 }
 0x981   :  { %v11837_v44 = vadd.f32 %v5148_v5, %v5140_v48  ;;  %8096 = vtanh.f32 %v11832_v25  ;;  %v8083_v11 = vpop.eup %8082  ;;  %v5094_v52 = vadd.f32 1.0, %v8081_v26 }
 0x982   :  { %v8085_v2 = vpop.eup %8084  ;;  %v5096_v57 = vadd.f32 1.0, %v8083_v11  ;;  %v5117_v35 = vmul.f32 0.5, %v5093_v33  ;;  %v13798_v33 = vld [vmem:[#allocation29_spill] sm:$0xff] }
 0x983   :  { %8098 = vtanh.f32 %v11837_v44  ;;  %v8087_v36 = vpop.eup %8086  ;;  %v5098_v30 = vadd.f32 1.0, %v8085_v2  ;;  %v5118_v21 = vmul.f32 0.5, %v5094_v52 }
 0x984   :  { %8100 = vtanh.f32 %v11823_v22  ;;  %v8089_v46 = vpop.eup %8088  ;;  %v5100_v4 = vadd.f32 1.0, %v8087_v36  ;;  %v5120_v19 = vmul.f32 0.5, %v5096_v57  ;;  %v13794_v57 = vld [vmem:[#allocation225_spill] sm:$0xff] }
 0x985   :  { %8102 = vtanh.f32 %v11835_v7  ;;  %v8091_v13 = vpop.eup %8090  ;;  %v5099_v42 = vadd.f32 1.0, %v8089_v46  ;;  %v5122_v8 = vmul.f32 0.5, %v5098_v30  ;;  %v13792_v30 = vld [vmem:[#allocation31_spill] sm:$0xff] }
 0x986   :  { %8104 = vtanh.f32 %v11817_v10  ;;  %v8093_v31 = vpop.eup %8092  ;;  %v5097_v38 = vadd.f32 1.0, %v8091_v13  ;;  %v5124_v40 = vmul.f32 0.5, %v5100_v4 }
 0x987   :  { %8106 = vtanh.f32 %v11841_v56  ;;  %v5095_v29 = vadd.f32 1.0, %v8093_v31  ;;  %v5123_v17 = vmul.f32 0.5, %v5099_v42 }
 0x988   :  { %8108 = vtanh.f32 %v11812_v1  ;;  %v5121_v41 = vmul.f32 0.5, %v5097_v38 }
 0x989   :  { %v5119_v53 = vmul.f32 0.5, %v5095_v29  ;;  %v13796_v29 = vld [vmem:[#allocation228_spill] sm:$0xff] }
 0x98c   :  { %v8095_v18 = vpop.eup %8094 }
 0x98d   :  { %v5170_v59 = vmul.f32 %v8095_v18, %v5122_v8  ;;  %v13793_v18 = vld [vmem:[#allocation222_spill] sm:$0xff]  ;;  %v13797_v8 = vld [vmem:[#allocation231_spill] sm:$0xff] }
 0x98e   :  { %v8097_v37 = vpop.eup %8096  ;;  %v1419_v38 = vadd.f32 %v13793_v18, %v13792_v30 }
 0x98f   :  { %v5171_v45 = vmul.f32 %v8097_v37, %v5123_v17 }
 0x990   :  { %v8099_v14 = vpop.eup %8098 }
 0x991   :  { %v8101_v20 = vpop.eup %8100  ;;  %v5172_v60 = vmul.f32 %v8099_v14, %v5124_v40  ;;  %v1421_v40 = vadd.f32 %v13794_v57, %v13792_v30  ;;  %v13795_v14 = vld [vmem:[#allocation25_spill] sm:$0xff]  ;;  %v13809_v57 = vld [vmem:[#allocation258_spill] sm:$0xff] }
 0x992   :  { %v8103_v51 = vpop.eup %8102  ;;  %v5169_v15 = vmul.f32 %v8101_v20, %v5121_v41  ;;  %v1425_v17 = vadd.f32 %v13796_v29, %v13795_v14  ;;  %v13799_v41 = vld [vmem:[#allocation246_spill] sm:$0xff]  ;;  %v13810_v29 = vld [vmem:[#allocation261_spill] sm:$0xff] }
 0x993   :  { %v8105_v23 = vpop.eup %8104  ;;  %5229 = vmatprep.subr.mxu1 %v5172_v60  ;;  %v5168_v0 = vmul.f32 %v8103_v51, %v5120_v19  ;;  %v1427_v60 = vadd.f32 %v13797_v8, %v13795_v14 }
 0x994   :  { %v8107_v3 = vpop.eup %8106  ;;  %5230 = vmatpush1.msra.mxu1 %v5171_v45  ;;  %v5167_v9 = vmul.f32 %v8105_v23, %v5119_v53  ;;  %v1443_v45 = vadd.f32 %v13799_v41, %v13798_v33 }
 0x995   :  { %v8109_v16 = vpop.eup %8108  ;;  %5231 = vmatprep.subr.mxu1 %v5170_v59  ;;  %v5166_v27 = vmul.f32 %v8107_v3, %v5118_v21  ;;  %v13800_v59 = vld [vmem:[#allocation13_spill] sm:$0xff]  ;;  %v13801_v3 = vld [vmem:[#allocation234_spill] sm:$0xff] }
 0x996   :  { %5232 = vmatpush1.msra.mxu1 %v5169_v15  ;;  %v5165_v62 = vmul.f32 %v8109_v16, %v5117_v35  ;;  %v1431_v53 = vadd.f32 %v13801_v3, %v13800_v59  ;;  %v13802_v16 = vld [vmem:[#allocation237_spill] sm:$0xff] }
 0x997   :  { %5233 = vmatprep.subr.mxu1 %v5168_v0  ;;  %v1433_v21 = vadd.f32 %v13802_v16, %v13800_v59 }
 0x998   :  { %5234 = vmatpush1.msra.mxu1 %v5167_v9 }
 0x999   :  { %5235 = vmatprep.subr.mxu1 %v5166_v27  ;;  %v13803_v27 = vld [vmem:[#allocation23_spill] sm:$0xff] }
 0x99a   :  { %5236 = vmatpush1.msra.mxu1 %v5165_v62  ;;  %v13804_v62 = vld [vmem:[#allocation252_spill] sm:$0xff] }
 0x99b   :  { %7419 = vmatmul.mubr.msk.f32.vlgmr.msra.gmra.mxu1 %vm2573_vm1, %v11589_v47  ;;  %v13783_v47 = vld [vmem:[#allocation21_spill] sm:$0xff] }
 0x99c   :  { %5275 = vmatprep.mubr.f32.mxu1 %v13135_v50 }
 0x99f   :  { %7420 = vmatmul.mubr.msk.f32.gmra.mxu1 %vm2573_vm1, %v11597_v34  ;;  %v13784_v34 = vld [vmem:[#allocation38_spill] sm:$0xff] }
 0x9a0   :  { %5281 = vmatprep.mubr.f32.mxu1 %v13135_v50 }
 0x9a3   :  { %7421 = vmatmul.mubr.msk.f32.gmra.mxu1 %vm2573_vm1, %v11605_v61  ;;  %v13785_v61 = vld [vmem:[#allocation22_spill] sm:$0xff] }
 0x9a4   :  { %5287 = vmatprep.mubr.f32.mxu1 %v13135_v50 }
 0x9a7   :  { %7422 = vmatmul.mubr.msk.f32.gmra.mxu1 %vm2573_vm1, %v11613_v43  ;;  %v13786_v43 = vld [vmem:[#allocation24_spill] sm:$0xff] }
 0x9a8   :  { %5293 = vmatprep.mubr.f32.mxu1 %v13135_v50 }
 0x9ab   :  { %7423 = vmatmul.mubr.msk.f32.gmra.mxu1 %vm2573_vm1, %v11621_v49  ;;  %v13787_v49 = vld [vmem:[#allocation26_spill] sm:$0xff] }
 0x9ac   :  { %5299 = vmatprep.mubr.f32.mxu1 %v13135_v50 }
 0x9af   :  { %7424 = vmatmul.mubr.msk.f32.gmra.mxu1 %vm2573_vm1, %v11629_v63  ;;  %v13788_v63 = vld [vmem:[#allocation39_spill] sm:$0xff] }
 0x9b0   :  { %5305 = vmatprep.mubr.f32.mxu1 %v13135_v50 }
 0x9b3   :  { %7425 = vmatmul.mubr.msk.f32.gmra.mxu1 %vm2573_vm1, %v11637_v39  ;;  %v13789_v39 = vld [vmem:[#allocation28_spill] sm:$0xff] }
 0x9b4   :  { %5311 = vmatprep.mubr.f32.mxu1 %v13135_v50 }
 0x9b7   :  { %7426 = vmatmul.mubr.msk.f32.gmra.mxu1 %vm2573_vm1, %v13783_v47  ;;  %v1449_v47 = vadd.f32 %v13804_v62, %v13803_v27 }
 0x9b8   :  { %5317 = vmatprep.mubr.f32.mxu1 %v13135_v50 }
 0x9bb   :  { %7427 = vmatmul.mubr.msk.f32.gmra.mxu1 %vm2573_vm1, %v13784_v34 }
 0x9bc   :  { %5323 = vmatprep.mubr.f32.mxu1 %v13135_v50 }
 0x9bf   :  { %7428 = vmatmul.mubr.msk.f32.gmra.mxu1 %vm2573_vm1, %v13785_v61 }
 0x9c0   :  { %5329 = vmatprep.mubr.f32.mxu1 %v13135_v50 }
 0x9c3   :  { %7429 = vmatmul.mubr.msk.f32.gmra.mxu1 %vm2573_vm1, %v13786_v43 }
 0x9c4   :  { %5335 = vmatprep.mubr.f32.mxu1 %v13135_v50 }
 0x9c7   :  { %7430 = vmatmul.mubr.msk.f32.gmra.mxu1 %vm2573_vm1, %v13787_v49 }
 0x9c8   :  { %5341 = vmatprep.mubr.f32.mxu1 %v13135_v50 }
 0x9cb   :  { %7431 = vmatmul.mubr.msk.f32.gmra.mxu1 %vm2573_vm1, %v13788_v63 }
 0x9cc   :  { %5347 = vmatprep.mubr.f32.mxu1 %v13135_v50 }
 0x9cf   :  { %7432 = vmatmul.mubr.msk.f32.gmra.mxu1 %vm2573_vm1, %v13789_v39  ;;  %v13805_v39 = vld [vmem:[#allocation15_spill] sm:$0xff] }
 0x9d0   :  { %5353 = vmatprep.mubr.f32.mxu1 %v13135_v50 }
 0x9d3   :  { %7433 = vmatmul.mubr.msk.f32.gmra.mxu1 %vm2573_vm1, %v13790_v54  ;;  %v13806_v54 = vld [vmem:[#allocation240_spill] sm:$0xff] }
 0x9d4   :  { %5359 = vmatprep.mubr.f32.mxu1 %v13135_v50 }
 0x9d7   :  { %7434 = vmatmul.mubr.msk.f32.gmra.mxu1 %vm2573_vm1, %v13791_v58  ;;  %v1437_v58 = vadd.f32 %v13806_v54, %v13805_v39  ;;  %v13816_v54 = vld [vmem:[#allocation42_spill] sm:$0xff] }
 0x9d8   :  { %6007 = vmatprep.mubr.f32.mxu1 %v13135_v50 }
 0xa5b   :  { %v5271_v48 = vpop.f32.mrf.mxu1 }
 0xa5c   :  { %v5366_v20 = vadd.f32 %v5271_v48, %v1419_v38  ;;  %v13808_v38 = vld [vmem:[#allocation18_spill] sm:$0xff] }
 0xa5d   :  { %v5273_v32 = vpop.f32.mrf.mxu1 }
 0xa5e   :  { %v5367_v51 = vadd.f32 %v5273_v32, %v1421_v40  ;;  %v5398_v0 = vmul.f32 0.5, %v5366_v20  ;;  %v1455_v40 = vadd.f32 %v13809_v57, %v13808_v38 }
 0xa5f   :  { %v5277_v5 = vpop.f32.mrf.mxu1 }
 0xa60   :  { %v5368_v23 = vadd.f32 %v5277_v5, %v1425_v17  ;;  %v5399_v34 = vmul.f32 0.5, %v5367_v51  ;;  %v13807_v5 = vld [vmem:[#allocation243_spill] sm:$0xff]  ;;  %8110 = vtanh.f32 %v5398_v0  ;;  %v1457_v17 = vadd.f32 %v13810_v29, %v13808_v38 }
 0xa61   :  { %v5279_v12 = vpop.f32.mrf.mxu1 }
 0xa62   :  { %v5369_v15 = vadd.f32 %v5279_v12, %v1427_v60  ;;  %v5400_v43 = vmul.f32 0.5, %v5368_v23  ;;  %v1439_v12 = vadd.f32 %v13807_v5, %v13805_v39  ;;  %8112 = vtanh.f32 %v5399_v34  ;;  %v13811_v60 = vld [vmem:[#allocation255_spill] sm:$0xff] }
 0xa63   :  { %v5283_v28 = vpop.f32.mrf.mxu1  ;;  %v1451_v51 = vadd.f32 %v13811_v60, %v13803_v27  ;;  %v13820_v60 = vld [vmem:[#allocation320_spill] sm:$0xff] }
 0xa64   :  { %v5370_v61 = vadd.f32 %v5283_v28, %v1431_v53  ;;  %v5401_v48 = vmul.f32 0.5, %v5369_v15  ;;  %8114 = vtanh.f32 %v5400_v43  ;;  %v13812_v53 = vld [vmem:[#allocation20_spill] sm:$0xff] }
 0xa65   :  { %v5285_v26 = vpop.f32.mrf.mxu1 }
 0xa66   :  { %v5371_v49 = vadd.f32 %v5285_v26, %v1433_v21  ;;  %v5402_v28 = vmul.f32 0.5, %v5370_v61  ;;  %8116 = vtanh.f32 %v5401_v48 }
 0xa67   :  { %v5289_v11 = vpop.f32.mrf.mxu1 }
 0xa68   :  { %v5372_v26 = vadd.f32 %v5289_v11, %v1437_v58  ;;  %v5403_v20 = vmul.f32 0.5, %v5371_v49  ;;  %v13813_v11 = vld [vmem:[#allocation264_spill] sm:$0xff]  ;;  %v13817_v58 = vld [vmem:[#allocation294_spill] sm:$0xff] }
 0xa69   :  { %v5291_v2 = vpop.f32.mrf.mxu1  ;;  %v1461_v15 = vadd.f32 %v13813_v11, %v13812_v53 }
 0xa6a   :  { %v5373_v8 = vadd.f32 %v5291_v2, %v1439_v12  ;;  %v5404_v16 = vmul.f32 0.5, %v5372_v26  ;;  %v13814_v2 = vld [vmem:[#allocation267_spill] sm:$0xff] }
 0xa6b   :  { %v5295_v36 = vpop.f32.mrf.mxu1  ;;  %v1463_v0 = vadd.f32 %v13814_v2, %v13812_v53  ;;  %v13825_v2 = vld [vmem:[#allocation279_spill] sm:$0xff] }
 0xa6c   :  { %v5374_v35 = vadd.f32 %v5295_v36, %v1443_v45 }
 0xa6d   :  { %v11897_v46 = vpop.f32.mrf.mxu1 }
 0xa6e   :  { %v5406_v36 = vmul.f32 0.5, %v5374_v35  ;;  %v5405_v35 = vmul.f32 0.5, %v5373_v8 }
 0xa6f   :  { %v5301_v13 = vpop.f32.mrf.mxu1 }
 0xa70   :  { %v5376_v32 = vadd.f32 %v5301_v13, %v1449_v47  ;;  %8118 = vtanh.f32 %v5406_v36 }
 0xa71   :  { %v5303_v4 = vpop.f32.mrf.mxu1  ;;  %8120 = vtanh.f32 %v5402_v28  ;;  %v13818_v28 = vld [vmem:[#allocation45_spill] sm:$0xff] }
 0xa72   :  { %v5408_v41 = vmul.f32 0.5, %v5376_v32  ;;  %v5377_v21 = vadd.f32 %v5303_v4, %v1451_v51  ;;  %8122 = vtanh.f32 %v5403_v20  ;;  %v1491_v4 = vadd.f32 %v13817_v58, %v13816_v54  ;;  %v13821_v51 = vld [vmem:[#allocation270_spill] sm:$0xff]  ;;  %v13829_v58 = vld [vmem:[#allocation285_spill] sm:$0xff] }
 0xa73   :  { %v5307_v42 = vpop.f32.mrf.mxu1 }
 0xa74   :  { %v5378_v45 = vadd.f32 %v5307_v42, %v1455_v40  ;;  %8124 = vtanh.f32 %v5408_v41  ;;  %v5409_v48 = vmul.f32 0.5, %v5377_v21  ;;  %v8111_v40 = vpop.eup %8110  ;;  %v13822_v41 = vld [vmem:[#allocation273_spill] sm:$0xff] }
 0xa75   :  { %v5309_v31 = vpop.f32.mrf.mxu1  ;;  %8126 = vtanh.f32 %v5404_v16  ;;  %v8113_v29 = vpop.eup %8112  ;;  %v13824_v16 = vld [vmem:[#allocation276_spill] sm:$0xff] }
 0xa76   :  { %v5379_v23 = vadd.f32 %v5309_v31, %v1457_v17  ;;  %v5410_v47 = vmul.f32 0.5, %v5378_v45  ;;  %v13815_v31 = vld [vmem:[#allocation249_spill] sm:$0xff]  ;;  %8128 = vtanh.f32 %v5405_v35  ;;  %v8115_v8 = vpop.eup %8114  ;;  %v1469_v45 = vadd.f32 %v13822_v41, %v13820_v60  ;;  %v13826_v35 = vld [vmem:[#allocation303_spill] sm:$0xff]  ;;  %v13833_v41 = vld [vmem:[#allocation288_spill] sm:$0xff] }
 0xa77   :  { %v5313_v37 = vpop.f32.mrf.mxu1  ;;  %v1445_v34 = vadd.f32 %v13815_v31, %v13798_v33  ;;  %v8117_v11 = vpop.eup %8116 }
 0xa78   :  { %v5380_v42 = vadd.f32 %v5313_v37, %v1461_v15  ;;  %v5411_v61 = vmul.f32 0.5, %v5379_v23  ;;  %8130 = vtanh.f32 %v5410_v47  ;;  %v13823_v15 = vld [vmem:[#allocation319_spill] sm:$0xff]  ;;  %v1499_v47 = vadd.f32 %v13826_v35, %v13818_v28 }
 0xa79   :  { %v5315_v52 = vpop.f32.mrf.mxu1  ;;  %v5375_v32 = vadd.f32 %v11897_v46, %v1445_v34  ;;  %v1467_v46 = vadd.f32 %v13821_v51, %v13820_v60  ;;  %v11958_v21 = vadd.f32 %v13824_v16, %v13823_v15  ;;  %v13827_v34 = vld [vmem:[#allocation317_spill] sm:$0xff] }
 0xa7a   :  { %v5381_v43 = vadd.f32 %v5315_v52, %v1463_v0  ;;  %v5412_v12 = vmul.f32 0.5, %v5380_v42  ;;  %8132 = vtanh.f32 %v5411_v61  ;;  %v13819_v52 = vld [vmem:[#allocation300_spill] sm:$0xff]  ;;  %v1475_v0 = vadd.f32 %v13825_v2, %v13823_v15  ;;  %v13828_v61 = vld [vmem:[#allocation282_spill] sm:$0xff]  ;;  %v13832_v51 = vld [vmem:[#allocation53_spill] sm:$0xff] }
 0xa7b   :  { %v11909_v19 = vpop.f32.mrf.mxu1  ;;  %v1497_v26 = vadd.f32 %v13819_v52, %v13818_v28  ;;  %8134 = vtanh.f32 %v5409_v48  ;;  %v5407_v17 = vmul.f32 0.5, %v5375_v32  ;;  %v13830_v48 = vld [vmem:[#allocation306_spill] sm:$0xff]  ;;  %v5446_v52 = vadd.f32 1.0, %v8111_v40  ;;  %v13834_v2 = vld [vmem:[#allocation291_spill] sm:$0xff] }
 0xa7c   :  { %v5413_v37 = vmul.f32 0.5, %v5381_v43  ;;  %v11966_v43 = vadd.f32 %v13828_v61, %v13827_v34  ;;  %v1503_v32 = vadd.f32 %v13830_v48, %v13773_v55  ;;  %v1485_v16 = vadd.f32 %v13833_v41, %v13832_v51  ;;  %v13835_v61 = vld [vmem:[#allocation309_spill] sm:$0xff] }
 0xa7d   :  { %v11915_v9 = vpop.f32.mrf.mxu1  ;;  %v8119_v31 = vpop.eup %8118  ;;  %v1487_v35 = vadd.f32 %v13834_v2, %v13832_v51  ;;  %v5448_v15 = vadd.f32 1.0, %v8115_v8  ;;  %v5470_v2 = vmul.f32 0.5, %v5446_v52  ;;  %v5449_v51 = vadd.f32 1.0, %v8117_v11 }
 0xa7e   :  { %v5454_v60 = vadd.f32 1.0, %v8119_v31  ;;  %v5382_v52 = vadd.f32 %v11909_v19, %v1467_v46 }
 0xa7f   :  { %v11919_v63 = vpop.f32.mrf.mxu1 }
 0xa81   :  { %v11925_v18 = vpop.f32.mrf.mxu1 }
 0xa83   :  { %v11931_v13 = vpop.f32.mrf.mxu1 }
 0xa85   :  { %v11935_v3 = vpop.f32.mrf.mxu1 }
 0xa87   :  { %v11941_v62 = vpop.f32.mrf.mxu1 }
 0xa89   :  { %v11945_v49 = vpop.f32.mrf.mxu1 }
 0xa8b   :  { %v5343_v5 = vpop.f32.mrf.mxu1 }
 0xa8c   :  { %v5390_v36 = vadd.f32 %v5343_v5, %v1491_v4  ;;  %v1481_v4 = vadd.f32 %v13829_v58, %v13827_v34  ;;  %v8121_v5 = vpop.eup %8120  ;;  %v1505_v58 = vadd.f32 %v13835_v61, %v13773_v55  ;;  %v5447_v34 = vadd.f32 1.0, %v8113_v29 }
 0xa8d   :  { %v5345_v57 = vpop.f32.mrf.mxu1  ;;  %v5450_v53 = vadd.f32 1.0, %v8121_v5  ;;  %v5472_v61 = vmul.f32 0.5, %v5448_v15 }
 0xa8e   :  { %8136 = vtanh.f32 %v5390_v36  ;;  %v5387_v19 = vadd.f32 %v11935_v3, %v1481_v4 }
 0xa8f   :  { %v5349_v20 = vpop.f32.mrf.mxu1  ;;  %8138 = vtanh.f32 %v5412_v12  ;;  %v13831_v12 = vld [vmem:[#allocation297_spill] sm:$0xff] }
 0xa90   :  { %v5392_v23 = vadd.f32 %v5349_v20, %v1497_v26  ;;  %8140 = vtanh.f32 %v5413_v37  ;;  %v1493_v36 = vadd.f32 %v13831_v12, %v13816_v54  ;;  %v8123_v20 = vpop.eup %8122 }
 0xa91   :  { %v5351_v42 = vpop.f32.mrf.mxu1  ;;  %v5451_v29 = vadd.f32 1.0, %v8123_v20  ;;  %v5474_v20 = vmul.f32 0.5, %v5450_v53  ;;  %v5414_v53 = vmul.f32 0.5, %v5382_v52 }
 0xa92   :  { %8142 = vtanh.f32 %v5392_v23  ;;  %v5393_v37 = vadd.f32 %v5351_v42, %v1499_v47  ;;  %v8125_v23 = vpop.eup %8124  ;;  %v5391_v12 = vadd.f32 %v5345_v57, %v1493_v36  ;;  %v13837_v42 = vld [vmem:[#allocation311_spill] sm:$0xff]  ;;  %v11984_v36 = vmul.f32 0.5, %v5447_v34 }
 0xa93   :  { %8144 = vtanh.f32 %v5407_v17  ;;  %v5355_v26 = vpop.f32.mrf.mxu1  ;;  %v13836_v17 = vld [vmem:[#allocation310_spill] sm:$0xff]  ;;  %v1511_v28 = vadd.f32 %v13837_v42, %v13780_v24  ;;  %v8127_v54 = vpop.eup %8126  ;;  %v5456_v8 = vadd.f32 1.0, %v8125_v23  ;;  %v5383_v23 = vadd.f32 %v11915_v9, %v1469_v45 }
 0xa94   :  { %v5394_v48 = vadd.f32 %v5355_v26, %v1503_v32  ;;  %v1509_v47 = vadd.f32 %v13836_v17, %v13780_v24  ;;  %v8129_v26 = vpop.eup %8128  ;;  %v5478_v17 = vmul.f32 0.5, %v5454_v60  ;;  %v5389_v9 = vadd.f32 %v11945_v49, %v1487_v35 }
 0xa95   :  { %v5357_v40 = vpop.f32.mrf.mxu1  ;;  %v8131_v31 = vpop.eup %8130  ;;  %v5480_v15 = vmul.f32 0.5, %v5456_v8 }
 0xa96   :  { %8146 = vtanh.f32 %v5394_v48  ;;  %v5395_v41 = vadd.f32 %v5357_v40, %v1505_v58  ;;  %v8133_v48 = vpop.eup %8132  ;;  %v5452_v58 = vadd.f32 1.0, %v8127_v54  ;;  %v5385_v40 = vadd.f32 %v11925_v18, %v1475_v0 }
 0xa97   :  { %8148 = vtanh.f32 %v5393_v37  ;;  %v5361_v32 = vpop.f32.mrf.mxu1  ;;  %v8135_v5 = vpop.eup %8134  ;;  %v11987_v37 = vmul.f32 0.5, %v5449_v51  ;;  %v5458_v60 = vadd.f32 1.0, %v8131_v31  ;;  %v5502_v54 = vmul.f32 %v5478_v17, %v11812_v1 }
 0xa98   :  { %8150 = vtanh.f32 %v5395_v41  ;;  %v5396_v57 = vadd.f32 %v5361_v32, %v1509_v47  ;;  %v5475_v47 = vmul.f32 0.5, %v5451_v29  ;;  %v5459_v41 = vadd.f32 1.0, %v8133_v48 }
 0xa99   :  { %8152 = vtanh.f32 %v5391_v12  ;;  %v5363_v42 = vpop.f32.mrf.mxu1  ;;  %v5476_v51 = vmul.f32 0.5, %v5452_v58  ;;  %v5453_v32 = vadd.f32 1.0, %v8129_v26  ;;  %v5415_v18 = vmul.f32 0.5, %v5383_v23 }
 0xa9a   :  { %8154 = vtanh.f32 %v5396_v57  ;;  %v5397_v11 = vadd.f32 %v5363_v42, %v1511_v28  ;;  %v5417_v0 = vmul.f32 0.5, %v5385_v40  ;;  %v5388_v29 = vadd.f32 %v11941_v62, %v1485_v16 }
 0xa9b   :  { %v8137_v34 = vpop.eup %8136  ;;  %v5504_v1 = vmul.f32 %v5480_v15, %v11817_v10  ;;  %v5482_v31 = vmul.f32 0.5, %v5458_v60  ;;  %v5457_v4 = vadd.f32 1.0, %v8135_v5  ;;  %v5386_v26 = vadd.f32 %v11931_v13, %v11966_v43 }
 0xa9c   :  { %8156 = vtanh.f32 %v5397_v11  ;;  %v8139_v12 = vpop.eup %8138  ;;  %v5510_v28 = vmul.f32 %v8137_v34, %v5470_v2  ;;  %v5483_v2 = vmul.f32 0.5, %v5459_v41  ;;  %v5419_v42 = vmul.f32 0.5, %v5387_v19 }
 0xa9d   :  { %v8141_v46 = vpop.eup %8140  ;;  %v5460_v17 = vadd.f32 1.0, %v8139_v12  ;;  %8158 = vtanh.f32 %v5414_v53  ;;  %v5421_v35 = vmul.f32 0.5, %v5389_v9  ;;  %v5384_v10 = vadd.f32 %v11919_v63, %v11958_v21 }
 0xa9e   :  { %v11995_v8 = vadd.f32 %v5510_v28, %v5502_v54  ;;  %v5461_v49 = vadd.f32 1.0, %v8141_v46  ;;  %8160 = vtanh.f32 %v5415_v18  ;;  %v5420_v58 = vmul.f32 0.5, %v5388_v29 }
 0xa9f   :  { %v8143_v45 = vpop.eup %8142  ;;  %v5484_v11 = vmul.f32 0.5, %v5460_v17  ;;  %8162 = vtanh.f32 %v5417_v0  ;;  %v5481_v43 = vmul.f32 0.5, %v5457_v4  ;;  %v5507_v23 = vmul.f32 %v5483_v2, %v11827_v6 }
 0xaa0   :  { %v8145_v57 = vpop.eup %8144  ;;  %v5512_v3 = vmul.f32 %v8143_v45, %v5472_v61  ;;  %v5506_v61 = vmul.f32 %v5482_v31, %v11823_v22  ;;  %v5418_v40 = vmul.f32 0.5, %v5386_v26  ;;  %8164 = vtanh.f32 %v5419_v42 }
 0xaa1   :  { %v5455_v16 = vadd.f32 1.0, %v8145_v57  ;;  %v5485_v15 = vmul.f32 0.5, %v5461_v49  ;;  %8166 = vtanh.f32 %v5421_v35  ;;  %v5477_v21 = vmul.f32 0.5, %v5453_v32 }
 0xaa2   :  { %v12000_v48 = vadd.f32 %v5512_v3, %v5504_v1  ;;  %v5416_v41 = vmul.f32 0.5, %v5384_v10  ;;  %8168 = vtanh.f32 %v5420_v58  ;;  %v5508_v22 = vmul.f32 %v5484_v11, %v11832_v25 }
 0xaa3   :  { %v8147_v62 = vpop.eup %8146  ;;  %v5479_v54 = vmul.f32 0.5, %v5455_v16  ;;  %v5505_v46 = vmul.f32 %v5481_v43, %v11835_v7  ;;  %8170 = vtanh.f32 %v5418_v40  ;;  %v5509_v53 = vmul.f32 %v5485_v15, %v11837_v44 }
 0xaa4   :  { %v8149_v52 = vpop.eup %8148  ;;  %v5514_v5 = vmul.f32 %v8147_v62, %v5474_v20  ;;  %8172 = vtanh.f32 %v5416_v41 }
 0xaa5   :  { %v8151_v13 = vpop.eup %8150  ;;  %v5513_v20 = vmul.f32 %v8149_v52, %v11987_v37  ;;  %v5503_v45 = vmul.f32 %v5479_v54, %v11841_v56 }
 0xaa6   :  { %v8153_v34 = vpop.eup %8152  ;;  %v12006_v60 = vadd.f32 %v5514_v5, %v5506_v61  ;;  %v5515_v12 = vmul.f32 %v8151_v13, %v5475_v47 }
 0xaa7   :  { %v8155_v63 = vpop.eup %8154  ;;  %v5511_v47 = vmul.f32 %v8153_v34, %v11984_v36  ;;  %v12018_v25 = vadd.f32 %v5513_v20, %v5505_v46  ;;  %v12043_v46 = vld [vmem:[%s12908_s2 + $0x8] sm:$0xff] }
 0xaa8   :  { %v12010_v19 = vadd.f32 %v5515_v12, %v5507_v23  ;;  %v5516_v6 = vmul.f32 %v8155_v63, %v5476_v51 }
 0xaa9   :  { %v8157_v28 = vpop.eup %8156  ;;  %v12024_v7 = vadd.f32 %v5511_v47, %v5503_v45  ;;  %v12059_v47 = vld [vmem:[%s12908_s2 + $0x18] sm:$0xff]  ;;  %v12075_v45 = vld [vmem:[%s12908_s2 + $0x28] sm:$0xff] }
 0xaaa   :  { %v12015_v9 = vadd.f32 %v5516_v6, %v5508_v22  ;;  %v5517_v32 = vmul.f32 %v8157_v28, %v5477_v21  ;;  %8174 = vtanh.f32 %v12010_v19  ;;  %v8159_v44 = vpop.eup %8158  ;;  %v12035_v28 = vld [vmem:[%s12908_s2] sm:$0xff] }
 0xaab   :  { %v8161_v36 = vpop.eup %8160  ;;  %v5462_v11 = vadd.f32 1.0, %v8159_v44  ;;  %v12083_v44 = vld [vmem:[%s12908_s2 + $0x30] sm:$0xff] }
 0xaac   :  { %v12020_v37 = vadd.f32 %v5517_v32, %v5509_v53  ;;  %8176 = vtanh.f32 %v12015_v9  ;;  %v8163_v51 = vpop.eup %8162  ;;  %v5463_v10 = vadd.f32 1.0, %v8161_v36  ;;  %v12051_v53 = vld [vmem:[%s12908_s2 + $0x10] sm:$0xff]  ;;  %v12067_v32 = vld [vmem:[%s12908_s2 + $0x20] sm:$0xff]  ;;  %v12091_v36 = vld [vmem:[%s12908_s2 + $0x38] sm:$0xff] }
 0xaad   :  { %v8165_v56 = vpop.eup %8164  ;;  %v5465_v26 = vadd.f32 1.0, %v8163_v51  ;;  %v5486_v41 = vmul.f32 0.5, %v5462_v11  ;;  %13838 = vst [vmem:[#allocation41_spill] sm:$0xff] %v12091_v36  ;;  %v12099_v51 = vld [vmem:[%s12908_s2 + $0x40] sm:$0xff]  ;;  %v13847_v11 = vld [vmem:[#allocation214_spill] sm:$0xff] }
 0xaae   :  { %8178 = vtanh.f32 %v12020_v37  ;;  %v8167_v18 = vpop.eup %8166  ;;  %v5467_v17 = vadd.f32 1.0, %v8165_v56  ;;  %v5487_v21 = vmul.f32 0.5, %v5463_v10  ;;  %13839 = vst [vmem:[#allocation43_spill] sm:$0xff] %v12099_v51  ;;  %v12107_v56 = vld [vmem:[%s12908_s2 + $0x48] sm:$0xff] }
 0xaaf   :  { %8180 = vtanh.f32 %v12006_v60  ;;  %v8169_v0 = vpop.eup %8168  ;;  %v5469_v57 = vadd.f32 1.0, %v8167_v18  ;;  %v5489_v23 = vmul.f32 0.5, %v5465_v26  ;;  %13840 = vst [vmem:[#allocation44_spill] sm:$0xff] %v12107_v56  ;;  %v12115_v18 = vld [vmem:[%s12908_s2 + $0x50] sm:$0xff] }
 0xab0   :  { %8182 = vtanh.f32 %v12018_v25  ;;  %v8171_v29 = vpop.eup %8170  ;;  %v5468_v1 = vadd.f32 1.0, %v8169_v0  ;;  %v5491_v58 = vmul.f32 0.5, %v5467_v17  ;;  %13841 = vst [vmem:[#allocation69_spill] sm:$0xff] %v12115_v18  ;;  %v12123_v0 = vld [vmem:[%s12908_s2 + $0x58] sm:$0xff] }
 0xab1   :  { %8184 = vtanh.f32 %v12000_v48  ;;  %v8173_v31 = vpop.eup %8172  ;;  %v5466_v4 = vadd.f32 1.0, %v8171_v29  ;;  %v5493_v42 = vmul.f32 0.5, %v5469_v57  ;;  %13842 = vst [vmem:[#allocation64_spill] sm:$0xff] %v12123_v0  ;;  %v12131_v29 = vld [vmem:[%s12908_s2 + $0x60] sm:$0xff]  ;;  %v12139_v57 = vld [vmem:[%s12908_s2 + $0x68] sm:$0xff] }
 0xab2   :  { %8186 = vtanh.f32 %v12024_v7  ;;  %v5464_v35 = vadd.f32 1.0, %v8173_v31  ;;  %v5492_v62 = vmul.f32 0.5, %v5468_v1  ;;  %13843 = vst [vmem:[#allocation66_spill] sm:$0xff] %v12131_v29  ;;  %13844 = vst [vmem:[#allocation68_spill] sm:$0xff] %v12139_v57  ;;  %v12147_v1 = vld [vmem:[%s12908_s2 + $0x70] sm:$0xff]  ;;  %v12155_v31 = vld [vmem:[%s12908_s2 + $0x78] sm:$0xff] }
 0xab3   :  { %8188 = vtanh.f32 %v11995_v8  ;;  %v5490_v5 = vmul.f32 0.5, %v5466_v4  ;;  %13845 = vst [vmem:[#allocation71_spill] sm:$0xff] %v12147_v1  ;;  %13846 = vst [vmem:[#allocation73_spill] sm:$0xff] %v12155_v31 }
 0xab4   :  { %v5488_v15 = vmul.f32 0.5, %v5464_v35 }
 0xab7   :  { %v8175_v3 = vpop.eup %8174 }
 0xab8   :  { %v5539_v40 = vmul.f32 %v8175_v3, %v5491_v58 }
 0xab9   :  { %v8177_v2 = vpop.eup %8176 }
 0xaba   :  { %v5540_v13 = vmul.f32 %v8177_v2, %v5492_v62 }
 0xabb   :  { %v8179_v49 = vpop.eup %8178 }
 0xabc   :  { %v8181_v16 = vpop.eup %8180  ;;  %v5541_v52 = vmul.f32 %v8179_v49, %v5493_v42 }
 0xabd   :  { %v8183_v61 = vpop.eup %8182  ;;  %v5538_v12 = vmul.f32 %v8181_v16, %v5490_v5  ;;  %v1580_v5 = vadd.f32 %v13847_v11, %v13792_v30  ;;  %v13852_v11 = vld [vmem:[#allocation220_spill] sm:$0xff] }
 0xabe   :  { %v8185_v43 = vpop.eup %8184  ;;  %5598 = vmatprep.subr.mxu0 %v5541_v52  ;;  %v5537_v54 = vmul.f32 %v8183_v61, %v5489_v23 }
 0xabf   :  { %v8187_v34 = vpop.eup %8186  ;;  %5599 = vmatpush1.msra.mxu0 %v5540_v13  ;;  %v5536_v22 = vmul.f32 %v8185_v43, %v5488_v15  ;;  %v13848_v43 = vld [vmem:[#allocation215_spill] sm:$0xff] }
 0xac0   :  { %v8189_v63 = vpop.eup %8188  ;;  %5600 = vmatprep.subr.mxu0 %v5539_v40  ;;  %v5535_v20 = vmul.f32 %v8187_v34, %v5487_v21  ;;  %v1582_v23 = vadd.f32 %v13848_v43, %v13792_v30  ;;  %v13849_v40 = vld [vmem:[#allocation217_spill] sm:$0xff] }
 0xac1   :  { %5601 = vmatpush1.msra.mxu0 %v5538_v12  ;;  %v5534_v6 = vmul.f32 %v8189_v63, %v5486_v41  ;;  %v1586_v34 = vadd.f32 %v13849_v40, %v13795_v14  ;;  %v13850_v63 = vld [vmem:[#allocation218_spill] sm:$0xff]  ;;  %v13853_v43 = vld [vmem:[#allocation221_spill] sm:$0xff] }
 0xac2   :  { %5602 = vmatprep.subr.mxu0 %v5537_v54  ;;  %v1588_v21 = vadd.f32 %v13850_v63, %v13795_v14  ;;  %v13851_v41 = vld [vmem:[#allocation226_spill] sm:$0xff]  ;;  %v1594_v30 = vadd.f32 %v13853_v43, %v13800_v59  ;;  %v13854_v63 = vld [vmem:[#allocation229_spill] sm:$0xff]  ;;  %v13856_v43 = vld [vmem:[#allocation224_spill] sm:$0xff] }
 0xac3   :  { %5603 = vmatpush1.msra.mxu0 %v5536_v22  ;;  %v1604_v22 = vadd.f32 %v13851_v41, %v13798_v33 }
 0xac4   :  { %5604 = vmatprep.subr.mxu0 %v5535_v20 }
 0xac5   :  { %5605 = vmatpush1.msra.mxu0 %v5534_v6 }
 0xac6   :  { %7435 = vmatmul.mubr.msk.f32.vlgmr.msra.gmra.mxu0 %vm2573_vm1, %v12035_v28 }
 0xac7   :  { %5644 = vmatprep.mubr.f32.mxu0 %v13135_v50 }
 0xaca   :  { %7436 = vmatmul.mubr.msk.f32.gmra.mxu0 %vm2573_vm1, %v12043_v46 }
 0xacb   :  { %5650 = vmatprep.mubr.f32.mxu0 %v13135_v50 }
 0xace   :  { %7437 = vmatmul.mubr.msk.f32.gmra.mxu0 %vm2573_vm1, %v12051_v53 }
 0xacf   :  { %5656 = vmatprep.mubr.f32.mxu0 %v13135_v50 }
 0xad2   :  { %7438 = vmatmul.mubr.msk.f32.gmra.mxu0 %vm2573_vm1, %v12059_v47 }
 0xad3   :  { %5662 = vmatprep.mubr.f32.mxu0 %v13135_v50 }
 0xad6   :  { %7439 = vmatmul.mubr.msk.f32.gmra.mxu0 %vm2573_vm1, %v12067_v32 }
 0xad7   :  { %5668 = vmatprep.mubr.f32.mxu0 %v13135_v50 }
 0xada   :  { %7440 = vmatmul.mubr.msk.f32.gmra.mxu0 %vm2573_vm1, %v12075_v45 }
 0xadb   :  { %5674 = vmatprep.mubr.f32.mxu0 %v13135_v50 }
 0xade   :  { %7441 = vmatmul.mubr.msk.f32.gmra.mxu0 %vm2573_vm1, %v12083_v44 }
 0xadf   :  { %5680 = vmatprep.mubr.f32.mxu0 %v13135_v50 }
 0xae2   :  { %7442 = vmatmul.mubr.msk.f32.gmra.mxu0 %vm2573_vm1, %v12091_v36 }
 0xae3   :  { %5686 = vmatprep.mubr.f32.mxu0 %v13135_v50 }
 0xae6   :  { %7443 = vmatmul.mubr.msk.f32.gmra.mxu0 %vm2573_vm1, %v12099_v51 }
 0xae7   :  { %5692 = vmatprep.mubr.f32.mxu0 %v13135_v50 }
 0xaea   :  { %7444 = vmatmul.mubr.msk.f32.gmra.mxu0 %vm2573_vm1, %v12107_v56 }
 0xaeb   :  { %5698 = vmatprep.mubr.f32.mxu0 %v13135_v50 }
 0xaee   :  { %7445 = vmatmul.mubr.msk.f32.gmra.mxu0 %vm2573_vm1, %v12115_v18 }
 0xaef   :  { %5704 = vmatprep.mubr.f32.mxu0 %v13135_v50 }
 0xaf2   :  { %7446 = vmatmul.mubr.msk.f32.gmra.mxu0 %vm2573_vm1, %v12123_v0 }
 0xaf3   :  { %5710 = vmatprep.mubr.f32.mxu0 %v13135_v50 }
 0xaf6   :  { %7447 = vmatmul.mubr.msk.f32.gmra.mxu0 %vm2573_vm1, %v12131_v29 }
 0xaf7   :  { %5716 = vmatprep.mubr.f32.mxu0 %v13135_v50 }
 0xafa   :  { %7448 = vmatmul.mubr.msk.f32.gmra.mxu0 %vm2573_vm1, %v12139_v57  ;;  %v13855_v57 = vld [vmem:[#allocation223_spill] sm:$0xff] }
 0xafb   :  { %5722 = vmatprep.mubr.f32.mxu0 %v13135_v50 }
 0xafe   :  { %7449 = vmatmul.mubr.msk.f32.gmra.mxu0 %vm2573_vm1, %v12147_v1 }
 0xaff   :  { %5728 = vmatprep.mubr.f32.mxu0 %v13135_v50 }
 0xb02   :  { %7450 = vmatmul.mubr.msk.f32.gmra.mxu0 %vm2573_vm1, %v12155_v31  ;;  %v1592_v31 = vadd.f32 %v13852_v11, %v13800_v59  ;;  %v1598_v11 = vadd.f32 %v13855_v57, %v13805_v39  ;;  %v13881_v59 = vld [vmem:[#allocation247_spill] sm:$0xff] }
 0xb03   :  { %6376 = vmatprep.mubr.f32.mxu0 %v13135_v50 }
 0xb86   :  { %v5640_v17 = vpop.f32.mrf.mxu0 }
 0xb87   :  { %v5735_v15 = vadd.f32 %v5640_v17, %v1580_v5 }
 0xb88   :  { %v5642_v3 = vpop.f32.mrf.mxu0 }
 0xb89   :  { %v5736_v54 = vadd.f32 %v5642_v3, %v1582_v23  ;;  %v5767_v40 = vmul.f32 0.5, %v5735_v15  ;;  %v1610_v3 = vadd.f32 %v13854_v63, %v13803_v27  ;;  %v1600_v15 = vadd.f32 %v13856_v43, %v13805_v39  ;;  %v13857_v63 = vld [vmem:[#allocation232_spill] sm:$0xff] }
 0xb8a   :  { %v5646_v4 = vpop.f32.mrf.mxu0 }
 0xb8b   :  { %v5737_v20 = vadd.f32 %v5646_v4, %v1586_v34  ;;  %v5768_v23 = vmul.f32 0.5, %v5736_v54  ;;  %8190 = vtanh.f32 %v5767_v40  ;;  %v1616_v54 = vadd.f32 %v13857_v63, %v13808_v38 }
 0xb8c   :  { %v5648_v2 = vpop.f32.mrf.mxu0 }
 0xb8d   :  { %v5738_v1 = vadd.f32 %v5648_v2, %v1588_v21  ;;  %v5769_v41 = vmul.f32 0.5, %v5737_v20  ;;  %8192 = vtanh.f32 %v5768_v23  ;;  %v13859_v20 = vld [vmem:[#allocation230_spill] sm:$0xff] }
 0xb8e   :  { %v5652_v26 = vpop.f32.mrf.mxu0  ;;  %v1612_v40 = vadd.f32 %v13859_v20, %v13803_v27  ;;  %v13880_v27 = vld [vmem:[#allocation53_spill] sm:$0xff] }
 0xb8f   :  { %v5739_v14 = vadd.f32 %v5652_v26, %v1592_v31  ;;  %v5770_v2 = vmul.f32 0.5, %v5738_v1  ;;  %v13858_v26 = vld [vmem:[#allocation233_spill] sm:$0xff]  ;;  %8194 = vtanh.f32 %v5769_v41 }
 0xb90   :  { %v5654_v42 = vpop.f32.mrf.mxu0 }
 0xb91   :  { %v5740_v4 = vadd.f32 %v5654_v42, %v1594_v30  ;;  %v5771_v31 = vmul.f32 0.5, %v5739_v14  ;;  %v1618_v42 = vadd.f32 %v13858_v26, %v13808_v38  ;;  %8196 = vtanh.f32 %v5770_v2  ;;  %v13860_v14 = vld [vmem:[#allocation20_spill] sm:$0xff] }
 0xb92   :  { %v5658_v49 = vpop.f32.mrf.mxu0  ;;  %v13876_v38 = vld [vmem:[#allocation244_spill] sm:$0xff] }
 0xb93   :  { %v5741_v30 = vadd.f32 %v5658_v49, %v1598_v11  ;;  %v5772_v57 = vmul.f32 0.5, %v5740_v4  ;;  %v13861_v49 = vld [vmem:[#allocation235_spill] sm:$0xff] }
 0xb94   :  { %v5660_v35 = vpop.f32.mrf.mxu0  ;;  %v1622_v23 = vadd.f32 %v13861_v49, %v13860_v14 }
 0xb95   :  { %v5742_v1 = vadd.f32 %v5660_v35, %v1600_v15  ;;  %v5773_v11 = vmul.f32 0.5, %v5741_v30  ;;  %v13862_v35 = vld [vmem:[#allocation236_spill] sm:$0xff]  ;;  %v13865_v30 = vld [vmem:[#allocation250_spill] sm:$0xff] }
 0xb96   :  { %v5664_v62 = vpop.f32.mrf.mxu0  ;;  %v1624_v4 = vadd.f32 %v13862_v35, %v13860_v14 }
 0xb97   :  { %v5743_v17 = vadd.f32 %v5664_v62, %v1604_v22  ;;  %v5774_v15 = vmul.f32 0.5, %v5742_v1 }
 0xb98   :  { %v12160_v16 = vpop.f32.mrf.mxu0  ;;  %v8191_v49 = vpop.eup %8190 }
 0xb99   :  { %v5775_v62 = vmul.f32 0.5, %v5743_v17 }
 0xb9a   :  { %v5670_v10 = vpop.f32.mrf.mxu0  ;;  %v8193_v35 = vpop.eup %8192 }
 0xb9b   :  { %v5745_v21 = vadd.f32 %v5670_v10, %v1610_v3  ;;  %8198 = vtanh.f32 %v5775_v62  ;;  %v5816_v0 = vadd.f32 1.0, %v8193_v35 }
 0xb9c   :  { %v5672_v58 = vpop.f32.mrf.mxu0  ;;  %8200 = vtanh.f32 %v5771_v31  ;;  %v13864_v31 = vld [vmem:[#allocation42_spill] sm:$0xff] }
 0xb9d   :  { %v5777_v17 = vmul.f32 0.5, %v5745_v21  ;;  %v5746_v41 = vadd.f32 %v5672_v58, %v1612_v40  ;;  %8202 = vtanh.f32 %v5772_v57  ;;  %v1652_v58 = vadd.f32 %v13865_v30, %v13864_v31  ;;  %v13872_v30 = vld [vmem:[#allocation241_spill] sm:$0xff] }
 0xb9e   :  { %v5676_v52 = vpop.f32.mrf.mxu0 }
 0xb9f   :  { %v5747_v3 = vadd.f32 %v5676_v52, %v1616_v54  ;;  %8204 = vtanh.f32 %v5777_v17  ;;  %v5778_v20 = vmul.f32 0.5, %v5746_v41  ;;  %v8195_v41 = vpop.eup %8194 }
 0xba0   :  { %v5678_v61 = vpop.f32.mrf.mxu0  ;;  %8206 = vtanh.f32 %v5773_v11  ;;  %v5817_v18 = vadd.f32 1.0, %v8195_v41 }
 0xba1   :  { %v5748_v43 = vadd.f32 %v5678_v61, %v1618_v42  ;;  %v5779_v2 = vmul.f32 0.5, %v5747_v3  ;;  %v13863_v61 = vld [vmem:[#allocation227_spill] sm:$0xff]  ;;  %8208 = vtanh.f32 %v5774_v15  ;;  %v13868_v15 = vld [vmem:[#allocation320_spill] sm:$0xff] }
 0xba2   :  { %v5682_v13 = vpop.f32.mrf.mxu0  ;;  %v1606_v21 = vadd.f32 %v13863_v61, %v13798_v33  ;;  %v13869_v61 = vld [vmem:[#allocation238_spill] sm:$0xff]  ;;  %v13882_v33 = vld [vmem:[#allocation248_spill] sm:$0xff] }
 0xba3   :  { %v5749_v52 = vadd.f32 %v5682_v13, %v1622_v23  ;;  %v5780_v62 = vmul.f32 0.5, %v5748_v43  ;;  %8210 = vtanh.f32 %v5779_v2  ;;  %v13866_v43 = vld [vmem:[#allocation45_spill] sm:$0xff]  ;;  %v13870_v2 = vld [vmem:[#allocation239_spill] sm:$0xff]  ;;  %v1648_v29 = vadd.f32 %v13882_v33, %v13880_v27 }
 0xba4   :  { %v5684_v12 = vpop.f32.mrf.mxu0  ;;  %v5744_v57 = vadd.f32 %v12160_v16, %v1606_v21  ;;  %v1628_v16 = vadd.f32 %v13869_v61, %v13868_v15  ;;  %v13875_v61 = vld [vmem:[#allocation317_spill] sm:$0xff] }
 0xba5   :  { %v5750_v54 = vadd.f32 %v5684_v12, %v1624_v4  ;;  %v5781_v40 = vmul.f32 0.5, %v5749_v52  ;;  %8212 = vtanh.f32 %v5780_v62  ;;  %v13867_v12 = vld [vmem:[#allocation253_spill] sm:$0xff]  ;;  %v1630_v52 = vadd.f32 %v13870_v2, %v13868_v15  ;;  %v8197_v62 = vpop.eup %8196 }
 0xba6   :  { %v12172_v6 = vpop.f32.mrf.mxu0  ;;  %v1658_v23 = vadd.f32 %v13867_v12, %v13866_v43  ;;  %8214 = vtanh.f32 %v5778_v20  ;;  %v5776_v4 = vmul.f32 0.5, %v5744_v57  ;;  %v13873_v20 = vld [vmem:[#allocation242_spill] sm:$0xff]  ;;  %v12229_v39 = vadd.f32 %v13876_v38, %v13875_v61 }
 0xba7   :  { %v5782_v13 = vmul.f32 0.5, %v5750_v54  ;;  %v13871_v54 = vld [vmem:[#allocation319_spill] sm:$0xff]  ;;  %v13874_v57 = vld [vmem:[#allocation254_spill] sm:$0xff]  ;;  %v5815_v15 = vadd.f32 1.0, %v8191_v49  ;;  %v1646_v38 = vadd.f32 %v13881_v59, %v13880_v27  ;;  %v5818_v27 = vadd.f32 1.0, %v8197_v62 }
 0xba8   :  { %v12178_v5 = vpop.f32.mrf.mxu0  ;;  %v8199_v14 = vpop.eup %8198 }
 0xba9   :  { %v5823_v56 = vadd.f32 1.0, %v8199_v14  ;;  %v5839_v33 = vmul.f32 0.5, %v5815_v15  ;;  %v5751_v15 = vadd.f32 %v12172_v6, %v1628_v16 }
 0xbaa   :  { %v12182_v34 = vpop.f32.mrf.mxu0 }
 0xbac   :  { %v12188_v22 = vpop.f32.mrf.mxu0 }
 0xbae   :  { %v12194_v10 = vpop.f32.mrf.mxu0 }
 0xbb0   :  { %v12198_v63 = vpop.f32.mrf.mxu0 }
 0xbb2   :  { %v12204_v26 = vpop.f32.mrf.mxu0 }
 0xbb4   :  { %v12208_v42 = vpop.f32.mrf.mxu0 }
 0xbb6   :  { %v5712_v1 = vpop.f32.mrf.mxu0 }
 0xbb7   :  { %v5759_v17 = vadd.f32 %v5712_v1, %v1652_v58  ;;  %v12221_v58 = vadd.f32 %v13872_v30, %v13871_v54  ;;  %v1636_v1 = vadd.f32 %v13873_v20, %v13871_v54  ;;  %v8201_v30 = vpop.eup %8200  ;;  %v13879_v20 = vld [vmem:[#allocation251_spill] sm:$0xff] }
 0xbb8   :  { %v5714_v3 = vpop.f32.mrf.mxu0  ;;  %v1654_v54 = vadd.f32 %v13879_v20, %v13864_v31  ;;  %v5819_v36 = vadd.f32 1.0, %v8201_v30 }
 0xbb9   :  { %8216 = vtanh.f32 %v5759_v17  ;;  %v1660_v17 = vadd.f32 %v13874_v57, %v13866_v43  ;;  %v8203_v43 = vpop.eup %8202 }
 0xbba   :  { %v5718_v11 = vpop.f32.mrf.mxu0  ;;  %8218 = vtanh.f32 %v5781_v40  ;;  %v13877_v40 = vld [vmem:[#allocation245_spill] sm:$0xff]  ;;  %v5760_v20 = vadd.f32 %v5714_v3, %v1654_v54  ;;  %v5820_v35 = vadd.f32 1.0, %v8203_v43  ;;  %v12247_v54 = vmul.f32 0.5, %v5816_v0 }
 0xbbb   :  { %v5761_v21 = vadd.f32 %v5718_v11, %v1658_v23  ;;  %8220 = vtanh.f32 %v5782_v13  ;;  %v1642_v23 = vadd.f32 %v13877_v40, %v13875_v61  ;;  %v13878_v11 = vld [vmem:[#allocation256_spill] sm:$0xff]  ;;  %v13883_v40 = vld [vmem:[#allocation257_spill] sm:$0xff]  ;;  %v5843_v43 = vmul.f32 0.5, %v5819_v36 }
 0xbbc   :  { %v5720_v12 = vpop.f32.mrf.mxu0  ;;  %v1664_v2 = vadd.f32 %v13878_v11, %v13773_v55  ;;  %v1666_v61 = vadd.f32 %v13883_v40, %v13773_v55  ;;  %v5841_v40 = vmul.f32 0.5, %v5817_v18  ;;  %v5783_v36 = vmul.f32 0.5, %v5751_v15 }
 0xbbd   :  { %8222 = vtanh.f32 %v5761_v21  ;;  %v5762_v13 = vadd.f32 %v5720_v12, %v1660_v17  ;;  %v8205_v21 = vpop.eup %8204  ;;  %v13885_v12 = vld [vmem:[#allocation260_spill] sm:$0xff]  ;;  %v5756_v6 = vadd.f32 %v12198_v63, %v1642_v23 }
 0xbbe   :  { %8224 = vtanh.f32 %v5776_v4  ;;  %v5724_v57 = vpop.f32.mrf.mxu0  ;;  %v13884_v4 = vld [vmem:[#allocation259_spill] sm:$0xff]  ;;  %v1672_v31 = vadd.f32 %v13885_v12, %v13780_v24  ;;  %v8207_v51 = vpop.eup %8206  ;;  %v5825_v41 = vadd.f32 1.0, %v8205_v21  ;;  %v5752_v21 = vadd.f32 %v12178_v5, %v1630_v52 }
 0xbbf   :  { %v5763_v11 = vadd.f32 %v5724_v57, %v1664_v2  ;;  %v1670_v17 = vadd.f32 %v13884_v4, %v13780_v24  ;;  %v8209_v57 = vpop.eup %8208  ;;  %v5847_v4 = vmul.f32 0.5, %v5823_v56  ;;  %v5758_v5 = vadd.f32 %v12208_v42, %v1648_v29 }
 0xbc0   :  { %v5726_v49 = vpop.f32.mrf.mxu0  ;;  %v8211_v3 = vpop.eup %8210  ;;  %v5849_v18 = vmul.f32 0.5, %v5825_v41 }
 0xbc1   :  { %8226 = vtanh.f32 %v5763_v11  ;;  %v5764_v59 = vadd.f32 %v5726_v49, %v1666_v61  ;;  %v8213_v11 = vpop.eup %8212  ;;  %v5821_v61 = vadd.f32 1.0, %v8207_v51  ;;  %v5754_v49 = vadd.f32 %v12188_v22, %v1636_v1 }
 0xbc2   :  { %8228 = vtanh.f32 %v5762_v13  ;;  %v5730_v2 = vpop.f32.mrf.mxu0  ;;  %v8215_v30 = vpop.eup %8214  ;;  %v12250_v13 = vmul.f32 0.5, %v5818_v27  ;;  %v5827_v56 = vadd.f32 1.0, %v8211_v3  ;;  %v5871_v51 = vmul.f32 %v5847_v4, %v11995_v8 }
 0xbc3   :  { %8230 = vtanh.f32 %v5764_v59  ;;  %v5765_v14 = vadd.f32 %v5730_v2, %v1670_v17  ;;  %v5844_v17 = vmul.f32 0.5, %v5820_v35  ;;  %v5828_v59 = vadd.f32 1.0, %v8213_v11 }
 0xbc4   :  { %8232 = vtanh.f32 %v5760_v20  ;;  %v5732_v12 = vpop.f32.mrf.mxu0  ;;  %v5845_v27 = vmul.f32 0.5, %v5821_v61  ;;  %v5822_v2 = vadd.f32 1.0, %v8209_v57  ;;  %v5784_v22 = vmul.f32 0.5, %v5752_v21 }
 0xbc5   :  { %8234 = vtanh.f32 %v5765_v14  ;;  %v5766_v62 = vadd.f32 %v5732_v12, %v1672_v31  ;;  %v5786_v1 = vmul.f32 0.5, %v5754_v49  ;;  %v5757_v35 = vadd.f32 %v12204_v26, %v1646_v38 }
 0xbc6   :  { %v8217_v0 = vpop.eup %8216  ;;  %v5873_v8 = vmul.f32 %v5849_v18, %v12000_v48  ;;  %v5851_v3 = vmul.f32 0.5, %v5827_v56  ;;  %v5826_v23 = vadd.f32 1.0, %v8215_v30  ;;  %v5755_v57 = vadd.f32 %v12194_v10, %v12229_v39 }
 0xbc7   :  { %8236 = vtanh.f32 %v5766_v62  ;;  %v8219_v20 = vpop.eup %8218  ;;  %v5879_v31 = vmul.f32 %v8217_v0, %v5839_v33  ;;  %v5852_v33 = vmul.f32 0.5, %v5828_v59  ;;  %v5788_v12 = vmul.f32 0.5, %v5756_v6 }
 0xbc8   :  { %v8221_v16 = vpop.eup %8220  ;;  %v5829_v4 = vadd.f32 1.0, %v8219_v20  ;;  %8238 = vtanh.f32 %v5783_v36  ;;  %v5790_v42 = vmul.f32 0.5, %v5758_v5  ;;  %v5753_v48 = vadd.f32 %v12182_v34, %v12221_v58 }
 0xbc9   :  { %v12258_v41 = vadd.f32 %v5879_v31, %v5871_v51  ;;  %v5830_v29 = vadd.f32 1.0, %v8221_v16  ;;  %8240 = vtanh.f32 %v5784_v22  ;;  %v5789_v61 = vmul.f32 0.5, %v5757_v35 }
 0xbca   :  { %v8223_v52 = vpop.eup %8222  ;;  %v5853_v62 = vmul.f32 0.5, %v5829_v4  ;;  %8242 = vtanh.f32 %v5786_v1  ;;  %v5850_v10 = vmul.f32 0.5, %v5826_v23  ;;  %v5876_v21 = vmul.f32 %v5852_v33, %v12010_v19 }
 0xbcb   :  { %v8225_v14 = vpop.eup %8224  ;;  %v5881_v63 = vmul.f32 %v8223_v52, %v5841_v40  ;;  %v5875_v40 = vmul.f32 %v5851_v3, %v12006_v60  ;;  %v5787_v49 = vmul.f32 0.5, %v5755_v57  ;;  %8244 = vtanh.f32 %v5788_v12 }
 0xbcc   :  { %v5824_v38 = vadd.f32 1.0, %v8225_v14  ;;  %v5854_v18 = vmul.f32 0.5, %v5830_v29  ;;  %8246 = vtanh.f32 %v5790_v42  ;;  %v5846_v58 = vmul.f32 0.5, %v5822_v2 }
 0xbcd   :  { %v12263_v11 = vadd.f32 %v5881_v63, %v5873_v8  ;;  %v5785_v59 = vmul.f32 0.5, %v5753_v48  ;;  %8248 = vtanh.f32 %v5789_v61  ;;  %v5877_v60 = vmul.f32 %v5853_v62, %v12015_v9 }
 0xbce   :  { %v8227_v26 = vpop.eup %8226  ;;  %v5848_v51 = vmul.f32 0.5, %v5824_v38  ;;  %v5874_v16 = vmul.f32 %v5850_v10, %v12018_v25  ;;  %8250 = vtanh.f32 %v5787_v49  ;;  %v5878_v36 = vmul.f32 %v5854_v18, %v12020_v37 }
 0xbcf   :  { %v8229_v15 = vpop.eup %8228  ;;  %v5883_v30 = vmul.f32 %v8227_v26, %v5843_v43  ;;  %8252 = vtanh.f32 %v5785_v59 }
 0xbd0   :  { %v8231_v39 = vpop.eup %8230  ;;  %v5882_v43 = vmul.f32 %v8229_v15, %v12250_v13  ;;  %v5872_v52 = vmul.f32 %v5848_v51, %v12024_v7 }
 0xbd1   :  { %v8233_v0 = vpop.eup %8232  ;;  %v12269_v56 = vadd.f32 %v5883_v30, %v5875_v40  ;;  %v5884_v20 = vmul.f32 %v8231_v39, %v5844_v17 }
 0xbd2   :  { %v8235_v34 = vpop.eup %8234  ;;  %v5880_v17 = vmul.f32 %v8233_v0, %v12247_v54  ;;  %v12281_v9 = vadd.f32 %v5882_v43, %v5874_v16  ;;  %v13894_v16 = vld [vmem:[#allocation73_spill] sm:$0xff] }
 0xbd3   :  { %v12273_v6 = vadd.f32 %v5884_v20, %v5876_v21  ;;  %v5885_v19 = vmul.f32 %v8235_v34, %v5845_v27 }
 0xbd4   :  { %v8237_v31 = vpop.eup %8236  ;;  %v12287_v25 = vadd.f32 %v5880_v17, %v5872_v52 }
 0xbd5   :  { %v12278_v5 = vadd.f32 %v5885_v19, %v5877_v60  ;;  %v5886_v2 = vmul.f32 %v8237_v31, %v5846_v58  ;;  %8254 = vtanh.f32 %v12273_v6  ;;  %v8239_v37 = vpop.eup %8238  ;;  %v13893_v31 = vld [vmem:[#allocation71_spill] sm:$0xff] }
 0xbd6   :  { %v8241_v54 = vpop.eup %8240  ;;  %v5831_v62 = vadd.f32 1.0, %v8239_v37 }
 0xbd7   :  { %v12283_v13 = vadd.f32 %v5886_v2, %v5878_v36  ;;  %8256 = vtanh.f32 %v12278_v5  ;;  %v8243_v27 = vpop.eup %8242  ;;  %v5832_v48 = vadd.f32 1.0, %v8241_v54 }
 0xbd8   :  { %v8245_v7 = vpop.eup %8244  ;;  %v5834_v57 = vadd.f32 1.0, %v8243_v27  ;;  %v5855_v59 = vmul.f32 0.5, %v5831_v62  ;;  %v13901_v62 = vld [vmem:[#allocation29_spill] sm:$0xff] }
 0xbd9   :  { %8258 = vtanh.f32 %v12283_v13  ;;  %v8247_v22 = vpop.eup %8246  ;;  %v5836_v4 = vadd.f32 1.0, %v8245_v7  ;;  %v5856_v58 = vmul.f32 0.5, %v5832_v48 }
 0xbda   :  { %8260 = vtanh.f32 %v12269_v56  ;;  %v8249_v1 = vpop.eup %8248  ;;  %v5838_v14 = vadd.f32 1.0, %v8247_v22  ;;  %v5858_v21 = vmul.f32 0.5, %v5834_v57  ;;  %v13897_v57 = vld [vmem:[#allocation313_spill] sm:$0xff] }
 0xbdb   :  { %8262 = vtanh.f32 %v12281_v9  ;;  %v8251_v35 = vpop.eup %8250  ;;  %v5837_v8 = vadd.f32 1.0, %v8249_v1  ;;  %v5860_v61 = vmul.f32 0.5, %v5836_v4  ;;  %v13895_v4 = vld [vmem:[#allocation31_spill] sm:$0xff] }
 0xbdc   :  { %8264 = vtanh.f32 %v12263_v11  ;;  %v8253_v3 = vpop.eup %8252  ;;  %v5835_v23 = vadd.f32 1.0, %v8251_v35  ;;  %v5862_v12 = vmul.f32 0.5, %v5838_v14 }
 0xbdd   :  { %8266 = vtanh.f32 %v12287_v25  ;;  %v5833_v42 = vadd.f32 1.0, %v8253_v3  ;;  %v5861_v26 = vmul.f32 0.5, %v5837_v8 }
 0xbde   :  { %8268 = vtanh.f32 %v12258_v41  ;;  %v5859_v30 = vmul.f32 0.5, %v5835_v23 }
 0xbdf   :  { %v5857_v18 = vmul.f32 0.5, %v5833_v42  ;;  %v13899_v42 = vld [vmem:[#allocation314_spill] sm:$0xff] }
 0xbe2   :  { %v8255_v63 = vpop.eup %8254 }
 0xbe3   :  { %v5908_v49 = vmul.f32 %v8255_v63, %v5860_v61  ;;  %v13896_v63 = vld [vmem:[#allocation312_spill] sm:$0xff]  ;;  %v13900_v61 = vld [vmem:[#allocation315_spill] sm:$0xff] }
 0xbe4   :  { %v8257_v33 = vpop.eup %8256  ;;  %v1741_v23 = vadd.f32 %v13896_v63, %v13895_v4 }
 0xbe5   :  { %v5909_v39 = vmul.f32 %v8257_v33, %v5861_v26 }
 0xbe6   :  { %v8259_v29 = vpop.eup %8258 }
 0xbe7   :  { %v8261_v38 = vpop.eup %8260  ;;  %v5910_v15 = vmul.f32 %v8259_v29, %v5862_v12  ;;  %v1743_v12 = vadd.f32 %v13897_v57, %v13895_v4  ;;  %v13898_v29 = vld [vmem:[#allocation25_spill] sm:$0xff] }
 0xbe8   :  { %v8263_v40 = vpop.eup %8262  ;;  %v5907_v20 = vmul.f32 %v8261_v38, %v5859_v30  ;;  %v1747_v26 = vadd.f32 %v13899_v42, %v13898_v29  ;;  %v13902_v30 = vld [vmem:[#allocation27_spill] sm:$0xff]  ;;  %v13912_v57 = vld [vmem:[#allocation325_spill] sm:$0xff]  ;;  %v13913_v42 = vld [vmem:[#allocation326_spill] sm:$0xff] }
 0xbe9   :  { %v8265_v10 = vpop.eup %8264  ;;  %5967 = vmatprep.subr.mxu1 %v5910_v15  ;;  %v5906_v51 = vmul.f32 %v8263_v40, %v5858_v21  ;;  %v1749_v15 = vadd.f32 %v13900_v61, %v13898_v29 }
 0xbea   :  { %v8267_v0 = vpop.eup %8266  ;;  %5968 = vmatpush1.msra.mxu1 %v5909_v39  ;;  %v5905_v60 = vmul.f32 %v8265_v10, %v5857_v18  ;;  %v1765_v39 = vadd.f32 %v13902_v30, %v13901_v62 }
 0xbeb   :  { %v8269_v34 = vpop.eup %8268  ;;  %5969 = vmatprep.subr.mxu1 %v5908_v49  ;;  %v5904_v43 = vmul.f32 %v8267_v0, %v5856_v58  ;;  %v13903_v49 = vld [vmem:[#allocation13_spill] sm:$0xff]  ;;  %v13904_v0 = vld [vmem:[#allocation316_spill] sm:$0xff] }
 0xbec   :  { %5970 = vmatpush1.msra.mxu1 %v5907_v20  ;;  %v5903_v19 = vmul.f32 %v8269_v34, %v5855_v59  ;;  %v1753_v18 = vadd.f32 %v13904_v0, %v13903_v49  ;;  %v13905_v34 = vld [vmem:[#allocation318_spill] sm:$0xff] }
 0xbed   :  { %5971 = vmatprep.subr.mxu1 %v5906_v51  ;;  %v1755_v58 = vadd.f32 %v13905_v34, %v13903_v49 }
 0xbee   :  { %5972 = vmatpush1.msra.mxu1 %v5905_v60 }
 0xbef   :  { %5973 = vmatprep.subr.mxu1 %v5904_v43  ;;  %v13906_v43 = vld [vmem:[#allocation23_spill] sm:$0xff] }
 0xbf0   :  { %5974 = vmatpush1.msra.mxu1 %v5903_v19  ;;  %v13907_v19 = vld [vmem:[#allocation323_spill] sm:$0xff] }
 0xbf1   :  { %7451 = vmatmul.mubr.msk.f32.vlgmr.msra.gmra.mxu1 %vm2573_vm1, %v12035_v28  ;;  %v13886_v28 = vld [vmem:[#allocation41_spill] sm:$0xff] }
 0xbf2   :  { %6013 = vmatprep.mubr.f32.mxu1 %v13135_v50 }
 0xbf5   :  { %7452 = vmatmul.mubr.msk.f32.gmra.mxu1 %vm2573_vm1, %v12043_v46  ;;  %v13887_v46 = vld [vmem:[#allocation43_spill] sm:$0xff] }
 0xbf6   :  { %6019 = vmatprep.mubr.f32.mxu1 %v13135_v50 }
 0xbf9   :  { %7453 = vmatmul.mubr.msk.f32.gmra.mxu1 %vm2573_vm1, %v12051_v53  ;;  %v13888_v53 = vld [vmem:[#allocation44_spill] sm:$0xff] }
 0xbfa   :  { %6025 = vmatprep.mubr.f32.mxu1 %v13135_v50 }
 0xbfd   :  { %7454 = vmatmul.mubr.msk.f32.gmra.mxu1 %vm2573_vm1, %v12059_v47  ;;  %v13889_v47 = vld [vmem:[#allocation69_spill] sm:$0xff] }
 0xbfe   :  { %6031 = vmatprep.mubr.f32.mxu1 %v13135_v50 }
 0xc01   :  { %7455 = vmatmul.mubr.msk.f32.gmra.mxu1 %vm2573_vm1, %v12067_v32  ;;  %v13890_v32 = vld [vmem:[#allocation64_spill] sm:$0xff] }
 0xc02   :  { %6037 = vmatprep.mubr.f32.mxu1 %v13135_v50 }
 0xc05   :  { %7456 = vmatmul.mubr.msk.f32.gmra.mxu1 %vm2573_vm1, %v12075_v45  ;;  %v13891_v45 = vld [vmem:[#allocation66_spill] sm:$0xff] }
 0xc06   :  { %6043 = vmatprep.mubr.f32.mxu1 %v13135_v50 }
 0xc09   :  { %7457 = vmatmul.mubr.msk.f32.gmra.mxu1 %vm2573_vm1, %v12083_v44  ;;  %v13892_v44 = vld [vmem:[#allocation68_spill] sm:$0xff] }
 0xc0a   :  { %6049 = vmatprep.mubr.f32.mxu1 %v13135_v50 }
 0xc0d   :  { %7458 = vmatmul.mubr.msk.f32.gmra.mxu1 %vm2573_vm1, %v13886_v28  ;;  %v1771_v28 = vadd.f32 %v13907_v19, %v13906_v43 }
 0xc0e   :  { %6055 = vmatprep.mubr.f32.mxu1 %v13135_v50 }
 0xc11   :  { %7459 = vmatmul.mubr.msk.f32.gmra.mxu1 %vm2573_vm1, %v13887_v46 }
 0xc12   :  { %6061 = vmatprep.mubr.f32.mxu1 %v13135_v50 }
 0xc15   :  { %7460 = vmatmul.mubr.msk.f32.gmra.mxu1 %vm2573_vm1, %v13888_v53 }
 0xc16   :  { %6067 = vmatprep.mubr.f32.mxu1 %v13135_v50 }
 0xc19   :  { %7461 = vmatmul.mubr.msk.f32.gmra.mxu1 %vm2573_vm1, %v13889_v47 }
 0xc1a   :  { %6073 = vmatprep.mubr.f32.mxu1 %v13135_v50 }
 0xc1d   :  { %7462 = vmatmul.mubr.msk.f32.gmra.mxu1 %vm2573_vm1, %v13890_v32 }
 0xc1e   :  { %6079 = vmatprep.mubr.f32.mxu1 %v13135_v50 }
 0xc21   :  { %7463 = vmatmul.mubr.msk.f32.gmra.mxu1 %vm2573_vm1, %v13891_v45 }
 0xc22   :  { %6085 = vmatprep.mubr.f32.mxu1 %v13135_v50 }
 0xc25   :  { %7464 = vmatmul.mubr.msk.f32.gmra.mxu1 %vm2573_vm1, %v13892_v44  ;;  %v13908_v44 = vld [vmem:[#allocation15_spill] sm:$0xff] }
 0xc26   :  { %6091 = vmatprep.mubr.f32.mxu1 %v13135_v50 }
 0xc29   :  { %7465 = vmatmul.mubr.msk.f32.gmra.mxu1 %vm2573_vm1, %v13893_v31  ;;  %v13909_v31 = vld [vmem:[#allocation321_spill] sm:$0xff] }
 0xc2a   :  { %6097 = vmatprep.mubr.f32.mxu1 %v13135_v50 }
 0xc2d   :  { %7466 = vmatmul.mubr.msk.f32.gmra.mxu1 %vm2573_vm1, %v13894_v16  ;;  %v1759_v16 = vadd.f32 %v13909_v31, %v13908_v44  ;;  %v13919_v31 = vld [vmem:[#allocation42_spill] sm:$0xff] }
 0xc2e   :  { %6745 = vmatprep.mubr.f32.mxu1 %v13135_v50 }
 0xcb1   :  { %v6009_v36 = vpop.f32.mrf.mxu1 }
 0xcb2   :  { %v6104_v38 = vadd.f32 %v6009_v36, %v1741_v23  ;;  %v13911_v23 = vld [vmem:[#allocation18_spill] sm:$0xff] }
 0xcb3   :  { %v6011_v17 = vpop.f32.mrf.mxu1 }
 0xcb4   :  { %v6105_v40 = vadd.f32 %v6011_v17, %v1743_v12  ;;  %v6136_v51 = vmul.f32 0.5, %v6104_v38  ;;  %v1777_v12 = vadd.f32 %v13912_v57, %v13911_v23 }
 0xcb5   :  { %v6015_v2 = vpop.f32.mrf.mxu1 }
 0xcb6   :  { %v6106_v10 = vadd.f32 %v6015_v2, %v1747_v26  ;;  %v6137_v46 = vmul.f32 0.5, %v6105_v40  ;;  %v13910_v2 = vld [vmem:[#allocation33_spill] sm:$0xff]  ;;  %8270 = vtanh.f32 %v6136_v51  ;;  %v1779_v26 = vadd.f32 %v13913_v42, %v13911_v23 }
 0xcb7   :  { %v6017_v52 = vpop.f32.mrf.mxu1 }
 0xcb8   :  { %v6107_v20 = vadd.f32 %v6017_v52, %v1749_v15  ;;  %v6138_v47 = vmul.f32 0.5, %v6106_v10  ;;  %v1761_v52 = vadd.f32 %v13910_v2, %v13908_v44  ;;  %8272 = vtanh.f32 %v6137_v46  ;;  %v13914_v15 = vld [vmem:[#allocation324_spill] sm:$0xff] }
 0xcb9   :  { %v6021_v37 = vpop.f32.mrf.mxu1  ;;  %v1773_v40 = vadd.f32 %v13914_v15, %v13906_v43  ;;  %v13923_v15 = vld [vmem:[#allocation320_spill] sm:$0xff] }
 0xcba   :  { %v6108_v53 = vadd.f32 %v6021_v37, %v1753_v18  ;;  %v6139_v36 = vmul.f32 0.5, %v6107_v20  ;;  %8274 = vtanh.f32 %v6138_v47  ;;  %v13915_v18 = vld [vmem:[#allocation20_spill] sm:$0xff] }
 0xcbb   :  { %v6023_v54 = vpop.f32.mrf.mxu1 }
 0xcbc   :  { %v6109_v32 = vadd.f32 %v6023_v54, %v1755_v58  ;;  %v6140_v37 = vmul.f32 0.5, %v6108_v53  ;;  %8276 = vtanh.f32 %v6139_v36 }
 0xcbd   :  { %v6027_v27 = vpop.f32.mrf.mxu1 }
 0xcbe   :  { %v6110_v54 = vadd.f32 %v6027_v27, %v1759_v16  ;;  %v6141_v38 = vmul.f32 0.5, %v6109_v32  ;;  %v13916_v27 = vld [vmem:[#allocation327_spill] sm:$0xff]  ;;  %v13920_v16 = vld [vmem:[#allocation337_spill] sm:$0xff] }
 0xcbf   :  { %v6029_v7 = vpop.f32.mrf.mxu1  ;;  %v1783_v20 = vadd.f32 %v13916_v27, %v13915_v18 }
 0xcc0   :  { %v6111_v61 = vadd.f32 %v6029_v7, %v1761_v52  ;;  %v6142_v34 = vmul.f32 0.5, %v6110_v54  ;;  %v13917_v7 = vld [vmem:[#allocation328_spill] sm:$0xff] }
 0xcc1   :  { %v6033_v22 = vpop.f32.mrf.mxu1  ;;  %v1785_v51 = vadd.f32 %v13917_v7, %v13915_v18  ;;  %v13928_v7 = vld [vmem:[#allocation332_spill] sm:$0xff] }
 0xcc2   :  { %v6112_v59 = vadd.f32 %v6033_v22, %v1765_v39 }
 0xcc3   :  { %v12343_v1 = vpop.f32.mrf.mxu1 }
 0xcc4   :  { %v6144_v22 = vmul.f32 0.5, %v6112_v59  ;;  %v6143_v59 = vmul.f32 0.5, %v6111_v61 }
 0xcc5   :  { %v6039_v35 = vpop.f32.mrf.mxu1 }
 0xcc6   :  { %v6114_v17 = vadd.f32 %v6039_v35, %v1771_v28  ;;  %8278 = vtanh.f32 %v6144_v22 }
 0xcc7   :  { %v6041_v14 = vpop.f32.mrf.mxu1  ;;  %8280 = vtanh.f32 %v6140_v37  ;;  %v13921_v37 = vld [vmem:[#allocation45_spill] sm:$0xff] }
 0xcc8   :  { %v6146_v30 = vmul.f32 0.5, %v6114_v17  ;;  %v6115_v58 = vadd.f32 %v6041_v14, %v1773_v40  ;;  %8282 = vtanh.f32 %v6141_v38  ;;  %v1813_v14 = vadd.f32 %v13920_v16, %v13919_v31  ;;  %v13924_v40 = vld [vmem:[#allocation329_spill] sm:$0xff]  ;;  %v13932_v16 = vld [vmem:[#allocation334_spill] sm:$0xff] }
 0xcc9   :  { %v6045_v8 = vpop.f32.mrf.mxu1 }
 0xcca   :  { %v6116_v39 = vadd.f32 %v6045_v8, %v1777_v12  ;;  %8284 = vtanh.f32 %v6146_v30  ;;  %v6147_v36 = vmul.f32 0.5, %v6115_v58  ;;  %v8271_v12 = vpop.eup %8270  ;;  %v13925_v30 = vld [vmem:[#allocation330_spill] sm:$0xff] }
 0xccb   :  { %v6047_v3 = vpop.f32.mrf.mxu1  ;;  %8286 = vtanh.f32 %v6142_v34  ;;  %v8273_v42 = vpop.eup %8272  ;;  %v13927_v34 = vld [vmem:[#allocation331_spill] sm:$0xff] }
 0xccc   :  { %v6117_v10 = vadd.f32 %v6047_v3, %v1779_v26  ;;  %v6148_v28 = vmul.f32 0.5, %v6116_v39  ;;  %v13918_v3 = vld [vmem:[#allocation322_spill] sm:$0xff]  ;;  %8288 = vtanh.f32 %v6143_v59  ;;  %v8275_v61 = vpop.eup %8274  ;;  %v1791_v39 = vadd.f32 %v13925_v30, %v13923_v15  ;;  %v13929_v59 = vld [vmem:[#allocation340_spill] sm:$0xff]  ;;  %v13936_v30 = vld [vmem:[#allocation335_spill] sm:$0xff] }
 0xccd   :  { %v6051_v33 = vpop.f32.mrf.mxu1  ;;  %v1767_v46 = vadd.f32 %v13918_v3, %v13901_v62  ;;  %v8277_v27 = vpop.eup %8276 }
 0xcce   :  { %v6118_v8 = vadd.f32 %v6051_v33, %v1783_v20  ;;  %v6149_v53 = vmul.f32 0.5, %v6117_v10  ;;  %8290 = vtanh.f32 %v6148_v28  ;;  %v13926_v20 = vld [vmem:[#allocation319_spill] sm:$0xff]  ;;  %v1821_v28 = vadd.f32 %v13929_v59, %v13921_v37 }
 0xccf   :  { %v6053_v48 = vpop.f32.mrf.mxu1  ;;  %v6113_v17 = vadd.f32 %v12343_v1, %v1767_v46  ;;  %v1789_v1 = vadd.f32 %v13924_v40, %v13923_v15  ;;  %v12404_v58 = vadd.f32 %v13927_v34, %v13926_v20  ;;  %v13930_v46 = vld [vmem:[#allocation317_spill] sm:$0xff] }
 0xcd0   :  { %v6119_v47 = vadd.f32 %v6053_v48, %v1785_v51  ;;  %v6150_v52 = vmul.f32 0.5, %v6118_v8  ;;  %8292 = vtanh.f32 %v6149_v53  ;;  %v13922_v48 = vld [vmem:[#allocation339_spill] sm:$0xff]  ;;  %v1797_v51 = vadd.f32 %v13928_v7, %v13926_v20  ;;  %v13931_v53 = vld [vmem:[#allocation333_spill] sm:$0xff]  ;;  %v13937_v7 = vld [vmem:[#allocation336_spill] sm:$0xff] }
 0xcd1   :  { %v12355_v21 = vpop.f32.mrf.mxu1  ;;  %v1819_v54 = vadd.f32 %v13922_v48, %v13921_v37  ;;  %8294 = vtanh.f32 %v6147_v36  ;;  %v6145_v26 = vmul.f32 0.5, %v6113_v17  ;;  %v13933_v36 = vld [vmem:[#allocation341_spill] sm:$0xff]  ;;  %v6184_v48 = vadd.f32 1.0, %v8271_v12 }
 0xcd2   :  { %v6151_v33 = vmul.f32 0.5, %v6119_v47  ;;  %v12412_v47 = vadd.f32 %v13931_v53, %v13930_v46  ;;  %v1825_v17 = vadd.f32 %v13933_v36, %v13773_v55  ;;  %v13935_v40 = vld [vmem:[#allocation53_spill] sm:$0xff]  ;;  %v13938_v53 = vld [vmem:[#allocation342_spill] sm:$0xff]  ;;  %v6186_v20 = vadd.f32 1.0, %v8275_v61 }
 0xcd3   :  { %v12361_v60 = vpop.f32.mrf.mxu1  ;;  %v8279_v3 = vpop.eup %8278  ;;  %v1807_v34 = vadd.f32 %v13936_v30, %v13935_v40  ;;  %v1809_v59 = vadd.f32 %v13937_v7, %v13935_v40  ;;  %v6208_v7 = vmul.f32 0.5, %v6184_v48  ;;  %v6187_v40 = vadd.f32 1.0, %v8277_v27 }
 0xcd4   :  { %v6192_v15 = vadd.f32 1.0, %v8279_v3  ;;  %v6120_v48 = vadd.f32 %v12355_v21, %v1789_v1 }
 0xcd5   :  { %v12365_v45 = vpop.f32.mrf.mxu1 }
 0xcd7   :  { %v12371_v63 = vpop.f32.mrf.mxu1 }
 0xcd9   :  { %v12377_v35 = vpop.f32.mrf.mxu1 }
 0xcdb   :  { %v12381_v0 = vpop.f32.mrf.mxu1 }
 0xcdd   :  { %v12387_v19 = vpop.f32.mrf.mxu1 }
 0xcdf   :  { %v12391_v32 = vpop.f32.mrf.mxu1 }
 0xce1   :  { %v6081_v2 = vpop.f32.mrf.mxu1 }
 0xce2   :  { %v6128_v22 = vadd.f32 %v6081_v2, %v1813_v14  ;;  %v1803_v14 = vadd.f32 %v13932_v16, %v13930_v46  ;;  %v8281_v2 = vpop.eup %8280  ;;  %v1827_v16 = vadd.f32 %v13938_v53, %v13773_v55  ;;  %v6185_v46 = vadd.f32 1.0, %v8273_v42 }
 0xce3   :  { %v6083_v57 = vpop.f32.mrf.mxu1  ;;  %v6188_v18 = vadd.f32 1.0, %v8281_v2  ;;  %v6210_v53 = vmul.f32 0.5, %v6186_v20 }
 0xce4   :  { %8296 = vtanh.f32 %v6128_v22  ;;  %v6125_v21 = vadd.f32 %v12381_v0, %v1803_v14 }
 0xce5   :  { %v6087_v38 = vpop.f32.mrf.mxu1  ;;  %8298 = vtanh.f32 %v6150_v52  ;;  %v13934_v52 = vld [vmem:[#allocation338_spill] sm:$0xff] }
 0xce6   :  { %v6130_v10 = vadd.f32 %v6087_v38, %v1819_v54  ;;  %8300 = vtanh.f32 %v6151_v33  ;;  %v1815_v22 = vadd.f32 %v13934_v52, %v13919_v31  ;;  %v8283_v38 = vpop.eup %8282 }
 0xce7   :  { %v6089_v8 = vpop.f32.mrf.mxu1  ;;  %v6189_v42 = vadd.f32 1.0, %v8283_v38  ;;  %v6212_v38 = vmul.f32 0.5, %v6188_v18  ;;  %v6152_v18 = vmul.f32 0.5, %v6120_v48 }
 0xce8   :  { %8302 = vtanh.f32 %v6130_v10  ;;  %v6131_v33 = vadd.f32 %v6089_v8, %v1821_v28  ;;  %v8285_v10 = vpop.eup %8284  ;;  %v6129_v52 = vadd.f32 %v6083_v57, %v1815_v22  ;;  %v13940_v8 = vld [vmem:[#allocation184_spill] sm:$0xff]  ;;  %v12430_v22 = vmul.f32 0.5, %v6185_v46 }
 0xce9   :  { %8304 = vtanh.f32 %v6145_v26  ;;  %v6093_v54 = vpop.f32.mrf.mxu1  ;;  %v13939_v26 = vld [vmem:[#allocation181_spill] sm:$0xff]  ;;  %v1833_v37 = vadd.f32 %v13940_v8, %v13780_v24  ;;  %v8287_v31 = vpop.eup %8286  ;;  %v6194_v61 = vadd.f32 1.0, %v8285_v10  ;;  %v6121_v10 = vadd.f32 %v12361_v60, %v1791_v39 }
 0xcea   :  { %v6132_v36 = vadd.f32 %v6093_v54, %v1825_v17  ;;  %v1831_v28 = vadd.f32 %v13939_v26, %v13780_v24  ;;  %v8289_v54 = vpop.eup %8288  ;;  %v6216_v26 = vmul.f32 0.5, %v6192_v15  ;;  %v6127_v60 = vadd.f32 %v12391_v32, %v1809_v59 }
 0xceb   :  { %v6095_v12 = vpop.f32.mrf.mxu1  ;;  %v8291_v3 = vpop.eup %8290  ;;  %v6218_v20 = vmul.f32 0.5, %v6194_v61 }
 0xcec   :  { %8306 = vtanh.f32 %v6132_v36  ;;  %v6133_v30 = vadd.f32 %v6095_v12, %v1827_v16  ;;  %v8293_v36 = vpop.eup %8292  ;;  %v6190_v16 = vadd.f32 1.0, %v8287_v31  ;;  %v6123_v12 = vadd.f32 %v12371_v63, %v1797_v51 }
 0xced   :  { %8308 = vtanh.f32 %v6131_v33  ;;  %v6099_v17 = vpop.f32.mrf.mxu1  ;;  %v8295_v2 = vpop.eup %8294  ;;  %v12433_v33 = vmul.f32 0.5, %v6187_v40  ;;  %v6196_v15 = vadd.f32 1.0, %v8291_v3  ;;  %v6240_v31 = vmul.f32 %v6216_v26, %v12258_v41 }
 0xcee   :  { %8310 = vtanh.f32 %v6133_v30  ;;  %v6134_v57 = vadd.f32 %v6099_v17, %v1831_v28  ;;  %v6213_v28 = vmul.f32 0.5, %v6189_v42  ;;  %v6197_v30 = vadd.f32 1.0, %v8293_v36 }
 0xcef   :  { %8312 = vtanh.f32 %v6129_v52  ;;  %v6101_v8 = vpop.f32.mrf.mxu1  ;;  %v6214_v40 = vmul.f32 0.5, %v6190_v16  ;;  %v6191_v17 = vadd.f32 1.0, %v8289_v54  ;;  %v6153_v63 = vmul.f32 0.5, %v6121_v10 }
 0xcf0   :  { %8314 = vtanh.f32 %v6134_v57  ;;  %v6135_v27 = vadd.f32 %v6101_v8, %v1833_v37  ;;  %v6155_v51 = vmul.f32 0.5, %v6123_v12  ;;  %v6126_v42 = vadd.f32 %v12387_v19, %v1807_v34 }
 0xcf1   :  { %v8297_v46 = vpop.eup %8296  ;;  %v6242_v41 = vmul.f32 %v6218_v20, %v12263_v11  ;;  %v6220_v3 = vmul.f32 0.5, %v6196_v15  ;;  %v6195_v14 = vadd.f32 1.0, %v8295_v2  ;;  %v6124_v54 = vadd.f32 %v12377_v35, %v12412_v47 }
 0xcf2   :  { %8316 = vtanh.f32 %v6135_v27  ;;  %v8299_v52 = vpop.eup %8298  ;;  %v6248_v37 = vmul.f32 %v8297_v46, %v6208_v7  ;;  %v6221_v7 = vmul.f32 0.5, %v6197_v30  ;;  %v6157_v8 = vmul.f32 0.5, %v6125_v21 }
 0xcf3   :  { %v8301_v1 = vpop.eup %8300  ;;  %v6198_v26 = vadd.f32 1.0, %v8299_v52  ;;  %8318 = vtanh.f32 %v6152_v18  ;;  %v6159_v59 = vmul.f32 0.5, %v6127_v60  ;;  %v6122_v11 = vadd.f32 %v12365_v45, %v12404_v58 }
 0xcf4   :  { %v12441_v61 = vadd.f32 %v6248_v37, %v6240_v31  ;;  %v6199_v32 = vadd.f32 1.0, %v8301_v1  ;;  %8320 = vtanh.f32 %v6153_v63  ;;  %v6158_v16 = vmul.f32 0.5, %v6126_v42 }
 0xcf5   :  { %v8303_v39 = vpop.eup %8302  ;;  %v6222_v27 = vmul.f32 0.5, %v6198_v26  ;;  %8322 = vtanh.f32 %v6155_v51  ;;  %v6219_v47 = vmul.f32 0.5, %v6195_v14  ;;  %v6245_v10 = vmul.f32 %v6221_v7, %v12273_v6 }
 0xcf6   :  { %v8305_v57 = vpop.eup %8304  ;;  %v6250_v0 = vmul.f32 %v8303_v39, %v6210_v53  ;;  %v6244_v53 = vmul.f32 %v6220_v3, %v12269_v56  ;;  %v6156_v12 = vmul.f32 0.5, %v6124_v54  ;;  %8324 = vtanh.f32 %v6157_v8 }
 0xcf7   :  { %v6193_v34 = vadd.f32 1.0, %v8305_v57  ;;  %v6223_v20 = vmul.f32 0.5, %v6199_v32  ;;  %8326 = vtanh.f32 %v6159_v59  ;;  %v6215_v58 = vmul.f32 0.5, %v6191_v17 }
 0xcf8   :  { %v12446_v36 = vadd.f32 %v6250_v0, %v6242_v41  ;;  %v6154_v30 = vmul.f32 0.5, %v6122_v11  ;;  %8328 = vtanh.f32 %v6158_v16  ;;  %v6246_v56 = vmul.f32 %v6222_v27, %v12278_v5 }
 0xcf9   :  { %v8307_v19 = vpop.eup %8306  ;;  %v6217_v31 = vmul.f32 0.5, %v6193_v34  ;;  %v6243_v1 = vmul.f32 %v6219_v47, %v12281_v9  ;;  %8330 = vtanh.f32 %v6156_v12  ;;  %v6247_v18 = vmul.f32 %v6223_v20, %v12283_v13 }
 0xcfa   :  { %v8309_v48 = vpop.eup %8308  ;;  %v6252_v2 = vmul.f32 %v8307_v19, %v6212_v38  ;;  %8332 = vtanh.f32 %v6154_v30 }
 0xcfb   :  { %v8311_v35 = vpop.eup %8310  ;;  %v6251_v38 = vmul.f32 %v8309_v48, %v12433_v33  ;;  %v6241_v39 = vmul.f32 %v6217_v31, %v12287_v25 }
 0xcfc   :  { %v8313_v46 = vpop.eup %8312  ;;  %v12452_v15 = vadd.f32 %v6252_v2, %v6244_v53  ;;  %v6253_v52 = vmul.f32 %v8311_v35, %v6213_v28 }
 0xcfd   :  { %v8315_v45 = vpop.eup %8314  ;;  %v6249_v28 = vmul.f32 %v8313_v46, %v12430_v22  ;;  %v12464_v5 = vadd.f32 %v6251_v38, %v6243_v1  ;;  %v12489_v1 = vld [vmem:[%s12908_s2 + $0x8] sm:$0xff] }
 0xcfe   :  { %v12456_v21 = vadd.f32 %v6253_v52, %v6245_v10  ;;  %v6254_v6 = vmul.f32 %v8315_v45, %v6214_v40 }
 0xcff   :  { %v8317_v37 = vpop.eup %8316  ;;  %v12470_v9 = vadd.f32 %v6249_v28, %v6241_v39  ;;  %v12505_v28 = vld [vmem:[%s12908_s2 + $0x18] sm:$0xff]  ;;  %v12521_v39 = vld [vmem:[%s12908_s2 + $0x28] sm:$0xff] }
 0xd00   :  { %v12461_v60 = vadd.f32 %v6254_v6, %v6246_v56  ;;  %v6255_v17 = vmul.f32 %v8317_v37, %v6215_v58  ;;  %8334 = vtanh.f32 %v12456_v21  ;;  %v8319_v13 = vpop.eup %8318  ;;  %v12481_v37 = vld [vmem:[%s12908_s2] sm:$0xff] }
 0xd01   :  { %v8321_v22 = vpop.eup %8320  ;;  %v6200_v27 = vadd.f32 1.0, %v8319_v13  ;;  %v12529_v13 = vld [vmem:[%s12908_s2 + $0x30] sm:$0xff] }
 0xd02   :  { %v12466_v33 = vadd.f32 %v6255_v17, %v6247_v18  ;;  %8336 = vtanh.f32 %v12461_v60  ;;  %v8323_v40 = vpop.eup %8322  ;;  %v6201_v11 = vadd.f32 1.0, %v8321_v22  ;;  %v12497_v18 = vld [vmem:[%s12908_s2 + $0x10] sm:$0xff]  ;;  %v12513_v17 = vld [vmem:[%s12908_s2 + $0x20] sm:$0xff]  ;;  %v12537_v22 = vld [vmem:[%s12908_s2 + $0x38] sm:$0xff] }
 0xd03   :  { %v8325_v25 = vpop.eup %8324  ;;  %v6203_v54 = vadd.f32 1.0, %v8323_v40  ;;  %v6224_v30 = vmul.f32 0.5, %v6200_v27  ;;  %13941 = vst [vmem:[#allocation75_spill] sm:$0xff] %v12537_v22  ;;  %v12545_v40 = vld [vmem:[%s12908_s2 + $0x40] sm:$0xff]  ;;  %v13950_v27 = vld [vmem:[#allocation262_spill] sm:$0xff] }
 0xd04   :  { %8338 = vtanh.f32 %v12466_v33  ;;  %v8327_v63 = vpop.eup %8326  ;;  %v6205_v26 = vadd.f32 1.0, %v8325_v25  ;;  %v6225_v58 = vmul.f32 0.5, %v6201_v11  ;;  %13942 = vst [vmem:[#allocation77_spill] sm:$0xff] %v12545_v40  ;;  %v12553_v25 = vld [vmem:[%s12908_s2 + $0x48] sm:$0xff] }
 0xd05   :  { %8340 = vtanh.f32 %v12452_v15  ;;  %v8329_v51 = vpop.eup %8328  ;;  %v6207_v57 = vadd.f32 1.0, %v8327_v63  ;;  %v6227_v10 = vmul.f32 0.5, %v6203_v54  ;;  %13943 = vst [vmem:[#allocation81_spill] sm:$0xff] %v12553_v25  ;;  %v12561_v63 = vld [vmem:[%s12908_s2 + $0x50] sm:$0xff] }
 0xd06   :  { %8342 = vtanh.f32 %v12464_v5  ;;  %v8331_v42 = vpop.eup %8330  ;;  %v6206_v41 = vadd.f32 1.0, %v8329_v51  ;;  %v6229_v16 = vmul.f32 0.5, %v6205_v26  ;;  %13944 = vst [vmem:[#allocation83_spill] sm:$0xff] %v12561_v63  ;;  %v12569_v51 = vld [vmem:[%s12908_s2 + $0x58] sm:$0xff] }
 0xd07   :  { %8344 = vtanh.f32 %v12446_v36  ;;  %v8333_v3 = vpop.eup %8332  ;;  %v6204_v14 = vadd.f32 1.0, %v8331_v42  ;;  %v6231_v8 = vmul.f32 0.5, %v6207_v57  ;;  %13945 = vst [vmem:[#allocation85_spill] sm:$0xff] %v12569_v51  ;;  %v12577_v42 = vld [vmem:[%s12908_s2 + $0x60] sm:$0xff]  ;;  %v12585_v57 = vld [vmem:[%s12908_s2 + $0x68] sm:$0xff] }
 0xd08   :  { %8346 = vtanh.f32 %v12470_v9  ;;  %v6202_v59 = vadd.f32 1.0, %v8333_v3  ;;  %v6230_v19 = vmul.f32 0.5, %v6206_v41  ;;  %13946 = vst [vmem:[#allocation87_spill] sm:$0xff] %v12577_v42  ;;  %13947 = vst [vmem:[#allocation79_spill] sm:$0xff] %v12585_v57  ;;  %v12593_v41 = vld [vmem:[%s12908_s2 + $0x70] sm:$0xff]  ;;  %v12601_v3 = vld [vmem:[%s12908_s2 + $0x78] sm:$0xff] }
 0xd09   :  { %8348 = vtanh.f32 %v12441_v61  ;;  %v6228_v2 = vmul.f32 0.5, %v6204_v14  ;;  %13948 = vst [vmem:[#allocation89_spill] sm:$0xff] %v12593_v41  ;;  %13949 = vst [vmem:[#allocation91_spill] sm:$0xff] %v12601_v3 }
 0xd0a   :  { %v6226_v20 = vmul.f32 0.5, %v6202_v59 }
 0xd0d   :  { %v8335_v0 = vpop.eup %8334 }
 0xd0e   :  { %v6277_v12 = vmul.f32 %v8335_v0, %v6229_v16 }
 0xd0f   :  { %v8337_v7 = vpop.eup %8336 }
 0xd10   :  { %v6278_v35 = vmul.f32 %v8337_v7, %v6230_v19 }
 0xd11   :  { %v8339_v32 = vpop.eup %8338 }
 0xd12   :  { %v8341_v34 = vpop.eup %8340  ;;  %v6279_v48 = vmul.f32 %v8339_v32, %v6231_v8 }
 0xd13   :  { %v8343_v53 = vpop.eup %8342  ;;  %v6276_v52 = vmul.f32 %v8341_v34, %v6228_v2  ;;  %v1902_v2 = vadd.f32 %v13950_v27, %v13895_v4  ;;  %v13955_v27 = vld [vmem:[#allocation268_spill] sm:$0xff] }
 0xd14   :  { %v8345_v47 = vpop.eup %8344  ;;  %6336 = vmatprep.subr.mxu0 %v6279_v48  ;;  %v6275_v31 = vmul.f32 %v8343_v53, %v6227_v10 }
 0xd15   :  { %v8347_v46 = vpop.eup %8346  ;;  %6337 = vmatpush1.msra.mxu0 %v6278_v35  ;;  %v6274_v56 = vmul.f32 %v8345_v47, %v6226_v20  ;;  %v13951_v47 = vld [vmem:[#allocation263_spill] sm:$0xff] }
 0xd16   :  { %v8349_v45 = vpop.eup %8348  ;;  %6338 = vmatprep.subr.mxu0 %v6277_v12  ;;  %v6273_v38 = vmul.f32 %v8347_v46, %v6225_v58  ;;  %v1904_v10 = vadd.f32 %v13951_v47, %v13895_v4  ;;  %v13952_v12 = vld [vmem:[#allocation265_spill] sm:$0xff] }
 0xd17   :  { %6339 = vmatpush1.msra.mxu0 %v6276_v52  ;;  %v6272_v6 = vmul.f32 %v8349_v45, %v6224_v30  ;;  %v1908_v46 = vadd.f32 %v13952_v12, %v13898_v29  ;;  %v13953_v45 = vld [vmem:[#allocation266_spill] sm:$0xff]  ;;  %v13956_v47 = vld [vmem:[#allocation269_spill] sm:$0xff] }
 0xd18   :  { %6340 = vmatprep.subr.mxu0 %v6275_v31  ;;  %v1910_v58 = vadd.f32 %v13953_v45, %v13898_v29  ;;  %v13954_v30 = vld [vmem:[#allocation274_spill] sm:$0xff]  ;;  %v1916_v4 = vadd.f32 %v13956_v47, %v13903_v49  ;;  %v13957_v45 = vld [vmem:[#allocation277_spill] sm:$0xff]  ;;  %v13959_v47 = vld [vmem:[#allocation272_spill] sm:$0xff] }
 0xd19   :  { %6341 = vmatpush1.msra.mxu0 %v6274_v56  ;;  %v1926_v56 = vadd.f32 %v13954_v30, %v13901_v62 }
 0xd1a   :  { %6342 = vmatprep.subr.mxu0 %v6273_v38 }
 0xd1b   :  { %6343 = vmatpush1.msra.mxu0 %v6272_v6 }
 0xd1c   :  { %7467 = vmatmul.mubr.msk.f32.vlgmr.msra.gmra.mxu0 %vm2573_vm1, %v12481_v37 }
 0xd1d   :  { %6382 = vmatprep.mubr.f32.mxu0 %v13135_v50 }
 0xd20   :  { %7468 = vmatmul.mubr.msk.f32.gmra.mxu0 %vm2573_vm1, %v12489_v1 }
 0xd21   :  { %6388 = vmatprep.mubr.f32.mxu0 %v13135_v50 }
 0xd24   :  { %7469 = vmatmul.mubr.msk.f32.gmra.mxu0 %vm2573_vm1, %v12497_v18 }
 0xd25   :  { %6394 = vmatprep.mubr.f32.mxu0 %v13135_v50 }
 0xd28   :  { %7470 = vmatmul.mubr.msk.f32.gmra.mxu0 %vm2573_vm1, %v12505_v28 }
 0xd29   :  { %6400 = vmatprep.mubr.f32.mxu0 %v13135_v50 }
 0xd2c   :  { %7471 = vmatmul.mubr.msk.f32.gmra.mxu0 %vm2573_vm1, %v12513_v17 }
 0xd2d   :  { %6406 = vmatprep.mubr.f32.mxu0 %v13135_v50 }
 0xd30   :  { %7472 = vmatmul.mubr.msk.f32.gmra.mxu0 %vm2573_vm1, %v12521_v39 }
 0xd31   :  { %6412 = vmatprep.mubr.f32.mxu0 %v13135_v50 }
 0xd34   :  { %7473 = vmatmul.mubr.msk.f32.gmra.mxu0 %vm2573_vm1, %v12529_v13 }
 0xd35   :  { %6418 = vmatprep.mubr.f32.mxu0 %v13135_v50 }
 0xd38   :  { %7474 = vmatmul.mubr.msk.f32.gmra.mxu0 %vm2573_vm1, %v12537_v22 }
 0xd39   :  { %6424 = vmatprep.mubr.f32.mxu0 %v13135_v50 }
 0xd3c   :  { %7475 = vmatmul.mubr.msk.f32.gmra.mxu0 %vm2573_vm1, %v12545_v40 }
 0xd3d   :  { %6430 = vmatprep.mubr.f32.mxu0 %v13135_v50 }
 0xd40   :  { %7476 = vmatmul.mubr.msk.f32.gmra.mxu0 %vm2573_vm1, %v12553_v25 }
 0xd41   :  { %6436 = vmatprep.mubr.f32.mxu0 %v13135_v50 }
 0xd44   :  { %7477 = vmatmul.mubr.msk.f32.gmra.mxu0 %vm2573_vm1, %v12561_v63 }
 0xd45   :  { %6442 = vmatprep.mubr.f32.mxu0 %v13135_v50 }
 0xd48   :  { %7478 = vmatmul.mubr.msk.f32.gmra.mxu0 %vm2573_vm1, %v12569_v51 }
 0xd49   :  { %6448 = vmatprep.mubr.f32.mxu0 %v13135_v50 }
 0xd4c   :  { %7479 = vmatmul.mubr.msk.f32.gmra.mxu0 %vm2573_vm1, %v12577_v42 }
 0xd4d   :  { %6454 = vmatprep.mubr.f32.mxu0 %v13135_v50 }
 0xd50   :  { %7480 = vmatmul.mubr.msk.f32.gmra.mxu0 %vm2573_vm1, %v12585_v57  ;;  %v13958_v57 = vld [vmem:[#allocation271_spill] sm:$0xff] }
 0xd51   :  { %6460 = vmatprep.mubr.f32.mxu0 %v13135_v50 }
 0xd54   :  { %7481 = vmatmul.mubr.msk.f32.gmra.mxu0 %vm2573_vm1, %v12593_v41 }
 0xd55   :  { %6466 = vmatprep.mubr.f32.mxu0 %v13135_v50 }
 0xd58   :  { %7482 = vmatmul.mubr.msk.f32.gmra.mxu0 %vm2573_vm1, %v12601_v3  ;;  %v1914_v3 = vadd.f32 %v13955_v27, %v13903_v49  ;;  %v1920_v27 = vadd.f32 %v13958_v57, %v13908_v44  ;;  %v13983_v49 = vld [vmem:[#allocation53_spill] sm:$0xff] }
 0xd59   :  { %7092 = vmatprep.mubr.f32.mxu0 %v13135_v50 }
 0xddc   :  { %v6378_v26 = vpop.f32.mrf.mxu0 }
 0xddd   :  { %v6473_v20 = vadd.f32 %v6378_v26, %v1902_v2 }
 0xdde   :  { %v6380_v0 = vpop.f32.mrf.mxu0 }
 0xddf   :  { %v6474_v31 = vadd.f32 %v6380_v0, %v1904_v10  ;;  %v6505_v12 = vmul.f32 0.5, %v6473_v20  ;;  %v1932_v0 = vadd.f32 %v13957_v45, %v13906_v43  ;;  %v1922_v20 = vadd.f32 %v13959_v47, %v13908_v44  ;;  %v13960_v45 = vld [vmem:[#allocation280_spill] sm:$0xff] }
 0xde0   :  { %v6384_v14 = vpop.f32.mrf.mxu0 }
 0xde1   :  { %v6475_v38 = vadd.f32 %v6384_v14, %v1908_v46  ;;  %v6506_v10 = vmul.f32 0.5, %v6474_v31  ;;  %8350 = vtanh.f32 %v6505_v12  ;;  %v1938_v31 = vadd.f32 %v13960_v45, %v13911_v23 }
 0xde2   :  { %v6386_v7 = vpop.f32.mrf.mxu0 }
 0xde3   :  { %v6476_v41 = vadd.f32 %v6386_v7, %v1910_v58  ;;  %v6507_v30 = vmul.f32 0.5, %v6475_v38  ;;  %8352 = vtanh.f32 %v6506_v10  ;;  %v13962_v38 = vld [vmem:[#allocation278_spill] sm:$0xff] }
 0xde4   :  { %v6390_v54 = vpop.f32.mrf.mxu0  ;;  %v1934_v12 = vadd.f32 %v13962_v38, %v13906_v43  ;;  %v13984_v43 = vld [vmem:[#allocation295_spill] sm:$0xff] }
 0xde5   :  { %v6477_v29 = vadd.f32 %v6390_v54, %v1914_v3  ;;  %v6508_v7 = vmul.f32 0.5, %v6476_v41  ;;  %v13961_v54 = vld [vmem:[#allocation281_spill] sm:$0xff]  ;;  %8354 = vtanh.f32 %v6507_v30 }
 0xde6   :  { %v6392_v8 = vpop.f32.mrf.mxu0 }
 0xde7   :  { %v6478_v14 = vadd.f32 %v6392_v8, %v1916_v4  ;;  %v6509_v3 = vmul.f32 0.5, %v6477_v29  ;;  %v1940_v8 = vadd.f32 %v13961_v54, %v13911_v23  ;;  %8356 = vtanh.f32 %v6508_v7  ;;  %v13963_v29 = vld [vmem:[#allocation20_spill] sm:$0xff] }
 0xde8   :  { %v6396_v32 = vpop.f32.mrf.mxu0  ;;  %v13979_v23 = vld [vmem:[#allocation292_spill] sm:$0xff] }
 0xde9   :  { %v6479_v4 = vadd.f32 %v6396_v32, %v1920_v27  ;;  %v6510_v57 = vmul.f32 0.5, %v6478_v14  ;;  %v13964_v32 = vld [vmem:[#allocation283_spill] sm:$0xff] }
 0xdea   :  { %v6398_v59 = vpop.f32.mrf.mxu0  ;;  %v1944_v10 = vadd.f32 %v13964_v32, %v13963_v29 }
 0xdeb   :  { %v6480_v41 = vadd.f32 %v6398_v59, %v1922_v20  ;;  %v6511_v27 = vmul.f32 0.5, %v6479_v4  ;;  %v13965_v59 = vld [vmem:[#allocation284_spill] sm:$0xff]  ;;  %v13968_v4 = vld [vmem:[#allocation298_spill] sm:$0xff] }
 0xdec   :  { %v6402_v19 = vpop.f32.mrf.mxu0  ;;  %v1946_v14 = vadd.f32 %v13965_v59, %v13963_v29 }
 0xded   :  { %v6481_v26 = vadd.f32 %v6402_v19, %v1926_v56  ;;  %v6512_v20 = vmul.f32 0.5, %v6480_v41 }
 0xdee   :  { %v12606_v34 = vpop.f32.mrf.mxu0  ;;  %v8351_v32 = vpop.eup %8350 }
 0xdef   :  { %v6513_v19 = vmul.f32 0.5, %v6481_v26 }
 0xdf0   :  { %v6408_v11 = vpop.f32.mrf.mxu0  ;;  %v8353_v59 = vpop.eup %8352 }
 0xdf1   :  { %v6483_v58 = vadd.f32 %v6408_v11, %v1932_v0  ;;  %8358 = vtanh.f32 %v6513_v19  ;;  %v6554_v51 = vadd.f32 1.0, %v8353_v59 }
 0xdf2   :  { %v6410_v16 = vpop.f32.mrf.mxu0  ;;  %8360 = vtanh.f32 %v6509_v3  ;;  %v13967_v3 = vld [vmem:[#allocation42_spill] sm:$0xff] }
 0xdf3   :  { %v6515_v26 = vmul.f32 0.5, %v6483_v58  ;;  %v6484_v30 = vadd.f32 %v6410_v16, %v1934_v12  ;;  %8362 = vtanh.f32 %v6510_v57  ;;  %v1974_v16 = vadd.f32 %v13968_v4, %v13967_v3  ;;  %v13975_v4 = vld [vmem:[#allocation289_spill] sm:$0xff] }
 0xdf4   :  { %v6414_v48 = vpop.f32.mrf.mxu0 }
 0xdf5   :  { %v6485_v0 = vadd.f32 %v6414_v48, %v1938_v31  ;;  %8364 = vtanh.f32 %v6515_v26  ;;  %v6516_v38 = vmul.f32 0.5, %v6484_v30  ;;  %v8355_v30 = vpop.eup %8354 }
 0xdf6   :  { %v6416_v53 = vpop.f32.mrf.mxu0  ;;  %8366 = vtanh.f32 %v6511_v27  ;;  %v6555_v63 = vadd.f32 1.0, %v8355_v30 }
 0xdf7   :  { %v6486_v47 = vadd.f32 %v6416_v53, %v1940_v8  ;;  %v6517_v7 = vmul.f32 0.5, %v6485_v0  ;;  %v13966_v53 = vld [vmem:[#allocation275_spill] sm:$0xff]  ;;  %8368 = vtanh.f32 %v6512_v20  ;;  %v13971_v20 = vld [vmem:[#allocation320_spill] sm:$0xff] }
 0xdf8   :  { %v6420_v35 = vpop.f32.mrf.mxu0  ;;  %v1928_v58 = vadd.f32 %v13966_v53, %v13901_v62  ;;  %v13972_v53 = vld [vmem:[#allocation286_spill] sm:$0xff]  ;;  %v13985_v62 = vld [vmem:[#allocation296_spill] sm:$0xff] }
 0xdf9   :  { %v6487_v48 = vadd.f32 %v6420_v35, %v1944_v10  ;;  %v6518_v19 = vmul.f32 0.5, %v6486_v47  ;;  %8370 = vtanh.f32 %v6517_v7  ;;  %v13969_v47 = vld [vmem:[#allocation45_spill] sm:$0xff]  ;;  %v13973_v7 = vld [vmem:[#allocation287_spill] sm:$0xff]  ;;  %v1970_v42 = vadd.f32 %v13985_v62, %v13983_v49 }
 0xdfa   :  { %v6422_v52 = vpop.f32.mrf.mxu0  ;;  %v6482_v57 = vadd.f32 %v12606_v34, %v1928_v58  ;;  %v1950_v34 = vadd.f32 %v13972_v53, %v13971_v20  ;;  %v13978_v53 = vld [vmem:[#allocation317_spill] sm:$0xff] }
 0xdfb   :  { %v6488_v31 = vadd.f32 %v6422_v52, %v1946_v14  ;;  %v6519_v12 = vmul.f32 0.5, %v6487_v48  ;;  %8372 = vtanh.f32 %v6518_v19  ;;  %v13970_v52 = vld [vmem:[#allocation301_spill] sm:$0xff]  ;;  %v1952_v48 = vadd.f32 %v13973_v7, %v13971_v20  ;;  %v8357_v19 = vpop.eup %8356 }
 0xdfc   :  { %v12618_v6 = vpop.f32.mrf.mxu0  ;;  %v1980_v10 = vadd.f32 %v13970_v52, %v13969_v47  ;;  %8374 = vtanh.f32 %v6516_v38  ;;  %v6514_v14 = vmul.f32 0.5, %v6482_v57  ;;  %v13976_v38 = vld [vmem:[#allocation290_spill] sm:$0xff]  ;;  %v12675_v44 = vadd.f32 %v13979_v23, %v13978_v53 }
 0xdfd   :  { %v6520_v35 = vmul.f32 0.5, %v6488_v31  ;;  %v13974_v31 = vld [vmem:[#allocation319_spill] sm:$0xff]  ;;  %v13977_v57 = vld [vmem:[#allocation302_spill] sm:$0xff]  ;;  %v6553_v20 = vadd.f32 1.0, %v8351_v32  ;;  %v1968_v23 = vadd.f32 %v13984_v43, %v13983_v49  ;;  %v6556_v49 = vadd.f32 1.0, %v8357_v19 }
 0xdfe   :  { %v12624_v2 = vpop.f32.mrf.mxu0  ;;  %v8359_v29 = vpop.eup %8358 }
 0xdff   :  { %v6561_v25 = vadd.f32 1.0, %v8359_v29  ;;  %v6577_v62 = vmul.f32 0.5, %v6553_v20  ;;  %v6489_v20 = vadd.f32 %v12618_v6, %v1950_v34 }
 0xe00   :  { %v12628_v46 = vpop.f32.mrf.mxu0 }
 0xe02   :  { %v12634_v56 = vpop.f32.mrf.mxu0 }
 0xe04   :  { %v12640_v11 = vpop.f32.mrf.mxu0 }
 0xe06   :  { %v12644_v45 = vpop.f32.mrf.mxu0 }
 0xe08   :  { %v12650_v54 = vpop.f32.mrf.mxu0 }
 0xe0a   :  { %v12654_v8 = vpop.f32.mrf.mxu0 }
 0xe0c   :  { %v6450_v41 = vpop.f32.mrf.mxu0 }
 0xe0d   :  { %v6497_v26 = vadd.f32 %v6450_v41, %v1974_v16  ;;  %v12667_v16 = vadd.f32 %v13975_v4, %v13974_v31  ;;  %v1958_v41 = vadd.f32 %v13976_v38, %v13974_v31  ;;  %v8361_v4 = vpop.eup %8360  ;;  %v13982_v38 = vld [vmem:[#allocation299_spill] sm:$0xff] }
 0xe0e   :  { %v6452_v0 = vpop.f32.mrf.mxu0  ;;  %v1976_v31 = vadd.f32 %v13982_v38, %v13967_v3  ;;  %v6557_v22 = vadd.f32 1.0, %v8361_v4 }
 0xe0f   :  { %8376 = vtanh.f32 %v6497_v26  ;;  %v1982_v26 = vadd.f32 %v13977_v57, %v13969_v47  ;;  %v8363_v47 = vpop.eup %8362 }
 0xe10   :  { %v6456_v27 = vpop.f32.mrf.mxu0  ;;  %8378 = vtanh.f32 %v6519_v12  ;;  %v13980_v12 = vld [vmem:[#allocation293_spill] sm:$0xff]  ;;  %v6498_v38 = vadd.f32 %v6452_v0, %v1976_v31  ;;  %v6558_v59 = vadd.f32 1.0, %v8363_v47  ;;  %v12693_v31 = vmul.f32 0.5, %v6554_v51 }
 0xe11   :  { %v6499_v58 = vadd.f32 %v6456_v27, %v1980_v10  ;;  %8380 = vtanh.f32 %v6520_v35  ;;  %v1964_v10 = vadd.f32 %v13980_v12, %v13978_v53  ;;  %v13981_v27 = vld [vmem:[#allocation304_spill] sm:$0xff]  ;;  %v13986_v12 = vld [vmem:[#allocation305_spill] sm:$0xff]  ;;  %v6581_v47 = vmul.f32 0.5, %v6557_v22 }
 0xe12   :  { %v6458_v52 = vpop.f32.mrf.mxu0  ;;  %v1986_v7 = vadd.f32 %v13981_v27, %v13773_v55  ;;  %v1988_v53 = vadd.f32 %v13986_v12, %v13773_v55  ;;  %v6579_v12 = vmul.f32 0.5, %v6555_v63  ;;  %v6521_v22 = vmul.f32 0.5, %v6489_v20 }
 0xe13   :  { %8382 = vtanh.f32 %v6499_v58  ;;  %v6500_v35 = vadd.f32 %v6458_v52, %v1982_v26  ;;  %v8365_v58 = vpop.eup %8364  ;;  %v13988_v52 = vld [vmem:[#allocation308_spill] sm:$0xff]  ;;  %v6494_v6 = vadd.f32 %v12644_v45, %v1964_v10 }
 0xe14   :  { %8384 = vtanh.f32 %v6514_v14  ;;  %v6462_v57 = vpop.f32.mrf.mxu0  ;;  %v13987_v14 = vld [vmem:[#allocation307_spill] sm:$0xff]  ;;  %v1994_v3 = vadd.f32 %v13988_v52, %v13780_v24  ;;  %v8367_v40 = vpop.eup %8366  ;;  %v6563_v30 = vadd.f32 1.0, %v8365_v58  ;;  %v6490_v58 = vadd.f32 %v12624_v2, %v1952_v48 }
 0xe15   :  { %v6501_v27 = vadd.f32 %v6462_v57, %v1986_v7  ;;  %v1992_v26 = vadd.f32 %v13987_v14, %v13780_v24  ;;  %v8369_v57 = vpop.eup %8368  ;;  %v6585_v14 = vmul.f32 0.5, %v6561_v25  ;;  %v6496_v2 = vadd.f32 %v12654_v8, %v1970_v42 }
 0xe16   :  { %v6464_v32 = vpop.f32.mrf.mxu0  ;;  %v8371_v0 = vpop.eup %8370  ;;  %v6587_v63 = vmul.f32 0.5, %v6563_v30 }
 0xe17   :  { %8386 = vtanh.f32 %v6501_v27  ;;  %v6502_v43 = vadd.f32 %v6464_v32, %v1988_v53  ;;  %v8373_v27 = vpop.eup %8372  ;;  %v6559_v53 = vadd.f32 1.0, %v8367_v40  ;;  %v6492_v32 = vadd.f32 %v12634_v56, %v1958_v41 }
 0xe18   :  { %8388 = vtanh.f32 %v6500_v35  ;;  %v6468_v7 = vpop.f32.mrf.mxu0  ;;  %v8375_v4 = vpop.eup %8374  ;;  %v12696_v35 = vmul.f32 0.5, %v6556_v49  ;;  %v6565_v25 = vadd.f32 1.0, %v8371_v0  ;;  %v6609_v40 = vmul.f32 %v6585_v14, %v12441_v61 }
 0xe19   :  { %8390 = vtanh.f32 %v6502_v43  ;;  %v6503_v29 = vadd.f32 %v6468_v7, %v1992_v26  ;;  %v6582_v26 = vmul.f32 0.5, %v6558_v59  ;;  %v6566_v43 = vadd.f32 1.0, %v8373_v27 }
 0xe1a   :  { %8392 = vtanh.f32 %v6498_v38  ;;  %v6470_v52 = vpop.f32.mrf.mxu0  ;;  %v6583_v49 = vmul.f32 0.5, %v6559_v53  ;;  %v6560_v7 = vadd.f32 1.0, %v8369_v57  ;;  %v6522_v56 = vmul.f32 0.5, %v6490_v58 }
 0xe1b   :  { %8394 = vtanh.f32 %v6503_v29  ;;  %v6504_v19 = vadd.f32 %v6470_v52, %v1994_v3  ;;  %v6524_v41 = vmul.f32 0.5, %v6492_v32  ;;  %v6495_v59 = vadd.f32 %v12650_v54, %v1968_v23 }
 0xe1c   :  { %v8377_v51 = vpop.eup %8376  ;;  %v6611_v61 = vmul.f32 %v6587_v63, %v12446_v36  ;;  %v6589_v0 = vmul.f32 0.5, %v6565_v25  ;;  %v6564_v10 = vadd.f32 1.0, %v8375_v4  ;;  %v6493_v57 = vadd.f32 %v12640_v11, %v12675_v44 }
 0xe1d   :  { %8396 = vtanh.f32 %v6504_v19  ;;  %v8379_v38 = vpop.eup %8378  ;;  %v6617_v3 = vmul.f32 %v8377_v51, %v6577_v62  ;;  %v6590_v62 = vmul.f32 0.5, %v6566_v43  ;;  %v6526_v52 = vmul.f32 0.5, %v6494_v6 }
 0xe1e   :  { %v8381_v34 = vpop.eup %8380  ;;  %v6567_v14 = vadd.f32 1.0, %v8379_v38  ;;  %8398 = vtanh.f32 %v6521_v22  ;;  %v6528_v8 = vmul.f32 0.5, %v6496_v2  ;;  %v6491_v36 = vadd.f32 %v12628_v46, %v12667_v16 }
 0xe1f   :  { %v12704_v30 = vadd.f32 %v6617_v3, %v6609_v40  ;;  %v6568_v42 = vadd.f32 1.0, %v8381_v34  ;;  %8400 = vtanh.f32 %v6522_v56  ;;  %v6527_v53 = vmul.f32 0.5, %v6495_v59 }
 0xe20   :  { %v8383_v48 = vpop.eup %8382  ;;  %v6591_v19 = vmul.f32 0.5, %v6567_v14  ;;  %8402 = vtanh.f32 %v6524_v41  ;;  %v6588_v11 = vmul.f32 0.5, %v6564_v10  ;;  %v6614_v58 = vmul.f32 %v6590_v62, %v12456_v21 }
 0xe21   :  { %v8385_v29 = vpop.eup %8384  ;;  %v6619_v45 = vmul.f32 %v8383_v48, %v6579_v12  ;;  %v6613_v12 = vmul.f32 %v6589_v0, %v12452_v15  ;;  %v6525_v32 = vmul.f32 0.5, %v6493_v57  ;;  %8404 = vtanh.f32 %v6526_v52 }
 0xe22   :  { %v6562_v23 = vadd.f32 1.0, %v8385_v29  ;;  %v6592_v63 = vmul.f32 0.5, %v6568_v42  ;;  %8406 = vtanh.f32 %v6528_v8  ;;  %v6584_v16 = vmul.f32 0.5, %v6560_v7 }
 0xe23   :  { %v12709_v27 = vadd.f32 %v6619_v45, %v6611_v61  ;;  %v6523_v43 = vmul.f32 0.5, %v6491_v36  ;;  %8408 = vtanh.f32 %v6527_v53  ;;  %v6615_v15 = vmul.f32 %v6591_v19, %v12461_v60 }
 0xe24   :  { %v8387_v54 = vpop.eup %8386  ;;  %v6586_v40 = vmul.f32 0.5, %v6562_v23  ;;  %v6612_v34 = vmul.f32 %v6588_v11, %v12464_v5  ;;  %8410 = vtanh.f32 %v6525_v32  ;;  %v6616_v22 = vmul.f32 %v6592_v63, %v12466_v33 }
 0xe25   :  { %v8389_v20 = vpop.eup %8388  ;;  %v6621_v4 = vmul.f32 %v8387_v54, %v6581_v47  ;;  %8412 = vtanh.f32 %v6523_v43 }
 0xe26   :  { %v8391_v44 = vpop.eup %8390  ;;  %v6620_v47 = vmul.f32 %v8389_v20, %v12696_v35  ;;  %v6610_v48 = vmul.f32 %v6586_v40, %v12470_v9 }
 0xe27   :  { %v8393_v51 = vpop.eup %8392  ;;  %v12715_v25 = vadd.f32 %v6621_v4, %v6613_v12  ;;  %v6622_v38 = vmul.f32 %v8391_v44, %v6582_v26 }
 0xe28   :  { %v8395_v46 = vpop.eup %8394  ;;  %v6618_v26 = vmul.f32 %v8393_v51, %v12693_v31  ;;  %v12727_v60 = vadd.f32 %v6620_v47, %v6612_v34  ;;  %v13997_v34 = vld [vmem:[#allocation91_spill] sm:$0xff] }
 0xe29   :  { %v12719_v6 = vadd.f32 %v6622_v38, %v6614_v58  ;;  %v6623_v21 = vmul.f32 %v8395_v46, %v6583_v49 }
 0xe2a   :  { %v8397_v3 = vpop.eup %8396  ;;  %v12733_v5 = vadd.f32 %v6618_v26, %v6610_v48 }
 0xe2b   :  { %v12724_v2 = vadd.f32 %v6623_v21, %v6615_v15  ;;  %v6624_v7 = vmul.f32 %v8397_v3, %v6584_v16  ;;  %8414 = vtanh.f32 %v12719_v6  ;;  %v8399_v33 = vpop.eup %8398  ;;  %v13996_v3 = vld [vmem:[#allocation89_spill] sm:$0xff] }
 0xe2c   :  { %v8401_v31 = vpop.eup %8400  ;;  %v6569_v19 = vadd.f32 1.0, %v8399_v33 }
 0xe2d   :  { %v12729_v35 = vadd.f32 %v6624_v7, %v6616_v22  ;;  %8416 = vtanh.f32 %v12724_v2  ;;  %v8403_v49 = vpop.eup %8402  ;;  %v6570_v36 = vadd.f32 1.0, %v8401_v31 }
 0xe2e   :  { %v8405_v9 = vpop.eup %8404  ;;  %v6572_v57 = vadd.f32 1.0, %v8403_v49  ;;  %v6593_v43 = vmul.f32 0.5, %v6569_v19 }
 0xe2f   :  { %8418 = vtanh.f32 %v12729_v35  ;;  %v8407_v56 = vpop.eup %8406  ;;  %v6574_v14 = vadd.f32 1.0, %v8405_v9  ;;  %v6594_v16 = vmul.f32 0.5, %v6570_v36  ;;  %v14003_v36 = vld [vmem:[#allocation29_spill] sm:$0xff] }
 0xe30   :  { %8420 = vtanh.f32 %v12715_v25  ;;  %v8409_v41 = vpop.eup %8408  ;;  %v6576_v29 = vadd.f32 1.0, %v8407_v56  ;;  %v6596_v58 = vmul.f32 0.5, %v6572_v57 }
 0xe31   :  { %8422 = vtanh.f32 %v12727_v60  ;;  %v8411_v59 = vpop.eup %8410  ;;  %v6575_v61 = vadd.f32 1.0, %v8409_v41  ;;  %v6598_v53 = vmul.f32 0.5, %v6574_v14 }
 0xe32   :  { %8424 = vtanh.f32 %v12709_v27  ;;  %v8413_v0 = vpop.eup %8412  ;;  %v6573_v10 = vadd.f32 1.0, %v8411_v59  ;;  %v6600_v52 = vmul.f32 0.5, %v6576_v29 }
 0xe33   :  { %8426 = vtanh.f32 %v12733_v5  ;;  %v6571_v8 = vadd.f32 1.0, %v8413_v0  ;;  %v6599_v54 = vmul.f32 0.5, %v6575_v61 }
 0xe34   :  { %8428 = vtanh.f32 %v12704_v30  ;;  %v6597_v4 = vmul.f32 0.5, %v6573_v10 }
 0xe35   :  { %v6595_v63 = vmul.f32 0.5, %v6571_v8  ;;  %v14002_v8 = vld [vmem:[#allocation345_spill] sm:$0xff] }
 0xe38   :  { %v8415_v45 = vpop.eup %8414 }
 0xe39   :  { %v6646_v32 = vmul.f32 %v8415_v45, %v6598_v53  ;;  %v13999_v45 = vld [vmem:[#allocation343_spill] sm:$0xff] }
 0xe3a   :  { %v8417_v62 = vpop.eup %8416  ;;  %v14004_v53 = vld [vmem:[#allocation351_spill] sm:$0xff] }
 0xe3b   :  { %v6647_v44 = vmul.f32 %v8417_v62, %v6599_v54  ;;  %v14000_v62 = vld [vmem:[#allocation344_spill] sm:$0xff] }
 0xe3c   :  { %v8419_v42 = vpop.eup %8418 }
 0xe3d   :  { %v8421_v23 = vpop.eup %8420  ;;  %v6648_v20 = vmul.f32 %v8419_v42, %v6600_v52  ;;  %v14001_v42 = vld [vmem:[#allocation25_spill] sm:$0xff] }
 0xe3e   :  { %v8423_v12 = vpop.eup %8422  ;;  %v6645_v38 = vmul.f32 %v8421_v23, %v6597_v4  ;;  %v2069_v54 = vadd.f32 %v14002_v8, %v14001_v42  ;;  %v14005_v4 = vld [vmem:[#allocation346_spill] sm:$0xff] }
 0xe3f   :  { %v8425_v11 = vpop.eup %8424  ;;  %6705 = vmatprep.subr.mxu1 %v6648_v20  ;;  %v6644_v40 = vmul.f32 %v8423_v12, %v6596_v58  ;;  %v2087_v20 = vadd.f32 %v14004_v53, %v14003_v36  ;;  %v14006_v58 = vld [vmem:[#allocation23_spill] sm:$0xff] }
 0xe40   :  { %v8427_v51 = vpop.eup %8426  ;;  %6706 = vmatpush1.msra.mxu1 %v6647_v44  ;;  %v6643_v15 = vmul.f32 %v8425_v11, %v6595_v63  ;;  %v2071_v44 = vadd.f32 %v14005_v4, %v14001_v42 }
 0xe41   :  { %v8429_v46 = vpop.eup %8428  ;;  %6707 = vmatprep.subr.mxu1 %v6646_v32  ;;  %v6642_v47 = vmul.f32 %v8427_v51, %v6594_v16  ;;  %v14007_v32 = vld [vmem:[#allocation353_spill] sm:$0xff]  ;;  %v14009_v16 = vld [vmem:[#allocation347_spill] sm:$0xff] }
 0xe42   :  { %6708 = vmatpush1.msra.mxu1 %v6645_v38  ;;  %v6641_v21 = vmul.f32 %v8429_v46, %v6593_v43  ;;  %v2093_v51 = vadd.f32 %v14007_v32, %v14006_v58  ;;  %v14008_v46 = vld [vmem:[#allocation13_spill] sm:$0xff]  ;;  %v14020_v32 = vld [vmem:[#allocation358_spill] sm:$0xff] }
 0xe43   :  { %6709 = vmatprep.subr.mxu1 %v6644_v40  ;;  %v2075_v40 = vadd.f32 %v14009_v16, %v14008_v46 }
 0xe44   :  { %6710 = vmatpush1.msra.mxu1 %v6643_v15 }
 0xe45   :  { %6711 = vmatprep.subr.mxu1 %v6642_v47  ;;  %v14010_v47 = vld [vmem:[#allocation348_spill] sm:$0xff] }
 0xe46   :  { %6712 = vmatpush1.msra.mxu1 %v6641_v21  ;;  %v2077_v21 = vadd.f32 %v14010_v47, %v14008_v46 }
 0xe47   :  { %7483 = vmatmul.mubr.msk.f32.vlgmr.msra.gmra.mxu1 %vm2573_vm1, %v12481_v37  ;;  %v13989_v37 = vld [vmem:[#allocation75_spill] sm:$0xff] }
 0xe48   :  { %6751 = vmatprep.mubr.f32.mxu1 %v13135_v50 }
 0xe4b   :  { %7484 = vmatmul.mubr.msk.f32.gmra.mxu1 %vm2573_vm1, %v12489_v1  ;;  %v13990_v1 = vld [vmem:[#allocation77_spill] sm:$0xff] }
 0xe4c   :  { %6757 = vmatprep.mubr.f32.mxu1 %v13135_v50 }
 0xe4f   :  { %7485 = vmatmul.mubr.msk.f32.gmra.mxu1 %vm2573_vm1, %v12497_v18  ;;  %v13991_v18 = vld [vmem:[#allocation81_spill] sm:$0xff] }
 0xe50   :  { %6763 = vmatprep.mubr.f32.mxu1 %v13135_v50 }
 0xe53   :  { %7486 = vmatmul.mubr.msk.f32.gmra.mxu1 %vm2573_vm1, %v12505_v28  ;;  %v13992_v28 = vld [vmem:[#allocation83_spill] sm:$0xff] }
 0xe54   :  { %6769 = vmatprep.mubr.f32.mxu1 %v13135_v50 }
 0xe57   :  { %7487 = vmatmul.mubr.msk.f32.gmra.mxu1 %vm2573_vm1, %v12513_v17  ;;  %v13993_v17 = vld [vmem:[#allocation85_spill] sm:$0xff] }
 0xe58   :  { %6775 = vmatprep.mubr.f32.mxu1 %v13135_v50 }
 0xe5b   :  { %7488 = vmatmul.mubr.msk.f32.gmra.mxu1 %vm2573_vm1, %v12521_v39  ;;  %v13994_v39 = vld [vmem:[#allocation87_spill] sm:$0xff] }
 0xe5c   :  { %6781 = vmatprep.mubr.f32.mxu1 %v13135_v50 }
 0xe5f   :  { %7489 = vmatmul.mubr.msk.f32.gmra.mxu1 %vm2573_vm1, %v12529_v13  ;;  %v13995_v13 = vld [vmem:[#allocation79_spill] sm:$0xff] }
 0xe60   :  { %6787 = vmatprep.mubr.f32.mxu1 %v13135_v50 }
 0xe63   :  { %7490 = vmatmul.mubr.msk.f32.gmra.mxu1 %vm2573_vm1, %v13989_v37 }
 0xe64   :  { %6793 = vmatprep.mubr.f32.mxu1 %v13135_v50 }
 0xe67   :  { %7491 = vmatmul.mubr.msk.f32.gmra.mxu1 %vm2573_vm1, %v13990_v1 }
 0xe68   :  { %6799 = vmatprep.mubr.f32.mxu1 %v13135_v50 }
 0xe6b   :  { %7492 = vmatmul.mubr.msk.f32.gmra.mxu1 %vm2573_vm1, %v13991_v18 }
 0xe6c   :  { %6805 = vmatprep.mubr.f32.mxu1 %v13135_v50 }
 0xe6f   :  { %7493 = vmatmul.mubr.msk.f32.gmra.mxu1 %vm2573_vm1, %v13992_v28  ;;  %v14011_v28 = vld [vmem:[#allocation15_spill] sm:$0xff] }
 0xe70   :  { %6811 = vmatprep.mubr.f32.mxu1 %v13135_v50 }
 0xe73   :  { %7494 = vmatmul.mubr.msk.f32.gmra.mxu1 %vm2573_vm1, %v13993_v17  ;;  %v14012_v17 = vld [vmem:[#allocation349_spill] sm:$0xff] }
 0xe74   :  { %6817 = vmatprep.mubr.f32.mxu1 %v13135_v50 }
 0xe77   :  { %7495 = vmatmul.mubr.msk.f32.gmra.mxu1 %vm2573_vm1, %v13994_v39  ;;  %v2081_v39 = vadd.f32 %v14012_v17, %v14011_v28  ;;  %v14025_v17 = vld [vmem:[#allocation359_spill] sm:$0xff] }
 0xe78   :  { %6823 = vmatprep.mubr.f32.mxu1 %v13135_v50 }
 0xe7b   :  { %7496 = vmatmul.mubr.msk.f32.gmra.mxu1 %vm2573_vm1, %v13995_v13 }
 0xe7c   :  { %6829 = vmatprep.mubr.f32.mxu1 %v13135_v50 }
 0xe7f   :  { %7497 = vmatmul.mubr.msk.f32.gmra.mxu1 %vm2573_vm1, %v13996_v3 }
 0xe80   :  { %6835 = vmatprep.mubr.f32.mxu1 %v13135_v50  ;;  %v13998_v50 = vld [vmem:[#allocation31_spill] sm:$0xff] }
 0xe81   :  { %v2063_v10 = vadd.f32 %v13999_v45, %v13998_v50  ;;  %v2065_v57 = vadd.f32 %v14000_v62, %v13998_v50  ;;  %v14015_v50 = vld [vmem:[#allocation355_spill] sm:$0xff]  ;;  %v14016_v62 = vld [vmem:[#allocation354_spill] sm:$0xff] }
 0xe83   :  { %7498 = vmatmul.mubr.msk.f32.gmra.mxu1 %vm2573_vm1, %v13997_v34  ;;  %v14013_v34 = vld [vmem:[#allocation350_spill] sm:$0xff] }
 0xf07   :  { %v6747_v22 = vpop.f32.mrf.mxu1 }
 0xf08   :  { %v6842_v23 = vadd.f32 %v6747_v22, %v2063_v10  ;;  %v2083_v22 = vadd.f32 %v14013_v34, %v14011_v28  ;;  %v14024_v28 = vld [vmem:[#allocation320_spill] sm:$0xff] }
 0xf09   :  { %v6749_v26 = vpop.f32.mrf.mxu1 }
 0xf0a   :  { %v6843_v12 = vadd.f32 %v6749_v26, %v2065_v57  ;;  %v6874_v43 = vmul.f32 0.5, %v6842_v23  ;;  %v2095_v57 = vadd.f32 %v14016_v62, %v14006_v58 }
 0xf0b   :  { %v6753_v7 = vpop.f32.mrf.mxu1 }
 0xf0c   :  { %v6844_v11 = vadd.f32 %v6753_v7, %v2069_v54  ;;  %v6875_v37 = vmul.f32 0.5, %v6843_v12  ;;  %8430 = vtanh.f32 %v6874_v43  ;;  %v14017_v54 = vld [vmem:[#allocation356_spill] sm:$0xff] }
 0xf0d   :  { %v6755_v48 = vpop.f32.mrf.mxu1 }
 0xf0e   :  { %v6845_v15 = vadd.f32 %v6755_v48, %v2071_v44  ;;  %v6876_v13 = vmul.f32 0.5, %v6844_v11  ;;  %v14014_v48 = vld [vmem:[#allocation18_spill] sm:$0xff]  ;;  %8432 = vtanh.f32 %v6875_v37  ;;  %v14019_v44 = vld [vmem:[#allocation357_spill] sm:$0xff] }
 0xf0f   :  { %v6759_v33 = vpop.f32.mrf.mxu1  ;;  %v2099_v45 = vadd.f32 %v14015_v50, %v14014_v48 }
 0xf10   :  { %v6846_v3 = vadd.f32 %v6759_v33, %v2075_v40  ;;  %v6877_v10 = vmul.f32 0.5, %v6845_v15  ;;  %8434 = vtanh.f32 %v6876_v13 }
 0xf11   :  { %v6761_v31 = vpop.f32.mrf.mxu1 }
 0xf12   :  { %v6847_v26 = vadd.f32 %v6761_v31, %v2077_v21  ;;  %v2101_v31 = vadd.f32 %v14017_v54, %v14014_v48  ;;  %v6878_v23 = vmul.f32 0.5, %v6846_v3  ;;  %v14022_v21 = vld [vmem:[#allocation42_spill] sm:$0xff] }
 0xf13   :  { %v6765_v49 = vpop.f32.mrf.mxu1 }
 0xf15   :  { %v6767_v9 = vpop.f32.mrf.mxu1 }
 0xf16   :  { %v6849_v42 = vadd.f32 %v6767_v9, %v2083_v22 }
 0xf17   :  { %v6771_v56 = vpop.f32.mrf.mxu1 }
 0xf18   :  { %v6850_v63 = vadd.f32 %v6771_v56, %v2087_v20  ;;  %v6879_v20 = vmul.f32 0.5, %v6847_v26  ;;  %v14026_v26 = vld [vmem:[#allocation45_spill] sm:$0xff] }
 0xf19   :  { %v12788_v41 = vpop.f32.mrf.mxu1  ;;  %v8431_v50 = vpop.eup %8430 }
 0xf1a   :  { %v6882_v7 = vmul.f32 0.5, %v6850_v63  ;;  %v6881_v63 = vmul.f32 0.5, %v6849_v42  ;;  %v14030_v42 = vld [vmem:[#allocation361_spill] sm:$0xff] }
 0xf1b   :  { %v6777_v59 = vpop.f32.mrf.mxu1 }
 0xf1c   :  { %v6852_v1 = vadd.f32 %v6777_v59, %v2093_v51  ;;  %v6848_v59 = vadd.f32 %v6765_v49, %v2081_v39  ;;  %8436 = vtanh.f32 %v6882_v7  ;;  %v14018_v49 = vld [vmem:[#allocation20_spill] sm:$0xff]  ;;  %v2111_v39 = vadd.f32 %v14025_v17, %v14024_v28  ;;  %v14027_v7 = vld [vmem:[#allocation369_spill] sm:$0xff] }
 0xf1d   :  { %v6779_v29 = vpop.f32.mrf.mxu1  ;;  %v2105_v11 = vadd.f32 %v14019_v44, %v14018_v49  ;;  %8438 = vtanh.f32 %v6877_v10  ;;  %v2107_v51 = vadd.f32 %v14020_v32, %v14018_v49  ;;  %v2141_v48 = vadd.f32 %v14027_v7, %v14026_v26  ;;  %v14035_v32 = vld [vmem:[#allocation364_spill] sm:$0xff] }
 0xf1e   :  { %v6884_v8 = vmul.f32 0.5, %v6852_v1  ;;  %v6853_v12 = vadd.f32 %v6779_v29, %v2095_v57  ;;  %v6880_v58 = vmul.f32 0.5, %v6848_v59  ;;  %v14021_v29 = vld [vmem:[#allocation352_spill] sm:$0xff]  ;;  %v8433_v59 = vpop.eup %8432  ;;  %v14029_v57 = vld [vmem:[#allocation319_spill] sm:$0xff] }
 0xf1f   :  { %v6783_v61 = vpop.f32.mrf.mxu1  ;;  %v2089_v40 = vadd.f32 %v14021_v29, %v14003_v36  ;;  %v14037_v29 = vld [vmem:[#allocation368_spill] sm:$0xff] }
 0xf20   :  { %v6854_v53 = vadd.f32 %v6783_v61, %v2099_v45  ;;  %8440 = vtanh.f32 %v6884_v8  ;;  %v6885_v43 = vmul.f32 0.5, %v6853_v12  ;;  %v2117_v8 = vadd.f32 %v14030_v42, %v14029_v57 }
 0xf21   :  { %v6785_v0 = vpop.f32.mrf.mxu1  ;;  %8442 = vtanh.f32 %v6878_v23  ;;  %v6851_v13 = vadd.f32 %v12788_v41, %v2089_v40  ;;  %v14028_v41 = vld [vmem:[#allocation360_spill] sm:$0xff]  ;;  %v2137_v40 = vadd.f32 %v14037_v29, %v14022_v21 }
 0xf22   :  { %v6855_v9 = vadd.f32 %v6785_v0, %v2101_v31  ;;  %v6886_v61 = vmul.f32 0.5, %v6854_v53  ;;  %8444 = vtanh.f32 %v6879_v20  ;;  %v14023_v0 = vld [vmem:[#allocation367_spill] sm:$0xff]  ;;  %v12848_v62 = vadd.f32 %v14028_v41, %v14024_v28  ;;  %v14031_v31 = vld [vmem:[#allocation362_spill] sm:$0xff]  ;;  %v14039_v28 = vld [vmem:[#allocation365_spill] sm:$0xff] }
 0xf23   :  { %v6789_v14 = vpop.f32.mrf.mxu1  ;;  %v2135_v37 = vadd.f32 %v14023_v0, %v14022_v21  ;;  %8446 = vtanh.f32 %v6880_v58  ;;  %v6883_v45 = vmul.f32 0.5, %v6851_v13  ;;  %v12854_v23 = vadd.f32 %v14031_v31, %v14029_v57  ;;  %v14032_v53 = vld [vmem:[#allocation370_spill] sm:$0xff]  ;;  %v14034_v58 = vld [vmem:[#allocation363_spill] sm:$0xff] }
 0xf24   :  { %v6856_v16 = vadd.f32 %v6789_v14, %v2105_v11  ;;  %v6887_v1 = vmul.f32 0.5, %v6855_v9  ;;  %8448 = vtanh.f32 %v6881_v63  ;;  %v2143_v20 = vadd.f32 %v14032_v53, %v14026_v26  ;;  %v14033_v11 = vld [vmem:[#allocation317_spill] sm:$0xff]  ;;  %v14036_v63 = vld [vmem:[#allocation371_spill] sm:$0xff] }
 0xf25   :  { %v6791_v52 = vpop.f32.mrf.mxu1  ;;  %8450 = vtanh.f32 %v6886_v61  ;;  %v2123_v9 = vadd.f32 %v14034_v58, %v14033_v11  ;;  %v2147_v61 = vadd.f32 %v14036_v63, %v13773_v55  ;;  %v6922_v41 = vadd.f32 1.0, %v8431_v50 }
 0xf26   :  { %v6857_v15 = vadd.f32 %v6791_v52, %v2107_v51  ;;  %v6888_v3 = vmul.f32 0.5, %v6856_v16  ;;  %8452 = vtanh.f32 %v6885_v43  ;;  %v12862_v51 = vadd.f32 %v14035_v32, %v14033_v11 }
 0xf27   :  { %v12798_v19 = vpop.f32.mrf.mxu1  ;;  %8454 = vtanh.f32 %v6887_v1  ;;  %v14038_v1 = vld [vmem:[#allocation53_spill] sm:$0xff]  ;;  %v6946_v32 = vmul.f32 0.5, %v6922_v41 }
 0xf28   :  { %v6889_v34 = vmul.f32 0.5, %v6857_v15  ;;  %v6858_v52 = vadd.f32 %v12798_v19, %v2111_v39  ;;  %v8435_v19 = vpop.eup %8434  ;;  %v2129_v17 = vadd.f32 %v14039_v28, %v14038_v1  ;;  %v14040_v39 = vld [vmem:[#allocation366_spill] sm:$0xff] }
 0xf29   :  { %v12804_v38 = vpop.f32.mrf.mxu1  ;;  %v8437_v44 = vpop.eup %8436  ;;  %v2131_v13 = vadd.f32 %v14040_v39, %v14038_v1 }
 0xf2a   :  { %v6890_v12 = vmul.f32 0.5, %v6858_v52  ;;  %v8439_v16 = vpop.eup %8438  ;;  %v14042_v52 = vld [vmem:[#allocation373_spill] sm:$0xff]  ;;  %v6930_v26 = vadd.f32 1.0, %v8437_v44 }
 0xf2b   :  { %v12810_v18 = vpop.f32.mrf.mxu1  ;;  %v2153_v21 = vadd.f32 %v14042_v52, %v13780_v24  ;;  %v6925_v44 = vadd.f32 1.0, %v8439_v16 }
 0xf2c   :  { %v6860_v43 = vadd.f32 %v12810_v18, %v2117_v8  ;;  %v6923_v8 = vadd.f32 1.0, %v8433_v59  ;;  %v6954_v58 = vmul.f32 0.5, %v6930_v26 }
 0xf2d   :  { %v12816_v56 = vpop.f32.mrf.mxu1 }
 0xf2e   :  { %v12880_v29 = vmul.f32 0.5, %v6923_v8  ;;  %v6978_v1 = vmul.f32 %v6954_v58, %v12704_v30  ;;  %v6861_v41 = vadd.f32 %v12816_v56, %v12854_v23 }
 0xf2f   :  { %v12822_v33 = vpop.f32.mrf.mxu1 }
 0xf31   :  { %v12826_v4 = vpop.f32.mrf.mxu1 }
 0xf33   :  { %v12832_v46 = vpop.f32.mrf.mxu1 }
 0xf35   :  { %v12836_v47 = vpop.f32.mrf.mxu1 }
 0xf37   :  { %v6819_v14 = vpop.f32.mrf.mxu1 }
 0xf38   :  { %v6866_v36 = vadd.f32 %v6819_v14, %v2135_v37  ;;  %v8441_v37 = vpop.eup %8440  ;;  %v14041_v14 = vld [vmem:[#allocation372_spill] sm:$0xff] }
 0xf39   :  { %v6821_v22 = vpop.f32.mrf.mxu1 }
 0xf3a   :  { %8456 = vtanh.f32 %v6866_v36  ;;  %v6867_v18 = vadd.f32 %v6821_v22, %v2137_v40 }
 0xf3b   :  { %v6825_v10 = vpop.f32.mrf.mxu1  ;;  %8458 = vtanh.f32 %v6888_v3  ;;  %v2149_v3 = vadd.f32 %v14041_v14, %v13773_v55  ;;  %v6892_v55 = vmul.f32 0.5, %v6860_v43 }
 0xf3c   :  { %v6868_v54 = vadd.f32 %v6825_v10, %v2141_v48  ;;  %8460 = vtanh.f32 %v6889_v34  ;;  %v8443_v34 = vpop.eup %8442 }
 0xf3d   :  { %v6827_v49 = vpop.f32.mrf.mxu1  ;;  %v8445_v48 = vpop.eup %8444  ;;  %v6926_v11 = vadd.f32 1.0, %v8443_v34  ;;  %v6865_v34 = vadd.f32 %v12836_v47, %v2131_v13  ;;  %v6859_v47 = vadd.f32 %v12804_v38, %v12848_v62 }
 0xf3e   :  { %8462 = vtanh.f32 %v6868_v54  ;;  %v6869_v15 = vadd.f32 %v6827_v49, %v2143_v20  ;;  %v8447_v42 = vpop.eup %8446  ;;  %v6932_v54 = vadd.f32 1.0, %v8441_v37  ;;  %v6924_v20 = vadd.f32 1.0, %v8435_v19 }
 0xf3f   :  { %8464 = vtanh.f32 %v6883_v45  ;;  %v6831_v0 = vpop.f32.mrf.mxu1  ;;  %v14043_v45 = vld [vmem:[#allocation374_spill] sm:$0xff]  ;;  %v8449_v53 = vpop.eup %8448  ;;  %v6862_v49 = vadd.f32 %v12822_v33, %v2123_v9  ;;  %v6927_v63 = vadd.f32 1.0, %v8445_v48  ;;  %v6864_v33 = vadd.f32 %v12832_v46, %v2129_v17 }
 0xf40   :  { %v6870_v36 = vadd.f32 %v6831_v0, %v2147_v61  ;;  %8466 = vtanh.f32 %v6890_v12  ;;  %v2155_v10 = vadd.f32 %v14043_v45, %v13780_v24  ;;  %v8451_v12 = vpop.eup %8450  ;;  %v6956_v40 = vmul.f32 0.5, %v6932_v54 }
 0xf41   :  { %v6833_v7 = vpop.f32.mrf.mxu1  ;;  %v8453_v50 = vpop.eup %8452  ;;  %v6948_v9 = vmul.f32 0.5, %v6924_v20  ;;  %v6934_v43 = vadd.f32 1.0, %v8451_v12  ;;  %v6894_v16 = vmul.f32 0.5, %v6862_v49  ;;  %v6949_v0 = vmul.f32 0.5, %v6925_v44 }
 0xf42   :  { %8468 = vtanh.f32 %v6870_v36  ;;  %v6871_v57 = vadd.f32 %v6833_v7, %v2149_v3  ;;  %v8455_v61 = vpop.eup %8454  ;;  %v6950_v37 = vmul.f32 0.5, %v6926_v11  ;;  %v6951_v14 = vmul.f32 0.5, %v6927_v63 }
 0xf43   :  { %8470 = vtanh.f32 %v6869_v15  ;;  %v6837_v31 = vpop.f32.mrf.mxu1  ;;  %v6928_v3 = vadd.f32 1.0, %v8447_v42  ;;  %v6863_v36 = vadd.f32 %v12826_v4, %v12862_v51  ;;  %v6980_v17 = vmul.f32 %v6956_v40, %v12709_v27 }
 0xf44   :  { %8472 = vtanh.f32 %v6871_v57  ;;  %v6872_v22 = vadd.f32 %v6837_v31, %v2153_v21  ;;  %v6935_v52 = vadd.f32 1.0, %v8455_v61  ;;  %v6896_v21 = vmul.f32 0.5, %v6864_v33 }
 0xf45   :  { %8474 = vtanh.f32 %v6867_v18  ;;  %v6839_v24 = vpop.f32.mrf.mxu1  ;;  %v6958_v7 = vmul.f32 0.5, %v6934_v43  ;;  %v6929_v45 = vadd.f32 1.0, %v8449_v53  ;;  %v6897_v27 = vmul.f32 0.5, %v6865_v34 }
 0xf46   :  { %8476 = vtanh.f32 %v6872_v22  ;;  %v6873_v59 = vadd.f32 %v6839_v24, %v2155_v10  ;;  %v6933_v10 = vadd.f32 1.0, %v8453_v50  ;;  %v6959_v8 = vmul.f32 0.5, %v6935_v52 }
 0xf47   :  { %8478 = vtanh.f32 %v6892_v55  ;;  %v8457_v19 = vpop.eup %8456  ;;  %v6895_v54 = vmul.f32 0.5, %v6863_v36  ;;  %v6982_v31 = vmul.f32 %v6958_v7, %v12715_v25  ;;  %v6952_v23 = vmul.f32 0.5, %v6928_v3 }
 0xf48   :  { %8480 = vtanh.f32 %v6873_v59  ;;  %v8459_v15 = vpop.eup %8458  ;;  %v6986_v28 = vmul.f32 %v8457_v19, %v6946_v32  ;;  %v6953_v49 = vmul.f32 0.5, %v6929_v45  ;;  %v6957_v22 = vmul.f32 0.5, %v6933_v10 }
 0xf49   :  { %v8461_v39 = vpop.eup %8460  ;;  %v6936_v48 = vadd.f32 1.0, %v8459_v15  ;;  %8482 = vtanh.f32 %v6894_v16  ;;  %v6893_v12 = vmul.f32 0.5, %v6861_v41  ;;  %v6983_v50 = vmul.f32 %v6959_v8, %v12719_v6 }
 0xf4a   :  { %v6994_v26 = vadd.f32 %v6986_v28, %v6978_v1  ;;  %v6937_v51 = vadd.f32 1.0, %v8461_v39  ;;  %v6891_v32 = vmul.f32 0.5, %v6859_v47  ;;  %v6981_v33 = vmul.f32 %v6957_v22, %v12727_v60  ;;  %v7023_v22 = vpop.permute.xlu0 %7022 }
 0xf4b   :  { %v8463_v46 = vpop.eup %8462  ;;  %v6960_v53 = vmul.f32 0.5, %v6936_v48 }
 0xf4c   :  { %v8465_v18 = vpop.eup %8464  ;;  %v6988_v30 = vmul.f32 %v8463_v46, %v6948_v9  ;;  %8484 = vtanh.f32 %v6994_v26  ;;  %v6961_v38 = vmul.f32 0.5, %v6937_v51 }
 0xf4d   :  { %v8467_v4 = vpop.eup %8466  ;;  %v6931_v42 = vadd.f32 1.0, %v8465_v18  ;;  %8486 = vtanh.f32 %v6896_v21  ;;  %v6984_v63 = vmul.f32 %v6960_v53, %v12724_v2 }
 0xf4e   :  { %v6996_v13 = vadd.f32 %v6988_v30, %v6980_v17  ;;  %v6938_v19 = vadd.f32 1.0, %v8467_v4  ;;  %v6985_v43 = vmul.f32 %v6961_v38, %v12729_v35 }
 0xf4f   :  { %v8469_v57 = vpop.eup %8468  ;;  %v6955_v24 = vmul.f32 0.5, %v6931_v42 }
 0xf50   :  { %v8471_v55 = vpop.eup %8470  ;;  %8488 = vtanh.f32 %v6996_v13  ;;  %v6990_v20 = vmul.f32 %v8469_v57, %v6950_v37  ;;  %v6962_v39 = vmul.f32 0.5, %v6938_v19 }
 0xf51   :  { %v8473_v56 = vpop.eup %8472  ;;  %8490 = vtanh.f32 %v6897_v27  ;;  %v6989_v59 = vmul.f32 %v8471_v55, %v6949_v0  ;;  %v6979_v37 = vmul.f32 %v6955_v24, %v12733_v5 }
 0xf52   :  { %v8475_v44 = vpop.eup %8474  ;;  %v6998_v62 = vadd.f32 %v6990_v20, %v6982_v31  ;;  %v6991_v11 = vmul.f32 %v8473_v56, %v6951_v14  ;;  %8492 = vtanh.f32 %v6895_v54 }
 0xf53   :  { %v8477_v58 = vpop.eup %8476  ;;  %v6987_v16 = vmul.f32 %v8475_v44, %v12880_v29  ;;  %v6997_v2 = vadd.f32 %v6989_v59, %v6981_v33 }
 0xf54   :  { %v8479_v25 = vpop.eup %8478  ;;  %8494 = vtanh.f32 %v6998_v62  ;;  %v6992_v61 = vmul.f32 %v8477_v58, %v6952_v23  ;;  %v6999_v9 = vadd.f32 %v6991_v11, %v6983_v50 }
 0xf55   :  { %v8481_v40 = vpop.eup %8480  ;;  %8496 = vtanh.f32 %v6893_v12  ;;  %v6940_v1 = vadd.f32 1.0, %v8479_v25  ;;  %v6995_v14 = vadd.f32 %v6987_v16, %v6979_v37 }
 0xf56   :  { %v7000_v15 = vadd.f32 %v6992_v61, %v6984_v63  ;;  %v6993_v6 = vmul.f32 %v8481_v40, %v6953_v49  ;;  %8498 = vtanh.f32 %v6891_v32  ;;  %v8483_v28 = vpop.eup %8482  ;;  %v7018_v49 = vld [vmem:[%s12910_s4] sm:$0xff] }
 0xf57   :  { %v6964_v35 = vmul.f32 0.5, %v6940_v1  ;;  %v6942_v34 = vadd.f32 1.0, %v8483_v28 }
 0xf58   :  { %8500 = vtanh.f32 %v7000_v15  ;;  %v7001_v0 = vadd.f32 %v6993_v6, %v6985_v43 }
 0xf59   :  { %8502 = vtanh.f32 %v6999_v9  ;;  %v8485_v60 = vpop.eup %8484  ;;  %v6966_v52 = vmul.f32 0.5, %v6942_v34 }
 0xf5a   :  { %8504 = vtanh.f32 %v7001_v0  ;;  %v7010_v3 = vmul.f32 %v8485_v60, %v6962_v39  ;;  %v8487_v36 = vpop.eup %8486 }
 0xf5b   :  { %8506 = vtanh.f32 %v6997_v2  ;;  %v6944_v21 = vadd.f32 1.0, %v8487_v36 }
 0xf5c   :  { %8508 = vtanh.f32 %v6995_v14 }
 0xf5d   :  { %v8489_v29 = vpop.eup %8488  ;;  %v6968_v10 = vmul.f32 0.5, %v6944_v21 }
 0xf5e   :  { %v7012_v46 = vmul.f32 %v8489_v29, %v6964_v35  ;;  %v8491_v5 = vpop.eup %8490 }
 0xf5f   :  { %v8493_v17 = vpop.eup %8492  ;;  %v6945_v7 = vadd.f32 1.0, %v8491_v5 }
 0xf60   :  { %v6943_v45 = vadd.f32 1.0, %v8493_v17 }
 0xf61   :  { %v8495_v26 = vpop.eup %8494  ;;  %v6969_v47 = vmul.f32 0.5, %v6945_v7 }
 0xf62   :  { %v8497_v18 = vpop.eup %8496  ;;  %v7014_v48 = vmul.f32 %v8495_v26, %v6966_v52  ;;  %v6967_v42 = vmul.f32 0.5, %v6943_v45 }
 0xf63   :  { %v8499_v30 = vpop.eup %8498  ;;  %v6941_v51 = vadd.f32 1.0, %v8497_v18 }
 0xf64   :  { %v6939_v57 = vadd.f32 1.0, %v8499_v30 }
 0xf65   :  { %v8501_v41 = vpop.eup %8500  ;;  %v6965_v55 = vmul.f32 0.5, %v6941_v51 }
 0xf66   :  { %v8503_v4 = vpop.eup %8502  ;;  %v7016_v27 = vmul.f32 %v8501_v41, %v6968_v10  ;;  %v6963_v20 = vmul.f32 0.5, %v6939_v57 }
 0xf67   :  { %v8505_v13 = vpop.eup %8504  ;;  %v7015_v31 = vmul.f32 %v8503_v4, %v6967_v42 }
 0xf68   :  { %v7017_v8 = vmul.f32 %v8505_v13, %v6969_v47  ;;  %v8507_v54 = vpop.eup %8506 }
 0xf69   :  { %v8509_v53 = vpop.eup %8508  ;;  %v7013_v56 = vmul.f32 %v8507_v54, %v6965_v55 }
 0xf6a   :  { %7052 = vmatprep.subr.mxu0 %v7017_v8  ;;  %v7011_v23 = vmul.f32 %v8509_v53, %v6963_v20 }
 0xf6b   :  { %7053 = vmatpush1.msra.mxu0 %v7016_v27 }
 0xf6c   :  { %7054 = vmatprep.subr.mxu0 %v7015_v31 }
 0xf6d   :  { %7055 = vmatpush1.msra.mxu0 %v7014_v48 }
 0xf6e   :  { %7056 = vmatprep.subr.mxu0 %v7013_v56 }
 0xf6f   :  { %7057 = vmatpush1.msra.mxu0 %v7012_v46 }
 0xf70   :  { %7058 = vmatprep.subr.mxu0 %v7011_v23 }
 0xf71   :  { %7059 = vmatpush1.msra.mxu0 %v7010_v3 }
 0xf72   :  { %7499 = vmatmul.mubr.msk.f32.vlgmr.msra.gmra.mxu0 %vm2573_vm1, %v7018_v49 }
0x1032   :  { %v7094_v12 = vpop.f32.mrf.mxu0 }
0x1033   :  { %v7095_v44 = vadd.f32 %v7094_v12, %v7023_v22 }
0x1034   :  { %v7096_v38 = vpop.f32.mrf.mxu0 }
0x1035   :  { %7099 = vst [vmem:[#allocation3] sm:$0xff] %v7095_v44  ;;  %v7097_v62 = vadd.f32 %v7096_v38, %v7023_v22 }
0x1037   :  { %7100 = vst [vmem:[#allocation3 + $0x8] sm:$0xff] %v7097_v62 }
0x1038   :  { %8617 = shalt.err (!%p8614_p4)
}
0x1039   :  { %7110 = dma.vmem_to_hbm [thread:$0]  %s7108_s1, 256, %s12912_s6, [#allocation4]  }
0x103a   :  { %8626 = dma.done.wait [#allocation4], 256  }
0x103b   :  { %8627 = vsyncadd [#allocation4], 4294967040 }
0x103c   :  { %7114 = vsyncpa [#allocation4], 1 }

</bundles_post_ra>
